<compile_context>
chip_gen: v5e
topology: v5e:2x2
jax: 0.10.0
libtpu: 0.0.40
codegen_flags: <defaults>
</compile_context>

<pallas_src>
import functools
import math

import jax
import jax.numpy as jnp
from jax.experimental import pallas as pl
from jax.experimental.pallas import tpu as pltpu

F32 = jnp.float32
BF16 = jnp.bfloat16


# ------------------------------ tiling helpers ------------------------------

def _lead_tile(n, max_tile):
    """Largest divisor of n that is <= max_tile (leading/outer block dim)."""
    for d in range(min(n, max_tile), 0, -1):
        if n % d == 0:
            return d
    return n


def _sublane_tile(n, max_tile):
    """Tile for a second-to-last block dim: == n, or a multiple of 8."""
    if n <= max_tile:
        return n
    d = max_tile - max_tile % 8
    while d >= 8:
        if n % d == 0:
            return d
        d -= 8
    return n


def _row_tile(m, max_rows=256):
    """Row tile for 2-D blocks: == m, or a multiple of 8 dividing m."""
    if m <= max_rows:
        return m
    d = max_rows - max_rows % 8
    while d >= 8:
        if m % d == 0:
            return d
        d -= 8
    return m


def _const_spec(shape):
    nd = len(shape)
    return pl.BlockSpec(shape, lambda *args, _nd=nd: (0,) * _nd)


def _ln(x, g, b, eps):
    mu = jnp.mean(x, axis=-1, keepdims=True)
    xc = x - mu
    var = jnp.mean(xc * xc, axis=-1, keepdims=True)
    return xc * jax.lax.rsqrt(var + eps) * g + b


def _sigmoid(x):
    return 1.0 / (1.0 + jnp.exp(-x))


# ------------------------------ Pallas kernels ------------------------------

def fused_mha_block(x, p, n_heads):
    """One pallas_call for a full MHAblockV2.  x: (N, S, E) f32."""
    N, S, E = x.shape
    H = n_heads
    Dh = E // H
    assert H * Dh == E
    scale = 1.0 / math.sqrt(Dh)
    TN = _lead_tile(N, 8)
    grid = (N // TN,)
    E4 = 4 * E

    def kernel(x_ref, wqkv_ref, wout_ref, g1_ref, b1_ref,
               w1_ref, bb1_ref, w2_ref, bb2_ref, g2_ref, b2_ref, o_ref):
        x3 = x_ref[...]                                    # (TN, S, E) f32
        xf = x3.reshape(TN * S, E)
        qkv = jnp.dot(xf.astype(BF16), wqkv_ref[...],
                      preferred_element_type=F32)          # (TN*S, 3E)

        ctx_rows = []
        for n in range(TN):                                # static unroll
            r0 = n * S
            heads = []
            for h in range(H):
                q = qkv[r0:r0 + S, h * Dh:(h + 1) * Dh] * scale
                k = qkv[r0:r0 + S, E + h * Dh:E + (h + 1) * Dh]
                v = qkv[r0:r0 + S, 2 * E + h * Dh:2 * E + (h + 1) * Dh]
                s = jax.lax.dot_general(
                    q.astype(BF16), k.astype(BF16),
                    (((1,), (1,)), ((), ())),
                    preferred_element_type=F32)            # (S, S)
                # zero (non-causal) attention mask is a no-op -> skipped
                s = s - jnp.max(s, axis=-1, keepdims=True)
                ps = jnp.exp(s)
                inv = pl.reciprocal(jnp.sum(ps, axis=-1, keepdims=True),
                                    approx=True)
                ps = ps * inv
                heads.append(jnp.dot(ps.astype(BF16), v.astype(BF16),
                                     preferred_element_type=F32))
            ctx_rows.append(jnp.concatenate(heads, axis=-1))  # (S, E)
        ctx = jnp.concatenate(ctx_rows, axis=0)               # (TN*S, E)

        attn = jnp.dot(ctx.astype(BF16), wout_ref[...],
                       preferred_element_type=F32)
        y = _ln(xf + attn, g1_ref[...], b1_ref[...], 1e-6)     # residual + LN1
        h1 = jnp.dot(y.astype(BF16), w1_ref[...], preferred_element_type=F32)
        h1 = jnp.maximum(h1 + bb1_ref[...], 0.0)               # fc1 + ReLU
        h2 = jnp.dot(h1.astype(BF16), w2_ref[...],
                     preferred_element_type=F32) + bb2_ref[...]  # fc2
        z = _ln(y + h2, g2_ref[...], b2_ref[...], 1e-6)        # residual + LN2
        o_ref[...] = z.reshape(TN, S, E)

    return pl.pallas_call(
        kernel,
        out_shape=jax.ShapeDtypeStruct((N, S, E), F32),
        grid=grid,
        in_specs=[
            pl.BlockSpec((TN, S, E), lambda i: (i, 0, 0)),
            _const_spec((E, 3 * E)), _const_spec((E, E)),
            _const_spec((1, E)), _const_spec((1, E)),
            _const_spec((E, E4)), _const_spec((1, E4)),
            _const_spec((E4, E)), _const_spec((1, E)),
            _const_spec((1, E)), _const_spec((1, E)),
        ],
        out_specs=pl.BlockSpec((TN, S, E), lambda i: (i, 0, 0)),
        compiler_params=pltpu.CompilerParams(
            dimension_semantics=("parallel",)),
    )(x.astype(F32), p["wqkv"], p["wout"], p["ln1_g"], p["ln1_b"],
      p["w1"], p["b1"], p["w2"], p["b2"], p["ln2_g"], p["ln2_b"])


def fc_instnorm_add(x, res, w_bf, b, eps):
    """out[m] = res[m] + InstanceNorm(x[m] @ w + b), per leading index m.

    x, res: (M, T, C) f32; w_bf: (C, C) bf16 (already transposed); b: (1, C).
    Fuses intra_fc (Linear) + InstanceNorm2d(width) + residual add."""
    M, T, C = x.shape
    TM = _lead_tile(M, 8)
    grid = (M // TM,)
    denom = 1.0 / float(T * C)

    def kernel(x_ref, r_ref, w_ref, b_ref, o_ref):
        x3 = x_ref[...]                                     # (TM, T, C)
        y = jnp.dot(x3.reshape(TM * T, C).astype(BF16), w_ref[...],
                    preferred_element_type=F32) + b_ref[...]
        y = y.reshape(TM, T, C)
        mu = jnp.sum(jnp.sum(y, axis=2, keepdims=True),
                     axis=1, keepdims=True) * denom
        d = y - mu
        var = jnp.sum(jnp.sum(d * d, axis=2, keepdims=True),
                      axis=1, keepdims=True) * denom
        o_ref[...] = r_ref[...] + d * jax.lax.rsqrt(var + eps)

    return pl.pallas_call(
        kernel,
        out_shape=jax.ShapeDtypeStruct((M, T, C), F32),
        grid=grid,
        in_specs=[
            pl.BlockSpec((TM, T, C), lambda i: (i, 0, 0)),
            pl.BlockSpec((TM, T, C), lambda i: (i, 0, 0)),
            _const_spec((C, C)), _const_spec((1, C)),
        ],
        out_specs=pl.BlockSpec((TM, T, C), lambda i: (i, 0, 0)),
        compiler_params=pltpu.CompilerParams(
            dimension_semantics=("parallel",)),
    )(x.astype(F32), res.astype(F32), w_bf, b)


def lstm_fc(x_tnc, wih_bf, whh_bf, bias, wfc_bf, bfc):
    """Fused single-layer unidirectional LSTM + output Linear (inter_fc).

    x_tnc: (T, NB, C) time-major.  Input projection is one big matmul over all
    timesteps; the recurrence is a statically unrolled time loop kept in VMEM.
    Returns (T, NB, C) f32."""
    T, NB, C = x_tnc.shape
    TNB = _sublane_tile(NB, 16)
    grid = (NB // TNB,)
    C4 = 4 * C

    def kernel(x_ref, wih_ref, whh_ref, b_ref, wfc_ref, bfc_ref, o_ref):
        x3 = x_ref[...]                                      # (T, TNB, C)
        gx = jnp.dot(x3.reshape(T * TNB, C).astype(BF16), wih_ref[...],
                     preferred_element_type=F32) + b_ref[...]  # (T*TNB, 4C)
        h = jnp.zeros((TNB, C), F32)
        c = jnp.zeros((TNB, C), F32)
        # TODO(synk): time loop is statically unrolled (T is small here); a
        # lax.fori_loop carry would be preferable for very long sequences.
        for t in range(T):
            gates = gx[t * TNB:(t + 1) * TNB] + jnp.dot(
                h.astype(BF16), whh_ref[...], preferred_element_type=F32)
            i_g = _sigmoid(gates[:, 0:C])
            f_g = _sigmoid(gates[:, C:2 * C])
            g_g = jnp.tanh(gates[:, 2 * C:3 * C])
            o_g = _sigmoid(gates[:, 3 * C:4 * C])
            c = f_g * c + i_g * g_g
            h = o_g * jnp.tanh(c)
            o_ref[t] = jnp.dot(h.astype(BF16), wfc_ref[...],
                               preferred_element_type=F32) + bfc_ref[...]

    return pl.pallas_call(
        kernel,
        out_shape=jax.ShapeDtypeStruct((T, NB, C), F32),
        grid=grid,
        in_specs=[
            pl.BlockSpec((T, TNB, C), lambda i: (0, i, 0)),
            _const_spec((C, C4)), _const_spec((C, C4)),
            _const_spec((1, C4)),
            _const_spec((C, C)), _const_spec((1, C)),
        ],
        out_specs=pl.BlockSpec((T, TNB, C), lambda i: (0, i, 0)),
        compiler_params=pltpu.CompilerParams(
            dimension_semantics=("parallel",)),
    )(x_tnc.astype(F32), wih_bf, whh_bf, bias, wfc_bf, bfc)


def instance_norm_add_rows(x2d, res2d, eps):
    """out = res + row-wise instance norm of x.  x2d, res2d: (M, L)."""
    M, L = x2d.shape
    TM = _row_tile(M, 256)
    grid = (M // TM,)

    def kernel(x_ref, r_ref, o_ref):
        xv = x_ref[...]
        mu = jnp.mean(xv, axis=-1, keepdims=True)
        d = xv - mu
        var = jnp.mean(d * d, axis=-1, keepdims=True)
        o_ref[...] = r_ref[...] + d * jax.lax.rsqrt(var + eps)

    return pl.pallas_call(
        kernel,
        out_shape=jax.ShapeDtypeStruct((M, L), F32),
        grid=grid,
        in_specs=[pl.BlockSpec((TM, L), lambda i: (i, 0)),
                  pl.BlockSpec((TM, L), lambda i: (i, 0))],
        out_specs=pl.BlockSpec((TM, L), lambda i: (i, 0)),
        compiler_params=pltpu.CompilerParams(
            dimension_semantics=("parallel",)),
    )(x2d.astype(F32), res2d.astype(F32))


# ------------------------------ DPARN forward --------------------------------

def make_pe(E, max_len):
    pos = jnp.arange(max_len, dtype=F32)[:, None]
    denom = jnp.exp(jnp.arange(0, E, 2, dtype=F32) * (-math.log(10000.0) / E))
    pe = jnp.zeros((max_len, E), F32)
    pe = pe.at[:, 0::2].set(jnp.sin(pos * denom))
    pe = pe.at[:, 1::2].set(jnp.cos(pos * denom))
    return pe


def dparn_forward(params, x, *, n_heads):
    """x: (B, C=numUnits, T, W=width)  ->  (B, C, T, W)."""
    B, C, T, W = x.shape
    xp = jnp.transpose(x, (0, 2, 3, 1)).astype(F32)            # (B, T, W, C)

    # ---- intra path: positional encoding + MHA blocks over the width axis ----
    pe = params["pe"][:W]
    intra = (xp + pe[None, None]).reshape(B * T, W, C)
    for blk in params["intra_blocks"]:
        intra = fused_mha_block(intra, blk, n_heads)

    # intra_fc + InstanceNorm2d(width) + residual, in (B, W, T, C) layout
    intra_bwtc = intra.reshape(B, T, W, C).transpose(0, 2, 1, 3).reshape(B * W, T, C)
    xres_bwtc = xp.transpose(0, 2, 1, 3).reshape(B * W, T, C)
    intra_out = fc_instnorm_add(intra_bwtc, xres_bwtc,
                                params["intra_fc_w"], params["intra_fc_b"],
                                1e-8)                          # (B*W, T, C)

    # ---- inter path: LSTM over the time axis + inter_fc (fused) -------------
    x_tnc = jnp.transpose(intra_out, (1, 0, 2))                # (T, B*W, C)
    lstm_out = lstm_fc(x_tnc, params["lstm_wih"], params["lstm_whh"],
                       params["lstm_b"], params["inter_fc_w"],
                       params["inter_fc_b"])                   # (T, B*W, C)

    # InstanceNorm2d(channel) over (T, W) per (b, c) + residual -> (B, C, T, W)
    inter_bctw = lstm_out.reshape(T, B, W, C).transpose(1, 3, 0, 2)
    res_bctw = intra_out.reshape(B, W, T, C).transpose(0, 3, 2, 1)
    out = instance_norm_add_rows(inter_bctw.reshape(B * C, T * W),
                                 res_bctw.reshape(B * C, T * W), 1e-8)
    return out.reshape(B, C, T, W)


# ------------------------------ parameters -----------------------------------

def init_params(key, num_units, mha_blocks, max_len=256):
    cnt = [0]

    def nxt():
        cnt[0] += 1
        return jax.random.fold_in(key, cnt[0])

    def rand(shape, scale=0.05):
        return (scale * jax.random.normal(nxt(), shape)).astype(F32)

    E = num_units
    E4 = 4 * E

    def mha_block():
        return {
            # nn.MultiheadAttention(bias=False): in_proj (3E,E), out_proj (E,E)
            "wqkv": rand((3 * E, E)).T.astype(BF16),
            "wout": rand((E, E)).T.astype(BF16),
            "ln1_g": jnp.ones((1, E), F32), "ln1_b": jnp.zeros((1, E), F32),
            # Conv1d(E, 4E, 1) / Conv1d(4E, E, 1) with bias
            "w1": rand((E4, E)).T.astype(BF16), "b1": rand((E4,)).reshape(1, E4),
            "w2": rand((E, E4)).T.astype(BF16), "b2": rand((E,)).reshape(1, E),
            "ln2_g": jnp.ones((1, E), F32), "ln2_b": jnp.zeros((1, E), F32),
        }

    return {
        "pe": make_pe(E, max_len),
        "intra_blocks": [mha_block() for _ in range(mha_blocks)],
        "intra_fc_w": rand((E, E)).T.astype(BF16),
        "intra_fc_b": rand((E,)).reshape(1, E),
        # LSTM weights (4E, E) in [i, f, g, o] order; b_ih + b_hh pre-summed
        "lstm_wih": rand((E4, E)).T.astype(BF16),
        "lstm_whh": rand((E4, E)).T.astype(BF16),
        "lstm_b": (rand((E4,)) + rand((E4,))).reshape(1, E4),
        "inter_fc_w": rand((E, E)).T.astype(BF16),
        "inter_fc_b": rand((E,)).reshape(1, E),
    }


# ---------------------------------- main -------------------------------------

if __name__ == "__main__":
    key = jax.random.PRNGKey(0)

    # Small shapes consistent with DPARN: numUnits == channel == d_model.
    NUM_UNITS = 32     # d_model / channel
    N_HEADS = 4        # head_dim = 8
    WIDTH = 16         # intra sequence length
    MHA_BLOCKS = 2
    B, T = 2, 8

    params = init_params(key, NUM_UNITS, MHA_BLOCKS,
                         max_len=max(WIDTH, T) + 8)
    x = jax.random.normal(jax.random.fold_in(key, 999),
                          (B, NUM_UNITS, T, WIDTH), dtype=F32)

    fwd = jax.jit(functools.partial(dparn_forward, n_heads=N_HEADS))
    out = jax.block_until_ready(fwd(params, x))

    assert out.shape == (B, NUM_UNITS, T, WIDTH), out.shape
    assert out.dtype == jnp.float32
    assert bool(jnp.all(jnp.isfinite(out)))
    print("KERNEL_OK")
</pallas_src>

<mosaic_0001>
module attributes {stable_mosaic.version = 11 : i64} {
  func.func @kernel(%arg0: i32, %arg1: memref<8x16x32xf32, #tpu.memory_space<vmem>>, %arg2: memref<32x96xbf16, #tpu.memory_space<vmem>>, %arg3: memref<32x32xbf16, #tpu.memory_space<vmem>>, %arg4: memref<1x32xf32, #tpu.memory_space<vmem>>, %arg5: memref<1x32xf32, #tpu.memory_space<vmem>>, %arg6: memref<32x128xbf16, #tpu.memory_space<vmem>>, %arg7: memref<1x128xf32, #tpu.memory_space<vmem>>, %arg8: memref<128x32xbf16, #tpu.memory_space<vmem>>, %arg9: memref<1x32xf32, #tpu.memory_space<vmem>>, %arg10: memref<1x32xf32, #tpu.memory_space<vmem>>, %arg11: memref<1x32xf32, #tpu.memory_space<vmem>>, %arg12: memref<8x16x32xf32, #tpu.memory_space<vmem>>) attributes {dimension_semantics = [#tpu.dimension_semantics<parallel>], iteration_bounds = array<i64: 2>, scalar_prefetch = 0 : i64, scratch_operands = 0 : i64, tpu.core_type = #tpu.core_type<tc>, window_params = [{transform_indices = @transform_0, window_bounds = array<i64: 8, 16, 32>}, {pipeline_mode = #tpu.pipeline_mode<synchronous>, transform_indices = @transform_1, window_bounds = array<i64: 32, 96>}, {pipeline_mode = #tpu.pipeline_mode<synchronous>, transform_indices = @transform_2, window_bounds = array<i64: 32, 32>}, {pipeline_mode = #tpu.pipeline_mode<synchronous>, transform_indices = @transform_3, window_bounds = array<i64: 1, 32>}, {pipeline_mode = #tpu.pipeline_mode<synchronous>, transform_indices = @transform_4, window_bounds = array<i64: 1, 32>}, {pipeline_mode = #tpu.pipeline_mode<synchronous>, transform_indices = @transform_5, window_bounds = array<i64: 32, 128>}, {pipeline_mode = #tpu.pipeline_mode<synchronous>, transform_indices = @transform_6, window_bounds = array<i64: 1, 128>}, {pipeline_mode = #tpu.pipeline_mode<synchronous>, transform_indices = @transform_7, window_bounds = array<i64: 128, 32>}, {pipeline_mode = #tpu.pipeline_mode<synchronous>, transform_indices = @transform_8, window_bounds = array<i64: 1, 32>}, {pipeline_mode = #tpu.pipeline_mode<synchronous>, transform_indices = @transform_9, window_bounds = array<i64: 1, 32>}, {pipeline_mode = #tpu.pipeline_mode<synchronous>, transform_indices = @transform_10, window_bounds = array<i64: 1, 32>}, {transform_indices = @transform_11, window_bounds = array<i64: 8, 16, 32>}]} {
    %c0 = arith.constant 0 : index
    %c0_0 = arith.constant 0 : index
    %c0_1 = arith.constant 0 : index
    %0 = vector.load %arg1[%c0, %c0_0, %c0_1] : memref<8x16x32xf32, #tpu.memory_space<vmem>>, vector<8x16x32xf32>
    %1 = vector.shape_cast %0 : vector<8x16x32xf32> to vector<128x32xf32>
    %2 = arith.truncf %1 : vector<128x32xf32> to vector<128x32xbf16>
    %c0_2 = arith.constant 0 : index
    %c0_3 = arith.constant 0 : index
    %3 = vector.load %arg2[%c0_2, %c0_3] : memref<32x96xbf16, #tpu.memory_space<vmem>>, vector<32x96xbf16>
    %cst = arith.constant dense<0.000000e+00> : vector<128x96xf32>
    %4 = tpu.matmul %2, %3, %cst {dimension_numbers = #tpu.dot_dimension_numbers<[1], [0], [0], [1], [0, 0, 1, 1], [], []>} : vector<128x32xbf16>, vector<32x96xbf16>, vector<128x96xf32> -> vector<128x96xf32>
    %5 = vector.extract_strided_slice %4 {offsets = [0, 0], sizes = [16, 8], strides = [1, 1]} : vector<128x96xf32> to vector<16x8xf32>
    %cst_4 = arith.constant 0.353553385 : f32
    %6 = vector.broadcast %cst_4 : f32 to vector<16x8xf32>
    %7 = arith.mulf %5, %6 : vector<16x8xf32>
    %8 = vector.extract_strided_slice %4 {offsets = [0, 32], sizes = [16, 8], strides = [1, 1]} : vector<128x96xf32> to vector<16x8xf32>
    %9 = vector.extract_strided_slice %4 {offsets = [0, 64], sizes = [16, 8], strides = [1, 1]} : vector<128x96xf32> to vector<16x8xf32>
    %10 = arith.truncf %7 : vector<16x8xf32> to vector<16x8xbf16>
    %11 = arith.truncf %8 : vector<16x8xf32> to vector<16x8xbf16>
    %cst_5 = arith.constant dense<0.000000e+00> : vector<16x16xf32>
    %12 = tpu.matmul %10, %11, %cst_5 {dimension_numbers = #tpu.dot_dimension_numbers<[1], [1], [0], [0], [0, 0, 1, 0], [], []>} : vector<16x8xbf16>, vector<16x8xbf16>, vector<16x16xf32> -> vector<16x16xf32>
    %cst_6 = arith.constant dense<0xFF800000> : vector<16xf32>
    %13 = vector.multi_reduction <maximumf>, %12, %cst_6 [1] : vector<16x16xf32> to vector<16xf32>
    %14 = vector.shape_cast %13 : vector<16xf32> to vector<16x1xf32>
    %15 = vector.broadcast %14 : vector<16x1xf32> to vector<16x16xf32>
    %16 = arith.subf %12, %15 : vector<16x16xf32>
    %17 = math.exp %16 : vector<16x16xf32>
    %cst_7 = arith.constant dense<0.000000e+00> : vector<16xf32>
    %18 = vector.multi_reduction <add>, %17, %cst_7 [1] : vector<16x16xf32> to vector<16xf32>
    %19 = vector.shape_cast %18 : vector<16xf32> to vector<16x1xf32>
    %20 = tpu.reciprocal %19 {approx = true} : vector<16x1xf32> -> vector<16x1xf32>
    %21 = vector.broadcast %20 : vector<16x1xf32> to vector<16x16xf32>
    %22 = arith.mulf %17, %21 : vector<16x16xf32>
    %23 = arith.truncf %22 : vector<16x16xf32> to vector<16x16xbf16>
    %24 = arith.truncf %9 : vector<16x8xf32> to vector<16x8xbf16>
    %cst_8 = arith.constant dense<0.000000e+00> : vector<16x8xf32>
    %25 = tpu.matmul %23, %24, %cst_8 {dimension_numbers = #tpu.dot_dimension_numbers<[1], [0], [0], [1], [0, 0, 1, 1], [], []>} : vector<16x16xbf16>, vector<16x8xbf16>, vector<16x8xf32> -> vector<16x8xf32>
    %26 = vector.extract_strided_slice %4 {offsets = [0, 8], sizes = [16, 8], strides = [1, 1]} : vector<128x96xf32> to vector<16x8xf32>
    %cst_9 = arith.constant 0.353553385 : f32
    %27 = vector.broadcast %cst_9 : f32 to vector<16x8xf32>
    %28 = arith.mulf %26, %27 : vector<16x8xf32>
    %29 = vector.extract_strided_slice %4 {offsets = [0, 40], sizes = [16, 8], strides = [1, 1]} : vector<128x96xf32> to vector<16x8xf32>
    %30 = vector.extract_strided_slice %4 {offsets = [0, 72], sizes = [16, 8], strides = [1, 1]} : vector<128x96xf32> to vector<16x8xf32>
    %31 = arith.truncf %28 : vector<16x8xf32> to vector<16x8xbf16>
    %32 = arith.truncf %29 : vector<16x8xf32> to vector<16x8xbf16>
    %cst_10 = arith.constant dense<0.000000e+00> : vector<16x16xf32>
    %33 = tpu.matmul %31, %32, %cst_10 {dimension_numbers = #tpu.dot_dimension_numbers<[1], [1], [0], [0], [0, 0, 1, 0], [], []>} : vector<16x8xbf16>, vector<16x8xbf16>, vector<16x16xf32> -> vector<16x16xf32>
    %cst_11 = arith.constant dense<0xFF800000> : vector<16xf32>
    %34 = vector.multi_reduction <maximumf>, %33, %cst_11 [1] : vector<16x16xf32> to vector<16xf32>
    %35 = vector.shape_cast %34 : vector<16xf32> to vector<16x1xf32>
    %36 = vector.broadcast %35 : vector<16x1xf32> to vector<16x16xf32>
    %37 = arith.subf %33, %36 : vector<16x16xf32>
    %38 = math.exp %37 : vector<16x16xf32>
    %cst_12 = arith.constant dense<0.000000e+00> : vector<16xf32>
    %39 = vector.multi_reduction <add>, %38, %cst_12 [1] : vector<16x16xf32> to vector<16xf32>
    %40 = vector.shape_cast %39 : vector<16xf32> to vector<16x1xf32>
    %41 = tpu.reciprocal %40 {approx = true} : vector<16x1xf32> -> vector<16x1xf32>
    %42 = vector.broadcast %41 : vector<16x1xf32> to vector<16x16xf32>
    %43 = arith.mulf %38, %42 : vector<16x16xf32>
    %44 = arith.truncf %43 : vector<16x16xf32> to vector<16x16xbf16>
    %45 = arith.truncf %30 : vector<16x8xf32> to vector<16x8xbf16>
    %cst_13 = arith.constant dense<0.000000e+00> : vector<16x8xf32>
    %46 = tpu.matmul %44, %45, %cst_13 {dimension_numbers = #tpu.dot_dimension_numbers<[1], [0], [0], [1], [0, 0, 1, 1], [], []>} : vector<16x16xbf16>, vector<16x8xbf16>, vector<16x8xf32> -> vector<16x8xf32>
    %47 = vector.extract_strided_slice %4 {offsets = [0, 16], sizes = [16, 8], strides = [1, 1]} : vector<128x96xf32> to vector<16x8xf32>
    %cst_14 = arith.constant 0.353553385 : f32
    %48 = vector.broadcast %cst_14 : f32 to vector<16x8xf32>
    %49 = arith.mulf %47, %48 : vector<16x8xf32>
    %50 = vector.extract_strided_slice %4 {offsets = [0, 48], sizes = [16, 8], strides = [1, 1]} : vector<128x96xf32> to vector<16x8xf32>
    %51 = vector.extract_strided_slice %4 {offsets = [0, 80], sizes = [16, 8], strides = [1, 1]} : vector<128x96xf32> to vector<16x8xf32>
    %52 = arith.truncf %49 : vector<16x8xf32> to vector<16x8xbf16>
    %53 = arith.truncf %50 : vector<16x8xf32> to vector<16x8xbf16>
    %cst_15 = arith.constant dense<0.000000e+00> : vector<16x16xf32>
    %54 = tpu.matmul %52, %53, %cst_15 {dimension_numbers = #tpu.dot_dimension_numbers<[1], [1], [0], [0], [0, 0, 1, 0], [], []>} : vector<16x8xbf16>, vector<16x8xbf16>, vector<16x16xf32> -> vector<16x16xf32>
    %cst_16 = arith.constant dense<0xFF800000> : vector<16xf32>
    %55 = vector.multi_reduction <maximumf>, %54, %cst_16 [1] : vector<16x16xf32> to vector<16xf32>
    %56 = vector.shape_cast %55 : vector<16xf32> to vector<16x1xf32>
    %57 = vector.broadcast %56 : vector<16x1xf32> to vector<16x16xf32>
    %58 = arith.subf %54, %57 : vector<16x16xf32>
    %59 = math.exp %58 : vector<16x16xf32>
    %cst_17 = arith.constant dense<0.000000e+00> : vector<16xf32>
    %60 = vector.multi_reduction <add>, %59, %cst_17 [1] : vector<16x16xf32> to vector<16xf32>
    %61 = vector.shape_cast %60 : vector<16xf32> to vector<16x1xf32>
    %62 = tpu.reciprocal %61 {approx = true} : vector<16x1xf32> -> vector<16x1xf32>
    %63 = vector.broadcast %62 : vector<16x1xf32> to vector<16x16xf32>
    %64 = arith.mulf %59, %63 : vector<16x16xf32>
    %65 = arith.truncf %64 : vector<16x16xf32> to vector<16x16xbf16>
    %66 = arith.truncf %51 : vector<16x8xf32> to vector<16x8xbf16>
    %cst_18 = arith.constant dense<0.000000e+00> : vector<16x8xf32>
    %67 = tpu.matmul %65, %66, %cst_18 {dimension_numbers = #tpu.dot_dimension_numbers<[1], [0], [0], [1], [0, 0, 1, 1], [], []>} : vector<16x16xbf16>, vector<16x8xbf16>, vector<16x8xf32> -> vector<16x8xf32>
    %68 = vector.extract_strided_slice %4 {offsets = [0, 24], sizes = [16, 8], strides = [1, 1]} : vector<128x96xf32> to vector<16x8xf32>
    %cst_19 = arith.constant 0.353553385 : f32
    %69 = vector.broadcast %cst_19 : f32 to vector<16x8xf32>
    %70 = arith.mulf %68, %69 : vector<16x8xf32>
    %71 = vector.extract_strided_slice %4 {offsets = [0, 56], sizes = [16, 8], strides = [1, 1]} : vector<128x96xf32> to vector<16x8xf32>
    %72 = vector.extract_strided_slice %4 {offsets = [0, 88], sizes = [16, 8], strides = [1, 1]} : vector<128x96xf32> to vector<16x8xf32>
    %73 = arith.truncf %70 : vector<16x8xf32> to vector<16x8xbf16>
    %74 = arith.truncf %71 : vector<16x8xf32> to vector<16x8xbf16>
    %cst_20 = arith.constant dense<0.000000e+00> : vector<16x16xf32>
    %75 = tpu.matmul %73, %74, %cst_20 {dimension_numbers = #tpu.dot_dimension_numbers<[1], [1], [0], [0], [0, 0, 1, 0], [], []>} : vector<16x8xbf16>, vector<16x8xbf16>, vector<16x16xf32> -> vector<16x16xf32>
    %cst_21 = arith.constant dense<0xFF800000> : vector<16xf32>
    %76 = vector.multi_reduction <maximumf>, %75, %cst_21 [1] : vector<16x16xf32> to vector<16xf32>
    %77 = vector.shape_cast %76 : vector<16xf32> to vector<16x1xf32>
    %78 = vector.broadcast %77 : vector<16x1xf32> to vector<16x16xf32>
    %79 = arith.subf %75, %78 : vector<16x16xf32>
    %80 = math.exp %79 : vector<16x16xf32>
    %cst_22 = arith.constant dense<0.000000e+00> : vector<16xf32>
    %81 = vector.multi_reduction <add>, %80, %cst_22 [1] : vector<16x16xf32> to vector<16xf32>
    %82 = vector.shape_cast %81 : vector<16xf32> to vector<16x1xf32>
    %83 = tpu.reciprocal %82 {approx = true} : vector<16x1xf32> -> vector<16x1xf32>
    %84 = vector.broadcast %83 : vector<16x1xf32> to vector<16x16xf32>
    %85 = arith.mulf %80, %84 : vector<16x16xf32>
    %86 = arith.truncf %85 : vector<16x16xf32> to vector<16x16xbf16>
    %87 = arith.truncf %72 : vector<16x8xf32> to vector<16x8xbf16>
    %cst_23 = arith.constant dense<0.000000e+00> : vector<16x8xf32>
    %88 = tpu.matmul %86, %87, %cst_23 {dimension_numbers = #tpu.dot_dimension_numbers<[1], [0], [0], [1], [0, 0, 1, 1], [], []>} : vector<16x16xbf16>, vector<16x8xbf16>, vector<16x8xf32> -> vector<16x8xf32>
    %89 = tpu.concatenate %25, %46, %67, %88 in 1 : vector<16x8xf32>, vector<16x8xf32>, vector<16x8xf32>, vector<16x8xf32> -> vector<16x32xf32>
    %90 = vector.extract_strided_slice %4 {offsets = [16, 0], sizes = [16, 8], strides = [1, 1]} : vector<128x96xf32> to vector<16x8xf32>
    %cst_24 = arith.constant 0.353553385 : f32
    %91 = vector.broadcast %cst_24 : f32 to vector<16x8xf32>
    %92 = arith.mulf %90, %91 : vector<16x8xf32>
    %93 = vector.extract_strided_slice %4 {offsets = [16, 32], sizes = [16, 8], strides = [1, 1]} : vector<128x96xf32> to vector<16x8xf32>
    %94 = vector.extract_strided_slice %4 {offsets = [16, 64], sizes = [16, 8], strides = [1, 1]} : vector<128x96xf32> to vector<16x8xf32>
    %95 = arith.truncf %92 : vector<16x8xf32> to vector<16x8xbf16>
    %96 = arith.truncf %93 : vector<16x8xf32> to vector<16x8xbf16>
    %cst_25 = arith.constant dense<0.000000e+00> : vector<16x16xf32>
    %97 = tpu.matmul %95, %96, %cst_25 {dimension_numbers = #tpu.dot_dimension_numbers<[1], [1], [0], [0], [0, 0, 1, 0], [], []>} : vector<16x8xbf16>, vector<16x8xbf16>, vector<16x16xf32> -> vector<16x16xf32>
    %cst_26 = arith.constant dense<0xFF800000> : vector<16xf32>
    %98 = vector.multi_reduction <maximumf>, %97, %cst_26 [1] : vector<16x16xf32> to vector<16xf32>
    %99 = vector.shape_cast %98 : vector<16xf32> to vector<16x1xf32>
    %100 = vector.broadcast %99 : vector<16x1xf32> to vector<16x16xf32>
    %101 = arith.subf %97, %100 : vector<16x16xf32>
    %102 = math.exp %101 : vector<16x16xf32>
    %cst_27 = arith.constant dense<0.000000e+00> : vector<16xf32>
    %103 = vector.multi_reduction <add>, %102, %cst_27 [1] : vector<16x16xf32> to vector<16xf32>
    %104 = vector.shape_cast %103 : vector<16xf32> to vector<16x1xf32>
    %105 = tpu.reciprocal %104 {approx = true} : vector<16x1xf32> -> vector<16x1xf32>
    %106 = vector.broadcast %105 : vector<16x1xf32> to vector<16x16xf32>
    %107 = arith.mulf %102, %106 : vector<16x16xf32>
    %108 = arith.truncf %107 : vector<16x16xf32> to vector<16x16xbf16>
    %109 = arith.truncf %94 : vector<16x8xf32> to vector<16x8xbf16>
    %cst_28 = arith.constant dense<0.000000e+00> : vector<16x8xf32>
    %110 = tpu.matmul %108, %109, %cst_28 {dimension_numbers = #tpu.dot_dimension_numbers<[1], [0], [0], [1], [0, 0, 1, 1], [], []>} : vector<16x16xbf16>, vector<16x8xbf16>, vector<16x8xf32> -> vector<16x8xf32>
    %111 = vector.extract_strided_slice %4 {offsets = [16, 8], sizes = [16, 8], strides = [1, 1]} : vector<128x96xf32> to vector<16x8xf32>
    %cst_29 = arith.constant 0.353553385 : f32
    %112 = vector.broadcast %cst_29 : f32 to vector<16x8xf32>
    %113 = arith.mulf %111, %112 : vector<16x8xf32>
    %114 = vector.extract_strided_slice %4 {offsets = [16, 40], sizes = [16, 8], strides = [1, 1]} : vector<128x96xf32> to vector<16x8xf32>
    %115 = vector.extract_strided_slice %4 {offsets = [16, 72], sizes = [16, 8], strides = [1, 1]} : vector<128x96xf32> to vector<16x8xf32>
    %116 = arith.truncf %113 : vector<16x8xf32> to vector<16x8xbf16>
    %117 = arith.truncf %114 : vector<16x8xf32> to vector<16x8xbf16>
    %cst_30 = arith.constant dense<0.000000e+00> : vector<16x16xf32>
    %118 = tpu.matmul %116, %117, %cst_30 {dimension_numbers = #tpu.dot_dimension_numbers<[1], [1], [0], [0], [0, 0, 1, 0], [], []>} : vector<16x8xbf16>, vector<16x8xbf16>, vector<16x16xf32> -> vector<16x16xf32>
    %cst_31 = arith.constant dense<0xFF800000> : vector<16xf32>
    %119 = vector.multi_reduction <maximumf>, %118, %cst_31 [1] : vector<16x16xf32> to vector<16xf32>
    %120 = vector.shape_cast %119 : vector<16xf32> to vector<16x1xf32>
    %121 = vector.broadcast %120 : vector<16x1xf32> to vector<16x16xf32>
    %122 = arith.subf %118, %121 : vector<16x16xf32>
    %123 = math.exp %122 : vector<16x16xf32>
    %cst_32 = arith.constant dense<0.000000e+00> : vector<16xf32>
    %124 = vector.multi_reduction <add>, %123, %cst_32 [1] : vector<16x16xf32> to vector<16xf32>
    %125 = vector.shape_cast %124 : vector<16xf32> to vector<16x1xf32>
    %126 = tpu.reciprocal %125 {approx = true} : vector<16x1xf32> -> vector<16x1xf32>
    %127 = vector.broadcast %126 : vector<16x1xf32> to vector<16x16xf32>
    %128 = arith.mulf %123, %127 : vector<16x16xf32>
    %129 = arith.truncf %128 : vector<16x16xf32> to vector<16x16xbf16>
    %130 = arith.truncf %115 : vector<16x8xf32> to vector<16x8xbf16>
    %cst_33 = arith.constant dense<0.000000e+00> : vector<16x8xf32>
    %131 = tpu.matmul %129, %130, %cst_33 {dimension_numbers = #tpu.dot_dimension_numbers<[1], [0], [0], [1], [0, 0, 1, 1], [], []>} : vector<16x16xbf16>, vector<16x8xbf16>, vector<16x8xf32> -> vector<16x8xf32>
    %132 = vector.extract_strided_slice %4 {offsets = [16, 16], sizes = [16, 8], strides = [1, 1]} : vector<128x96xf32> to vector<16x8xf32>
    %cst_34 = arith.constant 0.353553385 : f32
    %133 = vector.broadcast %cst_34 : f32 to vector<16x8xf32>
    %134 = arith.mulf %132, %133 : vector<16x8xf32>
    %135 = vector.extract_strided_slice %4 {offsets = [16, 48], sizes = [16, 8], strides = [1, 1]} : vector<128x96xf32> to vector<16x8xf32>
    %136 = vector.extract_strided_slice %4 {offsets = [16, 80], sizes = [16, 8], strides = [1, 1]} : vector<128x96xf32> to vector<16x8xf32>
    %137 = arith.truncf %134 : vector<16x8xf32> to vector<16x8xbf16>
    %138 = arith.truncf %135 : vector<16x8xf32> to vector<16x8xbf16>
    %cst_35 = arith.constant dense<0.000000e+00> : vector<16x16xf32>
    %139 = tpu.matmul %137, %138, %cst_35 {dimension_numbers = #tpu.dot_dimension_numbers<[1], [1], [0], [0], [0, 0, 1, 0], [], []>} : vector<16x8xbf16>, vector<16x8xbf16>, vector<16x16xf32> -> vector<16x16xf32>
    %cst_36 = arith.constant dense<0xFF800000> : vector<16xf32>
    %140 = vector.multi_reduction <maximumf>, %139, %cst_36 [1] : vector<16x16xf32> to vector<16xf32>
    %141 = vector.shape_cast %140 : vector<16xf32> to vector<16x1xf32>
    %142 = vector.broadcast %141 : vector<16x1xf32> to vector<16x16xf32>
    %143 = arith.subf %139, %142 : vector<16x16xf32>
    %144 = math.exp %143 : vector<16x16xf32>
    %cst_37 = arith.constant dense<0.000000e+00> : vector<16xf32>
    %145 = vector.multi_reduction <add>, %144, %cst_37 [1] : vector<16x16xf32> to vector<16xf32>
    %146 = vector.shape_cast %145 : vector<16xf32> to vector<16x1xf32>
    %147 = tpu.reciprocal %146 {approx = true} : vector<16x1xf32> -> vector<16x1xf32>
    %148 = vector.broadcast %147 : vector<16x1xf32> to vector<16x16xf32>
    %149 = arith.mulf %144, %148 : vector<16x16xf32>
    %150 = arith.truncf %149 : vector<16x16xf32> to vector<16x16xbf16>
    %151 = arith.truncf %136 : vector<16x8xf32> to vector<16x8xbf16>
    %cst_38 = arith.constant dense<0.000000e+00> : vector<16x8xf32>
    %152 = tpu.matmul %150, %151, %cst_38 {dimension_numbers = #tpu.dot_dimension_numbers<[1], [0], [0], [1], [0, 0, 1, 1], [], []>} : vector<16x16xbf16>, vector<16x8xbf16>, vector<16x8xf32> -> vector<16x8xf32>
    %153 = vector.extract_strided_slice %4 {offsets = [16, 24], sizes = [16, 8], strides = [1, 1]} : vector<128x96xf32> to vector<16x8xf32>
    %cst_39 = arith.constant 0.353553385 : f32
    %154 = vector.broadcast %cst_39 : f32 to vector<16x8xf32>
    %155 = arith.mulf %153, %154 : vector<16x8xf32>
    %156 = vector.extract_strided_slice %4 {offsets = [16, 56], sizes = [16, 8], strides = [1, 1]} : vector<128x96xf32> to vector<16x8xf32>
    %157 = vector.extract_strided_slice %4 {offsets = [16, 88], sizes = [16, 8], strides = [1, 1]} : vector<128x96xf32> to vector<16x8xf32>
    %158 = arith.truncf %155 : vector<16x8xf32> to vector<16x8xbf16>
    %159 = arith.truncf %156 : vector<16x8xf32> to vector<16x8xbf16>
    %cst_40 = arith.constant dense<0.000000e+00> : vector<16x16xf32>
    %160 = tpu.matmul %158, %159, %cst_40 {dimension_numbers = #tpu.dot_dimension_numbers<[1], [1], [0], [0], [0, 0, 1, 0], [], []>} : vector<16x8xbf16>, vector<16x8xbf16>, vector<16x16xf32> -> vector<16x16xf32>
    %cst_41 = arith.constant dense<0xFF800000> : vector<16xf32>
    %161 = vector.multi_reduction <maximumf>, %160, %cst_41 [1] : vector<16x16xf32> to vector<16xf32>
    %162 = vector.shape_cast %161 : vector<16xf32> to vector<16x1xf32>
    %163 = vector.broadcast %162 : vector<16x1xf32> to vector<16x16xf32>
    %164 = arith.subf %160, %163 : vector<16x16xf32>
    %165 = math.exp %164 : vector<16x16xf32>
    %cst_42 = arith.constant dense<0.000000e+00> : vector<16xf32>
    %166 = vector.multi_reduction <add>, %165, %cst_42 [1] : vector<16x16xf32> to vector<16xf32>
    %167 = vector.shape_cast %166 : vector<16xf32> to vector<16x1xf32>
    %168 = tpu.reciprocal %167 {approx = true} : vector<16x1xf32> -> vector<16x1xf32>
    %169 = vector.broadcast %168 : vector<16x1xf32> to vector<16x16xf32>
    %170 = arith.mulf %165, %169 : vector<16x16xf32>
    %171 = arith.truncf %170 : vector<16x16xf32> to vector<16x16xbf16>
    %172 = arith.truncf %157 : vector<16x8xf32> to vector<16x8xbf16>
    %cst_43 = arith.constant dense<0.000000e+00> : vector<16x8xf32>
    %173 = tpu.matmul %171, %172, %cst_43 {dimension_numbers = #tpu.dot_dimension_numbers<[1], [0], [0], [1], [0, 0, 1, 1], [], []>} : vector<16x16xbf16>, vector<16x8xbf16>, vector<16x8xf32> -> vector<16x8xf32>
    %174 = tpu.concatenate %110, %131, %152, %173 in 1 : vector<16x8xf32>, vector<16x8xf32>, vector<16x8xf32>, vector<16x8xf32> -> vector<16x32xf32>
    %175 = vector.extract_strided_slice %4 {offsets = [32, 0], sizes = [16, 8], strides = [1, 1]} : vector<128x96xf32> to vector<16x8xf32>
    %cst_44 = arith.constant 0.353553385 : f32
    %176 = vector.broadcast %cst_44 : f32 to vector<16x8xf32>
    %177 = arith.mulf %175, %176 : vector<16x8xf32>
    %178 = vector.extract_strided_slice %4 {offsets = [32, 32], sizes = [16, 8], strides = [1, 1]} : vector<128x96xf32> to vector<16x8xf32>
    %179 = vector.extract_strided_slice %4 {offsets = [32, 64], sizes = [16, 8], strides = [1, 1]} : vector<128x96xf32> to vector<16x8xf32>
    %180 = arith.truncf %177 : vector<16x8xf32> to vector<16x8xbf16>
    %181 = arith.truncf %178 : vector<16x8xf32> to vector<16x8xbf16>
    %cst_45 = arith.constant dense<0.000000e+00> : vector<16x16xf32>
    %182 = tpu.matmul %180, %181, %cst_45 {dimension_numbers = #tpu.dot_dimension_numbers<[1], [1], [0], [0], [0, 0, 1, 0], [], []>} : vector<16x8xbf16>, vector<16x8xbf16>, vector<16x16xf32> -> vector<16x16xf32>
    %cst_46 = arith.constant dense<0xFF800000> : vector<16xf32>
    %183 = vector.multi_reduction <maximumf>, %182, %cst_46 [1] : vector<16x16xf32> to vector<16xf32>
    %184 = vector.shape_cast %183 : vector<16xf32> to vector<16x1xf32>
    %185 = vector.broadcast %184 : vector<16x1xf32> to vector<16x16xf32>
    %186 = arith.subf %182, %185 : vector<16x16xf32>
    %187 = math.exp %186 : vector<16x16xf32>
    %cst_47 = arith.constant dense<0.000000e+00> : vector<16xf32>
    %188 = vector.multi_reduction <add>, %187, %cst_47 [1] : vector<16x16xf32> to vector<16xf32>
    %189 = vector.shape_cast %188 : vector<16xf32> to vector<16x1xf32>
    %190 = tpu.reciprocal %189 {approx = true} : vector<16x1xf32> -> vector<16x1xf32>
    %191 = vector.broadcast %190 : vector<16x1xf32> to vector<16x16xf32>
    %192 = arith.mulf %187, %191 : vector<16x16xf32>
    %193 = arith.truncf %192 : vector<16x16xf32> to vector<16x16xbf16>
    %194 = arith.truncf %179 : vector<16x8xf32> to vector<16x8xbf16>
    %cst_48 = arith.constant dense<0.000000e+00> : vector<16x8xf32>
    %195 = tpu.matmul %193, %194, %cst_48 {dimension_numbers = #tpu.dot_dimension_numbers<[1], [0], [0], [1], [0, 0, 1, 1], [], []>} : vector<16x16xbf16>, vector<16x8xbf16>, vector<16x8xf32> -> vector<16x8xf32>
    %196 = vector.extract_strided_slice %4 {offsets = [32, 8], sizes = [16, 8], strides = [1, 1]} : vector<128x96xf32> to vector<16x8xf32>
    %cst_49 = arith.constant 0.353553385 : f32
    %197 = vector.broadcast %cst_49 : f32 to vector<16x8xf32>
    %198 = arith.mulf %196, %197 : vector<16x8xf32>
    %199 = vector.extract_strided_slice %4 {offsets = [32, 40], sizes = [16, 8], strides = [1, 1]} : vector<128x96xf32> to vector<16x8xf32>
    %200 = vector.extract_strided_slice %4 {offsets = [32, 72], sizes = [16, 8], strides = [1, 1]} : vector<128x96xf32> to vector<16x8xf32>
    %201 = arith.truncf %198 : vector<16x8xf32> to vector<16x8xbf16>
    %202 = arith.truncf %199 : vector<16x8xf32> to vector<16x8xbf16>
    %cst_50 = arith.constant dense<0.000000e+00> : vector<16x16xf32>
    %203 = tpu.matmul %201, %202, %cst_50 {dimension_numbers = #tpu.dot_dimension_numbers<[1], [1], [0], [0], [0, 0, 1, 0], [], []>} : vector<16x8xbf16>, vector<16x8xbf16>, vector<16x16xf32> -> vector<16x16xf32>
    %cst_51 = arith.constant dense<0xFF800000> : vector<16xf32>
    %204 = vector.multi_reduction <maximumf>, %203, %cst_51 [1] : vector<16x16xf32> to vector<16xf32>
    %205 = vector.shape_cast %204 : vector<16xf32> to vector<16x1xf32>
    %206 = vector.broadcast %205 : vector<16x1xf32> to vector<16x16xf32>
    %207 = arith.subf %203, %206 : vector<16x16xf32>
    %208 = math.exp %207 : vector<16x16xf32>
    %cst_52 = arith.constant dense<0.000000e+00> : vector<16xf32>
    %209 = vector.multi_reduction <add>, %208, %cst_52 [1] : vector<16x16xf32> to vector<16xf32>
    %210 = vector.shape_cast %209 : vector<16xf32> to vector<16x1xf32>
    %211 = tpu.reciprocal %210 {approx = true} : vector<16x1xf32> -> vector<16x1xf32>
    %212 = vector.broadcast %211 : vector<16x1xf32> to vector<16x16xf32>
    %213 = arith.mulf %208, %212 : vector<16x16xf32>
    %214 = arith.truncf %213 : vector<16x16xf32> to vector<16x16xbf16>
    %215 = arith.truncf %200 : vector<16x8xf32> to vector<16x8xbf16>
    %cst_53 = arith.constant dense<0.000000e+00> : vector<16x8xf32>
    %216 = tpu.matmul %214, %215, %cst_53 {dimension_numbers = #tpu.dot_dimension_numbers<[1], [0], [0], [1], [0, 0, 1, 1], [], []>} : vector<16x16xbf16>, vector<16x8xbf16>, vector<16x8xf32> -> vector<16x8xf32>
    %217 = vector.extract_strided_slice %4 {offsets = [32, 16], sizes = [16, 8], strides = [1, 1]} : vector<128x96xf32> to vector<16x8xf32>
    %cst_54 = arith.constant 0.353553385 : f32
    %218 = vector.broadcast %cst_54 : f32 to vector<16x8xf32>
    %219 = arith.mulf %217, %218 : vector<16x8xf32>
    %220 = vector.extract_strided_slice %4 {offsets = [32, 48], sizes = [16, 8], strides = [1, 1]} : vector<128x96xf32> to vector<16x8xf32>
    %221 = vector.extract_strided_slice %4 {offsets = [32, 80], sizes = [16, 8], strides = [1, 1]} : vector<128x96xf32> to vector<16x8xf32>
    %222 = arith.truncf %219 : vector<16x8xf32> to vector<16x8xbf16>
    %223 = arith.truncf %220 : vector<16x8xf32> to vector<16x8xbf16>
    %cst_55 = arith.constant dense<0.000000e+00> : vector<16x16xf32>
    %224 = tpu.matmul %222, %223, %cst_55 {dimension_numbers = #tpu.dot_dimension_numbers<[1], [1], [0], [0], [0, 0, 1, 0], [], []>} : vector<16x8xbf16>, vector<16x8xbf16>, vector<16x16xf32> -> vector<16x16xf32>
    %cst_56 = arith.constant dense<0xFF800000> : vector<16xf32>
    %225 = vector.multi_reduction <maximumf>, %224, %cst_56 [1] : vector<16x16xf32> to vector<16xf32>
    %226 = vector.shape_cast %225 : vector<16xf32> to vector<16x1xf32>
    %227 = vector.broadcast %226 : vector<16x1xf32> to vector<16x16xf32>
    %228 = arith.subf %224, %227 : vector<16x16xf32>
    %229 = math.exp %228 : vector<16x16xf32>
    %cst_57 = arith.constant dense<0.000000e+00> : vector<16xf32>
    %230 = vector.multi_reduction <add>, %229, %cst_57 [1] : vector<16x16xf32> to vector<16xf32>
    %231 = vector.shape_cast %230 : vector<16xf32> to vector<16x1xf32>
    %232 = tpu.reciprocal %231 {approx = true} : vector<16x1xf32> -> vector<16x1xf32>
    %233 = vector.broadcast %232 : vector<16x1xf32> to vector<16x16xf32>
    %234 = arith.mulf %229, %233 : vector<16x16xf32>
    %235 = arith.truncf %234 : vector<16x16xf32> to vector<16x16xbf16>
    %236 = arith.truncf %221 : vector<16x8xf32> to vector<16x8xbf16>
    %cst_58 = arith.constant dense<0.000000e+00> : vector<16x8xf32>
    %237 = tpu.matmul %235, %236, %cst_58 {dimension_numbers = #tpu.dot_dimension_numbers<[1], [0], [0], [1], [0, 0, 1, 1], [], []>} : vector<16x16xbf16>, vector<16x8xbf16>, vector<16x8xf32> -> vector<16x8xf32>
    %238 = vector.extract_strided_slice %4 {offsets = [32, 24], sizes = [16, 8], strides = [1, 1]} : vector<128x96xf32> to vector<16x8xf32>
    %cst_59 = arith.constant 0.353553385 : f32
    %239 = vector.broadcast %cst_59 : f32 to vector<16x8xf32>
    %240 = arith.mulf %238, %239 : vector<16x8xf32>
    %241 = vector.extract_strided_slice %4 {offsets = [32, 56], sizes = [16, 8], strides = [1, 1]} : vector<128x96xf32> to vector<16x8xf32>
    %242 = vector.extract_strided_slice %4 {offsets = [32, 88], sizes = [16, 8], strides = [1, 1]} : vector<128x96xf32> to vector<16x8xf32>
    %243 = arith.truncf %240 : vector<16x8xf32> to vector<16x8xbf16>
    %244 = arith.truncf %241 : vector<16x8xf32> to vector<16x8xbf16>
    %cst_60 = arith.constant dense<0.000000e+00> : vector<16x16xf32>
    %245 = tpu.matmul %243, %244, %cst_60 {dimension_numbers = #tpu.dot_dimension_numbers<[1], [1], [0], [0], [0, 0, 1, 0], [], []>} : vector<16x8xbf16>, vector<16x8xbf16>, vector<16x16xf32> -> vector<16x16xf32>
    %cst_61 = arith.constant dense<0xFF800000> : vector<16xf32>
    %246 = vector.multi_reduction <maximumf>, %245, %cst_61 [1] : vector<16x16xf32> to vector<16xf32>
    %247 = vector.shape_cast %246 : vector<16xf32> to vector<16x1xf32>
    %248 = vector.broadcast %247 : vector<16x1xf32> to vector<16x16xf32>
    %249 = arith.subf %245, %248 : vector<16x16xf32>
    %250 = math.exp %249 : vector<16x16xf32>
    %cst_62 = arith.constant dense<0.000000e+00> : vector<16xf32>
    %251 = vector.multi_reduction <add>, %250, %cst_62 [1] : vector<16x16xf32> to vector<16xf32>
    %252 = vector.shape_cast %251 : vector<16xf32> to vector<16x1xf32>
    %253 = tpu.reciprocal %252 {approx = true} : vector<16x1xf32> -> vector<16x1xf32>
    %254 = vector.broadcast %253 : vector<16x1xf32> to vector<16x16xf32>
    %255 = arith.mulf %250, %254 : vector<16x16xf32>
    %256 = arith.truncf %255 : vector<16x16xf32> to vector<16x16xbf16>
    %257 = arith.truncf %242 : vector<16x8xf32> to vector<16x8xbf16>
    %cst_63 = arith.constant dense<0.000000e+00> : vector<16x8xf32>
    %258 = tpu.matmul %256, %257, %cst_63 {dimension_numbers = #tpu.dot_dimension_numbers<[1], [0], [0], [1], [0, 0, 1, 1], [], []>} : vector<16x16xbf16>, vector<16x8xbf16>, vector<16x8xf32> -> vector<16x8xf32>
    %259 = tpu.concatenate %195, %216, %237, %258 in 1 : vector<16x8xf32>, vector<16x8xf32>, vector<16x8xf32>, vector<16x8xf32> -> vector<16x32xf32>
    %260 = vector.extract_strided_slice %4 {offsets = [48, 0], sizes = [16, 8], strides = [1, 1]} : vector<128x96xf32> to vector<16x8xf32>
    %cst_64 = arith.constant 0.353553385 : f32
    %261 = vector.broadcast %cst_64 : f32 to vector<16x8xf32>
    %262 = arith.mulf %260, %261 : vector<16x8xf32>
    %263 = vector.extract_strided_slice %4 {offsets = [48, 32], sizes = [16, 8], strides = [1, 1]} : vector<128x96xf32> to vector<16x8xf32>
    %264 = vector.extract_strided_slice %4 {offsets = [48, 64], sizes = [16, 8], strides = [1, 1]} : vector<128x96xf32> to vector<16x8xf32>
    %265 = arith.truncf %262 : vector<16x8xf32> to vector<16x8xbf16>
    %266 = arith.truncf %263 : vector<16x8xf32> to vector<16x8xbf16>
    %cst_65 = arith.constant dense<0.000000e+00> : vector<16x16xf32>
    %267 = tpu.matmul %265, %266, %cst_65 {dimension_numbers = #tpu.dot_dimension_numbers<[1], [1], [0], [0], [0, 0, 1, 0], [], []>} : vector<16x8xbf16>, vector<16x8xbf16>, vector<16x16xf32> -> vector<16x16xf32>
    %cst_66 = arith.constant dense<0xFF800000> : vector<16xf32>
    %268 = vector.multi_reduction <maximumf>, %267, %cst_66 [1] : vector<16x16xf32> to vector<16xf32>
    %269 = vector.shape_cast %268 : vector<16xf32> to vector<16x1xf32>
    %270 = vector.broadcast %269 : vector<16x1xf32> to vector<16x16xf32>
    %271 = arith.subf %267, %270 : vector<16x16xf32>
    %272 = math.exp %271 : vector<16x16xf32>
    %cst_67 = arith.constant dense<0.000000e+00> : vector<16xf32>
    %273 = vector.multi_reduction <add>, %272, %cst_67 [1] : vector<16x16xf32> to vector<16xf32>
    %274 = vector.shape_cast %273 : vector<16xf32> to vector<16x1xf32>
    %275 = tpu.reciprocal %274 {approx = true} : vector<16x1xf32> -> vector<16x1xf32>
    %276 = vector.broadcast %275 : vector<16x1xf32> to vector<16x16xf32>
    %277 = arith.mulf %272, %276 : vector<16x16xf32>
    %278 = arith.truncf %277 : vector<16x16xf32> to vector<16x16xbf16>
    %279 = arith.truncf %264 : vector<16x8xf32> to vector<16x8xbf16>
    %cst_68 = arith.constant dense<0.000000e+00> : vector<16x8xf32>
    %280 = tpu.matmul %278, %279, %cst_68 {dimension_numbers = #tpu.dot_dimension_numbers<[1], [0], [0], [1], [0, 0, 1, 1], [], []>} : vector<16x16xbf16>, vector<16x8xbf16>, vector<16x8xf32> -> vector<16x8xf32>
    %281 = vector.extract_strided_slice %4 {offsets = [48, 8], sizes = [16, 8], strides = [1, 1]} : vector<128x96xf32> to vector<16x8xf32>
    %cst_69 = arith.constant 0.353553385 : f32
    %282 = vector.broadcast %cst_69 : f32 to vector<16x8xf32>
    %283 = arith.mulf %281, %282 : vector<16x8xf32>
    %284 = vector.extract_strided_slice %4 {offsets = [48, 40], sizes = [16, 8], strides = [1, 1]} : vector<128x96xf32> to vector<16x8xf32>
    %285 = vector.extract_strided_slice %4 {offsets = [48, 72], sizes = [16, 8], strides = [1, 1]} : vector<128x96xf32> to vector<16x8xf32>
    %286 = arith.truncf %283 : vector<16x8xf32> to vector<16x8xbf16>
    %287 = arith.truncf %284 : vector<16x8xf32> to vector<16x8xbf16>
    %cst_70 = arith.constant dense<0.000000e+00> : vector<16x16xf32>
    %288 = tpu.matmul %286, %287, %cst_70 {dimension_numbers = #tpu.dot_dimension_numbers<[1], [1], [0], [0], [0, 0, 1, 0], [], []>} : vector<16x8xbf16>, vector<16x8xbf16>, vector<16x16xf32> -> vector<16x16xf32>
    %cst_71 = arith.constant dense<0xFF800000> : vector<16xf32>
    %289 = vector.multi_reduction <maximumf>, %288, %cst_71 [1] : vector<16x16xf32> to vector<16xf32>
    %290 = vector.shape_cast %289 : vector<16xf32> to vector<16x1xf32>
    %291 = vector.broadcast %290 : vector<16x1xf32> to vector<16x16xf32>
    %292 = arith.subf %288, %291 : vector<16x16xf32>
    %293 = math.exp %292 : vector<16x16xf32>
    %cst_72 = arith.constant dense<0.000000e+00> : vector<16xf32>
    %294 = vector.multi_reduction <add>, %293, %cst_72 [1] : vector<16x16xf32> to vector<16xf32>
    %295 = vector.shape_cast %294 : vector<16xf32> to vector<16x1xf32>
    %296 = tpu.reciprocal %295 {approx = true} : vector<16x1xf32> -> vector<16x1xf32>
    %297 = vector.broadcast %296 : vector<16x1xf32> to vector<16x16xf32>
    %298 = arith.mulf %293, %297 : vector<16x16xf32>
    %299 = arith.truncf %298 : vector<16x16xf32> to vector<16x16xbf16>
    %300 = arith.truncf %285 : vector<16x8xf32> to vector<16x8xbf16>
    %cst_73 = arith.constant dense<0.000000e+00> : vector<16x8xf32>
    %301 = tpu.matmul %299, %300, %cst_73 {dimension_numbers = #tpu.dot_dimension_numbers<[1], [0], [0], [1], [0, 0, 1, 1], [], []>} : vector<16x16xbf16>, vector<16x8xbf16>, vector<16x8xf32> -> vector<16x8xf32>
    %302 = vector.extract_strided_slice %4 {offsets = [48, 16], sizes = [16, 8], strides = [1, 1]} : vector<128x96xf32> to vector<16x8xf32>
    %cst_74 = arith.constant 0.353553385 : f32
    %303 = vector.broadcast %cst_74 : f32 to vector<16x8xf32>
    %304 = arith.mulf %302, %303 : vector<16x8xf32>
    %305 = vector.extract_strided_slice %4 {offsets = [48, 48], sizes = [16, 8], strides = [1, 1]} : vector<128x96xf32> to vector<16x8xf32>
    %306 = vector.extract_strided_slice %4 {offsets = [48, 80], sizes = [16, 8], strides = [1, 1]} : vector<128x96xf32> to vector<16x8xf32>
    %307 = arith.truncf %304 : vector<16x8xf32> to vector<16x8xbf16>
    %308 = arith.truncf %305 : vector<16x8xf32> to vector<16x8xbf16>
    %cst_75 = arith.constant dense<0.000000e+00> : vector<16x16xf32>
    %309 = tpu.matmul %307, %308, %cst_75 {dimension_numbers = #tpu.dot_dimension_numbers<[1], [1], [0], [0], [0, 0, 1, 0], [], []>} : vector<16x8xbf16>, vector<16x8xbf16>, vector<16x16xf32> -> vector<16x16xf32>
    %cst_76 = arith.constant dense<0xFF800000> : vector<16xf32>
    %310 = vector.multi_reduction <maximumf>, %309, %cst_76 [1] : vector<16x16xf32> to vector<16xf32>
    %311 = vector.shape_cast %310 : vector<16xf32> to vector<16x1xf32>
    %312 = vector.broadcast %311 : vector<16x1xf32> to vector<16x16xf32>
    %313 = arith.subf %309, %312 : vector<16x16xf32>
    %314 = math.exp %313 : vector<16x16xf32>
    %cst_77 = arith.constant dense<0.000000e+00> : vector<16xf32>
    %315 = vector.multi_reduction <add>, %314, %cst_77 [1] : vector<16x16xf32> to vector<16xf32>
    %316 = vector.shape_cast %315 : vector<16xf32> to vector<16x1xf32>
    %317 = tpu.reciprocal %316 {approx = true} : vector<16x1xf32> -> vector<16x1xf32>
    %318 = vector.broadcast %317 : vector<16x1xf32> to vector<16x16xf32>
    %319 = arith.mulf %314, %318 : vector<16x16xf32>
    %320 = arith.truncf %319 : vector<16x16xf32> to vector<16x16xbf16>
    %321 = arith.truncf %306 : vector<16x8xf32> to vector<16x8xbf16>
    %cst_78 = arith.constant dense<0.000000e+00> : vector<16x8xf32>
    %322 = tpu.matmul %320, %321, %cst_78 {dimension_numbers = #tpu.dot_dimension_numbers<[1], [0], [0], [1], [0, 0, 1, 1], [], []>} : vector<16x16xbf16>, vector<16x8xbf16>, vector<16x8xf32> -> vector<16x8xf32>
    %323 = vector.extract_strided_slice %4 {offsets = [48, 24], sizes = [16, 8], strides = [1, 1]} : vector<128x96xf32> to vector<16x8xf32>
    %cst_79 = arith.constant 0.353553385 : f32
    %324 = vector.broadcast %cst_79 : f32 to vector<16x8xf32>
    %325 = arith.mulf %323, %324 : vector<16x8xf32>
    %326 = vector.extract_strided_slice %4 {offsets = [48, 56], sizes = [16, 8], strides = [1, 1]} : vector<128x96xf32> to vector<16x8xf32>
    %327 = vector.extract_strided_slice %4 {offsets = [48, 88], sizes = [16, 8], strides = [1, 1]} : vector<128x96xf32> to vector<16x8xf32>
    %328 = arith.truncf %325 : vector<16x8xf32> to vector<16x8xbf16>
    %329 = arith.truncf %326 : vector<16x8xf32> to vector<16x8xbf16>
    %cst_80 = arith.constant dense<0.000000e+00> : vector<16x16xf32>
    %330 = tpu.matmul %328, %329, %cst_80 {dimension_numbers = #tpu.dot_dimension_numbers<[1], [1], [0], [0], [0, 0, 1, 0], [], []>} : vector<16x8xbf16>, vector<16x8xbf16>, vector<16x16xf32> -> vector<16x16xf32>
    %cst_81 = arith.constant dense<0xFF800000> : vector<16xf32>
    %331 = vector.multi_reduction <maximumf>, %330, %cst_81 [1] : vector<16x16xf32> to vector<16xf32>
    %332 = vector.shape_cast %331 : vector<16xf32> to vector<16x1xf32>
    %333 = vector.broadcast %332 : vector<16x1xf32> to vector<16x16xf32>
    %334 = arith.subf %330, %333 : vector<16x16xf32>
    %335 = math.exp %334 : vector<16x16xf32>
    %cst_82 = arith.constant dense<0.000000e+00> : vector<16xf32>
    %336 = vector.multi_reduction <add>, %335, %cst_82 [1] : vector<16x16xf32> to vector<16xf32>
    %337 = vector.shape_cast %336 : vector<16xf32> to vector<16x1xf32>
    %338 = tpu.reciprocal %337 {approx = true} : vector<16x1xf32> -> vector<16x1xf32>
    %339 = vector.broadcast %338 : vector<16x1xf32> to vector<16x16xf32>
    %340 = arith.mulf %335, %339 : vector<16x16xf32>
    %341 = arith.truncf %340 : vector<16x16xf32> to vector<16x16xbf16>
    %342 = arith.truncf %327 : vector<16x8xf32> to vector<16x8xbf16>
    %cst_83 = arith.constant dense<0.000000e+00> : vector<16x8xf32>
    %343 = tpu.matmul %341, %342, %cst_83 {dimension_numbers = #tpu.dot_dimension_numbers<[1], [0], [0], [1], [0, 0, 1, 1], [], []>} : vector<16x16xbf16>, vector<16x8xbf16>, vector<16x8xf32> -> vector<16x8xf32>
    %344 = tpu.concatenate %280, %301, %322, %343 in 1 : vector<16x8xf32>, vector<16x8xf32>, vector<16x8xf32>, vector<16x8xf32> -> vector<16x32xf32>
    %345 = vector.extract_strided_slice %4 {offsets = [64, 0], sizes = [16, 8], strides = [1, 1]} : vector<128x96xf32> to vector<16x8xf32>
    %cst_84 = arith.constant 0.353553385 : f32
    %346 = vector.broadcast %cst_84 : f32 to vector<16x8xf32>
    %347 = arith.mulf %345, %346 : vector<16x8xf32>
    %348 = vector.extract_strided_slice %4 {offsets = [64, 32], sizes = [16, 8], strides = [1, 1]} : vector<128x96xf32> to vector<16x8xf32>
    %349 = vector.extract_strided_slice %4 {offsets = [64, 64], sizes = [16, 8], strides = [1, 1]} : vector<128x96xf32> to vector<16x8xf32>
    %350 = arith.truncf %347 : vector<16x8xf32> to vector<16x8xbf16>
    %351 = arith.truncf %348 : vector<16x8xf32> to vector<16x8xbf16>
    %cst_85 = arith.constant dense<0.000000e+00> : vector<16x16xf32>
    %352 = tpu.matmul %350, %351, %cst_85 {dimension_numbers = #tpu.dot_dimension_numbers<[1], [1], [0], [0], [0, 0, 1, 0], [], []>} : vector<16x8xbf16>, vector<16x8xbf16>, vector<16x16xf32> -> vector<16x16xf32>
    %cst_86 = arith.constant dense<0xFF800000> : vector<16xf32>
    %353 = vector.multi_reduction <maximumf>, %352, %cst_86 [1] : vector<16x16xf32> to vector<16xf32>
    %354 = vector.shape_cast %353 : vector<16xf32> to vector<16x1xf32>
    %355 = vector.broadcast %354 : vector<16x1xf32> to vector<16x16xf32>
    %356 = arith.subf %352, %355 : vector<16x16xf32>
    %357 = math.exp %356 : vector<16x16xf32>
    %cst_87 = arith.constant dense<0.000000e+00> : vector<16xf32>
    %358 = vector.multi_reduction <add>, %357, %cst_87 [1] : vector<16x16xf32> to vector<16xf32>
    %359 = vector.shape_cast %358 : vector<16xf32> to vector<16x1xf32>
    %360 = tpu.reciprocal %359 {approx = true} : vector<16x1xf32> -> vector<16x1xf32>
    %361 = vector.broadcast %360 : vector<16x1xf32> to vector<16x16xf32>
    %362 = arith.mulf %357, %361 : vector<16x16xf32>
    %363 = arith.truncf %362 : vector<16x16xf32> to vector<16x16xbf16>
    %364 = arith.truncf %349 : vector<16x8xf32> to vector<16x8xbf16>
    %cst_88 = arith.constant dense<0.000000e+00> : vector<16x8xf32>
    %365 = tpu.matmul %363, %364, %cst_88 {dimension_numbers = #tpu.dot_dimension_numbers<[1], [0], [0], [1], [0, 0, 1, 1], [], []>} : vector<16x16xbf16>, vector<16x8xbf16>, vector<16x8xf32> -> vector<16x8xf32>
    %366 = vector.extract_strided_slice %4 {offsets = [64, 8], sizes = [16, 8], strides = [1, 1]} : vector<128x96xf32> to vector<16x8xf32>
    %cst_89 = arith.constant 0.353553385 : f32
    %367 = vector.broadcast %cst_89 : f32 to vector<16x8xf32>
    %368 = arith.mulf %366, %367 : vector<16x8xf32>
    %369 = vector.extract_strided_slice %4 {offsets = [64, 40], sizes = [16, 8], strides = [1, 1]} : vector<128x96xf32> to vector<16x8xf32>
    %370 = vector.extract_strided_slice %4 {offsets = [64, 72], sizes = [16, 8], strides = [1, 1]} : vector<128x96xf32> to vector<16x8xf32>
    %371 = arith.truncf %368 : vector<16x8xf32> to vector<16x8xbf16>
    %372 = arith.truncf %369 : vector<16x8xf32> to vector<16x8xbf16>
    %cst_90 = arith.constant dense<0.000000e+00> : vector<16x16xf32>
    %373 = tpu.matmul %371, %372, %cst_90 {dimension_numbers = #tpu.dot_dimension_numbers<[1], [1], [0], [0], [0, 0, 1, 0], [], []>} : vector<16x8xbf16>, vector<16x8xbf16>, vector<16x16xf32> -> vector<16x16xf32>
    %cst_91 = arith.constant dense<0xFF800000> : vector<16xf32>
    %374 = vector.multi_reduction <maximumf>, %373, %cst_91 [1] : vector<16x16xf32> to vector<16xf32>
    %375 = vector.shape_cast %374 : vector<16xf32> to vector<16x1xf32>
    %376 = vector.broadcast %375 : vector<16x1xf32> to vector<16x16xf32>
    %377 = arith.subf %373, %376 : vector<16x16xf32>
    %378 = math.exp %377 : vector<16x16xf32>
    %cst_92 = arith.constant dense<0.000000e+00> : vector<16xf32>
    %379 = vector.multi_reduction <add>, %378, %cst_92 [1] : vector<16x16xf32> to vector<16xf32>
    %380 = vector.shape_cast %379 : vector<16xf32> to vector<16x1xf32>
    %381 = tpu.reciprocal %380 {approx = true} : vector<16x1xf32> -> vector<16x1xf32>
    %382 = vector.broadcast %381 : vector<16x1xf32> to vector<16x16xf32>
    %383 = arith.mulf %378, %382 : vector<16x16xf32>
    %384 = arith.truncf %383 : vector<16x16xf32> to vector<16x16xbf16>
    %385 = arith.truncf %370 : vector<16x8xf32> to vector<16x8xbf16>
    %cst_93 = arith.constant dense<0.000000e+00> : vector<16x8xf32>
    %386 = tpu.matmul %384, %385, %cst_93 {dimension_numbers = #tpu.dot_dimension_numbers<[1], [0], [0], [1], [0, 0, 1, 1], [], []>} : vector<16x16xbf16>, vector<16x8xbf16>, vector<16x8xf32> -> vector<16x8xf32>
    %387 = vector.extract_strided_slice %4 {offsets = [64, 16], sizes = [16, 8], strides = [1, 1]} : vector<128x96xf32> to vector<16x8xf32>
    %cst_94 = arith.constant 0.353553385 : f32
    %388 = vector.broadcast %cst_94 : f32 to vector<16x8xf32>
    %389 = arith.mulf %387, %388 : vector<16x8xf32>
    %390 = vector.extract_strided_slice %4 {offsets = [64, 48], sizes = [16, 8], strides = [1, 1]} : vector<128x96xf32> to vector<16x8xf32>
    %391 = vector.extract_strided_slice %4 {offsets = [64, 80], sizes = [16, 8], strides = [1, 1]} : vector<128x96xf32> to vector<16x8xf32>
    %392 = arith.truncf %389 : vector<16x8xf32> to vector<16x8xbf16>
    %393 = arith.truncf %390 : vector<16x8xf32> to vector<16x8xbf16>
    %cst_95 = arith.constant dense<0.000000e+00> : vector<16x16xf32>
    %394 = tpu.matmul %392, %393, %cst_95 {dimension_numbers = #tpu.dot_dimension_numbers<[1], [1], [0], [0], [0, 0, 1, 0], [], []>} : vector<16x8xbf16>, vector<16x8xbf16>, vector<16x16xf32> -> vector<16x16xf32>
    %cst_96 = arith.constant dense<0xFF800000> : vector<16xf32>
    %395 = vector.multi_reduction <maximumf>, %394, %cst_96 [1] : vector<16x16xf32> to vector<16xf32>
    %396 = vector.shape_cast %395 : vector<16xf32> to vector<16x1xf32>
    %397 = vector.broadcast %396 : vector<16x1xf32> to vector<16x16xf32>
    %398 = arith.subf %394, %397 : vector<16x16xf32>
    %399 = math.exp %398 : vector<16x16xf32>
    %cst_97 = arith.constant dense<0.000000e+00> : vector<16xf32>
    %400 = vector.multi_reduction <add>, %399, %cst_97 [1] : vector<16x16xf32> to vector<16xf32>
    %401 = vector.shape_cast %400 : vector<16xf32> to vector<16x1xf32>
    %402 = tpu.reciprocal %401 {approx = true} : vector<16x1xf32> -> vector<16x1xf32>
    %403 = vector.broadcast %402 : vector<16x1xf32> to vector<16x16xf32>
    %404 = arith.mulf %399, %403 : vector<16x16xf32>
    %405 = arith.truncf %404 : vector<16x16xf32> to vector<16x16xbf16>
    %406 = arith.truncf %391 : vector<16x8xf32> to vector<16x8xbf16>
    %cst_98 = arith.constant dense<0.000000e+00> : vector<16x8xf32>
    %407 = tpu.matmul %405, %406, %cst_98 {dimension_numbers = #tpu.dot_dimension_numbers<[1], [0], [0], [1], [0, 0, 1, 1], [], []>} : vector<16x16xbf16>, vector<16x8xbf16>, vector<16x8xf32> -> vector<16x8xf32>
    %408 = vector.extract_strided_slice %4 {offsets = [64, 24], sizes = [16, 8], strides = [1, 1]} : vector<128x96xf32> to vector<16x8xf32>
    %cst_99 = arith.constant 0.353553385 : f32
    %409 = vector.broadcast %cst_99 : f32 to vector<16x8xf32>
    %410 = arith.mulf %408, %409 : vector<16x8xf32>
    %411 = vector.extract_strided_slice %4 {offsets = [64, 56], sizes = [16, 8], strides = [1, 1]} : vector<128x96xf32> to vector<16x8xf32>
    %412 = vector.extract_strided_slice %4 {offsets = [64, 88], sizes = [16, 8], strides = [1, 1]} : vector<128x96xf32> to vector<16x8xf32>
    %413 = arith.truncf %410 : vector<16x8xf32> to vector<16x8xbf16>
    %414 = arith.truncf %411 : vector<16x8xf32> to vector<16x8xbf16>
    %cst_100 = arith.constant dense<0.000000e+00> : vector<16x16xf32>
    %415 = tpu.matmul %413, %414, %cst_100 {dimension_numbers = #tpu.dot_dimension_numbers<[1], [1], [0], [0], [0, 0, 1, 0], [], []>} : vector<16x8xbf16>, vector<16x8xbf16>, vector<16x16xf32> -> vector<16x16xf32>
    %cst_101 = arith.constant dense<0xFF800000> : vector<16xf32>
    %416 = vector.multi_reduction <maximumf>, %415, %cst_101 [1] : vector<16x16xf32> to vector<16xf32>
    %417 = vector.shape_cast %416 : vector<16xf32> to vector<16x1xf32>
    %418 = vector.broadcast %417 : vector<16x1xf32> to vector<16x16xf32>
    %419 = arith.subf %415, %418 : vector<16x16xf32>
    %420 = math.exp %419 : vector<16x16xf32>
    %cst_102 = arith.constant dense<0.000000e+00> : vector<16xf32>
    %421 = vector.multi_reduction <add>, %420, %cst_102 [1] : vector<16x16xf32> to vector<16xf32>
    %422 = vector.shape_cast %421 : vector<16xf32> to vector<16x1xf32>
    %423 = tpu.reciprocal %422 {approx = true} : vector<16x1xf32> -> vector<16x1xf32>
    %424 = vector.broadcast %423 : vector<16x1xf32> to vector<16x16xf32>
    %425 = arith.mulf %420, %424 : vector<16x16xf32>
    %426 = arith.truncf %425 : vector<16x16xf32> to vector<16x16xbf16>
    %427 = arith.truncf %412 : vector<16x8xf32> to vector<16x8xbf16>
    %cst_103 = arith.constant dense<0.000000e+00> : vector<16x8xf32>
    %428 = tpu.matmul %426, %427, %cst_103 {dimension_numbers = #tpu.dot_dimension_numbers<[1], [0], [0], [1], [0, 0, 1, 1], [], []>} : vector<16x16xbf16>, vector<16x8xbf16>, vector<16x8xf32> -> vector<16x8xf32>
    %429 = tpu.concatenate %365, %386, %407, %428 in 1 : vector<16x8xf32>, vector<16x8xf32>, vector<16x8xf32>, vector<16x8xf32> -> vector<16x32xf32>
    %430 = vector.extract_strided_slice %4 {offsets = [80, 0], sizes = [16, 8], strides = [1, 1]} : vector<128x96xf32> to vector<16x8xf32>
    %cst_104 = arith.constant 0.353553385 : f32
    %431 = vector.broadcast %cst_104 : f32 to vector<16x8xf32>
    %432 = arith.mulf %430, %431 : vector<16x8xf32>
    %433 = vector.extract_strided_slice %4 {offsets = [80, 32], sizes = [16, 8], strides = [1, 1]} : vector<128x96xf32> to vector<16x8xf32>
    %434 = vector.extract_strided_slice %4 {offsets = [80, 64], sizes = [16, 8], strides = [1, 1]} : vector<128x96xf32> to vector<16x8xf32>
    %435 = arith.truncf %432 : vector<16x8xf32> to vector<16x8xbf16>
    %436 = arith.truncf %433 : vector<16x8xf32> to vector<16x8xbf16>
    %cst_105 = arith.constant dense<0.000000e+00> : vector<16x16xf32>
    %437 = tpu.matmul %435, %436, %cst_105 {dimension_numbers = #tpu.dot_dimension_numbers<[1], [1], [0], [0], [0, 0, 1, 0], [], []>} : vector<16x8xbf16>, vector<16x8xbf16>, vector<16x16xf32> -> vector<16x16xf32>
    %cst_106 = arith.constant dense<0xFF800000> : vector<16xf32>
    %438 = vector.multi_reduction <maximumf>, %437, %cst_106 [1] : vector<16x16xf32> to vector<16xf32>
    %439 = vector.shape_cast %438 : vector<16xf32> to vector<16x1xf32>
    %440 = vector.broadcast %439 : vector<16x1xf32> to vector<16x16xf32>
    %441 = arith.subf %437, %440 : vector<16x16xf32>
    %442 = math.exp %441 : vector<16x16xf32>
    %cst_107 = arith.constant dense<0.000000e+00> : vector<16xf32>
    %443 = vector.multi_reduction <add>, %442, %cst_107 [1] : vector<16x16xf32> to vector<16xf32>
    %444 = vector.shape_cast %443 : vector<16xf32> to vector<16x1xf32>
    %445 = tpu.reciprocal %444 {approx = true} : vector<16x1xf32> -> vector<16x1xf32>
    %446 = vector.broadcast %445 : vector<16x1xf32> to vector<16x16xf32>
    %447 = arith.mulf %442, %446 : vector<16x16xf32>
    %448 = arith.truncf %447 : vector<16x16xf32> to vector<16x16xbf16>
    %449 = arith.truncf %434 : vector<16x8xf32> to vector<16x8xbf16>
    %cst_108 = arith.constant dense<0.000000e+00> : vector<16x8xf32>
    %450 = tpu.matmul %448, %449, %cst_108 {dimension_numbers = #tpu.dot_dimension_numbers<[1], [0], [0], [1], [0, 0, 1, 1], [], []>} : vector<16x16xbf16>, vector<16x8xbf16>, vector<16x8xf32> -> vector<16x8xf32>
    %451 = vector.extract_strided_slice %4 {offsets = [80, 8], sizes = [16, 8], strides = [1, 1]} : vector<128x96xf32> to vector<16x8xf32>
    %cst_109 = arith.constant 0.353553385 : f32
    %452 = vector.broadcast %cst_109 : f32 to vector<16x8xf32>
    %453 = arith.mulf %451, %452 : vector<16x8xf32>
    %454 = vector.extract_strided_slice %4 {offsets = [80, 40], sizes = [16, 8], strides = [1, 1]} : vector<128x96xf32> to vector<16x8xf32>
    %455 = vector.extract_strided_slice %4 {offsets = [80, 72], sizes = [16, 8], strides = [1, 1]} : vector<128x96xf32> to vector<16x8xf32>
    %456 = arith.truncf %453 : vector<16x8xf32> to vector<16x8xbf16>
    %457 = arith.truncf %454 : vector<16x8xf32> to vector<16x8xbf16>
    %cst_110 = arith.constant dense<0.000000e+00> : vector<16x16xf32>
    %458 = tpu.matmul %456, %457, %cst_110 {dimension_numbers = #tpu.dot_dimension_numbers<[1], [1], [0], [0], [0, 0, 1, 0], [], []>} : vector<16x8xbf16>, vector<16x8xbf16>, vector<16x16xf32> -> vector<16x16xf32>
    %cst_111 = arith.constant dense<0xFF800000> : vector<16xf32>
    %459 = vector.multi_reduction <maximumf>, %458, %cst_111 [1] : vector<16x16xf32> to vector<16xf32>
    %460 = vector.shape_cast %459 : vector<16xf32> to vector<16x1xf32>
    %461 = vector.broadcast %460 : vector<16x1xf32> to vector<16x16xf32>
    %462 = arith.subf %458, %461 : vector<16x16xf32>
    %463 = math.exp %462 : vector<16x16xf32>
    %cst_112 = arith.constant dense<0.000000e+00> : vector<16xf32>
    %464 = vector.multi_reduction <add>, %463, %cst_112 [1] : vector<16x16xf32> to vector<16xf32>
    %465 = vector.shape_cast %464 : vector<16xf32> to vector<16x1xf32>
    %466 = tpu.reciprocal %465 {approx = true} : vector<16x1xf32> -> vector<16x1xf32>
    %467 = vector.broadcast %466 : vector<16x1xf32> to vector<16x16xf32>
    %468 = arith.mulf %463, %467 : vector<16x16xf32>
    %469 = arith.truncf %468 : vector<16x16xf32> to vector<16x16xbf16>
    %470 = arith.truncf %455 : vector<16x8xf32> to vector<16x8xbf16>
    %cst_113 = arith.constant dense<0.000000e+00> : vector<16x8xf32>
    %471 = tpu.matmul %469, %470, %cst_113 {dimension_numbers = #tpu.dot_dimension_numbers<[1], [0], [0], [1], [0, 0, 1, 1], [], []>} : vector<16x16xbf16>, vector<16x8xbf16>, vector<16x8xf32> -> vector<16x8xf32>
    %472 = vector.extract_strided_slice %4 {offsets = [80, 16], sizes = [16, 8], strides = [1, 1]} : vector<128x96xf32> to vector<16x8xf32>
    %cst_114 = arith.constant 0.353553385 : f32
    %473 = vector.broadcast %cst_114 : f32 to vector<16x8xf32>
    %474 = arith.mulf %472, %473 : vector<16x8xf32>
    %475 = vector.extract_strided_slice %4 {offsets = [80, 48], sizes = [16, 8], strides = [1, 1]} : vector<128x96xf32> to vector<16x8xf32>
    %476 = vector.extract_strided_slice %4 {offsets = [80, 80], sizes = [16, 8], strides = [1, 1]} : vector<128x96xf32> to vector<16x8xf32>
    %477 = arith.truncf %474 : vector<16x8xf32> to vector<16x8xbf16>
    %478 = arith.truncf %475 : vector<16x8xf32> to vector<16x8xbf16>
    %cst_115 = arith.constant dense<0.000000e+00> : vector<16x16xf32>
    %479 = tpu.matmul %477, %478, %cst_115 {dimension_numbers = #tpu.dot_dimension_numbers<[1], [1], [0], [0], [0, 0, 1, 0], [], []>} : vector<16x8xbf16>, vector<16x8xbf16>, vector<16x16xf32> -> vector<16x16xf32>
    %cst_116 = arith.constant dense<0xFF800000> : vector<16xf32>
    %480 = vector.multi_reduction <maximumf>, %479, %cst_116 [1] : vector<16x16xf32> to vector<16xf32>
    %481 = vector.shape_cast %480 : vector<16xf32> to vector<16x1xf32>
    %482 = vector.broadcast %481 : vector<16x1xf32> to vector<16x16xf32>
    %483 = arith.subf %479, %482 : vector<16x16xf32>
    %484 = math.exp %483 : vector<16x16xf32>
    %cst_117 = arith.constant dense<0.000000e+00> : vector<16xf32>
    %485 = vector.multi_reduction <add>, %484, %cst_117 [1] : vector<16x16xf32> to vector<16xf32>
    %486 = vector.shape_cast %485 : vector<16xf32> to vector<16x1xf32>
    %487 = tpu.reciprocal %486 {approx = true} : vector<16x1xf32> -> vector<16x1xf32>
    %488 = vector.broadcast %487 : vector<16x1xf32> to vector<16x16xf32>
    %489 = arith.mulf %484, %488 : vector<16x16xf32>
    %490 = arith.truncf %489 : vector<16x16xf32> to vector<16x16xbf16>
    %491 = arith.truncf %476 : vector<16x8xf32> to vector<16x8xbf16>
    %cst_118 = arith.constant dense<0.000000e+00> : vector<16x8xf32>
    %492 = tpu.matmul %490, %491, %cst_118 {dimension_numbers = #tpu.dot_dimension_numbers<[1], [0], [0], [1], [0, 0, 1, 1], [], []>} : vector<16x16xbf16>, vector<16x8xbf16>, vector<16x8xf32> -> vector<16x8xf32>
    %493 = vector.extract_strided_slice %4 {offsets = [80, 24], sizes = [16, 8], strides = [1, 1]} : vector<128x96xf32> to vector<16x8xf32>
    %cst_119 = arith.constant 0.353553385 : f32
    %494 = vector.broadcast %cst_119 : f32 to vector<16x8xf32>
    %495 = arith.mulf %493, %494 : vector<16x8xf32>
    %496 = vector.extract_strided_slice %4 {offsets = [80, 56], sizes = [16, 8], strides = [1, 1]} : vector<128x96xf32> to vector<16x8xf32>
    %497 = vector.extract_strided_slice %4 {offsets = [80, 88], sizes = [16, 8], strides = [1, 1]} : vector<128x96xf32> to vector<16x8xf32>
    %498 = arith.truncf %495 : vector<16x8xf32> to vector<16x8xbf16>
    %499 = arith.truncf %496 : vector<16x8xf32> to vector<16x8xbf16>
    %cst_120 = arith.constant dense<0.000000e+00> : vector<16x16xf32>
    %500 = tpu.matmul %498, %499, %cst_120 {dimension_numbers = #tpu.dot_dimension_numbers<[1], [1], [0], [0], [0, 0, 1, 0], [], []>} : vector<16x8xbf16>, vector<16x8xbf16>, vector<16x16xf32> -> vector<16x16xf32>
    %cst_121 = arith.constant dense<0xFF800000> : vector<16xf32>
    %501 = vector.multi_reduction <maximumf>, %500, %cst_121 [1] : vector<16x16xf32> to vector<16xf32>
    %502 = vector.shape_cast %501 : vector<16xf32> to vector<16x1xf32>
    %503 = vector.broadcast %502 : vector<16x1xf32> to vector<16x16xf32>
    %504 = arith.subf %500, %503 : vector<16x16xf32>
    %505 = math.exp %504 : vector<16x16xf32>
    %cst_122 = arith.constant dense<0.000000e+00> : vector<16xf32>
    %506 = vector.multi_reduction <add>, %505, %cst_122 [1] : vector<16x16xf32> to vector<16xf32>
    %507 = vector.shape_cast %506 : vector<16xf32> to vector<16x1xf32>
    %508 = tpu.reciprocal %507 {approx = true} : vector<16x1xf32> -> vector<16x1xf32>
    %509 = vector.broadcast %508 : vector<16x1xf32> to vector<16x16xf32>
    %510 = arith.mulf %505, %509 : vector<16x16xf32>
    %511 = arith.truncf %510 : vector<16x16xf32> to vector<16x16xbf16>
    %512 = arith.truncf %497 : vector<16x8xf32> to vector<16x8xbf16>
    %cst_123 = arith.constant dense<0.000000e+00> : vector<16x8xf32>
    %513 = tpu.matmul %511, %512, %cst_123 {dimension_numbers = #tpu.dot_dimension_numbers<[1], [0], [0], [1], [0, 0, 1, 1], [], []>} : vector<16x16xbf16>, vector<16x8xbf16>, vector<16x8xf32> -> vector<16x8xf32>
    %514 = tpu.concatenate %450, %471, %492, %513 in 1 : vector<16x8xf32>, vector<16x8xf32>, vector<16x8xf32>, vector<16x8xf32> -> vector<16x32xf32>
    %515 = vector.extract_strided_slice %4 {offsets = [96, 0], sizes = [16, 8], strides = [1, 1]} : vector<128x96xf32> to vector<16x8xf32>
    %cst_124 = arith.constant 0.353553385 : f32
    %516 = vector.broadcast %cst_124 : f32 to vector<16x8xf32>
    %517 = arith.mulf %515, %516 : vector<16x8xf32>
    %518 = vector.extract_strided_slice %4 {offsets = [96, 32], sizes = [16, 8], strides = [1, 1]} : vector<128x96xf32> to vector<16x8xf32>
    %519 = vector.extract_strided_slice %4 {offsets = [96, 64], sizes = [16, 8], strides = [1, 1]} : vector<128x96xf32> to vector<16x8xf32>
    %520 = arith.truncf %517 : vector<16x8xf32> to vector<16x8xbf16>
    %521 = arith.truncf %518 : vector<16x8xf32> to vector<16x8xbf16>
    %cst_125 = arith.constant dense<0.000000e+00> : vector<16x16xf32>
    %522 = tpu.matmul %520, %521, %cst_125 {dimension_numbers = #tpu.dot_dimension_numbers<[1], [1], [0], [0], [0, 0, 1, 0], [], []>} : vector<16x8xbf16>, vector<16x8xbf16>, vector<16x16xf32> -> vector<16x16xf32>
    %cst_126 = arith.constant dense<0xFF800000> : vector<16xf32>
    %523 = vector.multi_reduction <maximumf>, %522, %cst_126 [1] : vector<16x16xf32> to vector<16xf32>
    %524 = vector.shape_cast %523 : vector<16xf32> to vector<16x1xf32>
    %525 = vector.broadcast %524 : vector<16x1xf32> to vector<16x16xf32>
    %526 = arith.subf %522, %525 : vector<16x16xf32>
    %527 = math.exp %526 : vector<16x16xf32>
    %cst_127 = arith.constant dense<0.000000e+00> : vector<16xf32>
    %528 = vector.multi_reduction <add>, %527, %cst_127 [1] : vector<16x16xf32> to vector<16xf32>
    %529 = vector.shape_cast %528 : vector<16xf32> to vector<16x1xf32>
    %530 = tpu.reciprocal %529 {approx = true} : vector<16x1xf32> -> vector<16x1xf32>
    %531 = vector.broadcast %530 : vector<16x1xf32> to vector<16x16xf32>
    %532 = arith.mulf %527, %531 : vector<16x16xf32>
    %533 = arith.truncf %532 : vector<16x16xf32> to vector<16x16xbf16>
    %534 = arith.truncf %519 : vector<16x8xf32> to vector<16x8xbf16>
    %cst_128 = arith.constant dense<0.000000e+00> : vector<16x8xf32>
    %535 = tpu.matmul %533, %534, %cst_128 {dimension_numbers = #tpu.dot_dimension_numbers<[1], [0], [0], [1], [0, 0, 1, 1], [], []>} : vector<16x16xbf16>, vector<16x8xbf16>, vector<16x8xf32> -> vector<16x8xf32>
    %536 = vector.extract_strided_slice %4 {offsets = [96, 8], sizes = [16, 8], strides = [1, 1]} : vector<128x96xf32> to vector<16x8xf32>
    %cst_129 = arith.constant 0.353553385 : f32
    %537 = vector.broadcast %cst_129 : f32 to vector<16x8xf32>
    %538 = arith.mulf %536, %537 : vector<16x8xf32>
    %539 = vector.extract_strided_slice %4 {offsets = [96, 40], sizes = [16, 8], strides = [1, 1]} : vector<128x96xf32> to vector<16x8xf32>
    %540 = vector.extract_strided_slice %4 {offsets = [96, 72], sizes = [16, 8], strides = [1, 1]} : vector<128x96xf32> to vector<16x8xf32>
    %541 = arith.truncf %538 : vector<16x8xf32> to vector<16x8xbf16>
    %542 = arith.truncf %539 : vector<16x8xf32> to vector<16x8xbf16>
    %cst_130 = arith.constant dense<0.000000e+00> : vector<16x16xf32>
    %543 = tpu.matmul %541, %542, %cst_130 {dimension_numbers = #tpu.dot_dimension_numbers<[1], [1], [0], [0], [0, 0, 1, 0], [], []>} : vector<16x8xbf16>, vector<16x8xbf16>, vector<16x16xf32> -> vector<16x16xf32>
    %cst_131 = arith.constant dense<0xFF800000> : vector<16xf32>
    %544 = vector.multi_reduction <maximumf>, %543, %cst_131 [1] : vector<16x16xf32> to vector<16xf32>
    %545 = vector.shape_cast %544 : vector<16xf32> to vector<16x1xf32>
    %546 = vector.broadcast %545 : vector<16x1xf32> to vector<16x16xf32>
    %547 = arith.subf %543, %546 : vector<16x16xf32>
    %548 = math.exp %547 : vector<16x16xf32>
    %cst_132 = arith.constant dense<0.000000e+00> : vector<16xf32>
    %549 = vector.multi_reduction <add>, %548, %cst_132 [1] : vector<16x16xf32> to vector<16xf32>
    %550 = vector.shape_cast %549 : vector<16xf32> to vector<16x1xf32>
    %551 = tpu.reciprocal %550 {approx = true} : vector<16x1xf32> -> vector<16x1xf32>
    %552 = vector.broadcast %551 : vector<16x1xf32> to vector<16x16xf32>
    %553 = arith.mulf %548, %552 : vector<16x16xf32>
    %554 = arith.truncf %553 : vector<16x16xf32> to vector<16x16xbf16>
    %555 = arith.truncf %540 : vector<16x8xf32> to vector<16x8xbf16>
    %cst_133 = arith.constant dense<0.000000e+00> : vector<16x8xf32>
    %556 = tpu.matmul %554, %555, %cst_133 {dimension_numbers = #tpu.dot_dimension_numbers<[1], [0], [0], [1], [0, 0, 1, 1], [], []>} : vector<16x16xbf16>, vector<16x8xbf16>, vector<16x8xf32> -> vector<16x8xf32>
    %557 = vector.extract_strided_slice %4 {offsets = [96, 16], sizes = [16, 8], strides = [1, 1]} : vector<128x96xf32> to vector<16x8xf32>
    %cst_134 = arith.constant 0.353553385 : f32
    %558 = vector.broadcast %cst_134 : f32 to vector<16x8xf32>
    %559 = arith.mulf %557, %558 : vector<16x8xf32>
    %560 = vector.extract_strided_slice %4 {offsets = [96, 48], sizes = [16, 8], strides = [1, 1]} : vector<128x96xf32> to vector<16x8xf32>
    %561 = vector.extract_strided_slice %4 {offsets = [96, 80], sizes = [16, 8], strides = [1, 1]} : vector<128x96xf32> to vector<16x8xf32>
    %562 = arith.truncf %559 : vector<16x8xf32> to vector<16x8xbf16>
    %563 = arith.truncf %560 : vector<16x8xf32> to vector<16x8xbf16>
    %cst_135 = arith.constant dense<0.000000e+00> : vector<16x16xf32>
    %564 = tpu.matmul %562, %563, %cst_135 {dimension_numbers = #tpu.dot_dimension_numbers<[1], [1], [0], [0], [0, 0, 1, 0], [], []>} : vector<16x8xbf16>, vector<16x8xbf16>, vector<16x16xf32> -> vector<16x16xf32>
    %cst_136 = arith.constant dense<0xFF800000> : vector<16xf32>
    %565 = vector.multi_reduction <maximumf>, %564, %cst_136 [1] : vector<16x16xf32> to vector<16xf32>
    %566 = vector.shape_cast %565 : vector<16xf32> to vector<16x1xf32>
    %567 = vector.broadcast %566 : vector<16x1xf32> to vector<16x16xf32>
    %568 = arith.subf %564, %567 : vector<16x16xf32>
    %569 = math.exp %568 : vector<16x16xf32>
    %cst_137 = arith.constant dense<0.000000e+00> : vector<16xf32>
    %570 = vector.multi_reduction <add>, %569, %cst_137 [1] : vector<16x16xf32> to vector<16xf32>
    %571 = vector.shape_cast %570 : vector<16xf32> to vector<16x1xf32>
    %572 = tpu.reciprocal %571 {approx = true} : vector<16x1xf32> -> vector<16x1xf32>
    %573 = vector.broadcast %572 : vector<16x1xf32> to vector<16x16xf32>
    %574 = arith.mulf %569, %573 : vector<16x16xf32>
    %575 = arith.truncf %574 : vector<16x16xf32> to vector<16x16xbf16>
    %576 = arith.truncf %561 : vector<16x8xf32> to vector<16x8xbf16>
    %cst_138 = arith.constant dense<0.000000e+00> : vector<16x8xf32>
    %577 = tpu.matmul %575, %576, %cst_138 {dimension_numbers = #tpu.dot_dimension_numbers<[1], [0], [0], [1], [0, 0, 1, 1], [], []>} : vector<16x16xbf16>, vector<16x8xbf16>, vector<16x8xf32> -> vector<16x8xf32>
    %578 = vector.extract_strided_slice %4 {offsets = [96, 24], sizes = [16, 8], strides = [1, 1]} : vector<128x96xf32> to vector<16x8xf32>
    %cst_139 = arith.constant 0.353553385 : f32
    %579 = vector.broadcast %cst_139 : f32 to vector<16x8xf32>
    %580 = arith.mulf %578, %579 : vector<16x8xf32>
    %581 = vector.extract_strided_slice %4 {offsets = [96, 56], sizes = [16, 8], strides = [1, 1]} : vector<128x96xf32> to vector<16x8xf32>
    %582 = vector.extract_strided_slice %4 {offsets = [96, 88], sizes = [16, 8], strides = [1, 1]} : vector<128x96xf32> to vector<16x8xf32>
    %583 = arith.truncf %580 : vector<16x8xf32> to vector<16x8xbf16>
    %584 = arith.truncf %581 : vector<16x8xf32> to vector<16x8xbf16>
    %cst_140 = arith.constant dense<0.000000e+00> : vector<16x16xf32>
    %585 = tpu.matmul %583, %584, %cst_140 {dimension_numbers = #tpu.dot_dimension_numbers<[1], [1], [0], [0], [0, 0, 1, 0], [], []>} : vector<16x8xbf16>, vector<16x8xbf16>, vector<16x16xf32> -> vector<16x16xf32>
    %cst_141 = arith.constant dense<0xFF800000> : vector<16xf32>
    %586 = vector.multi_reduction <maximumf>, %585, %cst_141 [1] : vector<16x16xf32> to vector<16xf32>
    %587 = vector.shape_cast %586 : vector<16xf32> to vector<16x1xf32>
    %588 = vector.broadcast %587 : vector<16x1xf32> to vector<16x16xf32>
    %589 = arith.subf %585, %588 : vector<16x16xf32>
    %590 = math.exp %589 : vector<16x16xf32>
    %cst_142 = arith.constant dense<0.000000e+00> : vector<16xf32>
    %591 = vector.multi_reduction <add>, %590, %cst_142 [1] : vector<16x16xf32> to vector<16xf32>
    %592 = vector.shape_cast %591 : vector<16xf32> to vector<16x1xf32>
    %593 = tpu.reciprocal %592 {approx = true} : vector<16x1xf32> -> vector<16x1xf32>
    %594 = vector.broadcast %593 : vector<16x1xf32> to vector<16x16xf32>
    %595 = arith.mulf %590, %594 : vector<16x16xf32>
    %596 = arith.truncf %595 : vector<16x16xf32> to vector<16x16xbf16>
    %597 = arith.truncf %582 : vector<16x8xf32> to vector<16x8xbf16>
    %cst_143 = arith.constant dense<0.000000e+00> : vector<16x8xf32>
    %598 = tpu.matmul %596, %597, %cst_143 {dimension_numbers = #tpu.dot_dimension_numbers<[1], [0], [0], [1], [0, 0, 1, 1], [], []>} : vector<16x16xbf16>, vector<16x8xbf16>, vector<16x8xf32> -> vector<16x8xf32>
    %599 = tpu.concatenate %535, %556, %577, %598 in 1 : vector<16x8xf32>, vector<16x8xf32>, vector<16x8xf32>, vector<16x8xf32> -> vector<16x32xf32>
    %600 = vector.extract_strided_slice %4 {offsets = [112, 0], sizes = [16, 8], strides = [1, 1]} : vector<128x96xf32> to vector<16x8xf32>
    %cst_144 = arith.constant 0.353553385 : f32
    %601 = vector.broadcast %cst_144 : f32 to vector<16x8xf32>
    %602 = arith.mulf %600, %601 : vector<16x8xf32>
    %603 = vector.extract_strided_slice %4 {offsets = [112, 32], sizes = [16, 8], strides = [1, 1]} : vector<128x96xf32> to vector<16x8xf32>
    %604 = vector.extract_strided_slice %4 {offsets = [112, 64], sizes = [16, 8], strides = [1, 1]} : vector<128x96xf32> to vector<16x8xf32>
    %605 = arith.truncf %602 : vector<16x8xf32> to vector<16x8xbf16>
    %606 = arith.truncf %603 : vector<16x8xf32> to vector<16x8xbf16>
    %cst_145 = arith.constant dense<0.000000e+00> : vector<16x16xf32>
    %607 = tpu.matmul %605, %606, %cst_145 {dimension_numbers = #tpu.dot_dimension_numbers<[1], [1], [0], [0], [0, 0, 1, 0], [], []>} : vector<16x8xbf16>, vector<16x8xbf16>, vector<16x16xf32> -> vector<16x16xf32>
    %cst_146 = arith.constant dense<0xFF800000> : vector<16xf32>
    %608 = vector.multi_reduction <maximumf>, %607, %cst_146 [1] : vector<16x16xf32> to vector<16xf32>
    %609 = vector.shape_cast %608 : vector<16xf32> to vector<16x1xf32>
    %610 = vector.broadcast %609 : vector<16x1xf32> to vector<16x16xf32>
    %611 = arith.subf %607, %610 : vector<16x16xf32>
    %612 = math.exp %611 : vector<16x16xf32>
    %cst_147 = arith.constant dense<0.000000e+00> : vector<16xf32>
    %613 = vector.multi_reduction <add>, %612, %cst_147 [1] : vector<16x16xf32> to vector<16xf32>
    %614 = vector.shape_cast %613 : vector<16xf32> to vector<16x1xf32>
    %615 = tpu.reciprocal %614 {approx = true} : vector<16x1xf32> -> vector<16x1xf32>
    %616 = vector.broadcast %615 : vector<16x1xf32> to vector<16x16xf32>
    %617 = arith.mulf %612, %616 : vector<16x16xf32>
    %618 = arith.truncf %617 : vector<16x16xf32> to vector<16x16xbf16>
    %619 = arith.truncf %604 : vector<16x8xf32> to vector<16x8xbf16>
    %cst_148 = arith.constant dense<0.000000e+00> : vector<16x8xf32>
    %620 = tpu.matmul %618, %619, %cst_148 {dimension_numbers = #tpu.dot_dimension_numbers<[1], [0], [0], [1], [0, 0, 1, 1], [], []>} : vector<16x16xbf16>, vector<16x8xbf16>, vector<16x8xf32> -> vector<16x8xf32>
    %621 = vector.extract_strided_slice %4 {offsets = [112, 8], sizes = [16, 8], strides = [1, 1]} : vector<128x96xf32> to vector<16x8xf32>
    %cst_149 = arith.constant 0.353553385 : f32
    %622 = vector.broadcast %cst_149 : f32 to vector<16x8xf32>
    %623 = arith.mulf %621, %622 : vector<16x8xf32>
    %624 = vector.extract_strided_slice %4 {offsets = [112, 40], sizes = [16, 8], strides = [1, 1]} : vector<128x96xf32> to vector<16x8xf32>
    %625 = vector.extract_strided_slice %4 {offsets = [112, 72], sizes = [16, 8], strides = [1, 1]} : vector<128x96xf32> to vector<16x8xf32>
    %626 = arith.truncf %623 : vector<16x8xf32> to vector<16x8xbf16>
    %627 = arith.truncf %624 : vector<16x8xf32> to vector<16x8xbf16>
    %cst_150 = arith.constant dense<0.000000e+00> : vector<16x16xf32>
    %628 = tpu.matmul %626, %627, %cst_150 {dimension_numbers = #tpu.dot_dimension_numbers<[1], [1], [0], [0], [0, 0, 1, 0], [], []>} : vector<16x8xbf16>, vector<16x8xbf16>, vector<16x16xf32> -> vector<16x16xf32>
    %cst_151 = arith.constant dense<0xFF800000> : vector<16xf32>
    %629 = vector.multi_reduction <maximumf>, %628, %cst_151 [1] : vector<16x16xf32> to vector<16xf32>
    %630 = vector.shape_cast %629 : vector<16xf32> to vector<16x1xf32>
    %631 = vector.broadcast %630 : vector<16x1xf32> to vector<16x16xf32>
    %632 = arith.subf %628, %631 : vector<16x16xf32>
    %633 = math.exp %632 : vector<16x16xf32>
    %cst_152 = arith.constant dense<0.000000e+00> : vector<16xf32>
    %634 = vector.multi_reduction <add>, %633, %cst_152 [1] : vector<16x16xf32> to vector<16xf32>
    %635 = vector.shape_cast %634 : vector<16xf32> to vector<16x1xf32>
    %636 = tpu.reciprocal %635 {approx = true} : vector<16x1xf32> -> vector<16x1xf32>
    %637 = vector.broadcast %636 : vector<16x1xf32> to vector<16x16xf32>
    %638 = arith.mulf %633, %637 : vector<16x16xf32>
    %639 = arith.truncf %638 : vector<16x16xf32> to vector<16x16xbf16>
    %640 = arith.truncf %625 : vector<16x8xf32> to vector<16x8xbf16>
    %cst_153 = arith.constant dense<0.000000e+00> : vector<16x8xf32>
    %641 = tpu.matmul %639, %640, %cst_153 {dimension_numbers = #tpu.dot_dimension_numbers<[1], [0], [0], [1], [0, 0, 1, 1], [], []>} : vector<16x16xbf16>, vector<16x8xbf16>, vector<16x8xf32> -> vector<16x8xf32>
    %642 = vector.extract_strided_slice %4 {offsets = [112, 16], sizes = [16, 8], strides = [1, 1]} : vector<128x96xf32> to vector<16x8xf32>
    %cst_154 = arith.constant 0.353553385 : f32
    %643 = vector.broadcast %cst_154 : f32 to vector<16x8xf32>
    %644 = arith.mulf %642, %643 : vector<16x8xf32>
    %645 = vector.extract_strided_slice %4 {offsets = [112, 48], sizes = [16, 8], strides = [1, 1]} : vector<128x96xf32> to vector<16x8xf32>
    %646 = vector.extract_strided_slice %4 {offsets = [112, 80], sizes = [16, 8], strides = [1, 1]} : vector<128x96xf32> to vector<16x8xf32>
    %647 = arith.truncf %644 : vector<16x8xf32> to vector<16x8xbf16>
    %648 = arith.truncf %645 : vector<16x8xf32> to vector<16x8xbf16>
    %cst_155 = arith.constant dense<0.000000e+00> : vector<16x16xf32>
    %649 = tpu.matmul %647, %648, %cst_155 {dimension_numbers = #tpu.dot_dimension_numbers<[1], [1], [0], [0], [0, 0, 1, 0], [], []>} : vector<16x8xbf16>, vector<16x8xbf16>, vector<16x16xf32> -> vector<16x16xf32>
    %cst_156 = arith.constant dense<0xFF800000> : vector<16xf32>
    %650 = vector.multi_reduction <maximumf>, %649, %cst_156 [1] : vector<16x16xf32> to vector<16xf32>
    %651 = vector.shape_cast %650 : vector<16xf32> to vector<16x1xf32>
    %652 = vector.broadcast %651 : vector<16x1xf32> to vector<16x16xf32>
    %653 = arith.subf %649, %652 : vector<16x16xf32>
    %654 = math.exp %653 : vector<16x16xf32>
    %cst_157 = arith.constant dense<0.000000e+00> : vector<16xf32>
    %655 = vector.multi_reduction <add>, %654, %cst_157 [1] : vector<16x16xf32> to vector<16xf32>
    %656 = vector.shape_cast %655 : vector<16xf32> to vector<16x1xf32>
    %657 = tpu.reciprocal %656 {approx = true} : vector<16x1xf32> -> vector<16x1xf32>
    %658 = vector.broadcast %657 : vector<16x1xf32> to vector<16x16xf32>
    %659 = arith.mulf %654, %658 : vector<16x16xf32>
    %660 = arith.truncf %659 : vector<16x16xf32> to vector<16x16xbf16>
    %661 = arith.truncf %646 : vector<16x8xf32> to vector<16x8xbf16>
    %cst_158 = arith.constant dense<0.000000e+00> : vector<16x8xf32>
    %662 = tpu.matmul %660, %661, %cst_158 {dimension_numbers = #tpu.dot_dimension_numbers<[1], [0], [0], [1], [0, 0, 1, 1], [], []>} : vector<16x16xbf16>, vector<16x8xbf16>, vector<16x8xf32> -> vector<16x8xf32>
    %663 = vector.extract_strided_slice %4 {offsets = [112, 24], sizes = [16, 8], strides = [1, 1]} : vector<128x96xf32> to vector<16x8xf32>
    %cst_159 = arith.constant 0.353553385 : f32
    %664 = vector.broadcast %cst_159 : f32 to vector<16x8xf32>
    %665 = arith.mulf %663, %664 : vector<16x8xf32>
    %666 = vector.extract_strided_slice %4 {offsets = [112, 56], sizes = [16, 8], strides = [1, 1]} : vector<128x96xf32> to vector<16x8xf32>
    %667 = vector.extract_strided_slice %4 {offsets = [112, 88], sizes = [16, 8], strides = [1, 1]} : vector<128x96xf32> to vector<16x8xf32>
    %668 = arith.truncf %665 : vector<16x8xf32> to vector<16x8xbf16>
    %669 = arith.truncf %666 : vector<16x8xf32> to vector<16x8xbf16>
    %cst_160 = arith.constant dense<0.000000e+00> : vector<16x16xf32>
    %670 = tpu.matmul %668, %669, %cst_160 {dimension_numbers = #tpu.dot_dimension_numbers<[1], [1], [0], [0], [0, 0, 1, 0], [], []>} : vector<16x8xbf16>, vector<16x8xbf16>, vector<16x16xf32> -> vector<16x16xf32>
    %cst_161 = arith.constant dense<0xFF800000> : vector<16xf32>
    %671 = vector.multi_reduction <maximumf>, %670, %cst_161 [1] : vector<16x16xf32> to vector<16xf32>
    %672 = vector.shape_cast %671 : vector<16xf32> to vector<16x1xf32>
    %673 = vector.broadcast %672 : vector<16x1xf32> to vector<16x16xf32>
    %674 = arith.subf %670, %673 : vector<16x16xf32>
    %675 = math.exp %674 : vector<16x16xf32>
    %cst_162 = arith.constant dense<0.000000e+00> : vector<16xf32>
    %676 = vector.multi_reduction <add>, %675, %cst_162 [1] : vector<16x16xf32> to vector<16xf32>
    %677 = vector.shape_cast %676 : vector<16xf32> to vector<16x1xf32>
    %678 = tpu.reciprocal %677 {approx = true} : vector<16x1xf32> -> vector<16x1xf32>
    %679 = vector.broadcast %678 : vector<16x1xf32> to vector<16x16xf32>
    %680 = arith.mulf %675, %679 : vector<16x16xf32>
    %681 = arith.truncf %680 : vector<16x16xf32> to vector<16x16xbf16>
    %682 = arith.truncf %667 : vector<16x8xf32> to vector<16x8xbf16>
    %cst_163 = arith.constant dense<0.000000e+00> : vector<16x8xf32>
    %683 = tpu.matmul %681, %682, %cst_163 {dimension_numbers = #tpu.dot_dimension_numbers<[1], [0], [0], [1], [0, 0, 1, 1], [], []>} : vector<16x16xbf16>, vector<16x8xbf16>, vector<16x8xf32> -> vector<16x8xf32>
    %684 = tpu.concatenate %620, %641, %662, %683 in 1 : vector<16x8xf32>, vector<16x8xf32>, vector<16x8xf32>, vector<16x8xf32> -> vector<16x32xf32>
    %685 = tpu.concatenate %89, %174, %259, %344, %429, %514, %599, %684 in 0 : vector<16x32xf32>, vector<16x32xf32>, vector<16x32xf32>, vector<16x32xf32>, vector<16x32xf32>, vector<16x32xf32>, vector<16x32xf32>, vector<16x32xf32> -> vector<128x32xf32>
    %686 = arith.truncf %685 : vector<128x32xf32> to vector<128x32xbf16>
    %c0_164 = arith.constant 0 : index
    %c0_165 = arith.constant 0 : index
    %687 = vector.load %arg3[%c0_164, %c0_165] : memref<32x32xbf16, #tpu.memory_space<vmem>>, vector<32x32xbf16>
    %cst_166 = arith.constant dense<0.000000e+00> : vector<128x32xf32>
    %688 = tpu.matmul %686, %687, %cst_166 {dimension_numbers = #tpu.dot_dimension_numbers<[1], [0], [0], [1], [0, 0, 1, 1], [], []>} : vector<128x32xbf16>, vector<32x32xbf16>, vector<128x32xf32> -> vector<128x32xf32>
    %689 = arith.addf %1, %688 : vector<128x32xf32>
    %c0_167 = arith.constant 0 : index
    %c0_168 = arith.constant 0 : index
    %690 = vector.load %arg4[%c0_167, %c0_168] : memref<1x32xf32, #tpu.memory_space<vmem>>, vector<1x32xf32>
    %c0_169 = arith.constant 0 : index
    %c0_170 = arith.constant 0 : index
    %691 = vector.load %arg5[%c0_169, %c0_170] : memref<1x32xf32, #tpu.memory_space<vmem>>, vector<1x32xf32>
    %cst_171 = arith.constant dense<0.000000e+00> : vector<128xf32>
    %692 = vector.multi_reduction <add>, %689, %cst_171 [1] : vector<128x32xf32> to vector<128xf32>
    %693 = vector.shape_cast %692 : vector<128xf32> to vector<128x1xf32>
    %cst_172 = arith.constant 3.200000e+01 : f32
    %694 = vector.broadcast %cst_172 : f32 to vector<128x1xf32>
    %695 = arith.divf %693, %694 : vector<128x1xf32>
    %696 = vector.broadcast %695 : vector<128x1xf32> to vector<128x32xf32>
    %697 = arith.subf %689, %696 : vector<128x32xf32>
    %698 = arith.mulf %697, %697 : vector<128x32xf32>
    %cst_173 = arith.constant dense<0.000000e+00> : vector<128xf32>
    %699 = vector.multi_reduction <add>, %698, %cst_173 [1] : vector<128x32xf32> to vector<128xf32>
    %700 = vector.shape_cast %699 : vector<128xf32> to vector<128x1xf32>
    %cst_174 = arith.constant 3.200000e+01 : f32
    %701 = vector.broadcast %cst_174 : f32 to vector<128x1xf32>
    %702 = arith.divf %700, %701 : vector<128x1xf32>
    %cst_175 = arith.constant 9.99999997E-7 : f32
    %703 = vector.broadcast %cst_175 : f32 to vector<128x1xf32>
    %704 = arith.addf %702, %703 : vector<128x1xf32>
    %705 = math.rsqrt %704 : vector<128x1xf32>
    %706 = vector.broadcast %705 : vector<128x1xf32> to vector<128x32xf32>
    %707 = arith.mulf %697, %706 : vector<128x32xf32>
    %708 = vector.broadcast %690 : vector<1x32xf32> to vector<128x32xf32>
    %709 = arith.mulf %707, %708 : vector<128x32xf32>
    %710 = vector.broadcast %691 : vector<1x32xf32> to vector<128x32xf32>
    %711 = arith.addf %709, %710 : vector<128x32xf32>
    %712 = arith.truncf %711 : vector<128x32xf32> to vector<128x32xbf16>
    %c0_176 = arith.constant 0 : index
    %c0_177 = arith.constant 0 : index
    %713 = vector.load %arg6[%c0_176, %c0_177] : memref<32x128xbf16, #tpu.memory_space<vmem>>, vector<32x128xbf16>
    %cst_178 = arith.constant dense<0.000000e+00> : vector<128x128xf32>
    %714 = tpu.matmul %712, %713, %cst_178 {dimension_numbers = #tpu.dot_dimension_numbers<[1], [0], [0], [1], [0, 0, 1, 1], [], []>} : vector<128x32xbf16>, vector<32x128xbf16>, vector<128x128xf32> -> vector<128x128xf32>
    %c0_179 = arith.constant 0 : index
    %c0_180 = arith.constant 0 : index
    %715 = vector.load %arg7[%c0_179, %c0_180] : memref<1x128xf32, #tpu.memory_space<vmem>>, vector<1x128xf32>
    %716 = vector.broadcast %715 : vector<1x128xf32> to vector<128x128xf32>
    %717 = arith.addf %714, %716 : vector<128x128xf32>
    %cst_181 = arith.constant 0.000000e+00 : f32
    %718 = vector.broadcast %cst_181 : f32 to vector<128x128xf32>
    %719 = arith.maximumf %717, %718 : vector<128x128xf32>
    %720 = arith.truncf %719 : vector<128x128xf32> to vector<128x128xbf16>
    %c0_182 = arith.constant 0 : index
    %c0_183 = arith.constant 0 : index
    %721 = vector.load %arg8[%c0_182, %c0_183] : memref<128x32xbf16, #tpu.memory_space<vmem>>, vector<128x32xbf16>
    %cst_184 = arith.constant dense<0.000000e+00> : vector<128x32xf32>
    %722 = tpu.matmul %720, %721, %cst_184 {dimension_numbers = #tpu.dot_dimension_numbers<[1], [0], [0], [1], [0, 0, 1, 1], [], []>} : vector<128x128xbf16>, vector<128x32xbf16>, vector<128x32xf32> -> vector<128x32xf32>
    %c0_185 = arith.constant 0 : index
    %c0_186 = arith.constant 0 : index
    %723 = vector.load %arg9[%c0_185, %c0_186] : memref<1x32xf32, #tpu.memory_space<vmem>>, vector<1x32xf32>
    %724 = vector.broadcast %723 : vector<1x32xf32> to vector<128x32xf32>
    %725 = arith.addf %722, %724 : vector<128x32xf32>
    %726 = arith.addf %711, %725 : vector<128x32xf32>
    %c0_187 = arith.constant 0 : index
    %c0_188 = arith.constant 0 : index
    %727 = vector.load %arg10[%c0_187, %c0_188] : memref<1x32xf32, #tpu.memory_space<vmem>>, vector<1x32xf32>
    %c0_189 = arith.constant 0 : index
    %c0_190 = arith.constant 0 : index
    %728 = vector.load %arg11[%c0_189, %c0_190] : memref<1x32xf32, #tpu.memory_space<vmem>>, vector<1x32xf32>
    %cst_191 = arith.constant dense<0.000000e+00> : vector<128xf32>
    %729 = vector.multi_reduction <add>, %726, %cst_191 [1] : vector<128x32xf32> to vector<128xf32>
    %730 = vector.shape_cast %729 : vector<128xf32> to vector<128x1xf32>
    %cst_192 = arith.constant 3.200000e+01 : f32
    %731 = vector.broadcast %cst_192 : f32 to vector<128x1xf32>
    %732 = arith.divf %730, %731 : vector<128x1xf32>
    %733 = vector.broadcast %732 : vector<128x1xf32> to vector<128x32xf32>
    %734 = arith.subf %726, %733 : vector<128x32xf32>
    %735 = arith.mulf %734, %734 : vector<128x32xf32>
    %cst_193 = arith.constant dense<0.000000e+00> : vector<128xf32>
    %736 = vector.multi_reduction <add>, %735, %cst_193 [1] : vector<128x32xf32> to vector<128xf32>
    %737 = vector.shape_cast %736 : vector<128xf32> to vector<128x1xf32>
    %cst_194 = arith.constant 3.200000e+01 : f32
    %738 = vector.broadcast %cst_194 : f32 to vector<128x1xf32>
    %739 = arith.divf %737, %738 : vector<128x1xf32>
    %cst_195 = arith.constant 9.99999997E-7 : f32
    %740 = vector.broadcast %cst_195 : f32 to vector<128x1xf32>
    %741 = arith.addf %739, %740 : vector<128x1xf32>
    %742 = math.rsqrt %741 : vector<128x1xf32>
    %743 = vector.broadcast %742 : vector<128x1xf32> to vector<128x32xf32>
    %744 = arith.mulf %734, %743 : vector<128x32xf32>
    %745 = vector.broadcast %727 : vector<1x32xf32> to vector<128x32xf32>
    %746 = arith.mulf %744, %745 : vector<128x32xf32>
    %747 = vector.broadcast %728 : vector<1x32xf32> to vector<128x32xf32>
    %748 = arith.addf %746, %747 : vector<128x32xf32>
    %749 = vector.shape_cast %748 : vector<128x32xf32> to vector<8x16x32xf32>
    %c0_196 = arith.constant 0 : index
    %c0_197 = arith.constant 0 : index
    %c0_198 = arith.constant 0 : index
    %750 = vector.load %arg12[%c0_196, %c0_197, %c0_198] : memref<8x16x32xf32, #tpu.memory_space<vmem>>, vector<8x16x32xf32>
    tpu.vector_store %arg12[%c0_196, %c0_197, %c0_198], %749 {strides = array<i32>} : memref<8x16x32xf32, #tpu.memory_space<vmem>>, vector<8x16x32xf32>,
    return
  }
  func.func @transform_0(%arg0: i32) -> (i32, i32, i32) {
    %c0_i32 = arith.constant 0 : i32
    %c0_i32_0 = arith.constant 0 : i32
    %c0_i32_1 = arith.constant 0 : i32
    return %arg0, %c0_i32, %c0_i32_0 : i32, i32, i32
  }
  func.func @transform_1(%arg0: i32) -> (i32, i32) {
    %c0_i32 = arith.constant 0 : i32
    %c0_i32_0 = arith.constant 0 : i32
    %c0_i32_1 = arith.constant 0 : i32
    return %c0_i32, %c0_i32_0 : i32, i32
  }
  func.func @transform_2(%arg0: i32) -> (i32, i32) {
    %c0_i32 = arith.constant 0 : i32
    %c0_i32_0 = arith.constant 0 : i32
    %c0_i32_1 = arith.constant 0 : i32
    return %c0_i32, %c0_i32_0 : i32, i32
  }
  func.func @transform_3(%arg0: i32) -> (i32, i32) {
    %c0_i32 = arith.constant 0 : i32
    %c0_i32_0 = arith.constant 0 : i32
    %c0_i32_1 = arith.constant 0 : i32
    return %c0_i32, %c0_i32_0 : i32, i32
  }
  func.func @transform_4(%arg0: i32) -> (i32, i32) {
    %c0_i32 = arith.constant 0 : i32
    %c0_i32_0 = arith.constant 0 : i32
    %c0_i32_1 = arith.constant 0 : i32
    return %c0_i32, %c0_i32_0 : i32, i32
  }
  func.func @transform_5(%arg0: i32) -> (i32, i32) {
    %c0_i32 = arith.constant 0 : i32
    %c0_i32_0 = arith.constant 0 : i32
    %c0_i32_1 = arith.constant 0 : i32
    return %c0_i32, %c0_i32_0 : i32, i32
  }
  func.func @transform_6(%arg0: i32) -> (i32, i32) {
    %c0_i32 = arith.constant 0 : i32
    %c0_i32_0 = arith.constant 0 : i32
    %c0_i32_1 = arith.constant 0 : i32
    return %c0_i32, %c0_i32_0 : i32, i32
  }
  func.func @transform_7(%arg0: i32) -> (i32, i32) {
    %c0_i32 = arith.constant 0 : i32
    %c0_i32_0 = arith.constant 0 : i32
    %c0_i32_1 = arith.constant 0 : i32
    return %c0_i32, %c0_i32_0 : i32, i32
  }
  func.func @transform_8(%arg0: i32) -> (i32, i32) {
    %c0_i32 = arith.constant 0 : i32
    %c0_i32_0 = arith.constant 0 : i32
    %c0_i32_1 = arith.constant 0 : i32
    return %c0_i32, %c0_i32_0 : i32, i32
  }
  func.func @transform_9(%arg0: i32) -> (i32, i32) {
    %c0_i32 = arith.constant 0 : i32
    %c0_i32_0 = arith.constant 0 : i32
    %c0_i32_1 = arith.constant 0 : i32
    return %c0_i32, %c0_i32_0 : i32, i32
  }
  func.func @transform_10(%arg0: i32) -> (i32, i32) {
    %c0_i32 = arith.constant 0 : i32
    %c0_i32_0 = arith.constant 0 : i32
    %c0_i32_1 = arith.constant 0 : i32
    return %c0_i32, %c0_i32_0 : i32, i32
  }
  func.func @transform_11(%arg0: i32) -> (i32, i32, i32) {
    %c0_i32 = arith.constant 0 : i32
    %c0_i32_0 = arith.constant 0 : i32
    %c0_i32_1 = arith.constant 0 : i32
    return %arg0, %c0_i32, %c0_i32_0 : i32, i32, i32
  }
}

module attributes {stable_mosaic.version = 11 : i64} {
  func.func @kernel(%arg0: i32, %arg1: memref<8x8x32xf32, #tpu.memory_space<vmem>>, %arg2: memref<8x8x32xf32, #tpu.memory_space<vmem>>, %arg3: memref<32x32xbf16, #tpu.memory_space<vmem>>, %arg4: memref<1x32xf32, #tpu.memory_space<vmem>>, %arg5: memref<8x8x32xf32, #tpu.memory_space<vmem>>) attributes {dimension_semantics = [#tpu.dimension_semantics<parallel>], iteration_bounds = array<i64: 4>, scalar_prefetch = 0 : i64, scratch_operands = 0 : i64, tpu.core_type = #tpu.core_type<tc>, window_params = [{transform_indices = @transform_0, window_bounds = array<i64: 8, 8, 32>}, {transform_indices = @transform_1, window_bounds = array<i64: 8, 8, 32>}, {pipeline_mode = #tpu.pipeline_mode<synchronous>, transform_indices = @transform_2, window_bounds = array<i64: 32, 32>}, {pipeline_mode = #tpu.pipeline_mode<synchronous>, transform_indices = @transform_3, window_bounds = array<i64: 1, 32>}, {transform_indices = @transform_4, window_bounds = array<i64: 8, 8, 32>}]} {
    %c0 = arith.constant 0 : index
    %c0_0 = arith.constant 0 : index
    %c0_1 = arith.constant 0 : index
    %0 = vector.load %arg1[%c0, %c0_0, %c0_1] : memref<8x8x32xf32, #tpu.memory_space<vmem>>, vector<8x8x32xf32>
    %1 = vector.shape_cast %0 : vector<8x8x32xf32> to vector<64x32xf32>
    %2 = arith.truncf %1 : vector<64x32xf32> to vector<64x32xbf16>
    %c0_2 = arith.constant 0 : index
    %c0_3 = arith.constant 0 : index
    %3 = vector.load %arg3[%c0_2, %c0_3] : memref<32x32xbf16, #tpu.memory_space<vmem>>, vector<32x32xbf16>
    %cst = arith.constant dense<0.000000e+00> : vector<64x32xf32>
    %4 = tpu.matmul %2, %3, %cst {dimension_numbers = #tpu.dot_dimension_numbers<[1], [0], [0], [1], [0, 0, 1, 1], [], []>} : vector<64x32xbf16>, vector<32x32xbf16>, vector<64x32xf32> -> vector<64x32xf32>
    %c0_4 = arith.constant 0 : index
    %c0_5 = arith.constant 0 : index
    %5 = vector.load %arg4[%c0_4, %c0_5] : memref<1x32xf32, #tpu.memory_space<vmem>>, vector<1x32xf32>
    %6 = vector.broadcast %5 : vector<1x32xf32> to vector<64x32xf32>
    %7 = arith.addf %4, %6 : vector<64x32xf32>
    %8 = vector.shape_cast %7 : vector<64x32xf32> to vector<8x8x32xf32>
    %cst_6 = arith.constant dense<0.000000e+00> : vector<8x8xf32>
    %9 = vector.multi_reduction <add>, %8, %cst_6 [2] : vector<8x8x32xf32> to vector<8x8xf32>
    %10 = vector.shape_cast %9 : vector<8x8xf32> to vector<8x8x1xf32>
    %cst_7 = arith.constant dense<0.000000e+00> : vector<8x1xf32>
    %11 = vector.multi_reduction <add>, %10, %cst_7 [1] : vector<8x8x1xf32> to vector<8x1xf32>
    %12 = vector.shape_cast %11 : vector<8x1xf32> to vector<8x1x1xf32>
    %cst_8 = arith.constant 3.906250e-03 : f32
    %13 = vector.broadcast %cst_8 : f32 to vector<8x1x1xf32>
    %14 = arith.mulf %12, %13 : vector<8x1x1xf32>
    %15 = vector.broadcast %14 : vector<8x1x1xf32> to vector<8x8x32xf32>
    %16 = arith.subf %8, %15 : vector<8x8x32xf32>
    %17 = arith.mulf %16, %16 : vector<8x8x32xf32>
    %cst_9 = arith.constant dense<0.000000e+00> : vector<8x8xf32>
    %18 = vector.multi_reduction <add>, %17, %cst_9 [2] : vector<8x8x32xf32> to vector<8x8xf32>
    %19 = vector.shape_cast %18 : vector<8x8xf32> to vector<8x8x1xf32>
    %cst_10 = arith.constant dense<0.000000e+00> : vector<8x1xf32>
    %20 = vector.multi_reduction <add>, %19, %cst_10 [1] : vector<8x8x1xf32> to vector<8x1xf32>
    %21 = vector.shape_cast %20 : vector<8x1xf32> to vector<8x1x1xf32>
    %cst_11 = arith.constant 3.906250e-03 : f32
    %22 = vector.broadcast %cst_11 : f32 to vector<8x1x1xf32>
    %23 = arith.mulf %21, %22 : vector<8x1x1xf32>
    %c0_12 = arith.constant 0 : index
    %c0_13 = arith.constant 0 : index
    %c0_14 = arith.constant 0 : index
    %24 = vector.load %arg2[%c0_12, %c0_13, %c0_14] : memref<8x8x32xf32, #tpu.memory_space<vmem>>, vector<8x8x32xf32>
    %cst_15 = arith.constant 9.99999993E-9 : f32
    %25 = vector.broadcast %cst_15 : f32 to vector<8x1x1xf32>
    %26 = arith.addf %23, %25 : vector<8x1x1xf32>
    %27 = math.rsqrt %26 : vector<8x1x1xf32>
    %28 = vector.broadcast %27 : vector<8x1x1xf32> to vector<8x8x32xf32>
    %29 = arith.mulf %16, %28 : vector<8x8x32xf32>
    %30 = arith.addf %24, %29 : vector<8x8x32xf32>
    %c0_16 = arith.constant 0 : index
    %c0_17 = arith.constant 0 : index
    %c0_18 = arith.constant 0 : index
    %31 = vector.load %arg5[%c0_16, %c0_17, %c0_18] : memref<8x8x32xf32, #tpu.memory_space<vmem>>, vector<8x8x32xf32>
    tpu.vector_store %arg5[%c0_16, %c0_17, %c0_18], %30 {strides = array<i32>} : memref<8x8x32xf32, #tpu.memory_space<vmem>>, vector<8x8x32xf32>,
    return
  }
  func.func @transform_0(%arg0: i32) -> (i32, i32, i32) {
    %c0_i32 = arith.constant 0 : i32
    %c0_i32_0 = arith.constant 0 : i32
    %c0_i32_1 = arith.constant 0 : i32
    return %arg0, %c0_i32, %c0_i32_0 : i32, i32, i32
  }
  func.func @transform_1(%arg0: i32) -> (i32, i32, i32) {
    %c0_i32 = arith.constant 0 : i32
    %c0_i32_0 = arith.constant 0 : i32
    %c0_i32_1 = arith.constant 0 : i32
    return %arg0, %c0_i32, %c0_i32_0 : i32, i32, i32
  }
  func.func @transform_2(%arg0: i32) -> (i32, i32) {
    %c0_i32 = arith.constant 0 : i32
    %c0_i32_0 = arith.constant 0 : i32
    %c0_i32_1 = arith.constant 0 : i32
    return %c0_i32, %c0_i32_0 : i32, i32
  }
  func.func @transform_3(%arg0: i32) -> (i32, i32) {
    %c0_i32 = arith.constant 0 : i32
    %c0_i32_0 = arith.constant 0 : i32
    %c0_i32_1 = arith.constant 0 : i32
    return %c0_i32, %c0_i32_0 : i32, i32
  }
  func.func @transform_4(%arg0: i32) -> (i32, i32, i32) {
    %c0_i32 = arith.constant 0 : i32
    %c0_i32_0 = arith.constant 0 : i32
    %c0_i32_1 = arith.constant 0 : i32
    return %arg0, %c0_i32, %c0_i32_0 : i32, i32, i32
  }
}

module attributes {stable_mosaic.version = 11 : i64} {
  func.func @kernel(%arg0: i32, %arg1: memref<8x16x32xf32, #tpu.memory_space<vmem>>, %arg2: memref<32x128xbf16, #tpu.memory_space<vmem>>, %arg3: memref<32x128xbf16, #tpu.memory_space<vmem>>, %arg4: memref<1x128xf32, #tpu.memory_space<vmem>>, %arg5: memref<32x32xbf16, #tpu.memory_space<vmem>>, %arg6: memref<1x32xf32, #tpu.memory_space<vmem>>, %arg7: memref<8x16x32xf32, #tpu.memory_space<vmem>>) attributes {dimension_semantics = [#tpu.dimension_semantics<parallel>], iteration_bounds = array<i64: 2>, scalar_prefetch = 0 : i64, scratch_operands = 0 : i64, tpu.core_type = #tpu.core_type<tc>, window_params = [{transform_indices = @transform_0, window_bounds = array<i64: 8, 16, 32>}, {pipeline_mode = #tpu.pipeline_mode<synchronous>, transform_indices = @transform_1, window_bounds = array<i64: 32, 128>}, {pipeline_mode = #tpu.pipeline_mode<synchronous>, transform_indices = @transform_2, window_bounds = array<i64: 32, 128>}, {pipeline_mode = #tpu.pipeline_mode<synchronous>, transform_indices = @transform_3, window_bounds = array<i64: 1, 128>}, {pipeline_mode = #tpu.pipeline_mode<synchronous>, transform_indices = @transform_4, window_bounds = array<i64: 32, 32>}, {pipeline_mode = #tpu.pipeline_mode<synchronous>, transform_indices = @transform_5, window_bounds = array<i64: 1, 32>}, {transform_indices = @transform_6, window_bounds = array<i64: 8, 16, 32>}]} {
    %c0 = arith.constant 0 : index
    %c0_0 = arith.constant 0 : index
    %c0_1 = arith.constant 0 : index
    %0 = vector.load %arg1[%c0, %c0_0, %c0_1] : memref<8x16x32xf32, #tpu.memory_space<vmem>>, vector<8x16x32xf32>
    %1 = vector.shape_cast %0 : vector<8x16x32xf32> to vector<128x32xf32>
    %2 = arith.truncf %1 : vector<128x32xf32> to vector<128x32xbf16>
    %c0_2 = arith.constant 0 : index
    %c0_3 = arith.constant 0 : index
    %3 = vector.load %arg2[%c0_2, %c0_3] : memref<32x128xbf16, #tpu.memory_space<vmem>>, vector<32x128xbf16>
    %cst = arith.constant dense<0.000000e+00> : vector<128x128xf32>
    %4 = tpu.matmul %2, %3, %cst {dimension_numbers = #tpu.dot_dimension_numbers<[1], [0], [0], [1], [0, 0, 1, 1], [], []>} : vector<128x32xbf16>, vector<32x128xbf16>, vector<128x128xf32> -> vector<128x128xf32>
    %c0_4 = arith.constant 0 : index
    %c0_5 = arith.constant 0 : index
    %5 = vector.load %arg4[%c0_4, %c0_5] : memref<1x128xf32, #tpu.memory_space<vmem>>, vector<1x128xf32>
    %6 = vector.broadcast %5 : vector<1x128xf32> to vector<128x128xf32>
    %7 = arith.addf %4, %6 : vector<128x128xf32>
    %cst_6 = arith.constant 0.000000e+00 : f32
    %8 = vector.broadcast %cst_6 : f32 to vector<16x32xf32>
    %cst_7 = arith.constant 0.000000e+00 : f32
    %9 = vector.broadcast %cst_7 : f32 to vector<16x32xf32>
    %10 = vector.extract_strided_slice %7 {offsets = [0, 0], sizes = [16, 128], strides = [1, 1]} : vector<128x128xf32> to vector<16x128xf32>
    %11 = arith.truncf %8 : vector<16x32xf32> to vector<16x32xbf16>
    %c0_8 = arith.constant 0 : index
    %c0_9 = arith.constant 0 : index
    %12 = vector.load %arg3[%c0_8, %c0_9] : memref<32x128xbf16, #tpu.memory_space<vmem>>, vector<32x128xbf16>
    %cst_10 = arith.constant dense<0.000000e+00> : vector<16x128xf32>
    %13 = tpu.matmul %11, %12, %cst_10 {dimension_numbers = #tpu.dot_dimension_numbers<[1], [0], [0], [1], [0, 0, 1, 1], [], []>} : vector<16x32xbf16>, vector<32x128xbf16>, vector<16x128xf32> -> vector<16x128xf32>
    %14 = arith.addf %10, %13 : vector<16x128xf32>
    %15 = vector.extract_strided_slice %14 {offsets = [0, 0], sizes = [16, 32], strides = [1, 1]} : vector<16x128xf32> to vector<16x32xf32>
    %cst_11 = arith.constant 0.000000e+00 : f32
    %16 = vector.broadcast %cst_11 : f32 to vector<16x32xf32>
    %17 = arith.subf %16, %15 : vector<16x32xf32>
    %18 = math.exp %17 : vector<16x32xf32>
    %cst_12 = arith.constant 1.000000e+00 : f32
    %19 = vector.broadcast %cst_12 : f32 to vector<16x32xf32>
    %20 = arith.addf %19, %18 : vector<16x32xf32>
    %cst_13 = arith.constant 1.000000e+00 : f32
    %21 = vector.broadcast %cst_13 : f32 to vector<16x32xf32>
    %22 = arith.divf %21, %20 : vector<16x32xf32>
    %23 = vector.extract_strided_slice %14 {offsets = [0, 32], sizes = [16, 32], strides = [1, 1]} : vector<16x128xf32> to vector<16x32xf32>
    %cst_14 = arith.constant 0.000000e+00 : f32
    %24 = vector.broadcast %cst_14 : f32 to vector<16x32xf32>
    %25 = arith.subf %24, %23 : vector<16x32xf32>
    %26 = math.exp %25 : vector<16x32xf32>
    %cst_15 = arith.constant 1.000000e+00 : f32
    %27 = vector.broadcast %cst_15 : f32 to vector<16x32xf32>
    %28 = arith.addf %27, %26 : vector<16x32xf32>
    %cst_16 = arith.constant 1.000000e+00 : f32
    %29 = vector.broadcast %cst_16 : f32 to vector<16x32xf32>
    %30 = arith.divf %29, %28 : vector<16x32xf32>
    %31 = vector.extract_strided_slice %14 {offsets = [0, 64], sizes = [16, 32], strides = [1, 1]} : vector<16x128xf32> to vector<16x32xf32>
    %32 = math.tanh %31 : vector<16x32xf32>
    %33 = vector.extract_strided_slice %14 {offsets = [0, 96], sizes = [16, 32], strides = [1, 1]} : vector<16x128xf32> to vector<16x32xf32>
    %cst_17 = arith.constant 0.000000e+00 : f32
    %34 = vector.broadcast %cst_17 : f32 to vector<16x32xf32>
    %35 = arith.subf %34, %33 : vector<16x32xf32>
    %36 = math.exp %35 : vector<16x32xf32>
    %cst_18 = arith.constant 1.000000e+00 : f32
    %37 = vector.broadcast %cst_18 : f32 to vector<16x32xf32>
    %38 = arith.addf %37, %36 : vector<16x32xf32>
    %cst_19 = arith.constant 1.000000e+00 : f32
    %39 = vector.broadcast %cst_19 : f32 to vector<16x32xf32>
    %40 = arith.divf %39, %38 : vector<16x32xf32>
    %41 = arith.mulf %30, %9 : vector<16x32xf32>
    %42 = arith.mulf %22, %32 : vector<16x32xf32>
    %43 = arith.addf %41, %42 : vector<16x32xf32>
    %44 = math.tanh %43 : vector<16x32xf32>
    %45 = arith.mulf %40, %44 : vector<16x32xf32>
    %46 = arith.truncf %45 : vector<16x32xf32> to vector<16x32xbf16>
    %c0_20 = arith.constant 0 : index
    %c0_21 = arith.constant 0 : index
    %47 = vector.load %arg5[%c0_20, %c0_21] : memref<32x32xbf16, #tpu.memory_space<vmem>>, vector<32x32xbf16>
    %cst_22 = arith.constant dense<0.000000e+00> : vector<16x32xf32>
    %48 = tpu.matmul %46, %47, %cst_22 {dimension_numbers = #tpu.dot_dimension_numbers<[1], [0], [0], [1], [0, 0, 1, 1], [], []>} : vector<16x32xbf16>, vector<32x32xbf16>, vector<16x32xf32> -> vector<16x32xf32>
    %c0_23 = arith.constant 0 : index
    %c0_24 = arith.constant 0 : index
    %49 = vector.load %arg6[%c0_23, %c0_24] : memref<1x32xf32, #tpu.memory_space<vmem>>, vector<1x32xf32>
    %50 = vector.broadcast %49 : vector<1x32xf32> to vector<16x32xf32>
    %51 = arith.addf %48, %50 : vector<16x32xf32>
    %c0_25 = arith.constant 0 : index
    %c0_26 = arith.constant 0 : index
    %c0_27 = arith.constant 0 : index
    %52 = vector.load %arg7[%c0_25, %c0_26, %c0_27] : memref<8x16x32xf32, #tpu.memory_space<vmem>>, vector<1x16x32xf32>
    %53 = vector.shape_cast %52 : vector<1x16x32xf32> to vector<16x32xf32>
    %54 = vector.shape_cast %51 : vector<16x32xf32> to vector<1x16x32xf32>
    tpu.vector_store %arg7[%c0_25, %c0_26, %c0_27], %54 {strides = array<i32>} : memref<8x16x32xf32, #tpu.memory_space<vmem>>, vector<1x16x32xf32>,
    %55 = vector.extract_strided_slice %7 {offsets = [16, 0], sizes = [16, 128], strides = [1, 1]} : vector<128x128xf32> to vector<16x128xf32>
    %56 = arith.truncf %45 : vector<16x32xf32> to vector<16x32xbf16>
    %c0_28 = arith.constant 0 : index
    %c0_29 = arith.constant 0 : index
    %57 = vector.load %arg3[%c0_28, %c0_29] : memref<32x128xbf16, #tpu.memory_space<vmem>>, vector<32x128xbf16>
    %cst_30 = arith.constant dense<0.000000e+00> : vector<16x128xf32>
    %58 = tpu.matmul %56, %57, %cst_30 {dimension_numbers = #tpu.dot_dimension_numbers<[1], [0], [0], [1], [0, 0, 1, 1], [], []>} : vector<16x32xbf16>, vector<32x128xbf16>, vector<16x128xf32> -> vector<16x128xf32>
    %59 = arith.addf %55, %58 : vector<16x128xf32>
    %60 = vector.extract_strided_slice %59 {offsets = [0, 0], sizes = [16, 32], strides = [1, 1]} : vector<16x128xf32> to vector<16x32xf32>
    %cst_31 = arith.constant 0.000000e+00 : f32
    %61 = vector.broadcast %cst_31 : f32 to vector<16x32xf32>
    %62 = arith.subf %61, %60 : vector<16x32xf32>
    %63 = math.exp %62 : vector<16x32xf32>
    %cst_32 = arith.constant 1.000000e+00 : f32
    %64 = vector.broadcast %cst_32 : f32 to vector<16x32xf32>
    %65 = arith.addf %64, %63 : vector<16x32xf32>
    %cst_33 = arith.constant 1.000000e+00 : f32
    %66 = vector.broadcast %cst_33 : f32 to vector<16x32xf32>
    %67 = arith.divf %66, %65 : vector<16x32xf32>
    %68 = vector.extract_strided_slice %59 {offsets = [0, 32], sizes = [16, 32], strides = [1, 1]} : vector<16x128xf32> to vector<16x32xf32>
    %cst_34 = arith.constant 0.000000e+00 : f32
    %69 = vector.broadcast %cst_34 : f32 to vector<16x32xf32>
    %70 = arith.subf %69, %68 : vector<16x32xf32>
    %71 = math.exp %70 : vector<16x32xf32>
    %cst_35 = arith.constant 1.000000e+00 : f32
    %72 = vector.broadcast %cst_35 : f32 to vector<16x32xf32>
    %73 = arith.addf %72, %71 : vector<16x32xf32>
    %cst_36 = arith.constant 1.000000e+00 : f32
    %74 = vector.broadcast %cst_36 : f32 to vector<16x32xf32>
    %75 = arith.divf %74, %73 : vector<16x32xf32>
    %76 = vector.extract_strided_slice %59 {offsets = [0, 64], sizes = [16, 32], strides = [1, 1]} : vector<16x128xf32> to vector<16x32xf32>
    %77 = math.tanh %76 : vector<16x32xf32>
    %78 = vector.extract_strided_slice %59 {offsets = [0, 96], sizes = [16, 32], strides = [1, 1]} : vector<16x128xf32> to vector<16x32xf32>
    %cst_37 = arith.constant 0.000000e+00 : f32
    %79 = vector.broadcast %cst_37 : f32 to vector<16x32xf32>
    %80 = arith.subf %79, %78 : vector<16x32xf32>
    %81 = math.exp %80 : vector<16x32xf32>
    %cst_38 = arith.constant 1.000000e+00 : f32
    %82 = vector.broadcast %cst_38 : f32 to vector<16x32xf32>
    %83 = arith.addf %82, %81 : vector<16x32xf32>
    %cst_39 = arith.constant 1.000000e+00 : f32
    %84 = vector.broadcast %cst_39 : f32 to vector<16x32xf32>
    %85 = arith.divf %84, %83 : vector<16x32xf32>
    %86 = arith.mulf %75, %43 : vector<16x32xf32>
    %87 = arith.mulf %67, %77 : vector<16x32xf32>
    %88 = arith.addf %86, %87 : vector<16x32xf32>
    %89 = math.tanh %88 : vector<16x32xf32>
    %90 = arith.mulf %85, %89 : vector<16x32xf32>
    %91 = arith.truncf %90 : vector<16x32xf32> to vector<16x32xbf16>
    %c0_40 = arith.constant 0 : index
    %c0_41 = arith.constant 0 : index
    %92 = vector.load %arg5[%c0_40, %c0_41] : memref<32x32xbf16, #tpu.memory_space<vmem>>, vector<32x32xbf16>
    %cst_42 = arith.constant dense<0.000000e+00> : vector<16x32xf32>
    %93 = tpu.matmul %91, %92, %cst_42 {dimension_numbers = #tpu.dot_dimension_numbers<[1], [0], [0], [1], [0, 0, 1, 1], [], []>} : vector<16x32xbf16>, vector<32x32xbf16>, vector<16x32xf32> -> vector<16x32xf32>
    %c0_43 = arith.constant 0 : index
    %c0_44 = arith.constant 0 : index
    %94 = vector.load %arg6[%c0_43, %c0_44] : memref<1x32xf32, #tpu.memory_space<vmem>>, vector<1x32xf32>
    %95 = vector.broadcast %94 : vector<1x32xf32> to vector<16x32xf32>
    %96 = arith.addf %93, %95 : vector<16x32xf32>
    %c1 = arith.constant 1 : index
    %c0_45 = arith.constant 0 : index
    %c0_46 = arith.constant 0 : index
    %97 = vector.load %arg7[%c1, %c0_45, %c0_46] : memref<8x16x32xf32, #tpu.memory_space<vmem>>, vector<1x16x32xf32>
    %98 = vector.shape_cast %97 : vector<1x16x32xf32> to vector<16x32xf32>
    %99 = vector.shape_cast %96 : vector<16x32xf32> to vector<1x16x32xf32>
    tpu.vector_store %arg7[%c1, %c0_45, %c0_46], %99 {strides = array<i32>} : memref<8x16x32xf32, #tpu.memory_space<vmem>>, vector<1x16x32xf32>,
    %100 = vector.extract_strided_slice %7 {offsets = [32, 0], sizes = [16, 128], strides = [1, 1]} : vector<128x128xf32> to vector<16x128xf32>
    %101 = arith.truncf %90 : vector<16x32xf32> to vector<16x32xbf16>
    %c0_47 = arith.constant 0 : index
    %c0_48 = arith.constant 0 : index
    %102 = vector.load %arg3[%c0_47, %c0_48] : memref<32x128xbf16, #tpu.memory_space<vmem>>, vector<32x128xbf16>
    %cst_49 = arith.constant dense<0.000000e+00> : vector<16x128xf32>
    %103 = tpu.matmul %101, %102, %cst_49 {dimension_numbers = #tpu.dot_dimension_numbers<[1], [0], [0], [1], [0, 0, 1, 1], [], []>} : vector<16x32xbf16>, vector<32x128xbf16>, vector<16x128xf32> -> vector<16x128xf32>
    %104 = arith.addf %100, %103 : vector<16x128xf32>
    %105 = vector.extract_strided_slice %104 {offsets = [0, 0], sizes = [16, 32], strides = [1, 1]} : vector<16x128xf32> to vector<16x32xf32>
    %cst_50 = arith.constant 0.000000e+00 : f32
    %106 = vector.broadcast %cst_50 : f32 to vector<16x32xf32>
    %107 = arith.subf %106, %105 : vector<16x32xf32>
    %108 = math.exp %107 : vector<16x32xf32>
    %cst_51 = arith.constant 1.000000e+00 : f32
    %109 = vector.broadcast %cst_51 : f32 to vector<16x32xf32>
    %110 = arith.addf %109, %108 : vector<16x32xf32>
    %cst_52 = arith.constant 1.000000e+00 : f32
    %111 = vector.broadcast %cst_52 : f32 to vector<16x32xf32>
    %112 = arith.divf %111, %110 : vector<16x32xf32>
    %113 = vector.extract_strided_slice %104 {offsets = [0, 32], sizes = [16, 32], strides = [1, 1]} : vector<16x128xf32> to vector<16x32xf32>
    %cst_53 = arith.constant 0.000000e+00 : f32
    %114 = vector.broadcast %cst_53 : f32 to vector<16x32xf32>
    %115 = arith.subf %114, %113 : vector<16x32xf32>
    %116 = math.exp %115 : vector<16x32xf32>
    %cst_54 = arith.constant 1.000000e+00 : f32
    %117 = vector.broadcast %cst_54 : f32 to vector<16x32xf32>
    %118 = arith.addf %117, %116 : vector<16x32xf32>
    %cst_55 = arith.constant 1.000000e+00 : f32
    %119 = vector.broadcast %cst_55 : f32 to vector<16x32xf32>
    %120 = arith.divf %119, %118 : vector<16x32xf32>
    %121 = vector.extract_strided_slice %104 {offsets = [0, 64], sizes = [16, 32], strides = [1, 1]} : vector<16x128xf32> to vector<16x32xf32>
    %122 = math.tanh %121 : vector<16x32xf32>
    %123 = vector.extract_strided_slice %104 {offsets = [0, 96], sizes = [16, 32], strides = [1, 1]} : vector<16x128xf32> to vector<16x32xf32>
    %cst_56 = arith.constant 0.000000e+00 : f32
    %124 = vector.broadcast %cst_56 : f32 to vector<16x32xf32>
    %125 = arith.subf %124, %123 : vector<16x32xf32>
    %126 = math.exp %125 : vector<16x32xf32>
    %cst_57 = arith.constant 1.000000e+00 : f32
    %127 = vector.broadcast %cst_57 : f32 to vector<16x32xf32>
    %128 = arith.addf %127, %126 : vector<16x32xf32>
    %cst_58 = arith.constant 1.000000e+00 : f32
    %129 = vector.broadcast %cst_58 : f32 to vector<16x32xf32>
    %130 = arith.divf %129, %128 : vector<16x32xf32>
    %131 = arith.mulf %120, %88 : vector<16x32xf32>
    %132 = arith.mulf %112, %122 : vector<16x32xf32>
    %133 = arith.addf %131, %132 : vector<16x32xf32>
    %134 = math.tanh %133 : vector<16x32xf32>
    %135 = arith.mulf %130, %134 : vector<16x32xf32>
    %136 = arith.truncf %135 : vector<16x32xf32> to vector<16x32xbf16>
    %c0_59 = arith.constant 0 : index
    %c0_60 = arith.constant 0 : index
    %137 = vector.load %arg5[%c0_59, %c0_60] : memref<32x32xbf16, #tpu.memory_space<vmem>>, vector<32x32xbf16>
    %cst_61 = arith.constant dense<0.000000e+00> : vector<16x32xf32>
    %138 = tpu.matmul %136, %137, %cst_61 {dimension_numbers = #tpu.dot_dimension_numbers<[1], [0], [0], [1], [0, 0, 1, 1], [], []>} : vector<16x32xbf16>, vector<32x32xbf16>, vector<16x32xf32> -> vector<16x32xf32>
    %c0_62 = arith.constant 0 : index
    %c0_63 = arith.constant 0 : index
    %139 = vector.load %arg6[%c0_62, %c0_63] : memref<1x32xf32, #tpu.memory_space<vmem>>, vector<1x32xf32>
    %140 = vector.broadcast %139 : vector<1x32xf32> to vector<16x32xf32>
    %141 = arith.addf %138, %140 : vector<16x32xf32>
    %c2 = arith.constant 2 : index
    %c0_64 = arith.constant 0 : index
    %c0_65 = arith.constant 0 : index
    %142 = vector.load %arg7[%c2, %c0_64, %c0_65] : memref<8x16x32xf32, #tpu.memory_space<vmem>>, vector<1x16x32xf32>
    %143 = vector.shape_cast %142 : vector<1x16x32xf32> to vector<16x32xf32>
    %144 = vector.shape_cast %141 : vector<16x32xf32> to vector<1x16x32xf32>
    tpu.vector_store %arg7[%c2, %c0_64, %c0_65], %144 {strides = array<i32>} : memref<8x16x32xf32, #tpu.memory_space<vmem>>, vector<1x16x32xf32>,
    %145 = vector.extract_strided_slice %7 {offsets = [48, 0], sizes = [16, 128], strides = [1, 1]} : vector<128x128xf32> to vector<16x128xf32>
    %146 = arith.truncf %135 : vector<16x32xf32> to vector<16x32xbf16>
    %c0_66 = arith.constant 0 : index
    %c0_67 = arith.constant 0 : index
    %147 = vector.load %arg3[%c0_66, %c0_67] : memref<32x128xbf16, #tpu.memory_space<vmem>>, vector<32x128xbf16>
    %cst_68 = arith.constant dense<0.000000e+00> : vector<16x128xf32>
    %148 = tpu.matmul %146, %147, %cst_68 {dimension_numbers = #tpu.dot_dimension_numbers<[1], [0], [0], [1], [0, 0, 1, 1], [], []>} : vector<16x32xbf16>, vector<32x128xbf16>, vector<16x128xf32> -> vector<16x128xf32>
    %149 = arith.addf %145, %148 : vector<16x128xf32>
    %150 = vector.extract_strided_slice %149 {offsets = [0, 0], sizes = [16, 32], strides = [1, 1]} : vector<16x128xf32> to vector<16x32xf32>
    %cst_69 = arith.constant 0.000000e+00 : f32
    %151 = vector.broadcast %cst_69 : f32 to vector<16x32xf32>
    %152 = arith.subf %151, %150 : vector<16x32xf32>
    %153 = math.exp %152 : vector<16x32xf32>
    %cst_70 = arith.constant 1.000000e+00 : f32
    %154 = vector.broadcast %cst_70 : f32 to vector<16x32xf32>
    %155 = arith.addf %154, %153 : vector<16x32xf32>
    %cst_71 = arith.constant 1.000000e+00 : f32
    %156 = vector.broadcast %cst_71 : f32 to vector<16x32xf32>
    %157 = arith.divf %156, %155 : vector<16x32xf32>
    %158 = vector.extract_strided_slice %149 {offsets = [0, 32], sizes = [16, 32], strides = [1, 1]} : vector<16x128xf32> to vector<16x32xf32>
    %cst_72 = arith.constant 0.000000e+00 : f32
    %159 = vector.broadcast %cst_72 : f32 to vector<16x32xf32>
    %160 = arith.subf %159, %158 : vector<16x32xf32>
    %161 = math.exp %160 : vector<16x32xf32>
    %cst_73 = arith.constant 1.000000e+00 : f32
    %162 = vector.broadcast %cst_73 : f32 to vector<16x32xf32>
    %163 = arith.addf %162, %161 : vector<16x32xf32>
    %cst_74 = arith.constant 1.000000e+00 : f32
    %164 = vector.broadcast %cst_74 : f32 to vector<16x32xf32>
    %165 = arith.divf %164, %163 : vector<16x32xf32>
    %166 = vector.extract_strided_slice %149 {offsets = [0, 64], sizes = [16, 32], strides = [1, 1]} : vector<16x128xf32> to vector<16x32xf32>
    %167 = math.tanh %166 : vector<16x32xf32>
    %168 = vector.extract_strided_slice %149 {offsets = [0, 96], sizes = [16, 32], strides = [1, 1]} : vector<16x128xf32> to vector<16x32xf32>
    %cst_75 = arith.constant 0.000000e+00 : f32
    %169 = vector.broadcast %cst_75 : f32 to vector<16x32xf32>
    %170 = arith.subf %169, %168 : vector<16x32xf32>
    %171 = math.exp %170 : vector<16x32xf32>
    %cst_76 = arith.constant 1.000000e+00 : f32
    %172 = vector.broadcast %cst_76 : f32 to vector<16x32xf32>
    %173 = arith.addf %172, %171 : vector<16x32xf32>
    %cst_77 = arith.constant 1.000000e+00 : f32
    %174 = vector.broadcast %cst_77 : f32 to vector<16x32xf32>
    %175 = arith.divf %174, %173 : vector<16x32xf32>
    %176 = arith.mulf %165, %133 : vector<16x32xf32>
    %177 = arith.mulf %157, %167 : vector<16x32xf32>
    %178 = arith.addf %176, %177 : vector<16x32xf32>
    %179 = math.tanh %178 : vector<16x32xf32>
    %180 = arith.mulf %175, %179 : vector<16x32xf32>
    %181 = arith.truncf %180 : vector<16x32xf32> to vector<16x32xbf16>
    %c0_78 = arith.constant 0 : index
    %c0_79 = arith.constant 0 : index
    %182 = vector.load %arg5[%c0_78, %c0_79] : memref<32x32xbf16, #tpu.memory_space<vmem>>, vector<32x32xbf16>
    %cst_80 = arith.constant dense<0.000000e+00> : vector<16x32xf32>
    %183 = tpu.matmul %181, %182, %cst_80 {dimension_numbers = #tpu.dot_dimension_numbers<[1], [0], [0], [1], [0, 0, 1, 1], [], []>} : vector<16x32xbf16>, vector<32x32xbf16>, vector<16x32xf32> -> vector<16x32xf32>
    %c0_81 = arith.constant 0 : index
    %c0_82 = arith.constant 0 : index
    %184 = vector.load %arg6[%c0_81, %c0_82] : memref<1x32xf32, #tpu.memory_space<vmem>>, vector<1x32xf32>
    %185 = vector.broadcast %184 : vector<1x32xf32> to vector<16x32xf32>
    %186 = arith.addf %183, %185 : vector<16x32xf32>
    %c3 = arith.constant 3 : index
    %c0_83 = arith.constant 0 : index
    %c0_84 = arith.constant 0 : index
    %187 = vector.load %arg7[%c3, %c0_83, %c0_84] : memref<8x16x32xf32, #tpu.memory_space<vmem>>, vector<1x16x32xf32>
    %188 = vector.shape_cast %187 : vector<1x16x32xf32> to vector<16x32xf32>
    %189 = vector.shape_cast %186 : vector<16x32xf32> to vector<1x16x32xf32>
    tpu.vector_store %arg7[%c3, %c0_83, %c0_84], %189 {strides = array<i32>} : memref<8x16x32xf32, #tpu.memory_space<vmem>>, vector<1x16x32xf32>,
    %190 = vector.extract_strided_slice %7 {offsets = [64, 0], sizes = [16, 128], strides = [1, 1]} : vector<128x128xf32> to vector<16x128xf32>
    %191 = arith.truncf %180 : vector<16x32xf32> to vector<16x32xbf16>
    %c0_85 = arith.constant 0 : index
    %c0_86 = arith.constant 0 : index
    %192 = vector.load %arg3[%c0_85, %c0_86] : memref<32x128xbf16, #tpu.memory_space<vmem>>, vector<32x128xbf16>
    %cst_87 = arith.constant dense<0.000000e+00> : vector<16x128xf32>
    %193 = tpu.matmul %191, %192, %cst_87 {dimension_numbers = #tpu.dot_dimension_numbers<[1], [0], [0], [1], [0, 0, 1, 1], [], []>} : vector<16x32xbf16>, vector<32x128xbf16>, vector<16x128xf32> -> vector<16x128xf32>
    %194 = arith.addf %190, %193 : vector<16x128xf32>
    %195 = vector.extract_strided_slice %194 {offsets = [0, 0], sizes = [16, 32], strides = [1, 1]} : vector<16x128xf32> to vector<16x32xf32>
    %cst_88 = arith.constant 0.000000e+00 : f32
    %196 = vector.broadcast %cst_88 : f32 to vector<16x32xf32>
    %197 = arith.subf %196, %195 : vector<16x32xf32>
    %198 = math.exp %197 : vector<16x32xf32>
    %cst_89 = arith.constant 1.000000e+00 : f32
    %199 = vector.broadcast %cst_89 : f32 to vector<16x32xf32>
    %200 = arith.addf %199, %198 : vector<16x32xf32>
    %cst_90 = arith.constant 1.000000e+00 : f32
    %201 = vector.broadcast %cst_90 : f32 to vector<16x32xf32>
    %202 = arith.divf %201, %200 : vector<16x32xf32>
    %203 = vector.extract_strided_slice %194 {offsets = [0, 32], sizes = [16, 32], strides = [1, 1]} : vector<16x128xf32> to vector<16x32xf32>
    %cst_91 = arith.constant 0.000000e+00 : f32
    %204 = vector.broadcast %cst_91 : f32 to vector<16x32xf32>
    %205 = arith.subf %204, %203 : vector<16x32xf32>
    %206 = math.exp %205 : vector<16x32xf32>
    %cst_92 = arith.constant 1.000000e+00 : f32
    %207 = vector.broadcast %cst_92 : f32 to vector<16x32xf32>
    %208 = arith.addf %207, %206 : vector<16x32xf32>
    %cst_93 = arith.constant 1.000000e+00 : f32
    %209 = vector.broadcast %cst_93 : f32 to vector<16x32xf32>
    %210 = arith.divf %209, %208 : vector<16x32xf32>
    %211 = vector.extract_strided_slice %194 {offsets = [0, 64], sizes = [16, 32], strides = [1, 1]} : vector<16x128xf32> to vector<16x32xf32>
    %212 = math.tanh %211 : vector<16x32xf32>
    %213 = vector.extract_strided_slice %194 {offsets = [0, 96], sizes = [16, 32], strides = [1, 1]} : vector<16x128xf32> to vector<16x32xf32>
    %cst_94 = arith.constant 0.000000e+00 : f32
    %214 = vector.broadcast %cst_94 : f32 to vector<16x32xf32>
    %215 = arith.subf %214, %213 : vector<16x32xf32>
    %216 = math.exp %215 : vector<16x32xf32>
    %cst_95 = arith.constant 1.000000e+00 : f32
    %217 = vector.broadcast %cst_95 : f32 to vector<16x32xf32>
    %218 = arith.addf %217, %216 : vector<16x32xf32>
    %cst_96 = arith.constant 1.000000e+00 : f32
    %219 = vector.broadcast %cst_96 : f32 to vector<16x32xf32>
    %220 = arith.divf %219, %218 : vector<16x32xf32>
    %221 = arith.mulf %210, %178 : vector<16x32xf32>
    %222 = arith.mulf %202, %212 : vector<16x32xf32>
    %223 = arith.addf %221, %222 : vector<16x32xf32>
    %224 = math.tanh %223 : vector<16x32xf32>
    %225 = arith.mulf %220, %224 : vector<16x32xf32>
    %226 = arith.truncf %225 : vector<16x32xf32> to vector<16x32xbf16>
    %c0_97 = arith.constant 0 : index
    %c0_98 = arith.constant 0 : index
    %227 = vector.load %arg5[%c0_97, %c0_98] : memref<32x32xbf16, #tpu.memory_space<vmem>>, vector<32x32xbf16>
    %cst_99 = arith.constant dense<0.000000e+00> : vector<16x32xf32>
    %228 = tpu.matmul %226, %227, %cst_99 {dimension_numbers = #tpu.dot_dimension_numbers<[1], [0], [0], [1], [0, 0, 1, 1], [], []>} : vector<16x32xbf16>, vector<32x32xbf16>, vector<16x32xf32> -> vector<16x32xf32>
    %c0_100 = arith.constant 0 : index
    %c0_101 = arith.constant 0 : index
    %229 = vector.load %arg6[%c0_100, %c0_101] : memref<1x32xf32, #tpu.memory_space<vmem>>, vector<1x32xf32>
    %230 = vector.broadcast %229 : vector<1x32xf32> to vector<16x32xf32>
    %231 = arith.addf %228, %230 : vector<16x32xf32>
    %c4 = arith.constant 4 : index
    %c0_102 = arith.constant 0 : index
    %c0_103 = arith.constant 0 : index
    %232 = vector.load %arg7[%c4, %c0_102, %c0_103] : memref<8x16x32xf32, #tpu.memory_space<vmem>>, vector<1x16x32xf32>
    %233 = vector.shape_cast %232 : vector<1x16x32xf32> to vector<16x32xf32>
    %234 = vector.shape_cast %231 : vector<16x32xf32> to vector<1x16x32xf32>
    tpu.vector_store %arg7[%c4, %c0_102, %c0_103], %234 {strides = array<i32>} : memref<8x16x32xf32, #tpu.memory_space<vmem>>, vector<1x16x32xf32>,
    %235 = vector.extract_strided_slice %7 {offsets = [80, 0], sizes = [16, 128], strides = [1, 1]} : vector<128x128xf32> to vector<16x128xf32>
    %236 = arith.truncf %225 : vector<16x32xf32> to vector<16x32xbf16>
    %c0_104 = arith.constant 0 : index
    %c0_105 = arith.constant 0 : index
    %237 = vector.load %arg3[%c0_104, %c0_105] : memref<32x128xbf16, #tpu.memory_space<vmem>>, vector<32x128xbf16>
    %cst_106 = arith.constant dense<0.000000e+00> : vector<16x128xf32>
    %238 = tpu.matmul %236, %237, %cst_106 {dimension_numbers = #tpu.dot_dimension_numbers<[1], [0], [0], [1], [0, 0, 1, 1], [], []>} : vector<16x32xbf16>, vector<32x128xbf16>, vector<16x128xf32> -> vector<16x128xf32>
    %239 = arith.addf %235, %238 : vector<16x128xf32>
    %240 = vector.extract_strided_slice %239 {offsets = [0, 0], sizes = [16, 32], strides = [1, 1]} : vector<16x128xf32> to vector<16x32xf32>
    %cst_107 = arith.constant 0.000000e+00 : f32
    %241 = vector.broadcast %cst_107 : f32 to vector<16x32xf32>
    %242 = arith.subf %241, %240 : vector<16x32xf32>
    %243 = math.exp %242 : vector<16x32xf32>
    %cst_108 = arith.constant 1.000000e+00 : f32
    %244 = vector.broadcast %cst_108 : f32 to vector<16x32xf32>
    %245 = arith.addf %244, %243 : vector<16x32xf32>
    %cst_109 = arith.constant 1.000000e+00 : f32
    %246 = vector.broadcast %cst_109 : f32 to vector<16x32xf32>
    %247 = arith.divf %246, %245 : vector<16x32xf32>
    %248 = vector.extract_strided_slice %239 {offsets = [0, 32], sizes = [16, 32], strides = [1, 1]} : vector<16x128xf32> to vector<16x32xf32>
    %cst_110 = arith.constant 0.000000e+00 : f32
    %249 = vector.broadcast %cst_110 : f32 to vector<16x32xf32>
    %250 = arith.subf %249, %248 : vector<16x32xf32>
    %251 = math.exp %250 : vector<16x32xf32>
    %cst_111 = arith.constant 1.000000e+00 : f32
    %252 = vector.broadcast %cst_111 : f32 to vector<16x32xf32>
    %253 = arith.addf %252, %251 : vector<16x32xf32>
    %cst_112 = arith.constant 1.000000e+00 : f32
    %254 = vector.broadcast %cst_112 : f32 to vector<16x32xf32>
    %255 = arith.divf %254, %253 : vector<16x32xf32>
    %256 = vector.extract_strided_slice %239 {offsets = [0, 64], sizes = [16, 32], strides = [1, 1]} : vector<16x128xf32> to vector<16x32xf32>
    %257 = math.tanh %256 : vector<16x32xf32>
    %258 = vector.extract_strided_slice %239 {offsets = [0, 96], sizes = [16, 32], strides = [1, 1]} : vector<16x128xf32> to vector<16x32xf32>
    %cst_113 = arith.constant 0.000000e+00 : f32
    %259 = vector.broadcast %cst_113 : f32 to vector<16x32xf32>
    %260 = arith.subf %259, %258 : vector<16x32xf32>
    %261 = math.exp %260 : vector<16x32xf32>
    %cst_114 = arith.constant 1.000000e+00 : f32
    %262 = vector.broadcast %cst_114 : f32 to vector<16x32xf32>
    %263 = arith.addf %262, %261 : vector<16x32xf32>
    %cst_115 = arith.constant 1.000000e+00 : f32
    %264 = vector.broadcast %cst_115 : f32 to vector<16x32xf32>
    %265 = arith.divf %264, %263 : vector<16x32xf32>
    %266 = arith.mulf %255, %223 : vector<16x32xf32>
    %267 = arith.mulf %247, %257 : vector<16x32xf32>
    %268 = arith.addf %266, %267 : vector<16x32xf32>
    %269 = math.tanh %268 : vector<16x32xf32>
    %270 = arith.mulf %265, %269 : vector<16x32xf32>
    %271 = arith.truncf %270 : vector<16x32xf32> to vector<16x32xbf16>
    %c0_116 = arith.constant 0 : index
    %c0_117 = arith.constant 0 : index
    %272 = vector.load %arg5[%c0_116, %c0_117] : memref<32x32xbf16, #tpu.memory_space<vmem>>, vector<32x32xbf16>
    %cst_118 = arith.constant dense<0.000000e+00> : vector<16x32xf32>
    %273 = tpu.matmul %271, %272, %cst_118 {dimension_numbers = #tpu.dot_dimension_numbers<[1], [0], [0], [1], [0, 0, 1, 1], [], []>} : vector<16x32xbf16>, vector<32x32xbf16>, vector<16x32xf32> -> vector<16x32xf32>
    %c0_119 = arith.constant 0 : index
    %c0_120 = arith.constant 0 : index
    %274 = vector.load %arg6[%c0_119, %c0_120] : memref<1x32xf32, #tpu.memory_space<vmem>>, vector<1x32xf32>
    %275 = vector.broadcast %274 : vector<1x32xf32> to vector<16x32xf32>
    %276 = arith.addf %273, %275 : vector<16x32xf32>
    %c5 = arith.constant 5 : index
    %c0_121 = arith.constant 0 : index
    %c0_122 = arith.constant 0 : index
    %277 = vector.load %arg7[%c5, %c0_121, %c0_122] : memref<8x16x32xf32, #tpu.memory_space<vmem>>, vector<1x16x32xf32>
    %278 = vector.shape_cast %277 : vector<1x16x32xf32> to vector<16x32xf32>
    %279 = vector.shape_cast %276 : vector<16x32xf32> to vector<1x16x32xf32>
    tpu.vector_store %arg7[%c5, %c0_121, %c0_122], %279 {strides = array<i32>} : memref<8x16x32xf32, #tpu.memory_space<vmem>>, vector<1x16x32xf32>,
    %280 = vector.extract_strided_slice %7 {offsets = [96, 0], sizes = [16, 128], strides = [1, 1]} : vector<128x128xf32> to vector<16x128xf32>
    %281 = arith.truncf %270 : vector<16x32xf32> to vector<16x32xbf16>
    %c0_123 = arith.constant 0 : index
    %c0_124 = arith.constant 0 : index
    %282 = vector.load %arg3[%c0_123, %c0_124] : memref<32x128xbf16, #tpu.memory_space<vmem>>, vector<32x128xbf16>
    %cst_125 = arith.constant dense<0.000000e+00> : vector<16x128xf32>
    %283 = tpu.matmul %281, %282, %cst_125 {dimension_numbers = #tpu.dot_dimension_numbers<[1], [0], [0], [1], [0, 0, 1, 1], [], []>} : vector<16x32xbf16>, vector<32x128xbf16>, vector<16x128xf32> -> vector<16x128xf32>
    %284 = arith.addf %280, %283 : vector<16x128xf32>
    %285 = vector.extract_strided_slice %284 {offsets = [0, 0], sizes = [16, 32], strides = [1, 1]} : vector<16x128xf32> to vector<16x32xf32>
    %cst_126 = arith.constant 0.000000e+00 : f32
    %286 = vector.broadcast %cst_126 : f32 to vector<16x32xf32>
    %287 = arith.subf %286, %285 : vector<16x32xf32>
    %288 = math.exp %287 : vector<16x32xf32>
    %cst_127 = arith.constant 1.000000e+00 : f32
    %289 = vector.broadcast %cst_127 : f32 to vector<16x32xf32>
    %290 = arith.addf %289, %288 : vector<16x32xf32>
    %cst_128 = arith.constant 1.000000e+00 : f32
    %291 = vector.broadcast %cst_128 : f32 to vector<16x32xf32>
    %292 = arith.divf %291, %290 : vector<16x32xf32>
    %293 = vector.extract_strided_slice %284 {offsets = [0, 32], sizes = [16, 32], strides = [1, 1]} : vector<16x128xf32> to vector<16x32xf32>
    %cst_129 = arith.constant 0.000000e+00 : f32
    %294 = vector.broadcast %cst_129 : f32 to vector<16x32xf32>
    %295 = arith.subf %294, %293 : vector<16x32xf32>
    %296 = math.exp %295 : vector<16x32xf32>
    %cst_130 = arith.constant 1.000000e+00 : f32
    %297 = vector.broadcast %cst_130 : f32 to vector<16x32xf32>
    %298 = arith.addf %297, %296 : vector<16x32xf32>
    %cst_131 = arith.constant 1.000000e+00 : f32
    %299 = vector.broadcast %cst_131 : f32 to vector<16x32xf32>
    %300 = arith.divf %299, %298 : vector<16x32xf32>
    %301 = vector.extract_strided_slice %284 {offsets = [0, 64], sizes = [16, 32], strides = [1, 1]} : vector<16x128xf32> to vector<16x32xf32>
    %302 = math.tanh %301 : vector<16x32xf32>
    %303 = vector.extract_strided_slice %284 {offsets = [0, 96], sizes = [16, 32], strides = [1, 1]} : vector<16x128xf32> to vector<16x32xf32>
    %cst_132 = arith.constant 0.000000e+00 : f32
    %304 = vector.broadcast %cst_132 : f32 to vector<16x32xf32>
    %305 = arith.subf %304, %303 : vector<16x32xf32>
    %306 = math.exp %305 : vector<16x32xf32>
    %cst_133 = arith.constant 1.000000e+00 : f32
    %307 = vector.broadcast %cst_133 : f32 to vector<16x32xf32>
    %308 = arith.addf %307, %306 : vector<16x32xf32>
    %cst_134 = arith.constant 1.000000e+00 : f32
    %309 = vector.broadcast %cst_134 : f32 to vector<16x32xf32>
    %310 = arith.divf %309, %308 : vector<16x32xf32>
    %311 = arith.mulf %300, %268 : vector<16x32xf32>
    %312 = arith.mulf %292, %302 : vector<16x32xf32>
    %313 = arith.addf %311, %312 : vector<16x32xf32>
    %314 = math.tanh %313 : vector<16x32xf32>
    %315 = arith.mulf %310, %314 : vector<16x32xf32>
    %316 = arith.truncf %315 : vector<16x32xf32> to vector<16x32xbf16>
    %c0_135 = arith.constant 0 : index
    %c0_136 = arith.constant 0 : index
    %317 = vector.load %arg5[%c0_135, %c0_136] : memref<32x32xbf16, #tpu.memory_space<vmem>>, vector<32x32xbf16>
    %cst_137 = arith.constant dense<0.000000e+00> : vector<16x32xf32>
    %318 = tpu.matmul %316, %317, %cst_137 {dimension_numbers = #tpu.dot_dimension_numbers<[1], [0], [0], [1], [0, 0, 1, 1], [], []>} : vector<16x32xbf16>, vector<32x32xbf16>, vector<16x32xf32> -> vector<16x32xf32>
    %c0_138 = arith.constant 0 : index
    %c0_139 = arith.constant 0 : index
    %319 = vector.load %arg6[%c0_138, %c0_139] : memref<1x32xf32, #tpu.memory_space<vmem>>, vector<1x32xf32>
    %320 = vector.broadcast %319 : vector<1x32xf32> to vector<16x32xf32>
    %321 = arith.addf %318, %320 : vector<16x32xf32>
    %c6 = arith.constant 6 : index
    %c0_140 = arith.constant 0 : index
    %c0_141 = arith.constant 0 : index
    %322 = vector.load %arg7[%c6, %c0_140, %c0_141] : memref<8x16x32xf32, #tpu.memory_space<vmem>>, vector<1x16x32xf32>
    %323 = vector.shape_cast %322 : vector<1x16x32xf32> to vector<16x32xf32>
    %324 = vector.shape_cast %321 : vector<16x32xf32> to vector<1x16x32xf32>
    tpu.vector_store %arg7[%c6, %c0_140, %c0_141], %324 {strides = array<i32>} : memref<8x16x32xf32, #tpu.memory_space<vmem>>, vector<1x16x32xf32>,
    %325 = vector.extract_strided_slice %7 {offsets = [112, 0], sizes = [16, 128], strides = [1, 1]} : vector<128x128xf32> to vector<16x128xf32>
    %326 = arith.truncf %315 : vector<16x32xf32> to vector<16x32xbf16>
    %c0_142 = arith.constant 0 : index
    %c0_143 = arith.constant 0 : index
    %327 = vector.load %arg3[%c0_142, %c0_143] : memref<32x128xbf16, #tpu.memory_space<vmem>>, vector<32x128xbf16>
    %cst_144 = arith.constant dense<0.000000e+00> : vector<16x128xf32>
    %328 = tpu.matmul %326, %327, %cst_144 {dimension_numbers = #tpu.dot_dimension_numbers<[1], [0], [0], [1], [0, 0, 1, 1], [], []>} : vector<16x32xbf16>, vector<32x128xbf16>, vector<16x128xf32> -> vector<16x128xf32>
    %329 = arith.addf %325, %328 : vector<16x128xf32>
    %330 = vector.extract_strided_slice %329 {offsets = [0, 0], sizes = [16, 32], strides = [1, 1]} : vector<16x128xf32> to vector<16x32xf32>
    %cst_145 = arith.constant 0.000000e+00 : f32
    %331 = vector.broadcast %cst_145 : f32 to vector<16x32xf32>
    %332 = arith.subf %331, %330 : vector<16x32xf32>
    %333 = math.exp %332 : vector<16x32xf32>
    %cst_146 = arith.constant 1.000000e+00 : f32
    %334 = vector.broadcast %cst_146 : f32 to vector<16x32xf32>
    %335 = arith.addf %334, %333 : vector<16x32xf32>
    %cst_147 = arith.constant 1.000000e+00 : f32
    %336 = vector.broadcast %cst_147 : f32 to vector<16x32xf32>
    %337 = arith.divf %336, %335 : vector<16x32xf32>
    %338 = vector.extract_strided_slice %329 {offsets = [0, 32], sizes = [16, 32], strides = [1, 1]} : vector<16x128xf32> to vector<16x32xf32>
    %cst_148 = arith.constant 0.000000e+00 : f32
    %339 = vector.broadcast %cst_148 : f32 to vector<16x32xf32>
    %340 = arith.subf %339, %338 : vector<16x32xf32>
    %341 = math.exp %340 : vector<16x32xf32>
    %cst_149 = arith.constant 1.000000e+00 : f32
    %342 = vector.broadcast %cst_149 : f32 to vector<16x32xf32>
    %343 = arith.addf %342, %341 : vector<16x32xf32>
    %cst_150 = arith.constant 1.000000e+00 : f32
    %344 = vector.broadcast %cst_150 : f32 to vector<16x32xf32>
    %345 = arith.divf %344, %343 : vector<16x32xf32>
    %346 = vector.extract_strided_slice %329 {offsets = [0, 64], sizes = [16, 32], strides = [1, 1]} : vector<16x128xf32> to vector<16x32xf32>
    %347 = math.tanh %346 : vector<16x32xf32>
    %348 = vector.extract_strided_slice %329 {offsets = [0, 96], sizes = [16, 32], strides = [1, 1]} : vector<16x128xf32> to vector<16x32xf32>
    %cst_151 = arith.constant 0.000000e+00 : f32
    %349 = vector.broadcast %cst_151 : f32 to vector<16x32xf32>
    %350 = arith.subf %349, %348 : vector<16x32xf32>
    %351 = math.exp %350 : vector<16x32xf32>
    %cst_152 = arith.constant 1.000000e+00 : f32
    %352 = vector.broadcast %cst_152 : f32 to vector<16x32xf32>
    %353 = arith.addf %352, %351 : vector<16x32xf32>
    %cst_153 = arith.constant 1.000000e+00 : f32
    %354 = vector.broadcast %cst_153 : f32 to vector<16x32xf32>
    %355 = arith.divf %354, %353 : vector<16x32xf32>
    %356 = arith.mulf %345, %313 : vector<16x32xf32>
    %357 = arith.mulf %337, %347 : vector<16x32xf32>
    %358 = arith.addf %356, %357 : vector<16x32xf32>
    %359 = math.tanh %358 : vector<16x32xf32>
    %360 = arith.mulf %355, %359 : vector<16x32xf32>
    %361 = arith.truncf %360 : vector<16x32xf32> to vector<16x32xbf16>
    %c0_154 = arith.constant 0 : index
    %c0_155 = arith.constant 0 : index
    %362 = vector.load %arg5[%c0_154, %c0_155] : memref<32x32xbf16, #tpu.memory_space<vmem>>, vector<32x32xbf16>
    %cst_156 = arith.constant dense<0.000000e+00> : vector<16x32xf32>
    %363 = tpu.matmul %361, %362, %cst_156 {dimension_numbers = #tpu.dot_dimension_numbers<[1], [0], [0], [1], [0, 0, 1, 1], [], []>} : vector<16x32xbf16>, vector<32x32xbf16>, vector<16x32xf32> -> vector<16x32xf32>
    %c0_157 = arith.constant 0 : index
    %c0_158 = arith.constant 0 : index
    %364 = vector.load %arg6[%c0_157, %c0_158] : memref<1x32xf32, #tpu.memory_space<vmem>>, vector<1x32xf32>
    %365 = vector.broadcast %364 : vector<1x32xf32> to vector<16x32xf32>
    %366 = arith.addf %363, %365 : vector<16x32xf32>
    %c7 = arith.constant 7 : index
    %c0_159 = arith.constant 0 : index
    %c0_160 = arith.constant 0 : index
    %367 = vector.load %arg7[%c7, %c0_159, %c0_160] : memref<8x16x32xf32, #tpu.memory_space<vmem>>, vector<1x16x32xf32>
    %368 = vector.shape_cast %367 : vector<1x16x32xf32> to vector<16x32xf32>
    %369 = vector.shape_cast %366 : vector<16x32xf32> to vector<1x16x32xf32>
    tpu.vector_store %arg7[%c7, %c0_159, %c0_160], %369 {strides = array<i32>} : memref<8x16x32xf32, #tpu.memory_space<vmem>>, vector<1x16x32xf32>,
    return
  }
  func.func @transform_0(%arg0: i32) -> (i32, i32, i32) {
    %c0_i32 = arith.constant 0 : i32
    %c0_i32_0 = arith.constant 0 : i32
    %c0_i32_1 = arith.constant 0 : i32
    return %c0_i32, %arg0, %c0_i32_0 : i32, i32, i32
  }
  func.func @transform_1(%arg0: i32) -> (i32, i32) {
    %c0_i32 = arith.constant 0 : i32
    %c0_i32_0 = arith.constant 0 : i32
    %c0_i32_1 = arith.constant 0 : i32
    return %c0_i32, %c0_i32_0 : i32, i32
  }
  func.func @transform_2(%arg0: i32) -> (i32, i32) {
    %c0_i32 = arith.constant 0 : i32
    %c0_i32_0 = arith.constant 0 : i32
    %c0_i32_1 = arith.constant 0 : i32
    return %c0_i32, %c0_i32_0 : i32, i32
  }
  func.func @transform_3(%arg0: i32) -> (i32, i32) {
    %c0_i32 = arith.constant 0 : i32
    %c0_i32_0 = arith.constant 0 : i32
    %c0_i32_1 = arith.constant 0 : i32
    return %c0_i32, %c0_i32_0 : i32, i32
  }
  func.func @transform_4(%arg0: i32) -> (i32, i32) {
    %c0_i32 = arith.constant 0 : i32
    %c0_i32_0 = arith.constant 0 : i32
    %c0_i32_1 = arith.constant 0 : i32
    return %c0_i32, %c0_i32_0 : i32, i32
  }
  func.func @transform_5(%arg0: i32) -> (i32, i32) {
    %c0_i32 = arith.constant 0 : i32
    %c0_i32_0 = arith.constant 0 : i32
    %c0_i32_1 = arith.constant 0 : i32
    return %c0_i32, %c0_i32_0 : i32, i32
  }
  func.func @transform_6(%arg0: i32) -> (i32, i32, i32) {
    %c0_i32 = arith.constant 0 : i32
    %c0_i32_0 = arith.constant 0 : i32
    %c0_i32_1 = arith.constant 0 : i32
    return %c0_i32, %arg0, %c0_i32_0 : i32, i32, i32
  }
}

module attributes {stable_mosaic.version = 11 : i64} {
  func.func @kernel(%arg0: i32, %arg1: memref<64x128xf32, #tpu.memory_space<vmem>>, %arg2: memref<64x128xf32, #tpu.memory_space<vmem>>, %arg3: memref<64x128xf32, #tpu.memory_space<vmem>>) attributes {dimension_semantics = [#tpu.dimension_semantics<parallel>], iteration_bounds = array<i64: 1>, scalar_prefetch = 0 : i64, scratch_operands = 0 : i64, tpu.core_type = #tpu.core_type<tc>, window_params = [{transform_indices = @transform_0, window_bounds = array<i64: 64, 128>}, {transform_indices = @transform_1, window_bounds = array<i64: 64, 128>}, {transform_indices = @transform_2, window_bounds = array<i64: 64, 128>}]} {
    %c0 = arith.constant 0 : index
    %c0_0 = arith.constant 0 : index
    %0 = vector.load %arg1[%c0, %c0_0] : memref<64x128xf32, #tpu.memory_space<vmem>>, vector<64x128xf32>
    %cst = arith.constant dense<0.000000e+00> : vector<64xf32>
    %1 = vector.multi_reduction <add>, %0, %cst [1] : vector<64x128xf32> to vector<64xf32>
    %2 = vector.shape_cast %1 : vector<64xf32> to vector<64x1xf32>
    %cst_1 = arith.constant 1.280000e+02 : f32
    %3 = vector.broadcast %cst_1 : f32 to vector<64x1xf32>
    %4 = arith.divf %2, %3 : vector<64x1xf32>
    %5 = vector.broadcast %4 : vector<64x1xf32> to vector<64x128xf32>
    %6 = arith.subf %0, %5 : vector<64x128xf32>
    %7 = arith.mulf %6, %6 : vector<64x128xf32>
    %cst_2 = arith.constant dense<0.000000e+00> : vector<64xf32>
    %8 = vector.multi_reduction <add>, %7, %cst_2 [1] : vector<64x128xf32> to vector<64xf32>
    %9 = vector.shape_cast %8 : vector<64xf32> to vector<64x1xf32>
    %cst_3 = arith.constant 1.280000e+02 : f32
    %10 = vector.broadcast %cst_3 : f32 to vector<64x1xf32>
    %11 = arith.divf %9, %10 : vector<64x1xf32>
    %c0_4 = arith.constant 0 : index
    %c0_5 = arith.constant 0 : index
    %12 = vector.load %arg2[%c0_4, %c0_5] : memref<64x128xf32, #tpu.memory_space<vmem>>, vector<64x128xf32>
    %cst_6 = arith.constant 9.99999993E-9 : f32
    %13 = vector.broadcast %cst_6 : f32 to vector<64x1xf32>
    %14 = arith.addf %11, %13 : vector<64x1xf32>
    %15 = math.rsqrt %14 : vector<64x1xf32>
    %16 = vector.broadcast %15 : vector<64x1xf32> to vector<64x128xf32>
    %17 = arith.mulf %6, %16 : vector<64x128xf32>
    %18 = arith.addf %12, %17 : vector<64x128xf32>
    %c0_7 = arith.constant 0 : index
    %c0_8 = arith.constant 0 : index
    %19 = vector.load %arg3[%c0_7, %c0_8] : memref<64x128xf32, #tpu.memory_space<vmem>>, vector<64x128xf32>
    tpu.vector_store %arg3[%c0_7, %c0_8], %18 {strides = array<i32>} : memref<64x128xf32, #tpu.memory_space<vmem>>, vector<64x128xf32>,
    return
  }
  func.func @transform_0(%arg0: i32) -> (i32, i32) {
    %c0_i32 = arith.constant 0 : i32
    %c0_i32_0 = arith.constant 0 : i32
    return %arg0, %c0_i32 : i32, i32
  }
  func.func @transform_1(%arg0: i32) -> (i32, i32) {
    %c0_i32 = arith.constant 0 : i32
    %c0_i32_0 = arith.constant 0 : i32
    return %arg0, %c0_i32 : i32, i32
  }
  func.func @transform_2(%arg0: i32) -> (i32, i32) {
    %c0_i32 = arith.constant 0 : i32
    %c0_i32_0 = arith.constant 0 : i32
    return %arg0, %c0_i32 : i32, i32
  }
}

</mosaic_0001>

<bundles_post_ra>
// kernel: dparn_forward.7
= control target key start
LH: loop header
LB: loop body
LE: loop exit
PB: predicated region body
PF: predicated region fallthrough
CT: control target
= control target key end

     0   :  { %s753_s15 = smov 0   ;;  %s942_s0 = inlined_call_operand.vmem [shape: f32[32,8,32], index: 0, kind: input, shape index: {}]   ;;  %s943_s1 = inlined_call_operand.vmem [shape: f32[32,8,32], index: 1, kind: input, shape index: {}]   ;;  %s944_s2 = inlined_call_operand.vmem [shape: bf16[32,32], index: 2, kind: input, shape index: {}]   ;;  %s945_s3 = inlined_call_operand.vmem [shape: f32[1,32], index: 3, kind: input, shape index: {}]   ;;  %s946_s4 = inlined_call_operand.vmem [shape: f32[32,8,32], index: 4, kind: output, shape index: {}]  }
   0x1 LB: > { %s662_s16 = sadd.s32 4294967295, %s726_s15   ;;  %p666_p0 = scmp.ge.s32.totalorder %s726_s15, 1  ;;  %s726_s15 = sphi %s753_s15, %s14_s15  }
   0x2   : > { %p174_p1 = scmp.lt.s32.totalorder %s726_s15, 5 }
   0x4   : > { %p175_p2 = pnand %p666_p0, %p174_p1 }
   0x5   : > { %s667_s19 = sshll.u32 (!%p175_p2), %s662_s16, 3 }
   0x6   : > { %178 = sbr.rel (%p175_p2) target bundleno = 462 (0x1ce), region = 36  ;;  %p206_p3 = scmp.lt.s32.totalorder (!%p175_p2), %s667_s19, 31 }
   0xb   : > { %v688_v0 = vld [vmem:[%s944_s2 + $0x8] sm:$0xff]  ;;  %v687_v1 = vld [vmem:[%s944_s2] sm:$0xff]  ;;  %s948_s19 = smov (!%p206_p3, %s667_s19), 31  ;;  %vm256_vm0 = vcmask 261120  }
   0xc   : > { %275 = vmatpush.bf16.msra.mxu0 %v688_v0  ;;  %689 = vmatpush.bf16.msra.mxu1 %v688_v0  ;;  %s767_s22 = sshll.u32 %s948_s19, 3  ;;  %v703_v14 = vld [vmem:[%s945_s3] ss:$0 sm:$0xff] }
   0xd   : > { %690 = vmatpush.bf16.msra.mxu2 %v688_v0  ;;  %691 = vmatpush.bf16.msra.mxu3 %v688_v0  ;;  %s209_s25 = scalar_lea.vmem %s942_s0, %s767_s22  ;;  %s875_s30 = scalar_lea.vmem %s943_s1, %s767_s22 }
   0xe   : > { %v224_v2 = vld [vmem:[%s209_s25] sm:$0xff]  ;;  %v225_v3 = vld [vmem:[%s209_s25 + $0x8] sm:$0xff]  ;;  %v226_v4 = vld [vmem:[%s209_s25 + $0x10] sm:$0xff]  ;;  %s898_s7 = scalar_lea.vmem %s946_s4, %s767_s22 }
   0xf   : > { %v232_v5 = vpack.c.bf16 %v225_v3, %v224_v2  ;;  %v227_v6 = vld [vmem:[%s209_s25 + $0x18] sm:$0xff]  ;;  %v228_v7 = vld [vmem:[%s209_s25 + $0x20] sm:$0xff]  ;;  %v229_v8 = vld [vmem:[%s209_s25 + $0x28] sm:$0xff] }
  0x10   : > { %276 = vmatpush.bf16.msra.mxu0 %v687_v1  ;;  %692 = vmatpush.bf16.msra.mxu1 %v687_v1  ;;  %v233_v9 = vpack.c.bf16 %v227_v6, %v226_v4  ;;  %v234_v10 = vpack.c.bf16 %v229_v8, %v228_v7  ;;  %v230_v11 = vld [vmem:[%s209_s25 + $0x30] sm:$0xff]  ;;  %v231_v12 = vld [vmem:[%s209_s25 + $0x38] sm:$0xff] }
  0x11   : > { %693 = vmatpush.bf16.msra.mxu2 %v687_v1  ;;  %694 = vmatpush.bf16.msra.mxu3 %v687_v1  ;;  %v235_v13 = vpack.c.bf16 %v231_v12, %v230_v11 }
  0x13   : > { %681 = vmatmul.msk.bf16.vlgmr.msra.gmra.mxu0 %vm256_vm0, %v232_v5  ;;  %682 = vmatmul.msk.bf16.vlgmr.msra.gmra.mxu1 %vm256_vm0, %v233_v9 }
  0x14   : > { %683 = vmatmul.msk.bf16.vlgmr.msra.gmra.mxu2 %vm256_vm0, %v234_v10  ;;  %684 = vmatmul.msk.bf16.vlgmr.msra.gmra.mxu3 %vm256_vm0, %v235_v13 }
  0x90   : > { %v278_v15 = vpop.f32.mrf.mxu0  ;;  %v283_v17 = vpop.f32.mrf.mxu1 }
  0x91   : > { %v279_v16 = vadd.f32 %v703_v14, %v278_v15  ;;  %v780_v18 = vadd.f32 %v703_v14, %v283_v17 }
  0x93   : > { %v298_v19 = vsel %vm256_vm0, %v279_v16, 0.0  ;;  %v304_v20 = vsel %vm256_vm0, %v780_v18, 0.0 }
  0x94   : > { %299 = vadd.xlane.f32.xlu0 %v298_v19  ;;  %305 = vadd.xlane.f32.xlu1 %v304_v20 }
  0x97   : > { %v288_v21 = vpop.f32.mrf.mxu2  ;;  %v293_v23 = vpop.f32.mrf.mxu3 }
  0x98   : > { %v785_v22 = vadd.f32 %v703_v14, %v288_v21  ;;  %v280_v24 = vpop.f32.mrf.mxu0  ;;  %v285_v26 = vpop.f32.mrf.mxu1  ;;  %v797_v31 = vadd.f32 %v703_v14, %v293_v23 }
  0x99   : > { %v787_v25 = vadd.f32 %v703_v14, %v280_v24  ;;  %v789_v27 = vadd.f32 %v703_v14, %v285_v26 }
  0x9a   : > { %v310_v28 = vsel %vm256_vm0, %v785_v22, 0.0  ;;  %v316_v37 = vsel %vm256_vm0, %v797_v31, 0.0 }
  0x9b   : > { %311 = vadd.xlane.f32.xlu2 %v310_v28  ;;  %v301_v29 = vsel %vm256_vm0, %v787_v25, 0.0  ;;  %v307_v30 = vsel %vm256_vm0, %v789_v27, 0.0 }
  0x9c   : > { %302 = vadd.xlane.f32.xlu0 %v301_v29  ;;  %308 = vadd.xlane.f32.xlu1 %v307_v30 }
  0x9f   : > { %v290_v32 = vpop.f32.mrf.mxu2  ;;  %v295_v34 = vpop.f32.mrf.mxu3 }
  0xa0   : > { %v799_v33 = vadd.f32 %v703_v14, %v290_v32  ;;  %v801_v35 = vadd.f32 %v703_v14, %v295_v34 }
  0xa2   : > { %v313_v36 = vsel %vm256_vm0, %v799_v33, 0.0  ;;  %v319_v38 = vsel %vm256_vm0, %v801_v35, 0.0 }
  0xa3   : > { %314 = vadd.xlane.f32.xlu2 %v313_v36 }
  0xa4   : > { %317 = vadd.xlane.f32.xlu0 %v316_v37  ;;  %320 = vadd.xlane.f32.xlu1 %v319_v38 }
 0x107   : > { %v300_v39 = vpop.xlane.xlu0 %299  ;;  %v306_v40 = vpop.xlane.xlu1 %305 }
 0x108   : > { %v322_v41 = vrot.slane %v300_v39, 4  ;;  %v334_v42 = vrot.slane %v306_v40, 4 }
 0x10a   : > { %v323_v43 = vadd.f32 %v322_v41, %v300_v39  ;;  %v335_v44 = vadd.f32 %v334_v42, %v306_v40 }
 0x10c   : > { %v324_v45 = vrot.slane %v323_v43, 2  ;;  %v336_v46 = vrot.slane %v335_v44, 2 }
 0x10e   : > { %v325_v47 = vadd.f32 %v324_v45, %v323_v43  ;;  %v312_v48 = vpop.xlane.xlu2 %311  ;;  %v337_v49 = vadd.f32 %v336_v46, %v335_v44 }
 0x10f   : > { %v346_v50 = vrot.slane %v312_v48, 4  ;;  %v303_v51 = vpop.xlane.xlu0 %302  ;;  %v309_v53 = vpop.xlane.xlu1 %308 }
 0x110   : > { %v326_v52 = vrot.slane %v325_v47, 1  ;;  %v328_v54 = vrot.slane %v303_v51, 4  ;;  %v338_v55 = vrot.slane %v337_v49, 1  ;;  %v340_v57 = vrot.slane %v309_v53, 4 }
 0x111   : > { %v347_v56 = vadd.f32 %v346_v50, %v312_v48 }
 0x112   : > { %v327_v58 = vadd.f32 %v326_v52, %v325_v47  ;;  %v329_v59 = vadd.f32 %v328_v54, %v303_v51  ;;  %v339_v60 = vadd.f32 %v338_v55, %v337_v49  ;;  %v341_v62 = vadd.f32 %v340_v57, %v309_v53 }
 0x113   : > { %v348_v61 = vrot.slane %v347_v56, 2 }
 0x114   : > { %v370_v63 = vmul.f32 0.00390625, %v327_v58  ;;  %v330_v0 = vrot.slane %v329_v59, 2  ;;  %v372_v1 = vmul.f32 0.00390625, %v339_v60  ;;  %v342_v3 = vrot.slane %v341_v62, 2 }
 0x115   : > { %v349_v2 = vadd.f32 %v348_v61, %v347_v56 }
 0x116   : > { %v331_v4 = vadd.f32 %v330_v0, %v329_v59  ;;  %v315_v5 = vpop.xlane.xlu2 %314  ;;  %v809_v6 = vsub.f32 %v279_v16, %v370_v63  ;;  %v343_v8 = vadd.f32 %v342_v3, %v341_v62  ;;  %v812_v11 = vsub.f32 %v780_v18, %v372_v1 }
 0x117   : > { %v350_v7 = vrot.slane %v349_v2, 1  ;;  %v352_v9 = vrot.slane %v315_v5, 4  ;;  %v318_v10 = vpop.xlane.xlu0 %317  ;;  %v321_v13 = vpop.xlane.xlu1 %320 }
 0x118   : > { %v332_v12 = vrot.slane %v331_v4, 1  ;;  %v358_v14 = vrot.slane %v318_v10, 4  ;;  %v386_v15 = vmul.f32 %v809_v6, %v809_v6  ;;  %v344_v19 = vrot.slane %v343_v8, 1 }
 0x119   : > { %v351_v17 = vadd.f32 %v350_v7, %v349_v2  ;;  %v353_v20 = vadd.f32 %v352_v9, %v315_v5  ;;  %v364_v21 = vrot.slane %v321_v13, 4  ;;  %v388_v24 = vmul.f32 %v812_v11, %v812_v11 }
 0x11a   : > { %v333_v23 = vadd.f32 %v332_v12, %v331_v4  ;;  %v359_v16 = vadd.f32 %v358_v14, %v318_v10  ;;  %v394_v26 = vsel %vm256_vm0, %v386_v15, 0.0  ;;  %v345_v18 = vadd.f32 %v344_v19, %v343_v8 }
 0x11b   : > { %v374_v28 = vmul.f32 0.00390625, %v351_v17  ;;  %v354_v29 = vrot.slane %v353_v20, 2  ;;  %v365_v30 = vadd.f32 %v364_v21, %v321_v13  ;;  %395 = vadd.xlane.f32.xlu2 %v394_v26  ;;  %v400_v36 = vsel %vm256_vm0, %v388_v24, 0.0 }
 0x11c   : > { %v371_v32 = vmul.f32 0.00390625, %v333_v23  ;;  %v360_v34 = vrot.slane %v359_v16, 2  ;;  %v373_v37 = vmul.f32 0.00390625, %v345_v18  ;;  %401 = vadd.xlane.f32.xlu1 %v400_v36 }
 0x11d   : > { %v355_v38 = vadd.f32 %v354_v29, %v353_v20  ;;  %v366_v39 = vrot.slane %v365_v30, 2  ;;  %v821_v40 = vsub.f32 %v785_v22, %v374_v28 }
 0x11e   : > { %v361_v41 = vadd.f32 %v360_v34, %v359_v16  ;;  %v826_v45 = vsub.f32 %v789_v27, %v373_v37  ;;  %v829_v47 = vsub.f32 %v787_v25, %v371_v32 }
 0x11f   : > { %v356_v42 = vrot.slane %v355_v38, 1  ;;  %v367_v43 = vadd.f32 %v366_v39, %v365_v30  ;;  %v390_v44 = vmul.f32 %v821_v40, %v821_v40 }
 0x120   : > { %v362_v46 = vrot.slane %v361_v41, 1  ;;  %v389_v22 = vmul.f32 %v826_v45, %v826_v45  ;;  %v387_v25 = vmul.f32 %v829_v47, %v829_v47 }
 0x121   : > { %v357_v48 = vadd.f32 %v356_v42, %v355_v38  ;;  %v368_v49 = vrot.slane %v367_v43, 1  ;;  %v406_v50 = vsel %vm256_vm0, %v390_v44, 0.0 }
 0x122   : > { %v363_v51 = vadd.f32 %v362_v46, %v361_v41  ;;  %407 = vadd.xlane.f32.xlu0 %v406_v50  ;;  %v403_v54 = vsel %vm256_vm0, %v389_v22, 0.0  ;;  %v397_v61 = vsel %vm256_vm0, %v387_v25, 0.0 }
 0x123   : > { %v375_v52 = vmul.f32 0.00390625, %v357_v48  ;;  %v369_v53 = vadd.f32 %v368_v49, %v367_v43  ;;  %404 = vadd.xlane.f32.xlu2 %v403_v54 }
 0x124   : > { %v376_v55 = vmul.f32 0.00390625, %v363_v51 }
 0x125   : > { %v377_v27 = vmul.f32 0.00390625, %v369_v53  ;;  %v836_v56 = vsub.f32 %v799_v33, %v375_v52 }
 0x126   : > { %v841_v57 = vsub.f32 %v797_v31, %v376_v55 }
 0x127   : > { %v391_v58 = vmul.f32 %v836_v56, %v836_v56  ;;  %v850_v62 = vsub.f32 %v801_v35, %v377_v27 }
 0x128   : > { %v392_v59 = vmul.f32 %v841_v57, %v841_v57 }
 0x129   : > { %v409_v60 = vsel %vm256_vm0, %v391_v58, 0.0  ;;  %v393_v31 = vmul.f32 %v850_v62, %v850_v62 }
 0x12a   : > { %410 = vadd.xlane.f32.xlu1 %v409_v60  ;;  %398 = vadd.xlane.f32.xlu0 %v397_v61  ;;  %v412_v33 = vsel %vm256_vm0, %v392_v59, 0.0 }
 0x12b   : > { %413 = vadd.xlane.f32.xlu2 %v412_v33  ;;  %v415_v63 = vsel %vm256_vm0, %v393_v31, 0.0 }
 0x132   : > { %416 = vadd.xlane.f32.xlu0 %v415_v63 }
 0x18e   : > { %v396_v0 = vpop.xlane.xlu2 %395 }
 0x18f   : > { %v418_v1 = vrot.slane %v396_v0, 4  ;;  %v402_v2 = vpop.xlane.xlu1 %401 }
 0x190   : > { %v430_v3 = vrot.slane %v402_v2, 4 }
 0x191   : > { %v419_v4 = vadd.f32 %v418_v1, %v396_v0 }
 0x192   : > { %v431_v5 = vadd.f32 %v430_v3, %v402_v2 }
 0x193   : > { %v420_v7 = vrot.slane %v419_v4, 2 }
 0x194   : > { %v432_v35 = vrot.slane %v431_v5, 2 }
 0x195   : > { %v421_v8 = vadd.f32 %v420_v7, %v419_v4  ;;  %v408_v9 = vpop.xlane.xlu0 %407 }
 0x196   : > { %v442_v10 = vrot.slane %v408_v9, 4  ;;  %v433_v12 = vadd.f32 %v432_v35, %v431_v5  ;;  %v405_v14 = vpop.xlane.xlu2 %404 }
 0x197   : > { %v422_v13 = vrot.slane %v421_v8, 1  ;;  %v436_v17 = vrot.slane %v405_v14, 4 }
 0x198   : > { %v443_v15 = vadd.f32 %v442_v10, %v408_v9  ;;  %v434_v19 = vrot.slane %v433_v12, 1 }
 0x199   : > { %v423_v20 = vadd.f32 %v422_v13, %v421_v8  ;;  %v437_v23 = vadd.f32 %v436_v17, %v405_v14 }
 0x19a   : > { %v444_v21 = vrot.slane %v443_v15, 2  ;;  %v435_v16 = vadd.f32 %v434_v19, %v433_v12 }
 0x19b   : > { %v466_v24 = vmul.f32 0.00390625, %v423_v20  ;;  %v438_v28 = vrot.slane %v437_v23, 2 }
 0x19c   : > { %v445_v26 = vadd.f32 %v444_v21, %v443_v15  ;;  %v468_v18 = vmul.f32 0.00390625, %v435_v16 }
 0x19d   : > { %v856_v29 = vadd.f32 1e-08, %v466_v24  ;;  %v411_v30 = vpop.xlane.xlu1 %410  ;;  %v399_v32 = vpop.xlane.xlu0 %398  ;;  %v439_v36 = vadd.f32 %v438_v28, %v437_v23 }
 0x19e   : > { %v446_v34 = vrot.slane %v445_v26, 1  ;;  %v448_v37 = vrot.slane %v411_v30, 4  ;;  %v424_v38 = vrot.slane %v399_v32, 4  ;;  %v858_v39 = vadd.f32 1e-08, %v468_v18  ;;  %v414_v41 = vpop.xlane.xlu2 %413 }
 0x19f   : > { %704 = vrsqrt.f32 %v856_v29  ;;  %v440_v43 = vrot.slane %v439_v36, 1  ;;  %v454_v48 = vrot.slane %v414_v41, 4  ;;  %vm496_vm1 = vweird.f32 %v856_v29 }
 0x1a0   : > { %v447_v42 = vadd.f32 %v446_v34, %v445_v26  ;;  %v449_v44 = vadd.f32 %v448_v37, %v411_v30  ;;  %v425_v46 = vadd.f32 %v424_v38, %v399_v32  ;;  %706 = vrsqrt.f32 %v858_v39  ;;  %v474_v34 = vld [vmem:[%s875_s30] sm:$0xff] }
 0x1a1   : > { %v441_v50 = vadd.f32 %v440_v43, %v439_v36  ;;  %v455_v52 = vadd.f32 %v454_v48, %v414_v41  ;;  %vm516_vm5 = vweird.f32 %v858_v39 }
 0x1a2   : > { %v470_v49 = vmul.f32 0.00390625, %v447_v42  ;;  %v450_v22 = vrot.slane %v449_v44, 2  ;;  %v426_v51 = vrot.slane %v425_v46, 2 }
 0x1a3   : > { %v469_v54 = vmul.f32 0.00390625, %v441_v50  ;;  %v456_v58 = vrot.slane %v455_v52, 2 }
 0x1a4   : > { %v862_v53 = vadd.f32 1e-08, %v470_v49  ;;  %v451_v55 = vadd.f32 %v450_v22, %v449_v44  ;;  %v427_v27 = vadd.f32 %v426_v51, %v425_v46 }
 0x1a5   : > { %v705_v25 = vpop.eup %704  ;;  %v417_v59 = vpop.xlane.xlu0 %416  ;;  %v866_v33 = vadd.f32 1e-08, %v469_v54  ;;  %v457_v0 = vadd.f32 %v456_v58, %v455_v52 }
 0x1a6   : > { %v491_v60 = vmul.f32 %v705_v25, %v856_v29  ;;  %708 = vrsqrt.f32 %v862_v53  ;;  %v707_v61 = vpop.eup %706  ;;  %v452_v31 = vrot.slane %v451_v55, 1  ;;  %v428_v63 = vrot.slane %v427_v27, 1  ;;  %v476_v29 = vld [vmem:[%s875_s30 + $0x10] sm:$0xff] }
 0x1a7   : > { %v511_v1 = vmul.f32 %v707_v61, %v858_v39  ;;  %v460_v3 = vrot.slane %v417_v59, 4  ;;  %710 = vrsqrt.f32 %v866_v33  ;;  %v458_v8 = vrot.slane %v457_v0, 1 }
 0x1a8   : > { %v492_v2 = vmul.f32 %v705_v25, %v491_v60  ;;  %v453_v4 = vadd.f32 %v452_v31, %v451_v55  ;;  %v429_v5 = vadd.f32 %v428_v63, %v427_v27  ;;  %vm497_vm2 = vweird.f32 %v705_v25 }
 0x1a9   : > { %v512_v7 = vmul.f32 %v707_v61, %v511_v1  ;;  %v461_v9 = vadd.f32 %v460_v3, %v417_v59  ;;  %v459_v17 = vadd.f32 %v458_v8, %v457_v0  ;;  %vm517_vm3 = vweird.f32 %v707_v61  ;;  %vm498_vm4 = vmor %vm496_vm1, %vm497_vm2  ;;  %v477_v1 = vld [vmem:[%s875_s30 + $0x18] sm:$0xff] }
 0x1aa   : > { %v493_v35 = vmul.f32 0.5, %v492_v2  ;;  %v471_v10 = vmul.f32 0.00390625, %v453_v4  ;;  %v467_v12 = vmul.f32 0.00390625, %v429_v5  ;;  %vm518_vm6 = vmor %vm516_vm5, %vm517_vm3  ;;  %vm536_vm8 = vweird.f32 %v862_v53 }
 0x1ab   : > { %v513_v14 = vmul.f32 0.5, %v512_v7  ;;  %v462_v19 = vrot.slane %v461_v9, 2  ;;  %v472_v26 = vmul.f32 0.00390625, %v459_v17  ;;  %vm526_vm11 = vweird.f32 %v866_v33 }
 0x1ac   : > { %v709_v13 = vpop.eup %708  ;;  %v494_v15 = vsub.f32 1.5, %v493_v35  ;;  %v878_v21 = vadd.f32 1e-08, %v471_v10  ;;  %v880_v23 = vadd.f32 1e-08, %v467_v12  ;;  %v479_v12 = vld [vmem:[%s875_s30 + $0x28] sm:$0xff] }
 0x1ad   : > { %v531_v20 = vmul.f32 %v709_v13, %v862_v53  ;;  %v514_v16 = vsub.f32 1.5, %v513_v14  ;;  %v463_v28 = vadd.f32 %v462_v19, %v461_v9  ;;  %v711_v18 = vpop.eup %710  ;;  %v892_v42 = vadd.f32 1e-08, %v472_v26 }
 0x1ae   : > { %v495_v24 = vmul.f32 %v705_v25, %v494_v15  ;;  %712 = vrsqrt.f32 %v878_v21  ;;  %v521_v37 = vmul.f32 %v711_v18, %v866_v33  ;;  %vm537_vm7 = vweird.f32 %v709_v13 }
 0x1af   : > { %v532_v30 = vmul.f32 %v709_v13, %v531_v20  ;;  %v515_v32 = vmul.f32 %v707_v61, %v514_v16  ;;  %714 = vrsqrt.f32 %v880_v23  ;;  %v464_v44 = vrot.slane %v463_v28, 1  ;;  %vm538_vm9 = vmor %vm536_vm8, %vm537_vm7  ;;  %v475_v20 = vld [vmem:[%s875_s30 + $0x8] sm:$0xff] }
 0x1b0   : > { %v499_v36 = vsel %vm498_vm4, %v705_v25, %v495_v24  ;;  %v522_v43 = vmul.f32 %v711_v18, %v521_v37  ;;  %716 = vrsqrt.f32 %v892_v42  ;;  %vm527_vm10 = vweird.f32 %v711_v18  ;;  %v478_v25 = vld [vmem:[%s875_s30 + $0x20] sm:$0xff] }
 0x1b1   : > { %v570_v38 = vmul.f32 %v499_v36, %v809_v6  ;;  %v533_v41 = vmul.f32 0.5, %v532_v30  ;;  %v519_v39 = vsel %vm518_vm6, %v707_v61, %v515_v32  ;;  %v465_v50 = vadd.f32 %v464_v44, %v463_v28  ;;  %vm528_vm12 = vmor %vm526_vm11, %vm527_vm10 }
 0x1b2   : > { %v572_v46 = vmul.f32 %v519_v39, %v812_v11  ;;  %v523_v49 = vmul.f32 0.5, %v522_v43  ;;  %vm546_vm14 = vweird.f32 %v878_v21  ;;  %vm506_vm2 = vweird.f32 %v880_v23 }
 0x1b3   : > { %v578_v48 = vadd.f32 %v570_v38, %v474_v34  ;;  %v534_v6 = vsub.f32 1.5, %v533_v41  ;;  %v473_v55 = vmul.f32 0.00390625, %v465_v50  ;;  %vm556_vm5 = vweird.f32 %v892_v42  ;;  %v481_v38 = vld [vmem:[%s875_s30 + $0x38] sm:$0xff] }
 0x1b4   : > { %v713_v22 = vpop.eup %712  ;;  %v580_v51 = vadd.f32 %v572_v46, %v476_v29  ;;  %v524_v54 = vsub.f32 1.5, %v523_v49 }
 0x1b5   : > { %586 = vst.msk [vmem:[%s898_s7] sm:$0xff] %vm256_vm0, %v578_v48  ;;  %v535_v52 = vmul.f32 %v709_v13, %v534_v6  ;;  %v541_v11 = vmul.f32 %v713_v22, %v878_v21  ;;  %v715_v27 = vpop.eup %714  ;;  %v489_v63 = vadd.f32 1e-08, %v473_v55  ;;  %vm547_vm13 = vweird.f32 %v713_v22 }
 0x1b6   : > { %588 = vst.msk [vmem:[%s898_s7 + $0x10] sm:$0xff] %vm256_vm0, %v580_v51  ;;  %v525_v60 = vmul.f32 %v711_v18, %v524_v54  ;;  %v501_v53 = vmul.f32 %v715_v27, %v880_v23  ;;  %v717_v31 = vpop.eup %716  ;;  %vm507_vm15 = vweird.f32 %v715_v27  ;;  %vm548_vm1 = vmor %vm546_vm14, %vm547_vm13 }
 0x1b7   : > { %v539_v58 = vsel %vm538_vm9, %v709_v13, %v535_v52  ;;  %v542_v61 = vmul.f32 %v713_v22, %v541_v11  ;;  %v551_v33 = vmul.f32 %v717_v31, %v892_v42  ;;  %718 = vrsqrt.f32 %v489_v63  ;;  %vm508_vm3 = vmor %vm506_vm2, %vm507_vm15 }
 0x1b8   : > { %v574_v59 = vmul.f32 %v539_v58, %v821_v40  ;;  %v529_v2 = vsel %vm528_vm12, %v711_v18, %v525_v60  ;;  %v502_v4 = vmul.f32 %v715_v27, %v501_v53  ;;  %vm557_vm4 = vweird.f32 %v717_v31  ;;  %v480_v18 = vld [vmem:[%s875_s30 + $0x30] sm:$0xff] }
 0x1b9   : > { %v543_v3 = vmul.f32 0.5, %v542_v61  ;;  %v573_v5 = vmul.f32 %v529_v2, %v826_v45  ;;  %v552_v8 = vmul.f32 %v717_v31, %v551_v33  ;;  %vm558_vm6 = vmor %vm556_vm5, %vm557_vm4  ;;  %vm566_vm8 = vweird.f32 %v489_v63 }
 0x1ba   : > { %v582_v0 = vadd.f32 %v574_v59, %v478_v25  ;;  %v503_v7 = vmul.f32 0.5, %v502_v4 }
 0x1bb   : > { %v544_v40 = vsub.f32 1.5, %v543_v3  ;;  %v581_v35 = vadd.f32 %v573_v5, %v477_v1  ;;  %v553_v45 = vmul.f32 0.5, %v552_v8 }
 0x1bc   : > { %590 = vst.msk [vmem:[%s898_s7 + $0x20] sm:$0xff] %vm256_vm0, %v582_v0  ;;  %v504_v10 = vsub.f32 1.5, %v503_v7 }
 0x1bd   : > { %v545_v9 = vmul.f32 %v713_v22, %v544_v40  ;;  %589 = vst.msk [vmem:[%s898_s7 + $0x18] sm:$0xff] %vm256_vm0, %v581_v35  ;;  %v719_v15 = vpop.eup %718  ;;  %v554_v19 = vsub.f32 1.5, %v553_v45 }
 0x1be   : > { %v505_v14 = vmul.f32 %v715_v27, %v504_v10  ;;  %v561_v16 = vmul.f32 %v719_v15, %v489_v63  ;;  %vm567_vm7 = vweird.f32 %v719_v15 }
 0x1bf   : > { %v549_v13 = vsel %vm548_vm1, %v713_v22, %v545_v9  ;;  %v555_v28 = vmul.f32 %v717_v31, %v554_v19  ;;  %vm568_vm9 = vmor %vm566_vm8, %vm567_vm7 }
 0x1c0   : > { %v575_v17 = vmul.f32 %v549_v13, %v836_v56  ;;  %v509_v21 = vsel %vm508_vm3, %v715_v27, %v505_v14  ;;  %v562_v23 = vmul.f32 %v719_v15, %v561_v16 }
 0x1c1   : > { %v571_v26 = vmul.f32 %v509_v21, %v829_v47  ;;  %v559_v30 = vsel %vm558_vm6, %v717_v31, %v555_v28 }
 0x1c2   : > { %v583_v24 = vadd.f32 %v575_v17, %v479_v12  ;;  %v576_v32 = vmul.f32 %v559_v30, %v841_v57  ;;  %v563_v34 = vmul.f32 0.5, %v562_v23 }
 0x1c3   : > { %v579_v56 = vadd.f32 %v571_v26, %v475_v20 }
 0x1c4   : > { %591 = vst.msk [vmem:[%s898_s7 + $0x28] sm:$0xff] %vm256_vm0, %v583_v24  ;;  %v584_v36 = vadd.f32 %v576_v32, %v480_v18  ;;  %v564_v37 = vsub.f32 1.5, %v563_v34 }
 0x1c5   : > { %587 = vst.msk [vmem:[%s898_s7 + $0x8] sm:$0xff] %vm256_vm0, %v579_v56 }
 0x1c6   : > { %592 = vst.msk [vmem:[%s898_s7 + $0x30] sm:$0xff] %vm256_vm0, %v584_v36  ;;  %v565_v47 = vmul.f32 %v719_v15, %v564_v37 }
 0x1c8   : > { %v569_v41 = vsel %vm568_vm9, %v719_v15, %v565_v47 }
 0x1c9   : > { %v577_v42 = vmul.f32 %v569_v41, %v850_v62 }
 0x1cb   : > { %v585_v29 = vadd.f32 %v577_v42, %v481_v38 }
 0x1cd   : > { %593 = vst.msk [vmem:[%s898_s7 + $0x38] sm:$0xff] %vm256_vm0, %v585_v29 }
 0x1ce PF: > { %s14_s15 = sadd.s32 1, %s726_s15  }
 0x1cf   : > { %p11_p4 = scmp.ge.s32.totalorder %s14_s15, 6  }
 0x1d1   :  { %13 = sbr.rel (!%p11_p4) target bundleno = 1 (0x1), region = 69 }

// kernel: dparn_forward.9
= control target key start
LH: loop header
LB: loop body
LE: loop exit
PB: predicated region body
PF: predicated region fallthrough
CT: control target
= control target key end

     0   :  { %v233_v8 = vmov 128.0   ;;  %s407_s0 = inlined_call_operand.vmem [shape: f32[64,128], index: 0, kind: input, shape index: {}]   ;;  %s408_s1 = inlined_call_operand.vmem [shape: f32[64,128], index: 1, kind: input, shape index: {}]   ;;  %s409_s2 = inlined_call_operand.vmem [shape: f32[64,128], index: 2, kind: output, shape index: {}]  }
   0x1   :  { %v15_v0 = vld [vmem:[%s407_s0 + $0x20] sm:$0xff]  ;;  %v13_v1 = vld [vmem:[%s407_s0 + $0x10] sm:$0xff]  ;;  %v16_v3 = vld [vmem:[%s407_s0 + $0x28] sm:$0xff]  ;;  %215 = vrcp.f32 %v233_v8 }
   0x2   :  { %v11_v2 = vld [vmem:[%s407_s0] sm:$0xff]  ;;  %27 = vadd.xlane.f32.xlu2 %v15_v0  ;;  %23 = vadd.xlane.f32.xlu1 %v13_v1  ;;  %v14_v4 = vld [vmem:[%s407_s0 + $0x18] sm:$0xff]  ;;  %v12_v5 = vld [vmem:[%s407_s0 + $0x8] sm:$0xff] }
   0x3   :  { %19 = vadd.xlane.f32.xlu0 %v11_v2  ;;  %v18_v6 = vld [vmem:[%s407_s0 + $0x38] sm:$0xff]  ;;  %v17_v7 = vld [vmem:[%s407_s0 + $0x30] sm:$0xff] }
   0x7   :  { %v216_v9 = vpop.eup %215 }
   0x8   :  { %v36_v10 = vmul.f32 128.0, %v216_v9  ;;  %vm40_vm0 = vweird.f32 %v216_v9 }
   0xa   :  { %29 = vadd.xlane.f32.xlu2 %v16_v3  ;;  %25 = vadd.xlane.f32.xlu1 %v14_v4  ;;  %v37_v11 = vsub.f32 1.0, %v36_v10 }
   0xb   :  { %21 = vadd.xlane.f32.xlu0 %v12_v5 }
   0xc   :  { %v38_v12 = vmul.f32 %v216_v9, %v37_v11 }
   0xe   :  { %v39_v13 = vadd.f32 %v216_v9, %v38_v12 }
  0x10   :  { %v273_v14 = vsel %vm40_vm0, %v216_v9, %v39_v13 }
  0x12   :  { %33 = vadd.xlane.f32.xlu1 %v18_v6 }
  0x13   :  { %31 = vadd.xlane.f32.xlu0 %v17_v7 }
  0x75   :  { %v28_v15 = vpop.xlane.xlu2 %27  ;;  %v24_v16 = vpop.xlane.xlu1 %23 }
  0x76   :  { %v44_v17 = vmul.f32 %v273_v14, %v24_v16  ;;  %v20_v18 = vpop.xlane.xlu0 %19  ;;  %v46_v32 = vmul.f32 %v273_v14, %v28_v15 }
  0x77   :  { %v42_v19 = vmul.f32 %v273_v14, %v20_v18 }
  0x78   :  { %v277_v20 = vsub.f32 %v13_v1, %v44_v17  ;;  %v301_v37 = vsub.f32 %v15_v0, %v46_v32 }
  0x79   :  { %v279_v21 = vsub.f32 %v11_v2, %v42_v19 }
  0x7a   :  { %v60_v22 = vmul.f32 %v277_v20, %v277_v20  ;;  %v62_v42 = vmul.f32 %v301_v37, %v301_v37 }
  0x7b   :  { %v58_v23 = vmul.f32 %v279_v21, %v279_v21 }
  0x7c   :  { %70 = vadd.xlane.f32.xlu1 %v60_v22 }
  0x7d   :  { %66 = vadd.xlane.f32.xlu2 %v58_v23  ;;  %v30_v24 = vpop.xlane.xlu2 %29  ;;  %v26_v25 = vpop.xlane.xlu1 %25 }
  0x7e   :  { %v47_v26 = vmul.f32 %v273_v14, %v30_v24  ;;  %v45_v27 = vmul.f32 %v273_v14, %v26_v25  ;;  %v22_v28 = vpop.xlane.xlu0 %21  ;;  %v92_v24 = vld [vmem:[%s408_s1 + $0x10] sm:$0xff] }
  0x7f   :  { %v43_v29 = vmul.f32 %v273_v14, %v22_v28 }
  0x80   :  { %v288_v30 = vsub.f32 %v16_v3, %v47_v26  ;;  %v290_v31 = vsub.f32 %v14_v4, %v45_v27 }
  0x81   :  { %v293_v33 = vsub.f32 %v12_v5, %v43_v29  ;;  %v90_v29 = vld [vmem:[%s408_s1] sm:$0xff] }
  0x82   :  { %v63_v34 = vmul.f32 %v288_v30, %v288_v30  ;;  %v61_v35 = vmul.f32 %v290_v31, %v290_v31 }
  0x83   :  { %v59_v36 = vmul.f32 %v293_v33, %v293_v33 }
  0x84   :  { %76 = vadd.xlane.f32.xlu1 %v63_v34 }
  0x85   :  { %72 = vadd.xlane.f32.xlu2 %v61_v35  ;;  %68 = vadd.xlane.f32.xlu0 %v59_v36  ;;  %v34_v39 = vpop.xlane.xlu1 %33 }
  0x86   :  { %v32_v38 = vpop.xlane.xlu0 %31  ;;  %v49_v43 = vmul.f32 %v273_v14, %v34_v39 }
  0x87   :  { %v48_v40 = vmul.f32 %v273_v14, %v32_v38 }
  0x88   :  { %v311_v45 = vsub.f32 %v18_v6, %v49_v43 }
  0x89   :  { %v304_v41 = vsub.f32 %v17_v7, %v48_v40 }
  0x8a   :  { %v65_v46 = vmul.f32 %v311_v45, %v311_v45 }
  0x8b   :  { %v64_v44 = vmul.f32 %v304_v41, %v304_v41 }
  0x8d   :  { %74 = vadd.xlane.f32.xlu0 %v62_v42  ;;  %78 = vadd.xlane.f32.xlu2 %v64_v44 }
  0x95   :  { %80 = vadd.xlane.f32.xlu0 %v65_v46 }
  0xef   :  { %v71_v47 = vpop.xlane.xlu1 %70 }
  0xf0   :  { %v84_v48 = vmul.f32 %v71_v47, %v273_v14  ;;  %v67_v49 = vpop.xlane.xlu2 %66 }
  0xf1   :  { %v82_v50 = vmul.f32 %v67_v49, %v273_v14 }
  0xf2   :  { %v100_v51 = vadd.f32 1e-08, %v84_v48 }
  0xf3   :  { %v98_v52 = vadd.f32 1e-08, %v82_v50 }
  0xf4   :  { %217 = vrsqrt.f32 %v100_v51  ;;  %vm132_vm1 = vweird.f32 %v100_v51 }
  0xf5   :  { %219 = vrsqrt.f32 %v98_v52  ;;  %vm112_vm5 = vweird.f32 %v98_v52 }
  0xf7   :  { %v77_v53 = vpop.xlane.xlu1 %76 }
  0xf8   :  { %v87_v54 = vmul.f32 %v77_v53, %v273_v14  ;;  %v73_v55 = vpop.xlane.xlu2 %72  ;;  %v69_v56 = vpop.xlane.xlu0 %68 }
  0xf9   :  { %v85_v57 = vmul.f32 %v73_v55, %v273_v14  ;;  %v83_v58 = vmul.f32 %v69_v56, %v273_v14 }
  0xfa   :  { %v218_v59 = vpop.eup %217  ;;  %v103_v60 = vadd.f32 1e-08, %v87_v54 }
  0xfb   :  { %v220_v61 = vpop.eup %219  ;;  %v127_v62 = vmul.f32 %v218_v59, %v100_v51  ;;  %v320_v63 = vadd.f32 1e-08, %v85_v57  ;;  %v322_v0 = vadd.f32 1e-08, %v83_v58  ;;  %vm133_vm2 = vweird.f32 %v218_v59  ;;  %v93_v58 = vld [vmem:[%s408_s1 + $0x18] sm:$0xff] }
  0xfc   :  { %v107_v1 = vmul.f32 %v220_v61, %v98_v52  ;;  %221 = vrsqrt.f32 %v103_v60  ;;  %vm113_vm3 = vweird.f32 %v220_v61  ;;  %vm134_vm4 = vmor %vm132_vm1, %vm133_vm2  ;;  %vm162_vm7 = vweird.f32 %v103_v60  ;;  %v95_v52 = vld [vmem:[%s408_s1 + $0x28] sm:$0xff] }
  0xfd   :  { %v128_v2 = vmul.f32 %v218_v59, %v127_v62  ;;  %223 = vrsqrt.f32 %v320_v63  ;;  %vm114_vm6 = vmor %vm112_vm5, %vm113_vm3  ;;  %vm142_vm10 = vweird.f32 %v320_v63  ;;  %vm122_vm14 = vweird.f32 %v322_v0 }
  0xfe   :  { %v108_v3 = vmul.f32 %v220_v61, %v107_v1  ;;  %225 = vrsqrt.f32 %v322_v0 }
  0xff   :  { %v129_v4 = vmul.f32 0.5, %v128_v2 }
 0x100   :  { %v109_v5 = vmul.f32 0.5, %v108_v3  ;;  %v79_v6 = vpop.xlane.xlu2 %78  ;;  %v75_v7 = vpop.xlane.xlu0 %74 }
 0x101   :  { %v130_v8 = vsub.f32 1.5, %v129_v4  ;;  %v88_v9 = vmul.f32 %v79_v6, %v273_v14  ;;  %v86_v10 = vmul.f32 %v75_v7, %v273_v14 }
 0x102   :  { %v222_v11 = vpop.eup %221  ;;  %v110_v12 = vsub.f32 1.5, %v109_v5 }
 0x103   :  { %v224_v13 = vpop.eup %223  ;;  %v131_v15 = vmul.f32 %v218_v59, %v130_v8  ;;  %v157_v16 = vmul.f32 %v222_v11, %v103_v60  ;;  %v328_v17 = vadd.f32 1e-08, %v88_v9  ;;  %v332_v23 = vadd.f32 1e-08, %v86_v10  ;;  %v96_v10 = vld [vmem:[%s408_s1 + $0x30] sm:$0xff] }
 0x104   :  { %v226_v18 = vpop.eup %225  ;;  %v111_v19 = vmul.f32 %v220_v61, %v110_v12  ;;  %v137_v22 = vmul.f32 %v224_v13, %v320_v63  ;;  %vm163_vm8 = vweird.f32 %v222_v11  ;;  %vm143_vm11 = vweird.f32 %v224_v13 }
 0x105   :  { %v135_v25 = vsel %vm134_vm4, %v218_v59, %v131_v15  ;;  %v158_v26 = vmul.f32 %v222_v11, %v157_v16  ;;  %v117_v27 = vmul.f32 %v226_v18, %v322_v0  ;;  %227 = vrsqrt.f32 %v328_v17  ;;  %vm350_vm9 = vmor %vm162_vm7, %vm163_vm8  ;;  %v94_v16 = vld [vmem:[%s408_s1 + $0x20] sm:$0xff] }
 0x106   :  { %v188_v28 = vmul.f32 %v135_v25, %v277_v20  ;;  %v115_v32 = vsel %vm114_vm6, %v220_v61, %v111_v19  ;;  %v138_v34 = vmul.f32 %v224_v13, %v137_v22  ;;  %229 = vrsqrt.f32 %v332_v23  ;;  %vm144_vm13 = vmor %vm142_vm10, %vm143_vm11  ;;  %v91_v61 = vld [vmem:[%s408_s1 + $0x8] sm:$0xff] }
 0x107   :  { %v186_v35 = vmul.f32 %v115_v32, %v279_v21  ;;  %v159_v36 = vmul.f32 0.5, %v158_v26  ;;  %v118_v38 = vmul.f32 %v226_v18, %v117_v27  ;;  %vm123_vm12 = vweird.f32 %v226_v18 }
 0x108   :  { %v196_v39 = vadd.f32 %v188_v28, %v92_v24  ;;  %v139_v40 = vmul.f32 0.5, %v138_v34  ;;  %v81_v42 = vpop.xlane.xlu0 %80  ;;  %vm124_vm15 = vmor %vm122_vm14, %vm123_vm12  ;;  %vm172_vm0 = vweird.f32 %v328_v17  ;;  %vm152_vm4 = vweird.f32 %v332_v23 }
 0x109   :  { %v194_v43 = vadd.f32 %v186_v35, %v90_v29  ;;  %v160_v20 = vsub.f32 1.5, %v159_v36  ;;  %v119_v44 = vmul.f32 0.5, %v118_v38  ;;  %v89_v46 = vmul.f32 %v81_v42, %v273_v14 }
 0x10a   :  { %204 = vst [vmem:[%s409_s2 + $0x10] sm:$0xff] %v196_v39  ;;  %v140_v47 = vsub.f32 1.5, %v139_v40 }
 0x10b   :  { %202 = vst [vmem:[%s409_s2] sm:$0xff] %v194_v43  ;;  %v161_v48 = vmul.f32 %v222_v11, %v160_v20  ;;  %v120_v49 = vsub.f32 1.5, %v119_v44  ;;  %v105_v14 = vadd.f32 1e-08, %v89_v46  ;;  %v228_v50 = vpop.eup %227 }
 0x10c   :  { %v141_v51 = vmul.f32 %v224_v13, %v140_v47  ;;  %v167_v55 = vmul.f32 %v228_v50, %v328_v17  ;;  %v230_v56 = vpop.eup %229  ;;  %vm173_vm1 = vweird.f32 %v228_v50 }
 0x10d   :  { %v165_v53 = vsel %vm350_vm9, %v222_v11, %v161_v48  ;;  %v121_v54 = vmul.f32 %v226_v18, %v120_v49  ;;  %231 = vrsqrt.f32 %v105_v14  ;;  %v147_v0 = vmul.f32 %v230_v56, %v332_v23  ;;  %vm174_vm3 = vmor %vm172_vm0, %vm173_vm1 }
 0x10e   :  { %v191_v57 = vmul.f32 %v165_v53, %v288_v30  ;;  %v145_v59 = vsel %vm144_vm13, %v224_v13, %v141_v51  ;;  %v168_v63 = vmul.f32 %v228_v50, %v167_v55  ;;  %vm153_vm2 = vweird.f32 %v230_v56 }
 0x10f   :  { %v189_v60 = vmul.f32 %v145_v59, %v290_v31  ;;  %v125_v62 = vsel %vm124_vm15, %v226_v18, %v121_v54  ;;  %v148_v4 = vmul.f32 %v230_v56, %v147_v0  ;;  %vm154_vm5 = vmor %vm152_vm4, %vm153_vm2  ;;  %vm182_vm7 = vweird.f32 %v105_v14 }
 0x110   :  { %v199_v1 = vadd.f32 %v191_v57, %v95_v52  ;;  %v187_v30 = vmul.f32 %v125_v62, %v293_v33  ;;  %v169_v3 = vmul.f32 0.5, %v168_v63 }
 0x111   :  { %v197_v2 = vadd.f32 %v189_v60, %v93_v58  ;;  %v149_v6 = vmul.f32 0.5, %v148_v4 }
 0x112   :  { %207 = vst [vmem:[%s409_s2 + $0x28] sm:$0xff] %v199_v1  ;;  %v195_v5 = vadd.f32 %v187_v30, %v91_v61  ;;  %v170_v31 = vsub.f32 1.5, %v169_v3 }
 0x113   :  { %205 = vst [vmem:[%s409_s2 + $0x18] sm:$0xff] %v197_v2  ;;  %v232_v7 = vpop.eup %231  ;;  %v150_v8 = vsub.f32 1.5, %v149_v6 }
 0x114   :  { %203 = vst [vmem:[%s409_s2 + $0x8] sm:$0xff] %v195_v5  ;;  %v171_v33 = vmul.f32 %v228_v50, %v170_v31  ;;  %v177_v9 = vmul.f32 %v232_v7, %v105_v14  ;;  %vm183_vm6 = vweird.f32 %v232_v7 }
 0x115   :  { %v151_v12 = vmul.f32 %v230_v56, %v150_v8  ;;  %vm184_vm8 = vmor %vm182_vm7, %vm183_vm6 }
 0x116   :  { %v175_v11 = vsel %vm174_vm3, %v228_v50, %v171_v33  ;;  %v178_v13 = vmul.f32 %v232_v7, %v177_v9 }
 0x117   :  { %v192_v15 = vmul.f32 %v175_v11, %v304_v41  ;;  %v155_v17 = vsel %vm154_vm5, %v230_v56, %v151_v12  ;;  %v97_v41 = vld [vmem:[%s408_s1 + $0x38] sm:$0xff] }
 0x118   :  { %v179_v18 = vmul.f32 0.5, %v178_v13  ;;  %v190_v22 = vmul.f32 %v155_v17, %v301_v37 }
 0x119   :  { %v200_v19 = vadd.f32 %v192_v15, %v96_v10 }
 0x11a   :  { %v180_v24 = vsub.f32 1.5, %v179_v18  ;;  %v198_v23 = vadd.f32 %v190_v22, %v94_v16 }
 0x11b   :  { %208 = vst [vmem:[%s409_s2 + $0x30] sm:$0xff] %v200_v19 }
 0x11c   :  { %v181_v25 = vmul.f32 %v232_v7, %v180_v24  ;;  %206 = vst [vmem:[%s409_s2 + $0x20] sm:$0xff] %v198_v23 }
 0x11e   :  { %v185_v26 = vsel %vm184_vm8, %v232_v7, %v181_v25 }
 0x11f   :  { %v193_v37 = vmul.f32 %v185_v26, %v311_v45 }
 0x121   :  { %v201_v27 = vadd.f32 %v193_v37, %v97_v41 }
 0x123   :  { %209 = vst [vmem:[%s409_s2 + $0x38] sm:$0xff] %v201_v27 }

// kernel: dparn_forward.8
= control target key start
LH: loop header
LB: loop body
LE: loop exit
PB: predicated region body
PF: predicated region fallthrough
CT: control target
= control target key end

     0   :  { %s2279_s21 = smov 0   ;;  %s2281_s22 = smov 0   ;;  %s2728_s0 = inlined_call_operand.vmem [shape: f32[8,32,32], index: 0, kind: input, shape index: {}]   ;;  %s2729_s1 = inlined_call_operand.vmem [shape: bf16[32,128], index: 1, kind: input, shape index: {}]   ;;  %s2730_s2 = inlined_call_operand.vmem [shape: bf16[32,128], index: 2, kind: input, shape index: {}]   ;;  %s2731_s3 = inlined_call_operand.vmem [shape: f32[1,128], index: 3, kind: input, shape index: {}]   ;;  %s2732_s4 = inlined_call_operand.vmem [shape: bf16[32,32], index: 4, kind: input, shape index: {}]   ;;  %s2733_s5 = inlined_call_operand.vmem [shape: f32[1,32], index: 5, kind: input, shape index: {}]   ;;  %s2734_s6 = inlined_call_operand.vmem [shape: f32[8,32,32], index: 6, kind: output, shape index: {}]  }
   0x1   :  { %s2283_s23 = smov 0  }
   0x2 LB: > { %s1824_s24 = sadd.s32 4294967295, %s2239_s23   ;;  %s2296_s25 = sadd.s32 1, %s2239_s23   ;;  %s2239_s23 = sphi %s2283_s23, %s2738_s23   ;;  %s2235_s22 = sphi %s2281_s22, %s2737_s22   ;;  %s2231_s21 = sphi %s2279_s21, %s2736_s21  }
   0x3   : > { %s20_s26 = ssub.s32 %s2239_s23, %s2296_s25  ;;  %s23_s27 = sadd.s32 1, %s2235_s22 }
   0x4   : > { %p21_p0 = scmp.eq.s32.totalorder %s20_s26, 0  ;;  %p30_p1 = scmp.ne.s32.totalorder %s2235_s22, %s2231_s21 }
   0x5   : > { %p31_p2 = scmp.eq.s32.totalorder %s2239_s23, 0  ;;  %p165_p3 = scmp.eq.s32.totalorder %s1824_s24, 1 }
   0x6   : > { %s2307_s28 = scalar_select %p21_p0, %s2235_s22, %s23_s27  }
   0x7   : > { %p32_p4 = por %p31_p2, %p30_p1  ;;  %p2309_p5 = por %p165_p3, %p30_p1 }
   0x8   : > { %p1827_p6 = scmp.ge.s32.totalorder %s2239_s23, 2 }
   0xa   : > { %202 = sbr.rel (%p1827_p6) target bundleno = 35 (0x23), region = 36 }
   0xf   : > { %205 = sbr.rel (!%p32_p4) target bundleno = 35 (0x23), region = 40  ;;  %s207_s30 = sand.u32 (%p32_p4), 1, %s2235_s22  }
  0x10   : > { %s2012_s7 = sshll.u32 (%p32_p4), %s2239_s23, 4  ;;  %s1828_s8 = sshll.u32 (%p32_p4), %s207_s30, 7 }
  0x11   : > { %s2319_s11 = scalar_lea.vmem (%p32_p4), %s2728_s0, %s2012_s7  ;;  %s209_s12 = scalar_lea.vmem (%p32_p4), [#allocation2], %s1828_s8 }
  0x12   : > { %v271_v0 = vld [vmem:[%s2319_s11] sm:$0xff] (%p32_p4)  ;;  %v273_v1 = vld [vmem:[%s2319_s11 + $0x8] sm:$0xff] (%p32_p4) }
  0x13   : > { %v275_v2 = vld [vmem:[%s2319_s11 + $0x20] sm:$0xff] (%p32_p4)  ;;  %272 = vst [vmem:[%s209_s12] sm:$0xff] (%p32_p4), %v271_v0  ;;  %v277_v3 = vld [vmem:[%s2319_s11 + $0x28] sm:$0xff] (%p32_p4) }
  0x14   : > { %274 = vst [vmem:[%s209_s12 + $0x8] sm:$0xff] %v273_v1  ;;  %v279_v4 = vld [vmem:[%s2319_s11 + $0x40] sm:$0xff]  ;;  %v281_v5 = vld [vmem:[%s2319_s11 + $0x48] sm:$0xff] }
  0x15   : > { %276 = vst [vmem:[%s209_s12 + $0x10] sm:$0xff] %v275_v2  ;;  %v283_v6 = vld [vmem:[%s2319_s11 + $0x60] sm:$0xff]  ;;  %v285_v7 = vld [vmem:[%s2319_s11 + $0x68] sm:$0xff] }
  0x16   : > { %278 = vst [vmem:[%s209_s12 + $0x18] sm:$0xff] %v277_v3  ;;  %v287_v8 = vld [vmem:[%s2319_s11 + $0x80] sm:$0xff]  ;;  %v289_v9 = vld [vmem:[%s2319_s11 + $0x88] sm:$0xff] }
  0x17   : > { %280 = vst [vmem:[%s209_s12 + $0x20] sm:$0xff] %v279_v4  ;;  %v291_v10 = vld [vmem:[%s2319_s11 + $0xa0] sm:$0xff]  ;;  %v293_v11 = vld [vmem:[%s2319_s11 + $0xa8] sm:$0xff] }
  0x18   : > { %282 = vst [vmem:[%s209_s12 + $0x28] sm:$0xff] %v281_v5  ;;  %v295_v12 = vld [vmem:[%s2319_s11 + $0xc0] sm:$0xff]  ;;  %v297_v13 = vld [vmem:[%s2319_s11 + $0xc8] sm:$0xff] }
  0x19   : > { %284 = vst [vmem:[%s209_s12 + $0x30] sm:$0xff] %v283_v6  ;;  %v299_v14 = vld [vmem:[%s2319_s11 + $0xe0] sm:$0xff]  ;;  %v301_v15 = vld [vmem:[%s2319_s11 + $0xe8] sm:$0xff] }
  0x1a   : > { %286 = vst [vmem:[%s209_s12 + $0x38] sm:$0xff] %v285_v7 }
  0x1b   : > { %288 = vst [vmem:[%s209_s12 + $0x40] sm:$0xff] %v287_v8 }
  0x1c   : > { %290 = vst [vmem:[%s209_s12 + $0x48] sm:$0xff] %v289_v9 }
  0x1d   : > { %292 = vst [vmem:[%s209_s12 + $0x50] sm:$0xff] %v291_v10 }
  0x1e   : > { %294 = vst [vmem:[%s209_s12 + $0x58] sm:$0xff] %v293_v11 }
  0x1f   : > { %296 = vst [vmem:[%s209_s12 + $0x60] sm:$0xff] %v295_v12 }
  0x20   : > { %298 = vst [vmem:[%s209_s12 + $0x68] sm:$0xff] %v297_v13 }
  0x21   : > { %300 = vst [vmem:[%s209_s12 + $0x70] sm:$0xff] %v299_v14 }
  0x22   : > { %302 = vst [vmem:[%s209_s12 + $0x78] sm:$0xff] %v301_v15 }
  0x23 PF: > { %p1831_p7 = scmp.ge.s32.totalorder %s2239_s23, 1  ;;  %p307_p8 = scmp.lt.s32.totalorder %s2239_s23, 3 }
  0x25   : > { %p308_p9 = pnand %p1831_p7, %p307_p8 }
  0x26   : > { %s314_s17 = sand.u32 (!%p308_p9), 1, %s2231_s21   ;;  %s2242_s8 = smov (!%p308_p9), 64  }
  0x27   : > { %311 = sbr.rel (%p308_p9) target bundleno = 4933 (0x1345), region = 78  ;;  %s2349_s20 = sshll.u32 (!%p308_p9), %s314_s17, 7 }
  0x28   : > { %s2355_s30 = scalar_lea.vmem (!%p308_p9), [#allocation2], %s2349_s20  ;;  %s2243_s9 = smov (!%p308_p9), 32  }
  0x29   : > { %s2416_s26 = scalar_lea.vmem (!%p308_p9), [#allocation3], %s2349_s20 }
  0x2c   : > { %v2014_v16 = vld [vmem:[%s2729_s1 + $0x8] sm:$0xff]  ;;  %v2013_v18 = vld [vmem:[%s2729_s1] sm:$0xff]  ;;  %vm389_vm0 = vcmask 261120   ;;  %v2241_v23 = vmov 0   ;;  %v359_v11 = vld [vmem:[%s2355_s30 + $0x70] sm:$0xff] }
  0x2d   : > { %v2016_v17 = vld [vmem:[%s2730_s2 + $0x8] sm:$0xff]  ;;  %420 = vmatpush.bf16.msra.mxu0 %v2014_v16  ;;  %v2015_v19 = vld [vmem:[%s2730_s2] sm:$0xff]  ;;  %2049 = vmatpush.bf16.msra.mxu3 %v2014_v16  ;;  %v360_v12 = vld [vmem:[%s2355_s30 + $0x78] sm:$0xff] }
  0x2e   : > { %488 = vmatpush.bf16.msra.mxu1 %v2016_v17  ;;  %v345_v20 = vld [vmem:[%s2355_s30] sm:$0xff]  ;;  %v346_v21 = vld [vmem:[%s2355_s30 + $0x8] sm:$0xff]  ;;  %2048 = vmatpush.bf16.msra.mxu2 %v2014_v16  ;;  %v368_v14 = vpack.c.bf16 %v360_v12, %v359_v11 }
  0x2f   : > { %v361_v22 = vpack.c.bf16 %v346_v21, %v345_v20  ;;  %v2363_v24 = vld [vmem:[%s2731_s3] ss:$0 sm:$0xff]  ;;  %v358_v15 = vld [vmem:[%s2355_s30 + $0x68] sm:$0xff]  ;;  %v348_v20 = vld [vmem:[%s2355_s30 + $0x18] sm:$0xff] }
  0x30   : > { %v357_v13 = vld [vmem:[%s2355_s30 + $0x60] sm:$0xff]  ;;  %v2020_v16 = vld [vmem:[%s2730_s2 + $0x8] sm:$0xff] }
  0x31   : > { %421 = vmatpush.bf16.msra.mxu0 %v2013_v18  ;;  %2051 = vmatpush.bf16.msra.mxu3 %v2013_v18  ;;  %v367_v17 = vpack.c.bf16 %v358_v15, %v357_v13 }
  0x32   : > { %489 = vmatpush.bf16.msra.mxu1 %v2015_v19  ;;  %2050 = vmatpush.bf16.msra.mxu2 %v2013_v18  ;;  %v2018_v18 = vld [vmem:[%s2732_s4 + $0x8] sm:$0xff]  ;;  %v347_v19 = vld [vmem:[%s2355_s30 + $0x10] sm:$0xff] }
  0x33   : > { %v362_v21 = vpack.c.bf16 %v348_v20, %v347_v19 }
  0x34   : > { %1842 = vmatmul.msk.bf16.vlgmr.msra.gmra.mxu0 %vm389_vm0, %v361_v22  ;;  %1849 = vmatmul.msk.bf16.vlgmr.msra.gmra.mxu3 %vm389_vm0, %v368_v14  ;;  %v2019_v22 = vld [vmem:[%s2730_s2] sm:$0xff] }
  0x35   : > { %490 = vmatmul.bf16.vlgmr.msra.gmra.mxu1 %v2241_v23  ;;  %1848 = vmatmul.msk.bf16.vlgmr.msra.gmra.mxu2 %vm389_vm0, %v367_v17  ;;  %v2017_v23 = vld [vmem:[%s2732_s4] sm:$0xff] }
  0x36   : > { %637 = vmatpush.bf16.msrb.mxu3 %v2020_v16  ;;  %605 = vmatpush.bf16.msrb.mxu2 %v2018_v18 }
  0x3a   : > { %638 = vmatpush.bf16.msrb.mxu3 %v2019_v22  ;;  %606 = vmatpush.bf16.msrb.mxu2 %v2017_v23 }
  0x44   : > { %1843 = vmatmul.msk.bf16.gmra.mxu0 %vm389_vm0, %v362_v21 }
  0xb1   : > { %v423_v25 = vpop.f32.mrf.mxu0 }
  0xb2   : > { %v491_v26 = vpop.f32.mrf.mxu1  ;;  %v424_v27 = vadd.f32 %v2363_v24, %v423_v25 }
  0xb4   : > { %v496_v28 = vadd.f32 %v491_v26, %v424_v27 }
  0xb6   : > { %2088 = vtanh.f32 %v496_v28  ;;  %v498_v35 = vsub.f32 0.0, %v496_v28 }
  0xb8   : > { %v500_v36 = vmul.f32 1.442695, %v498_v35 }
  0xb9   : > { %v425_v29 = vpop.f32.mrf.mxu0 }
  0xba   : > { %v426_v30 = vadd.f32 %v2363_v24, %v425_v29  ;;  %v493_v31 = vpop.f32.mrf.mxu1 }
  0xbc   : > { %v2089_v32 = vpop.eup %2088  ;;  %v497_v33 = vadd.f32 %v493_v31, %v426_v30  ;;  %v2403_v31 = vpop.f32.mrf.mxu2 }
  0xbd   : > { %542 = vrot.lane.b32.xlu0 %v2089_v32, %s2242_s8  ;;  %v2405_v32 = vpop.f32.mrf.mxu3 }
  0xbe   : > { %2090 = vtanh.f32 %v497_v33  ;;  %v499_v37 = vsub.f32 0.0, %v497_v33 }
  0xbf   : > { %2092 = vpow2.f32 %v500_v36 }
  0xc0   : > { %v502_v38 = vmul.f32 1.442695, %v499_v37  ;;  %v2080_v37 = vld [vmem:[%s2733_s5] ss:$0 sm:$0xff] }
  0xc1   : > { %v428_v35 = vpop.f32.mrf.mxu0 }
  0xc2   : > { %2094 = vpow2.f32 %v502_v38  ;;  %v429_v36 = vadd.f32 %v2363_v24, %v428_v35  ;;  %v350_v35 = vld [vmem:[%s2355_s30 + $0x28] sm:$0xff] }
  0xc4   : > { %v2091_v34 = vpop.eup %2090  ;;  %v2407_v33 = vpop.f32.mrf.mxu2 }
  0xc5   : > { %544 = vrot.lane.b32.xlu0 %v2091_v34, %s2242_s8  ;;  %v2093_v39 = vpop.eup %2092  ;;  %v2409_v34 = vpop.f32.mrf.mxu3 }
  0xc6   : > { %v504_v40 = vadd.f32 1.0, %v2093_v39 }
  0xc8   : > { %2096 = vrcp.f32 %v504_v40  ;;  %v2095_v41 = vpop.eup %2094  ;;  %v517_v51 = vand.u32 2147483648, %v504_v40  ;;  %vm511_vm2 = vweird.f32 %v504_v40  ;;  %v515_v52 = vand.u32 2147483647, %v504_v40 }
  0xc9   : > { %v505_v42 = vadd.f32 1.0, %v2095_v41 }
  0xca   : > { %v518_v55 = vor.u32 1.1754944e-38, %v517_v51  ;;  %vm516_vm4 = vcmp.eq.f32.partialorder %v515_v52, 8.507059e+37 }
  0xcb   : > { %2098 = vrcp.f32 %v505_v42  ;;  %v532_v60 = vand.u32 2147483648, %v505_v42  ;;  %vm526_vm6 = vweird.f32 %v505_v42  ;;  %v530_v61 = vand.u32 2147483647, %v505_v42 }
  0xcd   : > { %v533_v63 = vor.u32 1.1754944e-38, %v532_v60  ;;  %vm531_vm8 = vcmp.eq.f32.partialorder %v530_v61, 8.507059e+37 }
  0xce   : > { %v2097_v43 = vpop.eup %2096 }
  0xcf   : > { %v507_v44 = vmul.f32 %v2097_v43, %v504_v40  ;;  %vm512_vm1 = vweird.f32 %v2097_v43 }
  0xd0   : > { %vm513_vm3 = vmor %vm511_vm2, %vm512_vm1 }
  0xd1   : > { %v508_v45 = vsub.f32 1.0, %v507_v44  ;;  %v2099_v46 = vpop.eup %2098 }
  0xd2   : > { %v522_v48 = vmul.f32 %v2099_v46, %v505_v42  ;;  %vm527_vm5 = vweird.f32 %v2099_v46  ;;  %v430_v42 = vpop.f32.mrf.mxu0 }
  0xd3   : > { %v509_v47 = vmul.f32 %v2097_v43, %v508_v45  ;;  %vm528_vm7 = vmor %vm526_vm6, %vm527_vm5 }
  0xd4   : > { %v523_v50 = vsub.f32 1.0, %v522_v48 }
  0xd5   : > { %v510_v49 = vadd.f32 %v2097_v43, %v509_v47 }
  0xd6   : > { %v524_v54 = vmul.f32 %v2099_v46, %v523_v50 }
  0xd7   : > { %v514_v53 = vsel %vm513_vm3, %v2097_v43, %v510_v49  ;;  %v431_v43 = vadd.f32 %v2363_v24, %v430_v42 }
  0xd8   : > { %v519_v57 = vsel %vm516_vm4, %v518_v55, %v514_v53  ;;  %v525_v59 = vadd.f32 %v2099_v46, %v524_v54 }
  0xd9   : > { %v538_v3 = vmul.f32 0.0, %v519_v57 }
  0xda   : > { %v529_v62 = vsel %vm528_vm7, %v2099_v46, %v525_v59 }
  0xdb   : > { %v534_v0 = vsel %vm531_vm8, %v533_v63, %v529_v62 }
  0xdc   : > { %v539_v6 = vmul.f32 0.0, %v534_v0 }
 0x12f   : > { %v543_v56 = vpop.permute.xlu0 %542 }
 0x130   : > { %v548_v58 = vmul.f32 %v543_v56, %v519_v57 }
 0x132   : > { %552 = vrot.lane.b32.xlu1 %v548_v58, %s2243_s9 }
 0x137   : > { %v545_v1 = vpop.permute.xlu0 %544 }
 0x138   : > { %v549_v2 = vmul.f32 %v545_v1, %v534_v0 }
 0x13a   : > { %554 = vrot.lane.b32.xlu1 %v549_v2, %s2243_s9 }
 0x1a4   : > { %v553_v4 = vpop.permute.xlu1 %552 }
 0x1a5   : > { %v2371_v5 = vadd.f32 %v553_v4, %v538_v3 }
 0x1a7   : > { %2100 = vtanh.f32 %v2371_v5 }
 0x1ac   : > { %v555_v7 = vpop.permute.xlu1 %554 }
 0x1ad   : > { %v2101_v8 = vpop.eup %2100  ;;  %v2374_v9 = vadd.f32 %v555_v7, %v539_v6 }
 0x1ae   : > { %564 = vrot.lane.b32.xlu2 %v2101_v8, %s2242_s8 }
 0x1af   : > { %2102 = vtanh.f32 %v2374_v9 }
 0x1b5   : > { %v2103_v10 = vpop.eup %2102 }
 0x1b6   : > { %566 = vrot.lane.b32.xlu2 %v2103_v10, %s2242_s8 }
 0x208   : > { %v565_v25 = vpop.permute.xlu2 %564 }
 0x209   : > { %v570_v27 = vmul.f32 %v565_v25, %v519_v57 }
 0x210   : > { %v567_v26 = vpop.permute.xlu2 %566 }
 0x211   : > { %v571_v28 = vmul.f32 %v567_v26, %v534_v0 }
 0x213   : > { %v572_v29 = vpack.c.bf16 %v571_v28, %v570_v27 }
 0x215   : > { %582 = vrot.lane.b32.xlu0 %v572_v29, %s2243_s9  ;;  %v2022_v29 = vld [vmem:[%s2732_s4 + $0x8] sm:$0xff] }
 0x216   : > { %754 = vmatpush.bf16.msrb.mxu1 %v2022_v29 }
 0x287   : > { %v583_v30 = vpop.permute.xlu0 %582 }
 0x288   : > { %1866 = vmatmul.msk.bf16.vlgmr.msrb.gmra.mxu2 %vm389_vm0, %v583_v30  ;;  %1875 = vmatmul.msk.bf16.vlgmr.msrb.gmra.mxu3 %vm389_vm0, %v583_v30  ;;  %v349_v30 = vld [vmem:[%s2355_s30 + $0x20] sm:$0xff] }
 0x30b   : > { %v608_v38 = vpop.f32.mrf.mxu2  ;;  %v640_v39 = vpop.f32.mrf.mxu3 }
 0x30c   : > { %v609_v40 = vadd.f32 %v2080_v37, %v608_v38  ;;  %v645_v41 = vadd.f32 %v640_v39, %v429_v36  ;;  %v363_v36 = vpack.c.bf16 %v350_v35, %v349_v30 }
 0x30e   : > { %613 = vst.msk [vmem:[%s2416_s26] sm:$0xff] %vm389_vm0, %v609_v40  ;;  %2104 = vtanh.f32 %v645_v41  ;;  %v647_v53 = vsub.f32 0.0, %v645_v41  ;;  %1844 = vmatmul.msk.bf16.gmra.mxu0 %vm389_vm0, %v363_v36 }
 0x310   : > { %v649_v55 = vmul.f32 1.442695, %v647_v53 }
 0x313   : > { %v610_v44 = vpop.f32.mrf.mxu2  ;;  %v642_v45 = vpop.f32.mrf.mxu3 }
 0x314   : > { %v2105_v46 = vpop.eup %2104  ;;  %v611_v47 = vadd.f32 %v2080_v37, %v610_v44  ;;  %v646_v48 = vadd.f32 %v642_v45, %v431_v43  ;;  %v2021_v37 = vld [vmem:[%s2732_s4] sm:$0xff] }
 0x315   : > { %691 = vrot.lane.b32.xlu1 %v2105_v46, %s2242_s8  ;;  %755 = vmatpush.bf16.msrb.mxu1 %v2021_v37  ;;  %v2081_v44 = vld [vmem:[%s2733_s5] ss:$0 sm:$0xff] }
 0x316   : > { %614 = vst.msk [vmem:[%s2416_s26 + $0x8] sm:$0xff] %vm389_vm0, %v611_v47  ;;  %2106 = vtanh.f32 %v646_v48  ;;  %v648_v50 = vsub.f32 0.0, %v646_v48 }
 0x318   : > { %v651_v51 = vmul.f32 1.442695, %v648_v50 }
 0x31a   : > { %2108 = vpow2.f32 %v651_v51 }
 0x31c   : > { %v2107_v49 = vpop.eup %2106 }
 0x31d   : > { %693 = vrot.lane.b32.xlu2 %v2107_v49, %s2242_s8 }
 0x320   : > { %v2109_v52 = vpop.eup %2108 }
 0x321   : > { %v654_v54 = vadd.f32 1.0, %v2109_v52 }
 0x323   : > { %2110 = vrcp.f32 %v654_v54  ;;  %v681_v0 = vand.u32 2147483648, %v654_v54  ;;  %vm675_vm10 = vweird.f32 %v654_v54  ;;  %v679_v1 = vand.u32 2147483647, %v654_v54 }
 0x324   : > { %2112 = vpow2.f32 %v649_v55 }
 0x325   : > { %v682_v4 = vor.u32 1.1754944e-38, %v681_v0  ;;  %vm680_vm12 = vcmp.eq.f32.partialorder %v679_v1, 8.507059e+37 }
 0x329   : > { %v2111_v56 = vpop.eup %2110 }
 0x32a   : > { %v2113_v57 = vpop.eup %2112  ;;  %v671_v58 = vmul.f32 %v2111_v56, %v654_v54  ;;  %vm676_vm9 = vweird.f32 %v2111_v56 }
 0x32b   : > { %v653_v59 = vadd.f32 1.0, %v2113_v57  ;;  %vm677_vm11 = vmor %vm675_vm10, %vm676_vm9 }
 0x32c   : > { %v672_v60 = vsub.f32 1.0, %v671_v58 }
 0x32d   : > { %2114 = vrcp.f32 %v653_v59  ;;  %v666_v13 = vand.u32 2147483648, %v653_v59  ;;  %vm660_vm14 = vweird.f32 %v653_v59  ;;  %v664_v14 = vand.u32 2147483647, %v653_v59 }
 0x32e   : > { %v673_v61 = vmul.f32 %v2111_v56, %v672_v60 }
 0x32f   : > { %v667_v16 = vor.u32 1.1754944e-38, %v666_v13  ;;  %vm665_vm1 = vcmp.eq.f32.partialorder %v664_v14, 8.507059e+37 }
 0x330   : > { %v674_v62 = vadd.f32 %v2111_v56, %v673_v61 }
 0x332   : > { %v678_v2 = vsel %vm677_vm11, %v2111_v56, %v674_v62 }
 0x333   : > { %v2115_v63 = vpop.eup %2114  ;;  %v683_v7 = vsel %vm680_vm12, %v682_v4, %v678_v2 }
 0x334   : > { %v656_v3 = vmul.f32 %v2115_v63, %v653_v59  ;;  %vm661_vm13 = vweird.f32 %v2115_v63  ;;  %v688_v20 = vmul.f32 %v683_v7, %v2374_v9  ;;  %v2024_v9 = vld [vmem:[%s2730_s2 + $0x8] sm:$0xff] }
 0x335   : > { %vm662_vm15 = vmor %vm660_vm14, %vm661_vm13  ;;  %787 = vmatpush.bf16.msra.mxu2 %v2024_v9 }
 0x336   : > { %v657_v10 = vsub.f32 1.0, %v656_v3 }
 0x338   : > { %v658_v11 = vmul.f32 %v2115_v63, %v657_v10 }
 0x33a   : > { %v659_v12 = vadd.f32 %v2115_v63, %v658_v11 }
 0x33c   : > { %v663_v15 = vsel %vm662_vm15, %v2115_v63, %v659_v12 }
 0x33d   : > { %v668_v18 = vsel %vm665_vm1, %v667_v16, %v663_v15 }
 0x33e   : > { %v687_v25 = vmul.f32 %v668_v18, %v2371_v5  ;;  %v2023_v5 = vld [vmem:[%s2730_s2] sm:$0xff] }
 0x33f   : > { %788 = vmatpush.bf16.msra.mxu2 %v2023_v5 }
 0x377   : > { %v694_v6 = vpop.permute.xlu2 %693 }
 0x378   : > { %v698_v8 = vmul.f32 %v694_v6, %v683_v7 }
 0x37a   : > { %703 = vrot.lane.b32.xlu1 %v698_v8, %s2243_s9 }
 0x387   : > { %v692_v17 = vpop.permute.xlu1 %691 }
 0x388   : > { %v697_v19 = vmul.f32 %v692_v17, %v668_v18 }
 0x38a   : > { %701 = vrot.lane.b32.xlu0 %v697_v19, %s2243_s9 }
 0x38b   : > { %v433_v45 = vpop.f32.mrf.mxu0 }
 0x38c   : > { %v434_v48 = vadd.f32 %v2363_v24, %v433_v45  ;;  %v2027_v45 = vld [vmem:[%s2730_s2] sm:$0xff] }
 0x393   : > { %v435_v53 = vpop.f32.mrf.mxu0 }
 0x394   : > { %v436_v54 = vadd.f32 %v2363_v24, %v435_v53 }
 0x3ec   : > { %v704_v21 = vpop.permute.xlu1 %703 }
 0x3ed   : > { %v2428_v22 = vadd.f32 %v704_v21, %v688_v20 }
 0x3ef   : > { %2116 = vtanh.f32 %v2428_v22 }
 0x3f5   : > { %v2117_v23 = vpop.eup %2116 }
 0x3f6   : > { %715 = vrot.lane.b32.xlu0 %v2117_v23, %s2242_s8 }
 0x3fc   : > { %v702_v26 = vpop.permute.xlu0 %701 }
 0x3fd   : > { %v2433_v27 = vadd.f32 %v702_v26, %v687_v25 }
 0x3ff   : > { %2118 = vtanh.f32 %v2433_v27 }
 0x405   : > { %v2119_v28 = vpop.eup %2118 }
 0x406   : > { %713 = vrot.lane.b32.xlu2 %v2119_v28, %s2242_s8 }
 0x460   : > { %v714_v38 = vpop.permute.xlu2 %713 }
 0x461   : > { %v719_v40 = vmul.f32 %v714_v38, %v668_v18 }
 0x468   : > { %v716_v39 = vpop.permute.xlu0 %715 }
 0x469   : > { %v720_v41 = vmul.f32 %v716_v39, %v683_v7 }
 0x46b   : > { %v721_v42 = vpack.c.bf16 %v720_v41, %v719_v40 }
 0x46d   : > { %731 = vrot.lane.b32.xlu1 %v721_v42, %s2243_s9  ;;  %v351_v42 = vld [vmem:[%s2355_s30 + $0x30] sm:$0xff] }
 0x4df   : > { %v732_v43 = vpop.permute.xlu1 %731 }
 0x4e0   : > { %1884 = vmatmul.msk.bf16.vlgmr.msrb.gmra.mxu1 %vm389_vm0, %v732_v43  ;;  %1895 = vmatmul.msk.bf16.vlgmr.msra.gmra.mxu2 %vm389_vm0, %v732_v43  ;;  %v352_v43 = vld [vmem:[%s2355_s30 + $0x38] sm:$0xff] }
 0x55d   : > { %v757_v46 = vpop.f32.mrf.mxu1 }
 0x55e   : > { %v758_v47 = vadd.f32 %v2081_v44, %v757_v46  ;;  %v2025_v46 = vld [vmem:[%s2732_s4] sm:$0xff] }
 0x560   : > { %1885 = vst.msk [vmem:[%s2416_s26 + $0x10] sm:$0xff] %vm389_vm0, %v758_v47 }
 0x563   : > { %v790_v49 = vpop.f32.mrf.mxu2 }
 0x564   : > { %v795_v50 = vadd.f32 %v790_v49, %v434_v48 }
 0x565   : > { %v759_v51 = vpop.f32.mrf.mxu1 }
 0x566   : > { %2120 = vtanh.f32 %v795_v50  ;;  %v760_v52 = vadd.f32 %v2081_v44, %v759_v51  ;;  %v797_v59 = vsub.f32 0.0, %v795_v50  ;;  %v364_v44 = vpack.c.bf16 %v352_v43, %v351_v42 }
 0x568   : > { %1886 = vst.msk [vmem:[%s2416_s26 + $0x18] sm:$0xff] %vm389_vm0, %v760_v52  ;;  %v799_v60 = vmul.f32 1.442695, %v797_v59  ;;  %1845 = vmatmul.msk.bf16.gmra.mxu0 %vm389_vm0, %v364_v44 }
 0x56b   : > { %v792_v55 = vpop.f32.mrf.mxu2 }
 0x56c   : > { %v2121_v56 = vpop.eup %2120  ;;  %v796_v57 = vadd.f32 %v792_v55, %v436_v54 }
 0x56d   : > { %841 = vrot.lane.b32.xlu2 %v2121_v56, %s2242_s8 }
 0x56e   : > { %2122 = vtanh.f32 %v796_v57  ;;  %v798_v1 = vsub.f32 0.0, %v796_v57  ;;  %v2082_v57 = vld [vmem:[%s2733_s5] ss:$0 sm:$0xff] }
 0x56f   : > { %2124 = vpow2.f32 %v799_v60 }
 0x570   : > { %v801_v3 = vmul.f32 1.442695, %v798_v1 }
 0x574   : > { %v2123_v58 = vpop.eup %2122 }
 0x575   : > { %843 = vrot.lane.b32.xlu0 %v2123_v58, %s2242_s8  ;;  %v2125_v61 = vpop.eup %2124 }
 0x576   : > { %v803_v62 = vadd.f32 1.0, %v2125_v61 }
 0x578   : > { %2126 = vrcp.f32 %v803_v62  ;;  %v816_v7 = vand.u32 2147483648, %v803_v62  ;;  %vm810_vm3 = vweird.f32 %v803_v62  ;;  %v814_v8 = vand.u32 2147483647, %v803_v62 }
 0x579   : > { %2128 = vpow2.f32 %v801_v3 }
 0x57a   : > { %v817_v12 = vor.u32 1.1754944e-38, %v816_v7  ;;  %vm815_vm5 = vcmp.eq.f32.partialorder %v814_v8, 8.507059e+37 }
 0x57e   : > { %v2127_v63 = vpop.eup %2126 }
 0x57f   : > { %v806_v0 = vmul.f32 %v2127_v63, %v803_v62  ;;  %vm811_vm2 = vweird.f32 %v2127_v63  ;;  %v2129_v10 = vpop.eup %2128 }
 0x580   : > { %vm812_vm4 = vmor %vm810_vm3, %vm811_vm2  ;;  %v804_v13 = vadd.f32 1.0, %v2129_v10 }
 0x581   : > { %v807_v2 = vsub.f32 1.0, %v806_v0 }
 0x582   : > { %2130 = vrcp.f32 %v804_v13  ;;  %v831_v23 = vand.u32 2147483648, %v804_v13  ;;  %vm825_vm7 = vweird.f32 %v804_v13  ;;  %v829_v25 = vand.u32 2147483647, %v804_v13 }
 0x583   : > { %v808_v4 = vmul.f32 %v2127_v63, %v807_v2 }
 0x584   : > { %v832_v28 = vor.u32 1.1754944e-38, %v831_v23  ;;  %vm830_vm9 = vcmp.eq.f32.partialorder %v829_v25, 8.507059e+37 }
 0x585   : > { %v809_v6 = vadd.f32 %v2127_v63, %v808_v4 }
 0x587   : > { %v813_v11 = vsel %vm812_vm4, %v2127_v63, %v809_v6 }
 0x588   : > { %v818_v15 = vsel %vm815_vm5, %v817_v12, %v813_v11  ;;  %v2131_v17 = vpop.eup %2130 }
 0x589   : > { %v821_v18 = vmul.f32 %v2131_v17, %v804_v13  ;;  %vm826_vm6 = vweird.f32 %v2131_v17  ;;  %v837_v35 = vmul.f32 %v818_v15, %v2433_v27  ;;  %v2028_v27 = vld [vmem:[%s2730_s2 + $0x8] sm:$0xff] }
 0x58a   : > { %vm827_vm8 = vmor %vm825_vm7, %vm826_vm6  ;;  %937 = vmatpush.bf16.msra.mxu1 %v2028_v27 }
 0x58b   : > { %v822_v19 = vsub.f32 1.0, %v821_v18 }
 0x58d   : > { %v823_v20 = vmul.f32 %v2131_v17, %v822_v19 }
 0x58e   : > { %938 = vmatpush.bf16.msra.mxu1 %v2027_v45 }
 0x58f   : > { %v824_v21 = vadd.f32 %v2131_v17, %v823_v20 }
 0x591   : > { %v828_v26 = vsel %vm827_vm8, %v2131_v17, %v824_v21 }
 0x592   : > { %v833_v29 = vsel %vm830_vm9, %v832_v28, %v828_v26 }
 0x593   : > { %v838_v37 = vmul.f32 %v833_v29, %v2428_v22  ;;  %v2026_v22 = vld [vmem:[%s2732_s4 + $0x8] sm:$0xff] }
 0x594   : > { %904 = vmatpush.bf16.msra.mxu3 %v2026_v22 }
 0x598   : > { %905 = vmatpush.bf16.msra.mxu3 %v2025_v46 }
 0x5c7   : > { %v842_v14 = vpop.permute.xlu2 %841 }
 0x5c8   : > { %v847_v16 = vmul.f32 %v842_v14, %v818_v15 }
 0x5ca   : > { %851 = vrot.lane.b32.xlu1 %v847_v16, %s2243_s9 }
 0x5e5   : > { %v438_v53 = vpop.f32.mrf.mxu0 }
 0x5e6   : > { %v439_v54 = vadd.f32 %v2363_v24, %v438_v53  ;;  %v354_v53 = vld [vmem:[%s2355_s30 + $0x48] sm:$0xff] }
 0x5e7   : > { %v844_v9 = vpop.permute.xlu0 %843 }
 0x5e8   : > { %v848_v30 = vmul.f32 %v844_v9, %v833_v29 }
 0x5ea   : > { %853 = vrot.lane.b32.xlu2 %v848_v30, %s2243_s9 }
 0x5ed   : > { %v440_v58 = vpop.f32.mrf.mxu0 }
 0x5ee   : > { %v441_v60 = vadd.f32 %v2363_v24, %v440_v58 }
 0x63c   : > { %v852_v5 = vpop.permute.xlu1 %851 }
 0x63d   : > { %v2469_v36 = vadd.f32 %v852_v5, %v837_v35 }
 0x63f   : > { %2132 = vtanh.f32 %v2469_v36 }
 0x644   : > { %v854_v38 = vpop.permute.xlu2 %853 }
 0x645   : > { %v2133_v39 = vpop.eup %2132  ;;  %v2473_v40 = vadd.f32 %v854_v38, %v838_v37 }
 0x646   : > { %863 = vrot.lane.b32.xlu0 %v2133_v39, %s2242_s8 }
 0x647   : > { %2134 = vtanh.f32 %v2473_v40 }
 0x64d   : > { %v2135_v41 = vpop.eup %2134 }
 0x64e   : > { %865 = vrot.lane.b32.xlu1 %v2135_v41, %s2242_s8 }
 0x6b8   : > { %v864_v47 = vpop.permute.xlu0 %863 }
 0x6b9   : > { %v869_v49 = vmul.f32 %v864_v47, %v818_v15 }
 0x6c0   : > { %v866_v48 = vpop.permute.xlu1 %865 }
 0x6c1   : > { %v870_v50 = vmul.f32 %v866_v48, %v833_v29 }
 0x6c3   : > { %v871_v51 = vpack.c.bf16 %v870_v50, %v869_v49 }
 0x6c5   : > { %881 = vrot.lane.b32.xlu2 %v871_v51, %s2243_s9  ;;  %v2030_v51 = vld [vmem:[%s2732_s4 + $0x8] sm:$0xff] }
 0x6c6   : > { %1054 = vmatpush.bf16.msrb.mxu2 %v2030_v51 }
 0x71f   : > { %v882_v52 = vpop.permute.xlu2 %881 }
 0x720   : > { %1904 = vmatmul.msk.bf16.vlgmr.msra.gmra.mxu3 %vm389_vm0, %v882_v52  ;;  %1915 = vmatmul.msk.bf16.vlgmr.msra.gmra.mxu1 %vm389_vm0, %v882_v52  ;;  %v353_v52 = vld [vmem:[%s2355_s30 + $0x40] sm:$0xff] }
 0x79d   : > { %v940_v55 = vpop.f32.mrf.mxu1 }
 0x79e   : > { %v945_v56 = vadd.f32 %v940_v55, %v439_v54  ;;  %v365_v54 = vpack.c.bf16 %v354_v53, %v353_v52  ;;  %v2029_v55 = vld [vmem:[%s2732_s4] sm:$0xff] }
 0x79f   : > { %1055 = vmatpush.bf16.msrb.mxu2 %v2029_v55 }
 0x7a0   : > { %2136 = vtanh.f32 %v945_v56  ;;  %v947_v4 = vsub.f32 0.0, %v945_v56  ;;  %1846 = vmatmul.msk.bf16.gmra.mxu0 %vm389_vm0, %v365_v54 }
 0x7a2   : > { %v949_v6 = vmul.f32 1.442695, %v947_v4 }
 0x7a3   : > { %v907_v59 = vpop.f32.mrf.mxu3 }
 0x7a4   : > { %v908_v61 = vadd.f32 %v2082_v57, %v907_v59 }
 0x7a5   : > { %v942_v62 = vpop.f32.mrf.mxu1 }
 0x7a6   : > { %v2137_v63 = vpop.eup %2136  ;;  %1905 = vst.msk [vmem:[%s2416_s26 + $0x20] sm:$0xff] %vm389_vm0, %v908_v61  ;;  %v946_v0 = vadd.f32 %v942_v62, %v441_v60 }
 0x7a7   : > { %991 = vrot.lane.b32.xlu0 %v2137_v63, %s2242_s8 }
 0x7a8   : > { %2138 = vtanh.f32 %v946_v0  ;;  %v948_v7 = vsub.f32 0.0, %v946_v0  ;;  %v2083_v0 = vld [vmem:[%s2733_s5] ss:$0 sm:$0xff] }
 0x7a9   : > { %2140 = vpow2.f32 %v949_v6 }
 0x7aa   : > { %v951_v8 = vmul.f32 1.442695, %v948_v7 }
 0x7ab   : > { %v909_v1 = vpop.f32.mrf.mxu3 }
 0x7ac   : > { %v910_v2 = vadd.f32 %v2082_v57, %v909_v1  ;;  %2142 = vpow2.f32 %v951_v8 }
 0x7ae   : > { %v2139_v3 = vpop.eup %2138  ;;  %1906 = vst.msk [vmem:[%s2416_s26 + $0x28] sm:$0xff] %vm389_vm0, %v910_v2 }
 0x7af   : > { %993 = vrot.lane.b32.xlu1 %v2139_v3, %s2242_s8  ;;  %v2141_v10 = vpop.eup %2140 }
 0x7b0   : > { %v953_v11 = vadd.f32 1.0, %v2141_v10 }
 0x7b2   : > { %2144 = vrcp.f32 %v953_v11  ;;  %v2143_v12 = vpop.eup %2142  ;;  %v966_v23 = vand.u32 2147483648, %v953_v11  ;;  %vm960_vm11 = vweird.f32 %v953_v11  ;;  %v964_v25 = vand.u32 2147483647, %v953_v11 }
 0x7b3   : > { %v954_v13 = vadd.f32 1.0, %v2143_v12 }
 0x7b4   : > { %v967_v9 = vor.u32 1.1754944e-38, %v966_v23  ;;  %vm965_vm13 = vcmp.eq.f32.partialorder %v964_v25, 8.507059e+37 }
 0x7b5   : > { %2146 = vrcp.f32 %v954_v13  ;;  %v981_v37 = vand.u32 2147483648, %v954_v13  ;;  %vm975_vm15 = vweird.f32 %v954_v13  ;;  %v979_v38 = vand.u32 2147483647, %v954_v13 }
 0x7b7   : > { %v982_v41 = vor.u32 1.1754944e-38, %v981_v37  ;;  %vm980_vm2 = vcmp.eq.f32.partialorder %v979_v38, 8.507059e+37 }
 0x7b8   : > { %v2145_v14 = vpop.eup %2144 }
 0x7b9   : > { %v956_v15 = vmul.f32 %v2145_v14, %v953_v11  ;;  %vm961_vm10 = vweird.f32 %v2145_v14 }
 0x7ba   : > { %vm962_vm12 = vmor %vm960_vm11, %vm961_vm10 }
 0x7bb   : > { %v957_v16 = vsub.f32 1.0, %v956_v15  ;;  %v2147_v17 = vpop.eup %2146 }
 0x7bc   : > { %v971_v19 = vmul.f32 %v2147_v17, %v954_v13  ;;  %vm976_vm14 = vweird.f32 %v2147_v17 }
 0x7bd   : > { %v958_v18 = vmul.f32 %v2145_v14, %v957_v16  ;;  %vm977_vm1 = vmor %vm975_vm15, %vm976_vm14 }
 0x7be   : > { %v972_v21 = vsub.f32 1.0, %v971_v19 }
 0x7bf   : > { %v959_v20 = vadd.f32 %v2145_v14, %v958_v18 }
 0x7c0   : > { %v973_v28 = vmul.f32 %v2147_v17, %v972_v21 }
 0x7c1   : > { %v963_v26 = vsel %vm962_vm12, %v2145_v14, %v959_v20 }
 0x7c2   : > { %v968_v30 = vsel %vm965_vm13, %v967_v9, %v963_v26  ;;  %v974_v5 = vadd.f32 %v2147_v17, %v973_v28 }
 0x7c3   : > { %v987_v44 = vmul.f32 %v968_v30, %v2469_v36  ;;  %v2032_v36 = vld [vmem:[%s2730_s2 + $0x8] sm:$0xff] }
 0x7c4   : > { %v978_v39 = vsel %vm977_vm1, %v2147_v17, %v974_v5  ;;  %1087 = vmatpush.bf16.msrb.mxu3 %v2032_v36 }
 0x7c5   : > { %v983_v42 = vsel %vm980_vm2, %v982_v41, %v978_v39 }
 0x7c6   : > { %v988_v47 = vmul.f32 %v983_v42, %v2473_v40  ;;  %v2031_v40 = vld [vmem:[%s2730_s2] sm:$0xff] }
 0x7c8   : > { %1088 = vmatpush.bf16.msrb.mxu3 %v2031_v40 }
 0x819   : > { %v992_v29 = vpop.permute.xlu0 %991 }
 0x81a   : > { %v997_v35 = vmul.f32 %v992_v29, %v968_v30 }
 0x81c   : > { %1001 = vrot.lane.b32.xlu2 %v997_v35, %s2243_s9 }
 0x81d   : > { %v443_v62 = vpop.f32.mrf.mxu0 }
 0x81e   : > { %v444_v63 = vadd.f32 %v2363_v24, %v443_v62 }
 0x821   : > { %v994_v27 = vpop.permute.xlu1 %993 }
 0x822   : > { %v998_v43 = vmul.f32 %v994_v27, %v983_v42 }
 0x824   : > { %1003 = vrot.lane.b32.xlu0 %v998_v43, %s2243_s9 }
 0x825   : > { %v445_v6 = vpop.f32.mrf.mxu0 }
 0x826   : > { %v446_v7 = vadd.f32 %v2363_v24, %v445_v6 }
 0x876   : > { %v1002_v22 = vpop.permute.xlu2 %1001 }
 0x877   : > { %v2510_v45 = vadd.f32 %v1002_v22, %v987_v44 }
 0x879   : > { %2148 = vtanh.f32 %v2510_v45 }
 0x87f   : > { %v2149_v46 = vpop.eup %2148 }
 0x880   : > { %1013 = vrot.lane.b32.xlu1 %v2149_v46, %s2242_s8 }
 0x896   : > { %v1004_v48 = vpop.permute.xlu0 %1003 }
 0x897   : > { %v2515_v49 = vadd.f32 %v1004_v48, %v988_v47 }
 0x899   : > { %2150 = vtanh.f32 %v2515_v49 }
 0x89f   : > { %v2151_v50 = vpop.eup %2150 }
 0x8a0   : > { %1015 = vrot.lane.b32.xlu2 %v2151_v50, %s2242_s8 }
 0x8f2   : > { %v1014_v56 = vpop.permute.xlu1 %1013 }
 0x8f3   : > { %v1019_v58 = vmul.f32 %v1014_v56, %v968_v30 }
 0x8fa   : > { %v1016_v57 = vpop.permute.xlu2 %1015 }
 0x8fb   : > { %v1020_v59 = vmul.f32 %v1016_v57, %v983_v42 }
 0x8fd   : > { %v1021_v60 = vpack.c.bf16 %v1020_v59, %v1019_v58  ;;  %v2034_v59 = vld [vmem:[%s2732_s4 + $0x8] sm:$0xff] }
 0x8fe   : > { %1204 = vmatpush.bf16.msrb.mxu1 %v2034_v59 }
 0x8ff   : > { %1031 = vrot.lane.b32.xlu0 %v1021_v60, %s2243_s9  ;;  %v355_v60 = vld [vmem:[%s2355_s30 + $0x50] sm:$0xff] }
 0x971   : > { %v1032_v61 = vpop.permute.xlu0 %1031 }
 0x972   : > { %1924 = vmatmul.msk.bf16.vlgmr.msrb.gmra.mxu2 %vm389_vm0, %v1032_v61  ;;  %1935 = vmatmul.msk.bf16.vlgmr.msrb.gmra.mxu3 %vm389_vm0, %v1032_v61  ;;  %v356_v61 = vld [vmem:[%s2355_s30 + $0x58] sm:$0xff] }
 0x973   : > { %v366_v62 = vpack.c.bf16 %v356_v61, %v355_v60 }
 0x975   : > { %1847 = vmatmul.msk.bf16.gmra.mxu0 %vm389_vm0, %v366_v62 }
 0x9f5   : > { %v1057_v1 = vpop.f32.mrf.mxu2  ;;  %v1090_v2 = vpop.f32.mrf.mxu3 }
 0x9f6   : > { %v1058_v3 = vadd.f32 %v2083_v0, %v1057_v1  ;;  %v1095_v4 = vadd.f32 %v1090_v2, %v444_v63  ;;  %v2033_v63 = vld [vmem:[%s2732_s4] sm:$0xff] }
 0x9f7   : > { %1205 = vmatpush.bf16.msrb.mxu1 %v2033_v63 }
 0x9f8   : > { %1925 = vst.msk [vmem:[%s2416_s26 + $0x30] sm:$0xff] %vm389_vm0, %v1058_v3  ;;  %2152 = vtanh.f32 %v1095_v4  ;;  %v1097_v18 = vsub.f32 0.0, %v1095_v4 }
 0x9fa   : > { %v1099_v24 = vmul.f32 1.442695, %v1097_v18 }
 0x9fd   : > { %v1059_v8 = vpop.f32.mrf.mxu2  ;;  %v1092_v10 = vpop.f32.mrf.mxu3 }
 0x9fe   : > { %v2153_v11 = vpop.eup %2152  ;;  %v1060_v12 = vadd.f32 %v2083_v0, %v1059_v8  ;;  %v1096_v13 = vadd.f32 %v1092_v10, %v446_v7  ;;  %v2084_v7 = vld [vmem:[%s2733_s5] ss:$0 sm:$0xff]  ;;  %v448_v8 = vpop.f32.mrf.mxu0 }
 0x9ff   : > { %1141 = vrot.lane.b32.xlu1 %v2153_v11, %s2242_s8 }
 0xa00   : > { %1926 = vst.msk [vmem:[%s2416_s26 + $0x38] sm:$0xff] %vm389_vm0, %v1060_v12  ;;  %2154 = vtanh.f32 %v1096_v13  ;;  %v1098_v15 = vsub.f32 0.0, %v1096_v13  ;;  %v2584_v12 = vld [vmem:[%s2731_s3] ss:$0 sm:$0xff] }
 0xa01   : > { %v449_v13 = vadd.f32 %v2584_v12, %v448_v8 }
 0xa02   : > { %v1101_v16 = vmul.f32 1.442695, %v1098_v15 }
 0xa04   : > { %2156 = vpow2.f32 %v1101_v16 }
 0xa06   : > { %v2155_v14 = vpop.eup %2154  ;;  %v450_v18 = vpop.f32.mrf.mxu0 }
 0xa07   : > { %1143 = vrot.lane.b32.xlu2 %v2155_v14, %s2242_s8 }
 0xa0a   : > { %v2157_v17 = vpop.eup %2156 }
 0xa0b   : > { %v1104_v19 = vadd.f32 1.0, %v2157_v17 }
 0xa0d   : > { %2158 = vrcp.f32 %v1104_v19  ;;  %v1131_v30 = vand.u32 2147483648, %v1104_v19  ;;  %vm1125_vm4 = vweird.f32 %v1104_v19  ;;  %v1129_v35 = vand.u32 2147483647, %v1104_v19 }
 0xa0e   : > { %2160 = vpow2.f32 %v1099_v24 }
 0xa0f   : > { %v1132_v38 = vor.u32 1.1754944e-38, %v1131_v30  ;;  %vm1130_vm6 = vcmp.eq.f32.partialorder %v1129_v35, 8.507059e+37 }
 0xa13   : > { %v2159_v20 = vpop.eup %2158 }
 0xa14   : > { %v2161_v21 = vpop.eup %2160  ;;  %v1121_v23 = vmul.f32 %v2159_v20, %v1104_v19  ;;  %vm1126_vm3 = vweird.f32 %v2159_v20  ;;  %v451_v19 = vadd.f32 %v2584_v12, %v450_v18  ;;  %v2085_v18 = vld [vmem:[%s2733_s5] ss:$0 sm:$0xff] }
 0xa15   : > { %v1103_v25 = vadd.f32 1.0, %v2161_v21  ;;  %vm1127_vm5 = vmor %vm1125_vm4, %vm1126_vm3 }
 0xa16   : > { %v1122_v26 = vsub.f32 1.0, %v1121_v23 }
 0xa17   : > { %2162 = vrcp.f32 %v1103_v25  ;;  %v1116_v22 = vand.u32 2147483648, %v1103_v25  ;;  %vm1110_vm8 = vweird.f32 %v1103_v25  ;;  %v1114_v46 = vand.u32 2147483647, %v1103_v25 }
 0xa18   : > { %v1123_v28 = vmul.f32 %v2159_v20, %v1122_v26 }
 0xa19   : > { %v1117_v48 = vor.u32 1.1754944e-38, %v1116_v22  ;;  %vm1115_vm10 = vcmp.eq.f32.partialorder %v1114_v46, 8.507059e+37 }
 0xa1a   : > { %v1124_v9 = vadd.f32 %v2159_v20, %v1123_v28 }
 0xa1c   : > { %v1128_v5 = vsel %vm1127_vm5, %v2159_v20, %v1124_v9 }
 0xa1d   : > { %v2163_v29 = vpop.eup %2162  ;;  %v1133_v41 = vsel %vm1130_vm6, %v1132_v38, %v1128_v5 }
 0xa1e   : > { %v1106_v37 = vmul.f32 %v2163_v29, %v1103_v25  ;;  %vm1111_vm7 = vweird.f32 %v2163_v29  ;;  %v1138_v52 = vmul.f32 %v1133_v41, %v2515_v49  ;;  %v2036_v49 = vld [vmem:[%s2730_s2 + $0x8] sm:$0xff] }
 0xa1f   : > { %vm1112_vm9 = vmor %vm1110_vm8, %vm1111_vm7  ;;  %1237 = vmatpush.bf16.msra.mxu2 %v2036_v49 }
 0xa20   : > { %v1107_v42 = vsub.f32 1.0, %v1106_v37 }
 0xa22   : > { %v1108_v43 = vmul.f32 %v2163_v29, %v1107_v42 }
 0xa24   : > { %v1109_v44 = vadd.f32 %v2163_v29, %v1108_v43 }
 0xa26   : > { %v1113_v47 = vsel %vm1112_vm9, %v2163_v29, %v1109_v44 }
 0xa27   : > { %v1118_v36 = vsel %vm1115_vm10, %v1117_v48, %v1113_v47 }
 0xa28   : > { %v1137_v55 = vmul.f32 %v1118_v36, %v2510_v45  ;;  %v2035_v45 = vld [vmem:[%s2730_s2] sm:$0xff] }
 0xa29   : > { %1238 = vmatpush.bf16.msra.mxu2 %v2035_v45 }
 0xa61   : > { %v1144_v39 = vpop.permute.xlu2 %1143 }
 0xa62   : > { %v1148_v27 = vmul.f32 %v1144_v39, %v1133_v41 }
 0xa64   : > { %1153 = vrot.lane.b32.xlu1 %v1148_v27, %s2243_s9 }
 0xa71   : > { %v1142_v50 = vpop.permute.xlu1 %1141 }
 0xa72   : > { %v1147_v51 = vmul.f32 %v1142_v50, %v1118_v36 }
 0xa74   : > { %1151 = vrot.lane.b32.xlu0 %v1147_v51, %s2243_s9 }
 0xad6   : > { %v1154_v53 = vpop.permute.xlu1 %1153 }
 0xad7   : > { %v2551_v40 = vadd.f32 %v1154_v53, %v1138_v52 }
 0xad9   : > { %2164 = vtanh.f32 %v2551_v40 }
 0xadf   : > { %v2165_v54 = vpop.eup %2164 }
 0xae0   : > { %1165 = vrot.lane.b32.xlu0 %v2165_v54, %s2242_s8 }
 0xae6   : > { %v1152_v56 = vpop.permute.xlu0 %1151 }
 0xae7   : > { %v2556_v57 = vadd.f32 %v1152_v56, %v1137_v55 }
 0xae9   : > { %2166 = vtanh.f32 %v2556_v57 }
 0xaef   : > { %v2167_v58 = vpop.eup %2166 }
 0xaf0   : > { %1163 = vrot.lane.b32.xlu2 %v2167_v58, %s2242_s8 }
 0xb4a   : > { %v1164_v0 = vpop.permute.xlu2 %1163 }
 0xb4b   : > { %v1169_v2 = vmul.f32 %v1164_v0, %v1118_v36 }
 0xb52   : > { %v1166_v1 = vpop.permute.xlu0 %1165 }
 0xb53   : > { %v1170_v3 = vmul.f32 %v1166_v1, %v1133_v41 }
 0xb55   : > { %v1171_v4 = vpack.c.bf16 %v1170_v3, %v1169_v2 }
 0xb57   : > { %1181 = vrot.lane.b32.xlu1 %v1171_v4, %s2243_s9  ;;  %v2038_v4 = vld [vmem:[%s2732_s4 + $0x8] sm:$0xff] }
 0xb58   : > { %1354 = vmatpush.bf16.msra.mxu3 %v2038_v4 }
 0xbc9   : > { %v1182_v6 = vpop.permute.xlu1 %1181 }
 0xbca   : > { %1944 = vmatmul.msk.bf16.vlgmr.msrb.gmra.mxu1 %vm389_vm0, %v1182_v6  ;;  %1955 = vmatmul.msk.bf16.vlgmr.msra.gmra.mxu2 %vm389_vm0, %v1182_v6  ;;  %v2037_v6 = vld [vmem:[%s2732_s4] sm:$0xff] }
 0xbcb   : > { %1355 = vmatpush.bf16.msra.mxu3 %v2037_v6 }
 0xc47   : > { %v1207_v10 = vpop.f32.mrf.mxu1 }
 0xc48   : > { %v1208_v11 = vadd.f32 %v2084_v7, %v1207_v10 }
 0xc4a   : > { %1945 = vst.msk [vmem:[%s2416_s26 + $0x40] sm:$0xff] %vm389_vm0, %v1208_v11 }
 0xc4d   : > { %v1240_v14 = vpop.f32.mrf.mxu2 }
 0xc4e   : > { %v1245_v15 = vadd.f32 %v1240_v14, %v449_v13 }
 0xc4f   : > { %v1209_v16 = vpop.f32.mrf.mxu1 }
 0xc50   : > { %2168 = vtanh.f32 %v1245_v15  ;;  %v1210_v17 = vadd.f32 %v2084_v7, %v1209_v16  ;;  %v1247_v25 = vsub.f32 0.0, %v1245_v15  ;;  %v454_v15 = vadd.f32 %v2584_v12, %v2403_v31 }
 0xc52   : > { %1946 = vst.msk [vmem:[%s2416_s26 + $0x48] sm:$0xff] %vm389_vm0, %v1210_v17  ;;  %v1249_v26 = vmul.f32 1.442695, %v1247_v25 }
 0xc55   : > { %v1242_v24 = vpop.f32.mrf.mxu2 }
 0xc56   : > { %v2169_v20 = vpop.eup %2168  ;;  %v1246_v21 = vadd.f32 %v1242_v24, %v451_v19  ;;  %v456_v24 = vadd.f32 %v2584_v12, %v2407_v33 }
 0xc57   : > { %1291 = vrot.lane.b32.xlu2 %v2169_v20, %s2242_s8 }
 0xc58   : > { %2170 = vtanh.f32 %v1246_v21  ;;  %v1248_v35 = vsub.f32 0.0, %v1246_v21 }
 0xc59   : > { %2172 = vpow2.f32 %v1249_v26 }
 0xc5a   : > { %v1251_v37 = vmul.f32 1.442695, %v1248_v35 }
 0xc5e   : > { %v2171_v23 = vpop.eup %2170 }
 0xc5f   : > { %1293 = vrot.lane.b32.xlu0 %v2171_v23, %s2242_s8  ;;  %v2173_v28 = vpop.eup %2172 }
 0xc60   : > { %v1253_v9 = vadd.f32 1.0, %v2173_v28 }
 0xc62   : > { %2174 = vrcp.f32 %v1253_v9  ;;  %v1266_v41 = vand.u32 2147483648, %v1253_v9  ;;  %vm1260_vm12 = vweird.f32 %v1253_v9  ;;  %v1264_v27 = vand.u32 2147483647, %v1253_v9 }
 0xc63   : > { %2176 = vpow2.f32 %v1251_v37 }
 0xc64   : > { %v1267_v44 = vor.u32 1.1754944e-38, %v1266_v41  ;;  %vm1265_vm14 = vcmp.eq.f32.partialorder %v1264_v27, 8.507059e+37 }
 0xc68   : > { %v2175_v29 = vpop.eup %2174 }
 0xc69   : > { %v1256_v30 = vmul.f32 %v2175_v29, %v1253_v9  ;;  %vm1261_vm11 = vweird.f32 %v2175_v29  ;;  %v2177_v42 = vpop.eup %2176 }
 0xc6a   : > { %vm1262_vm13 = vmor %vm1260_vm12, %vm1261_vm11  ;;  %v1254_v22 = vadd.f32 1.0, %v2177_v42 }
 0xc6b   : > { %v1257_v5 = vsub.f32 1.0, %v1256_v30 }
 0xc6c   : > { %2178 = vrcp.f32 %v1254_v22  ;;  %v1281_v54 = vand.u32 2147483648, %v1254_v22  ;;  %vm1275_vm1 = vweird.f32 %v1254_v22  ;;  %v1279_v55 = vand.u32 2147483647, %v1254_v22 }
 0xc6d   : > { %v1258_v38 = vmul.f32 %v2175_v29, %v1257_v5 }
 0xc6e   : > { %v1282_v58 = vor.u32 1.1754944e-38, %v1281_v54  ;;  %vm1280_vm3 = vcmp.eq.f32.partialorder %v1279_v55, 8.507059e+37 }
 0xc6f   : > { %v1259_v39 = vadd.f32 %v2175_v29, %v1258_v38 }
 0xc71   : > { %v1263_v43 = vsel %vm1262_vm13, %v2175_v29, %v1259_v39 }
 0xc72   : > { %v1268_v47 = vsel %vm1265_vm14, %v1267_v44, %v1263_v43  ;;  %v2179_v50 = vpop.eup %2178 }
 0xc73   : > { %v1271_v36 = vmul.f32 %v2179_v50, %v1254_v22  ;;  %vm1276_vm15 = vweird.f32 %v2179_v50  ;;  %v1287_v61 = vmul.f32 %v1268_v47, %v2556_v57  ;;  %v2040_v57 = vld [vmem:[%s2730_s2 + $0x8] sm:$0xff] }
 0xc74   : > { %vm1277_vm2 = vmor %vm1275_vm1, %vm1276_vm15  ;;  %1387 = vmatpush.bf16.msra.mxu1 %v2040_v57 }
 0xc75   : > { %v1272_v51 = vsub.f32 1.0, %v1271_v36 }
 0xc77   : > { %v1273_v52 = vmul.f32 %v2179_v50, %v1272_v51 }
 0xc79   : > { %v1274_v53 = vadd.f32 %v2179_v50, %v1273_v52 }
 0xc7b   : > { %v1278_v56 = vsel %vm1277_vm2, %v2179_v50, %v1274_v53 }
 0xc7c   : > { %v1283_v59 = vsel %vm1280_vm3, %v1282_v58, %v1278_v56 }
 0xc7d   : > { %v1288_v63 = vmul.f32 %v1283_v59, %v2551_v40  ;;  %v2039_v40 = vld [vmem:[%s2730_s2] sm:$0xff] }
 0xc7e   : > { %1388 = vmatpush.bf16.msra.mxu1 %v2039_v40 }
 0xcb1   : > { %v1292_v46 = vpop.permute.xlu2 %1291 }
 0xcb2   : > { %v1297_v48 = vmul.f32 %v1292_v46, %v1268_v47 }
 0xcb4   : > { %1301 = vrot.lane.b32.xlu1 %v1297_v48, %s2243_s9 }
 0xcd1   : > { %v1294_v49 = vpop.permute.xlu0 %1293 }
 0xcd2   : > { %v1298_v60 = vmul.f32 %v1294_v49, %v1283_v59 }
 0xcd4   : > { %1303 = vrot.lane.b32.xlu2 %v1298_v60, %s2243_s9 }
 0xd26   : > { %v1302_v45 = vpop.permute.xlu1 %1301 }
 0xd27   : > { %v2597_v62 = vadd.f32 %v1302_v45, %v1287_v61 }
 0xd29   : > { %2180 = vtanh.f32 %v2597_v62 }
 0xd2e   : > { %v1304_v0 = vpop.permute.xlu2 %1303 }
 0xd2f   : > { %v2181_v1 = vpop.eup %2180  ;;  %v2601_v2 = vadd.f32 %v1304_v0, %v1288_v63 }
 0xd30   : > { %1313 = vrot.lane.b32.xlu0 %v2181_v1, %s2242_s8 }
 0xd31   : > { %2182 = vtanh.f32 %v2601_v2 }
 0xd37   : > { %v2183_v3 = vpop.eup %2182 }
 0xd38   : > { %1315 = vrot.lane.b32.xlu1 %v2183_v3, %s2242_s8 }
 0xda2   : > { %v1314_v7 = vpop.permute.xlu0 %1313 }
 0xda3   : > { %v1319_v10 = vmul.f32 %v1314_v7, %v1268_v47  ;;  %v2042_v7 = vld [vmem:[%s2732_s4 + $0x8] sm:$0xff] }
 0xda4   : > { %1504 = vmatpush.bf16.msrb.mxu2 %v2042_v7  ;;  %v2046_v7 = vld [vmem:[%s2732_s4 + $0x8] sm:$0xff] }
 0xda5   : > { %1654 = vmatpush.bf16.msrb.mxu1 %v2046_v7 }
 0xdaa   : > { %v1316_v8 = vpop.permute.xlu1 %1315 }
 0xdab   : > { %v1320_v11 = vmul.f32 %v1316_v8, %v1283_v59  ;;  %v2041_v8 = vld [vmem:[%s2732_s4] sm:$0xff] }
 0xdac   : > { %1505 = vmatpush.bf16.msrb.mxu2 %v2041_v8 }
 0xdad   : > { %v1321_v13 = vpack.c.bf16 %v1320_v11, %v1319_v10 }
 0xdaf   : > { %1331 = vrot.lane.b32.xlu2 %v1321_v13, %s2243_s9 }
 0xe09   : > { %v1332_v14 = vpop.permute.xlu2 %1331 }
 0xe0a   : > { %1964 = vmatmul.msk.bf16.vlgmr.msra.gmra.mxu3 %vm389_vm0, %v1332_v14  ;;  %1975 = vmatmul.msk.bf16.vlgmr.msra.gmra.mxu1 %vm389_vm0, %v1332_v14 }
 0xe87   : > { %v1390_v16 = vpop.f32.mrf.mxu1 }
 0xe88   : > { %v1395_v17 = vadd.f32 %v1390_v16, %v454_v15 }
 0xe8a   : > { %2184 = vtanh.f32 %v1395_v17  ;;  %v1397_v9 = vsub.f32 0.0, %v1395_v17  ;;  %v2086_v17 = vld [vmem:[%s2733_s5] ss:$0 sm:$0xff] }
 0xe8c   : > { %v1399_v29 = vmul.f32 1.442695, %v1397_v9 }
 0xe8d   : > { %v1357_v19 = vpop.f32.mrf.mxu3 }
 0xe8e   : > { %v1358_v20 = vadd.f32 %v2085_v18, %v1357_v19 }
 0xe8f   : > { %v1392_v21 = vpop.f32.mrf.mxu1 }
 0xe90   : > { %v2185_v23 = vpop.eup %2184  ;;  %1965 = vst.msk [vmem:[%s2416_s26 + $0x50] sm:$0xff] %vm389_vm0, %v1358_v20  ;;  %v1396_v25 = vadd.f32 %v1392_v21, %v456_v24 }
 0xe91   : > { %1441 = vrot.lane.b32.xlu0 %v2185_v23, %s2242_s8  ;;  %v461_v23 = vadd.f32 %v2584_v12, %v2409_v34 }
 0xe92   : > { %2186 = vtanh.f32 %v1396_v25  ;;  %v1398_v33 = vsub.f32 0.0, %v1396_v25 }
 0xe93   : > { %2188 = vpow2.f32 %v1399_v29 }
 0xe94   : > { %v1401_v30 = vmul.f32 1.442695, %v1398_v33 }
 0xe95   : > { %v1359_v31 = vpop.f32.mrf.mxu3 }
 0xe96   : > { %v1360_v26 = vadd.f32 %v2085_v18, %v1359_v31  ;;  %2190 = vpow2.f32 %v1401_v30  ;;  %v459_v18 = vadd.f32 %v2584_v12, %v2405_v32 }
 0xe98   : > { %v2187_v28 = vpop.eup %2186  ;;  %1966 = vst.msk [vmem:[%s2416_s26 + $0x58] sm:$0xff] %vm389_vm0, %v1360_v26 }
 0xe99   : > { %1443 = vrot.lane.b32.xlu1 %v2187_v28, %s2242_s8  ;;  %v2189_v35 = vpop.eup %2188 }
 0xe9a   : > { %v1403_v5 = vadd.f32 1.0, %v2189_v35 }
 0xe9c   : > { %2192 = vrcp.f32 %v1403_v5  ;;  %v2191_v37 = vpop.eup %2190  ;;  %v1416_v47 = vand.u32 2147483648, %v1403_v5  ;;  %vm1410_vm5 = vweird.f32 %v1403_v5  ;;  %v1414_v48 = vand.u32 2147483647, %v1403_v5 }
 0xe9d   : > { %v1404_v38 = vadd.f32 1.0, %v2191_v37 }
 0xe9e   : > { %v1417_v51 = vor.u32 1.1754944e-38, %v1416_v47  ;;  %vm1415_vm7 = vcmp.eq.f32.partialorder %v1414_v48, 8.507059e+37 }
 0xe9f   : > { %2194 = vrcp.f32 %v1404_v38  ;;  %v1431_v56 = vand.u32 2147483648, %v1404_v38  ;;  %vm1425_vm9 = vweird.f32 %v1404_v38  ;;  %v1429_v58 = vand.u32 2147483647, %v1404_v38 }
 0xea1   : > { %v1432_v59 = vor.u32 1.1754944e-38, %v1431_v56  ;;  %vm1430_vm11 = vcmp.eq.f32.partialorder %v1429_v58, 8.507059e+37 }
 0xea2   : > { %v2193_v39 = vpop.eup %2192 }
 0xea3   : > { %v1406_v41 = vmul.f32 %v2193_v39, %v1403_v5  ;;  %vm1411_vm4 = vweird.f32 %v2193_v39 }
 0xea4   : > { %vm1412_vm6 = vmor %vm1410_vm5, %vm1411_vm4 }
 0xea5   : > { %v1407_v27 = vsub.f32 1.0, %v1406_v41  ;;  %v2195_v42 = vpop.eup %2194 }
 0xea6   : > { %v1421_v44 = vmul.f32 %v2195_v42, %v1404_v38  ;;  %vm1426_vm8 = vweird.f32 %v2195_v42 }
 0xea7   : > { %v1408_v43 = vmul.f32 %v2193_v39, %v1407_v27  ;;  %vm1427_vm10 = vmor %vm1425_vm9, %vm1426_vm8 }
 0xea8   : > { %v1422_v46 = vsub.f32 1.0, %v1421_v44 }
 0xea9   : > { %v1409_v22 = vadd.f32 %v2193_v39, %v1408_v43 }
 0xeaa   : > { %v1423_v36 = vmul.f32 %v2195_v42, %v1422_v46 }
 0xeab   : > { %v1413_v50 = vsel %vm1412_vm6, %v2193_v39, %v1409_v22 }
 0xeac   : > { %v1418_v53 = vsel %vm1415_vm7, %v1417_v51, %v1413_v50  ;;  %v1424_v55 = vadd.f32 %v2195_v42, %v1423_v36 }
 0xead   : > { %v1437_v63 = vmul.f32 %v1418_v53, %v2597_v62  ;;  %v2044_v62 = vld [vmem:[%s2730_s2 + $0x8] sm:$0xff] }
 0xeae   : > { %v1428_v49 = vsel %vm1427_vm10, %v2195_v42, %v1424_v55  ;;  %1537 = vmatpush.bf16.msrb.mxu3 %v2044_v62 }
 0xeaf   : > { %v1433_v61 = vsel %vm1430_vm11, %v1432_v59, %v1428_v49 }
 0xeb0   : > { %v1438_v57 = vmul.f32 %v1433_v61, %v2601_v2  ;;  %v2043_v2 = vld [vmem:[%s2730_s2] sm:$0xff] }
 0xeb2   : > { %1538 = vmatpush.bf16.msrb.mxu3 %v2043_v2 }
 0xf03   : > { %v1442_v52 = vpop.permute.xlu0 %1441 }
 0xf04   : > { %v1447_v54 = vmul.f32 %v1442_v52, %v1418_v53 }
 0xf06   : > { %1451 = vrot.lane.b32.xlu2 %v1447_v54, %s2243_s9 }
 0xf0b   : > { %v1444_v60 = vpop.permute.xlu1 %1443 }
 0xf0c   : > { %v1448_v45 = vmul.f32 %v1444_v60, %v1433_v61 }
 0xf0e   : > { %1453 = vrot.lane.b32.xlu0 %v1448_v45, %s2243_s9 }
 0xf60   : > { %v1452_v0 = vpop.permute.xlu2 %1451 }
 0xf61   : > { %v2637_v1 = vadd.f32 %v1452_v0, %v1437_v63 }
 0xf63   : > { %2196 = vtanh.f32 %v2637_v1 }
 0xf69   : > { %v2197_v3 = vpop.eup %2196 }
 0xf6a   : > { %1463 = vrot.lane.b32.xlu1 %v2197_v3, %s2242_s8 }
 0xf80   : > { %v1454_v4 = vpop.permute.xlu0 %1453 }
 0xf81   : > { %v2642_v40 = vadd.f32 %v1454_v4, %v1438_v57 }
 0xf83   : > { %2198 = vtanh.f32 %v2642_v40 }
 0xf89   : > { %v2199_v6 = vpop.eup %2198 }
 0xf8a   : > { %1465 = vrot.lane.b32.xlu2 %v2199_v6, %s2242_s8 }
 0xfdc   : > { %v1464_v10 = vpop.permute.xlu1 %1463 }
 0xfdd   : > { %v1469_v13 = vmul.f32 %v1464_v10, %v1418_v53 }
 0xfe4   : > { %v1466_v11 = vpop.permute.xlu2 %1465 }
 0xfe5   : > { %v1470_v14 = vmul.f32 %v1466_v11, %v1433_v61 }
 0xfe7   : > { %v1471_v15 = vpack.c.bf16 %v1470_v14, %v1469_v13  ;;  %v2087_v14 = vld [vmem:[%s2733_s5] ss:$0 sm:$0xff] }
 0xfe9   : > { %1481 = vrot.lane.b32.xlu0 %v1471_v15, %s2243_s9 }
0x105b   : > { %v1482_v16 = vpop.permute.xlu0 %1481 }
0x105c   : > { %1984 = vmatmul.msk.bf16.vlgmr.msrb.gmra.mxu2 %vm389_vm0, %v1482_v16  ;;  %1995 = vmatmul.msk.bf16.vlgmr.msrb.gmra.mxu3 %vm389_vm0, %v1482_v16 }
0x10df   : > { %v1507_v19 = vpop.f32.mrf.mxu2  ;;  %v1540_v24 = vpop.f32.mrf.mxu3 }
0x10e0   : > { %v1508_v20 = vadd.f32 %v2086_v17, %v1507_v19  ;;  %v1545_v21 = vadd.f32 %v1540_v24, %v459_v18  ;;  %v1733_v19 = vld [vmem:[%s2416_s26] sm:$0xff] (%p2309_p5)  ;;  %v1735_v24 = vld [vmem:[%s2416_s26 + $0x8] sm:$0xff] (%p2309_p5) }
0x10e2   : > { %1985 = vst.msk [vmem:[%s2416_s26 + $0x60] sm:$0xff] %vm389_vm0, %v1508_v20  ;;  %2200 = vtanh.f32 %v1545_v21  ;;  %v1547_v35 = vsub.f32 0.0, %v1545_v21  ;;  %v1737_v20 = vld [vmem:[%s2416_s26 + $0x10] sm:$0xff] (%p2309_p5)  ;;  %v1739_v21 = vld [vmem:[%s2416_s26 + $0x18] sm:$0xff] (%p2309_p5) }
0x10e4   : > { %v1549_v34 = vmul.f32 1.442695, %v1547_v35 }
0x10e7   : > { %v1509_v25 = vpop.f32.mrf.mxu2  ;;  %v1542_v31 = vpop.f32.mrf.mxu3 }
0x10e8   : > { %v2201_v26 = vpop.eup %2200  ;;  %v1510_v28 = vadd.f32 %v2086_v17, %v1509_v25  ;;  %v1546_v9 = vadd.f32 %v1542_v31, %v461_v23  ;;  %v1741_v23 = vld [vmem:[%s2416_s26 + $0x20] sm:$0xff] (%p2309_p5)  ;;  %v1743_v25 = vld [vmem:[%s2416_s26 + $0x28] sm:$0xff] (%p2309_p5)  ;;  %v1745_v31 = vld [vmem:[%s2416_s26 + $0x30] sm:$0xff] (%p2309_p5) }
0x10e9   : > { %1591 = vrot.lane.b32.xlu1 %v2201_v26, %s2242_s8  ;;  %v1747_v26 = vld [vmem:[%s2416_s26 + $0x38] sm:$0xff] (%p2309_p5) }
0x10ea   : > { %1986 = vst.msk [vmem:[%s2416_s26 + $0x68] sm:$0xff] %vm389_vm0, %v1510_v28  ;;  %2202 = vtanh.f32 %v1546_v9  ;;  %v1548_v29 = vsub.f32 0.0, %v1546_v9  ;;  %v1749_v28 = vld [vmem:[%s2416_s26 + $0x40] sm:$0xff] (%p2309_p5)  ;;  %v1751_v9 = vld [vmem:[%s2416_s26 + $0x48] sm:$0xff] (%p2309_p5) }
0x10ec   : > { %v1551_v33 = vmul.f32 1.442695, %v1548_v29  ;;  %v1755_v29 = vld [vmem:[%s2416_s26 + $0x58] sm:$0xff] (%p2309_p5) }
0x10ee   : > { %2204 = vpow2.f32 %v1551_v33  ;;  %v1757_v33 = vld [vmem:[%s2416_s26 + $0x60] sm:$0xff] (%p2309_p5) }
0x10f0   : > { %v2203_v32 = vpop.eup %2202 }
0x10f1   : > { %1593 = vrot.lane.b32.xlu2 %v2203_v32, %s2242_s8  ;;  %v1753_v32 = vld [vmem:[%s2416_s26 + $0x50] sm:$0xff] (%p2309_p5) }
0x10f4   : > { %v2205_v30 = vpop.eup %2204 }
0x10f5   : > { %v1554_v5 = vadd.f32 1.0, %v2205_v30  ;;  %v1759_v30 = vld [vmem:[%s2416_s26 + $0x68] sm:$0xff] (%p2309_p5) }
0x10f7   : > { %2206 = vrcp.f32 %v1554_v5  ;;  %v1581_v44 = vand.u32 2147483648, %v1554_v5  ;;  %vm1575_vm13 = vweird.f32 %v1554_v5  ;;  %v1579_v22 = vand.u32 2147483647, %v1554_v5 }
0x10f8   : > { %2208 = vpow2.f32 %v1549_v34 }
0x10f9   : > { %v1582_v48 = vor.u32 1.1754944e-38, %v1581_v44  ;;  %vm1580_vm15 = vcmp.eq.f32.partialorder %v1579_v22, 8.507059e+37 }
0x10fd   : > { %v2207_v12 = vpop.eup %2206 }
0x10fe   : > { %v2209_v37 = vpop.eup %2208  ;;  %v1571_v38 = vmul.f32 %v2207_v12, %v1554_v5  ;;  %vm1576_vm12 = vweird.f32 %v2207_v12 }
0x10ff   : > { %v1553_v39 = vadd.f32 1.0, %v2209_v37  ;;  %vm1577_vm14 = vmor %vm1575_vm13, %vm1576_vm12 }
0x1100   : > { %v1572_v41 = vsub.f32 1.0, %v1571_v38 }
0x1101   : > { %2210 = vrcp.f32 %v1553_v39  ;;  %v1566_v55 = vand.u32 2147483648, %v1553_v39  ;;  %vm1560_vm2 = vweird.f32 %v1553_v39  ;;  %v1564_v56 = vand.u32 2147483647, %v1553_v39 }
0x1102   : > { %v1573_v27 = vmul.f32 %v2207_v12, %v1572_v41 }
0x1103   : > { %v1567_v49 = vor.u32 1.1754944e-38, %v1566_v55  ;;  %vm1565_vm4 = vcmp.eq.f32.partialorder %v1564_v56, 8.507059e+37 }
0x1104   : > { %v1574_v42 = vadd.f32 %v2207_v12, %v1573_v27 }
0x1106   : > { %v1578_v46 = vsel %vm1577_vm14, %v2207_v12, %v1574_v42 }
0x1107   : > { %v2211_v43 = vpop.eup %2210  ;;  %v1583_v36 = vsel %vm1580_vm15, %v1582_v48, %v1578_v46 }
0x1108   : > { %v1556_v47 = vmul.f32 %v2211_v43, %v1553_v39  ;;  %vm1561_vm1 = vweird.f32 %v2211_v43  ;;  %v1588_v45 = vmul.f32 %v1583_v36, %v2642_v40  ;;  %v2045_v40 = vld [vmem:[%s2732_s4] sm:$0xff] }
0x1109   : > { %vm1562_vm3 = vmor %vm1560_vm2, %vm1561_vm1  ;;  %1655 = vmatpush.bf16.msrb.mxu1 %v2045_v40 }
0x110a   : > { %v1557_v52 = vsub.f32 1.0, %v1556_v47 }
0x110c   : > { %v1558_v53 = vmul.f32 %v2211_v43, %v1557_v52 }
0x110e   : > { %v1559_v54 = vadd.f32 %v2211_v43, %v1558_v53 }
0x1110   : > { %v1563_v58 = vsel %vm1562_vm3, %v2211_v43, %v1559_v54 }
0x1111   : > { %v1568_v60 = vsel %vm1565_vm4, %v1567_v49, %v1563_v58 }
0x1112   : > { %v1587_v57 = vmul.f32 %v1568_v60, %v2637_v1 }
0x114b   : > { %v1594_v50 = vpop.permute.xlu2 %1593 }
0x114c   : > { %v1598_v51 = vmul.f32 %v1594_v50, %v1583_v36 }
0x114e   : > { %1603 = vrot.lane.b32.xlu1 %v1598_v51, %s2243_s9 }
0x115b   : > { %v1592_v59 = vpop.permute.xlu1 %1591 }
0x115c   : > { %v1597_v61 = vmul.f32 %v1592_v59, %v1568_v60 }
0x115e   : > { %1601 = vrot.lane.b32.xlu0 %v1597_v61, %s2243_s9 }
0x11c0   : > { %v1604_v63 = vpop.permute.xlu1 %1603 }
0x11c1   : > { %v1608_v0 = vadd.f32 %v1604_v63, %v1588_v45 }
0x11c3   : > { %2212 = vtanh.f32 %v1608_v0 }
0x11c9   : > { %v2213_v3 = vpop.eup %2212 }
0x11ca   : > { %1615 = vrot.lane.b32.xlu0 %v2213_v3, %s2242_s8 }
0x11d0   : > { %v1602_v4 = vpop.permute.xlu0 %1601 }
0x11d1   : > { %v1607_v6 = vadd.f32 %v1602_v4, %v1587_v57 }
0x11d3   : > { %2214 = vtanh.f32 %v1607_v6 }
0x11d9   : > { %v2215_v62 = vpop.eup %2214 }
0x11da   : > { %1613 = vrot.lane.b32.xlu2 %v2215_v62, %s2242_s8 }
0x1234   : > { %v1614_v2 = vpop.permute.xlu2 %1613 }
0x1235   : > { %v1619_v8 = vmul.f32 %v1614_v2, %v1568_v60 }
0x123c   : > { %v1616_v1 = vpop.permute.xlu0 %1615 }
0x123d   : > { %v1620_v10 = vmul.f32 %v1616_v1, %v1583_v36 }
0x123f   : > { %v1621_v11 = vpack.c.bf16 %v1620_v10, %v1619_v8 }
0x1241   : > { %1631 = vrot.lane.b32.xlu1 %v1621_v11, %s2243_s9  ;;  %s2047_s9 = sshll.u32 (%p2309_p5), %s1824_s24, 4 }
0x1242   : > { %s1674_s29 = scalar_lea.vmem (%p2309_p5), %s2734_s6, %s2047_s9 }
0x1243   : > { %1734 = vst [vmem:[%s1674_s29] sm:$0xff] (%p2309_p5), %v1733_v19 }
0x1244   : > { %1736 = vst [vmem:[%s1674_s29 + $0x8] sm:$0xff] (%p2309_p5), %v1735_v24 }
0x1245   : > { %1738 = vst [vmem:[%s1674_s29 + $0x20] sm:$0xff] (%p2309_p5), %v1737_v20 }
0x1246   : > { %1740 = vst [vmem:[%s1674_s29 + $0x28] sm:$0xff] (%p2309_p5), %v1739_v21 }
0x1247   : > { %1742 = vst [vmem:[%s1674_s29 + $0x40] sm:$0xff] (%p2309_p5), %v1741_v23 }
0x1248   : > { %1744 = vst [vmem:[%s1674_s29 + $0x48] sm:$0xff] (%p2309_p5), %v1743_v25 }
0x1249   : > { %1746 = vst [vmem:[%s1674_s29 + $0x60] sm:$0xff] (%p2309_p5), %v1745_v31 }
0x124a   : > { %1748 = vst [vmem:[%s1674_s29 + $0x68] sm:$0xff] (%p2309_p5), %v1747_v26 }
0x124b   : > { %1750 = vst [vmem:[%s1674_s29 + $0x80] sm:$0xff] (%p2309_p5), %v1749_v28 }
0x124c   : > { %1752 = vst [vmem:[%s1674_s29 + $0x88] sm:$0xff] (%p2309_p5), %v1751_v9 }
0x124d   : > { %1754 = vst [vmem:[%s1674_s29 + $0xa0] sm:$0xff] (%p2309_p5), %v1753_v32 }
0x124e   : > { %1756 = vst [vmem:[%s1674_s29 + $0xa8] sm:$0xff] (%p2309_p5), %v1755_v29 }
0x124f   : > { %1758 = vst [vmem:[%s1674_s29 + $0xc0] sm:$0xff] (%p2309_p5), %v1757_v33 }
0x1250   : > { %1760 = vst [vmem:[%s1674_s29 + $0xc8] sm:$0xff] (%p2309_p5), %v1759_v30 }
0x12b3   : > { %v1632_v13 = vpop.permute.xlu1 %1631 }
0x12b4   : > { %2004 = vmatmul.msk.bf16.vlgmr.msrb.gmra.mxu1 %vm389_vm0, %v1632_v13 }
0x1331   : > { %v1657_v15 = vpop.f32.mrf.mxu1 }
0x1332   : > { %v1658_v16 = vadd.f32 %v2087_v14, %v1657_v15 }
0x1334   : > { %2005 = vst.msk [vmem:[%s2416_s26 + $0x70] sm:$0xff] %vm389_vm0, %v1658_v16 }
0x1338   : > { %1671 = sbr.rel (!%p2309_p5) target bundleno = 4933 (0x1345), region = 86 }
0x1339   : > { %v1659_v17 = vpop.f32.mrf.mxu1 }
0x133a   : > { %v1660_v18 = vadd.f32 %v2087_v14, %v1659_v17 }
0x133b   : > { %v1761_v35 = vld [vmem:[%s2416_s26 + $0x70] sm:$0xff] (%p2309_p5) }
0x133c   : > { %2006 = vst.msk [vmem:[%s2416_s26 + $0x78] sm:$0xff] %vm389_vm0, %v1660_v18 }
0x133d   : > { %1762 = vst [vmem:[%s1674_s29 + $0xe0] sm:$0xff] %v1761_v35 }
0x1343   : > { %v1763_v5 = vld [vmem:[%s2416_s26 + $0x78] sm:$0xff] }
0x1344   : > { %1764 = vst [vmem:[%s1674_s29 + $0xe8] sm:$0xff] %v1763_v5 }
0x1345 PF: > { %p13_p10 = scmp.ge.s32.totalorder %s2296_s25, 4   ;;  %s2736_s21 = smov %s2235_s22 }
0x1346   : > { %s2737_s22 = smov %s2307_s28  ;;  %s2738_s23 = smov %s2296_s25 }
0x1347   :  { %15 = sbr.rel (!%p13_p10) target bundleno = 2 (0x2), region = 162 }

// kernel: dparn_forward.5
= control target key start
LH: loop header
LB: loop body
LE: loop exit
PB: predicated region body
PF: predicated region fallthrough
CT: control target
= control target key end

     0   :  { %s4918_s17 = smov 0   ;;  %s6837_s0 = inlined_call_operand.vmem [shape: f32[16,16,32], index: 0, kind: input, shape index: {}]   ;;  %s6838_s1 = inlined_call_operand.vmem [shape: bf16[32,96], index: 1, kind: input, shape index: {}]   ;;  %s6839_s2 = inlined_call_operand.vmem [shape: bf16[32,32], index: 2, kind: input, shape index: {}]   ;;  %s6840_s3 = inlined_call_operand.vmem [shape: f32[1,32], index: 3, kind: input, shape index: {}]   ;;  %s6841_s4 = inlined_call_operand.vmem [shape: f32[1,32], index: 4, kind: input, shape index: {}]   ;;  %s6842_s5 = inlined_call_operand.vmem [shape: bf16[32,128], index: 5, kind: input, shape index: {}]   ;;  %s6843_s6 = inlined_call_operand.vmem [shape: f32[1,128], index: 6, kind: input, shape index: {}]   ;;  %s6844_s7 = inlined_call_operand.vmem [shape: bf16[128,32], index: 7, kind: input, shape index: {}]   ;;  %s6845_s8 = inlined_call_operand.vmem [shape: f32[1,32], index: 8, kind: input, shape index: {}]   ;;  %s6846_s9 = inlined_call_operand.vmem [shape: f32[1,32], index: 9, kind: input, shape index: {}]   ;;  %s6847_s10 = inlined_call_operand.vmem [shape: f32[1,32], index: 10, kind: input, shape index: {}]   ;;  %s6848_s11 = inlined_call_operand.vmem [shape: f32[16,16,32], index: 11, kind: output, shape index: {}]  }
   0x1 LB: > { %s4165_s18 = sadd.s32 4294967295, %s4841_s17   ;;  %p4169_p0 = scmp.ge.s32.totalorder %s4841_s17, 1  ;;  %s4841_s17 = sphi %s4918_s17, %s21_s17  }
   0x2   : > { %p339_p1 = scmp.lt.s32.totalorder %s4841_s17, 3 }
   0x4   : > { %p340_p2 = pnand %p4169_p0, %p339_p1 }
   0x6   : > { %343 = sbr.rel (%p340_p2) target bundleno = 5101 (0x13ed), region = 64 }
   0xb   : > { %v4325_v0 = vld [vmem:[%s6838_s1 + $0x8] sm:$0xff]  ;;  %s4170_s21 = sshll.u32 %s4165_s18, 3  ;;  %v4324_v1 = vld [vmem:[%s6838_s1] sm:$0xff]  ;;  %vm436_vm0 = vcmask 261120   ;;  %s4843_s28 = smov 64   ;;  %vm517_vm1 = vcmask 64512  }
   0xc   : > { %p382_p3 = scmp.lt.s32.totalorder %s4170_s21, 15  ;;  %467 = vmatpush.bf16.msra.mxu0 %v4325_v0  ;;  %4338 = vmatpush.bf16.msra.mxu3 %v4325_v0  ;;  %s4844_s29 = smov 96   ;;  %vm538_vm2 = vcmask 130048   ;;  %vm812_vm3 = vcmask 195584  }
   0xd   : > { %s4845_s30 = smov 120   ;;  %s4846_s12 = smov 88  }
   0xe   : > { %s6882_s21 = smov (!%p382_p3, %s4170_s21), 15  ;;  %s4847_s13 = smov 80  }
   0xf   : > { %s4322_s24 = sshll.u32 %s6882_s21, 4  ;;  %s4848_s14 = smov 112  }
  0x10   : > { %468 = vmatpush.bf16.msra.mxu0 %v4324_v1  ;;  %s4940_s27 = scalar_lea.vmem %s6837_s0, %s4322_s24  ;;  %4339 = vmatpush.bf16.msra.mxu3 %v4324_v1  ;;  %s4849_s15 = smov 56  }
  0x11   : > { %v396_v2 = vld [vmem:[%s4940_s27] sm:$0xff]  ;;  %v397_v3 = vld [vmem:[%s4940_s27 + $0x8] sm:$0xff]  ;;  %v410_v26 = vld [vmem:[%s4940_s27 + $0x70] sm:$0xff]  ;;  %s4850_s16 = smov 104   ;;  %s4851_s18 = smov 48  }
  0x12   : > { %v412_v4 = vpack.c.bf16 %v397_v3, %v396_v2  ;;  %v411_v27 = vld [vmem:[%s4940_s27 + $0x78] sm:$0xff]  ;;  %v398_v46 = vld [vmem:[%s4940_s27 + $0x10] sm:$0xff]  ;;  %s4852_s19 = smov 72   ;;  %s4853_s20 = smov 40  }
  0x13   : > { %v419_v28 = vpack.c.bf16 %v411_v27, %v410_v26  ;;  %v399_v47 = vld [vmem:[%s4940_s27 + $0x18] sm:$0xff]  ;;  %s4854_s22 = smov 16   ;;  %s4855_s23 = smov 8  }
  0x14   : > { %4184 = vmatmul.msk.bf16.vlgmr.msra.gmra.mxu0 %vm436_vm0, %v412_v4  ;;  %v413_v48 = vpack.c.bf16 %v399_v47, %v398_v46  ;;  %s4856_s25 = smov 24  }
  0x15   : > { %4191 = vmatmul.msk.bf16.vlgmr.msra.gmra.mxu3 %vm436_vm0, %v419_v28 }
  0x24   : > { %4185 = vmatmul.msk.bf16.gmra.mxu0 %vm436_vm0, %v413_v48 }
  0x91   : > { %v470_v5 = vpop.f32.mrf.mxu0 }
  0x92   : > { %v510_v9 = vmul.f32 0.35355338, %v470_v5 }
  0x98   : > { %v4976_v44 = vpop.f32.mrf.mxu3 }
  0x99   : > { %v472_v6 = vpop.f32.mrf.mxu0 }
  0x9a   : > { %v4945_v7 = vpack.c.bf16 %v472_v6, %v470_v5  ;;  %v511_v8 = vmul.f32 0.35355338, %v472_v6 }
  0x9c   : > { %562 = vrot.lane.b32.xlu2 %v4945_v7, %s4843_s28  ;;  %515 = vrot.lane.b32.xlu0 %v4945_v7, %s4844_s29  ;;  %v4951_v10 = vpack.c.bf16 %v511_v8, %v510_v9 }
  0xa0   : > { %v4978_v45 = vpop.f32.mrf.mxu3 }
  0xa4   : > { %583 = vrot.lane.b32.xlu2 %v4951_v10, %s4845_s30 }
  0xf6   : > { %v563_v11 = vpop.permute.xlu2 %562 }
  0xf7   : > { %575 = vmatpush.bf16.msrb.mxu3 %v563_v11 }
  0xfe   : > { %v584_v31 = vpop.permute.xlu2 %583 }
 0x10e   : > { %v516_v12 = vpop.permute.xlu0 %515 }
 0x10f   : > { %v522_v13 = vsel %vm517_vm1, %v516_v12, 0 }
 0x110   : > { %531 = vmatpush.bf16.xpose.msra.mxu1 %v522_v13 }
 0x117   : > { %4192 = vmatmul.msk.bf16.vlgmr.msra.gmra.mxu1 %vm517_vm1, %v4951_v10 }
 0x194   : > { %v533_v14 = vpop.f32.mrf.mxu1 }
 0x195   : > { %v539_v15 = vsel %vm538_vm2, %v533_v14, -inf }
 0x196   : > { %540 = vmax.xlane.f32.xlu0 %v539_v15 }
 0x19c   : > { %v535_v16 = vpop.f32.mrf.mxu1 }
 0x19d   : > { %v542_v17 = vsel %vm538_vm2, %v535_v16, -inf }
 0x19e   : > { %543 = vmax.xlane.f32.xlu1 %v542_v17  ;;  %v475_v17 = vpop.f32.mrf.mxu0 }
 0x209   : > { %v541_v18 = vpop.xlane.xlu0 %540 }
 0x20a   : > { %v545_v19 = vsub.f32 %v533_v14, %v541_v18  ;;  %v477_v18 = vpop.f32.mrf.mxu0 }
 0x20c   : > { %v547_v20 = vmul.f32 1.442695, %v545_v19  ;;  %v5003_v19 = vpack.c.bf16 %v477_v18, %v475_v17 }
 0x20e   : > { %4497 = vpow2.f32 %v547_v20 }
 0x211   : > { %v544_v21 = vpop.xlane.xlu1 %543 }
 0x212   : > { %v546_v22 = vsub.f32 %v535_v16, %v544_v21 }
 0x214   : > { %v4498_v23 = vpop.eup %4497  ;;  %v549_v24 = vmul.f32 1.442695, %v546_v22 }
 0x215   : > { %v551_v25 = vsel %vm538_vm2, %v4498_v23, 0.0 }
 0x216   : > { %4499 = vpow2.f32 %v549_v24  ;;  %552 = vadd.xlane.f32.xlu1 %v551_v25 }
 0x21c   : > { %v4500_v29 = vpop.eup %4499 }
 0x21d   : > { %v554_v30 = vsel %vm538_vm2, %v4500_v29, 0.0 }
 0x21e   : > { %555 = vadd.xlane.f32.xlu2 %v554_v30 }
 0x22f   : > { %585 = vrot.lane.b32.xlu1 %v4945_v7, %s4846_s12 }
 0x236   : > { %652 = vrot.lane.b32.xlu2 %v4945_v7, %s4847_s13 }
 0x237   : > { %650 = vrot.lane.b32.xlu1 %v4951_v10, %s4848_s14 }
 0x289   : > { %v553_v32 = vpop.xlane.xlu1 %552 }
 0x28a   : > { %4501 = vrcp.f32 %v553_v32 }
 0x290   : > { %v4502_v34 = vpop.eup %4501 }
 0x291   : > { %v556_v33 = vpop.xlane.xlu2 %555  ;;  %v559_v36 = vmul.f32 %v4502_v34, %v4498_v23 }
 0x292   : > { %4503 = vrcp.f32 %v556_v33 }
 0x298   : > { %v4504_v35 = vpop.eup %4503 }
 0x299   : > { %v560_v37 = vmul.f32 %v4504_v35, %v4500_v29  ;;  %v653_v38 = vpop.permute.xlu2 %652 }
 0x29a   : > { %v658_v39 = vsel %vm517_vm1, %v653_v38, 0 }
 0x29b   : > { %667 = vmatpush.bf16.xpose.msrb.mxu1 %v658_v39  ;;  %v561_v40 = vpack.c.bf16 %v560_v37, %v559_v36 }
 0x29d   : > { %4193 = vmatmul.msk.bf16.vlgmr.msrb.gmra.mxu3 %vm538_vm2, %v561_v40  ;;  %v815_v40 = vmul.f32 0.35355338, %v475_v17 }
 0x2a1   : > { %v586_v41 = vpop.permute.xlu1 %585 }
 0x2a2   : > { %v591_v42 = vsel %vm517_vm1, %v586_v41, 0  ;;  %v816_v41 = vmul.f32 0.35355338, %v477_v18 }
 0x2a3   : > { %600 = vmatpush.bf16.xpose.msra.mxu3 %v591_v42 }
 0x2a4   : > { %v5011_v42 = vpack.c.bf16 %v816_v41, %v815_v40 }
 0x2a9   : > { %v651_v43 = vpop.permute.xlu1 %650 }
 0x2aa   : > { %4196 = vmatmul.msk.bf16.vlgmr.msrb.gmra.mxu1 %vm517_vm1, %v651_v43 }
 0x2ad   : > { %4194 = vmatmul.msk.bf16.vlgmr.msra.gmra.mxu3 %vm517_vm1, %v584_v31 }
 0x320   : > { %v4983_v49 = vpop.f32.mrf.mxu3 }
 0x321   : > { %6849 = vst [vmem:[#allocation2_spill] sm:$0xff] %v4983_v49 }
 0x327   : > { %v669_v50 = vpop.f32.mrf.mxu1 }
 0x328   : > { %v4985_v51 = vpop.f32.mrf.mxu3  ;;  %v674_v52 = vsel %vm538_vm2, %v669_v50, -inf }
 0x329   : > { %6850 = vst [vmem:[#allocation3_spill] sm:$0xff] %v4985_v51  ;;  %675 = vmax.xlane.f32.xlu0 %v674_v52 }
 0x32f   : > { %v671_v53 = vpop.f32.mrf.mxu1 }
 0x330   : > { %v602_v54 = vpop.f32.mrf.mxu3  ;;  %v677_v55 = vsel %vm538_vm2, %v671_v53, -inf }
 0x331   : > { %678 = vmax.xlane.f32.xlu0 %v677_v55  ;;  %v607_v56 = vsel %vm538_vm2, %v602_v54, -inf }
 0x332   : > { %608 = vmax.xlane.f32.xlu2 %v607_v56 }
 0x338   : > { %v604_v57 = vpop.f32.mrf.mxu3 }
 0x339   : > { %v610_v58 = vsel %vm538_vm2, %v604_v57, -inf }
 0x33a   : > { %611 = vmax.xlane.f32.xlu1 %v610_v58 }
 0x345   : > { %630 = vrot.lane.b32.xlu0 %v4945_v7, %s4849_s15 }
 0x34d   : > { %717 = vrot.lane.b32.xlu0 %v4951_v10, %s4850_s16 }
 0x39c   : > { %v676_v59 = vpop.xlane.xlu0 %675 }
 0x39d   : > { %v680_v60 = vsub.f32 %v669_v50, %v676_v59 }
 0x39f   : > { %v682_v61 = vmul.f32 1.442695, %v680_v60 }
 0x3a1   : > { %4505 = vpow2.f32 %v682_v61 }
 0x3a4   : > { %v679_v62 = vpop.xlane.xlu0 %678 }
 0x3a5   : > { %v681_v63 = vsub.f32 %v671_v53, %v679_v62  ;;  %v609_v0 = vpop.xlane.xlu2 %608 }
 0x3a6   : > { %v613_v1 = vsub.f32 %v602_v54, %v609_v0 }
 0x3a7   : > { %v4506_v2 = vpop.eup %4505  ;;  %v684_v3 = vmul.f32 1.442695, %v681_v63 }
 0x3a8   : > { %v615_v4 = vmul.f32 1.442695, %v613_v1  ;;  %v686_v5 = vsel %vm538_vm2, %v4506_v2, 0.0 }
 0x3a9   : > { %4507 = vpow2.f32 %v684_v3  ;;  %687 = vadd.xlane.f32.xlu2 %v686_v5 }
 0x3aa   : > { %4509 = vpow2.f32 %v615_v4 }
 0x3ad   : > { %v612_v6 = vpop.xlane.xlu1 %611 }
 0x3ae   : > { %v614_v8 = vsub.f32 %v604_v57, %v612_v6 }
 0x3af   : > { %v4508_v9 = vpop.eup %4507 }
 0x3b0   : > { %v4510_v10 = vpop.eup %4509  ;;  %v617_v11 = vmul.f32 1.442695, %v614_v8  ;;  %v689_v12 = vsel %vm538_vm2, %v4508_v9, 0.0 }
 0x3b1   : > { %690 = vadd.xlane.f32.xlu1 %v689_v12  ;;  %v619_v13 = vsel %vm538_vm2, %v4510_v10, 0.0 }
 0x3b2   : > { %4511 = vpow2.f32 %v617_v11  ;;  %620 = vadd.xlane.f32.xlu0 %v619_v13 }
 0x3b7   : > { %v631_v14 = vpop.permute.xlu0 %630 }
 0x3b8   : > { %v4512_v15 = vpop.eup %4511  ;;  %643 = vmatpush.bf16.msra.mxu2 %v631_v14 }
 0x3b9   : > { %v622_v16 = vsel %vm538_vm2, %v4512_v15, 0.0 }
 0x3ba   : > { %623 = vadd.xlane.f32.xlu0 %v622_v16 }
 0x3bf   : > { %v718_v21 = vpop.permute.xlu0 %717 }
 0x3c1   : > { %697 = vrot.lane.b32.xlu2 %v4945_v7, %s4851_s18 }
 0x3ca   : > { %719 = vrot.lane.b32.xlu1 %v4945_v7, %s4852_s19 }
 0x3ce   : > { %820 = vrot.lane.b32.xlu0 %v5003_v19, %s4844_s29 }
 0x41c   : > { %v688_v20 = vpop.xlane.xlu2 %687 }
 0x41d   : > { %4513 = vrcp.f32 %v688_v20 }
 0x423   : > { %v4514_v25 = vpop.eup %4513 }
 0x424   : > { %v698_v22 = vpop.permute.xlu2 %697  ;;  %v691_v23 = vpop.xlane.xlu1 %690  ;;  %v694_v27 = vmul.f32 %v4514_v25, %v4506_v2 }
 0x425   : > { %4515 = vrcp.f32 %v691_v23  ;;  %710 = vmatpush.bf16.msrb.mxu3 %v698_v22  ;;  %v621_v24 = vpop.xlane.xlu0 %620 }
 0x426   : > { %4517 = vrcp.f32 %v621_v24 }
 0x42b   : > { %v4516_v26 = vpop.eup %4515 }
 0x42c   : > { %v695_v28 = vmul.f32 %v4516_v26, %v4508_v9  ;;  %v4518_v31 = vpop.eup %4517 }
 0x42d   : > { %v624_v29 = vpop.xlane.xlu0 %623  ;;  %v627_v33 = vmul.f32 %v4518_v31, %v4510_v10 }
 0x42e   : > { %v696_v30 = vpack.c.bf16 %v695_v28, %v694_v27  ;;  %4519 = vrcp.f32 %v624_v29 }
 0x430   : > { %4197 = vmatmul.msk.bf16.vlgmr.msrb.gmra.mxu3 %vm538_vm2, %v696_v30 }
 0x434   : > { %v4520_v32 = vpop.eup %4519 }
 0x435   : > { %v628_v34 = vmul.f32 %v4520_v32, %v4512_v15 }
 0x437   : > { %v629_v35 = vpack.c.bf16 %v628_v34, %v627_v33 }
 0x439   : > { %4195 = vmatmul.msk.bf16.vlgmr.msra.gmra.mxu2 %vm538_vm2, %v629_v35 }
 0x43c   : > { %v720_v36 = vpop.permute.xlu1 %719 }
 0x43d   : > { %v725_v37 = vsel %vm517_vm1, %v720_v36, 0 }
 0x43e   : > { %734 = vmatpush.bf16.xpose.msrb.mxu2 %v725_v37 }
 0x440   : > { %v821_v38 = vpop.permute.xlu0 %820 }
 0x441   : > { %v826_v39 = vsel %vm517_vm1, %v821_v38, 0 }
 0x442   : > { %835 = vmatpush.bf16.xpose.msra.mxu3 %v826_v39 }
 0x449   : > { %4198 = vmatmul.msk.bf16.vlgmr.msrb.gmra.mxu2 %vm517_vm1, %v718_v21  ;;  %4200 = vmatmul.msk.bf16.vlgmr.msra.gmra.mxu3 %vm517_vm1, %v5011_v42 }
 0x4b3   : > { %v5016_v43 = vpop.f32.mrf.mxu3 }
 0x4b4   : > { %6851 = vst [vmem:[#allocation4_spill] sm:$0xff] %v5016_v43 }
 0x4bb   : > { %v5020_v47 = vpop.f32.mrf.mxu3 }
 0x4bc   : > { %v5018_v46 = vpop.f32.mrf.mxu2  ;;  %6852 = vst [vmem:[#allocation5_spill] sm:$0xff] %v5020_v47 }
 0x4c4   : > { %v5022_v48 = vpop.f32.mrf.mxu2 }
 0x4cc   : > { %v736_v50 = vpop.f32.mrf.mxu2  ;;  %v837_v52 = vpop.f32.mrf.mxu3 }
 0x4cd   : > { %v741_v53 = vsel %vm538_vm2, %v736_v50, -inf  ;;  %v842_v54 = vsel %vm538_vm2, %v837_v52, -inf }
 0x4ce   : > { %742 = vmax.xlane.f32.xlu0 %v741_v53  ;;  %843 = vmax.xlane.f32.xlu1 %v842_v54 }
 0x4d4   : > { %v839_v55 = vpop.f32.mrf.mxu3 }
 0x4d5   : > { %v845_v56 = vsel %vm538_vm2, %v839_v55, -inf }
 0x4d6   : > { %846 = vmax.xlane.f32.xlu0 %v845_v56 }
 0x4ea   : > { %764 = vrot.lane.b32.xlu0 %v4945_v7, %s4853_s20  ;;  %v738_v7 = vpop.f32.mrf.mxu2 }
 0x4eb   : > { %v744_v4 = vsel %vm538_vm2, %v738_v7, -inf }
 0x4f2   : > { %886 = vrot.lane.b32.xlu0 %v5011_v42, %s4845_s30 }
 0x4fa   : > { %955 = vrot.lane.b32.xlu0 %v5003_v19, %s4847_s13 }
 0x541   : > { %v743_v57 = vpop.xlane.xlu0 %742  ;;  %v844_v58 = vpop.xlane.xlu1 %843 }
 0x542   : > { %v848_v59 = vsub.f32 %v837_v52, %v844_v58  ;;  %v747_v6 = vsub.f32 %v736_v50, %v743_v57  ;;  %v400_v50 = vld [vmem:[%s4940_s27 + $0x20] sm:$0xff]  ;;  %v401_v52 = vld [vmem:[%s4940_s27 + $0x28] sm:$0xff] }
 0x543   : > { %v414_v53 = vpack.c.bf16 %v401_v52, %v400_v50 }
 0x544   : > { %v850_v60 = vmul.f32 1.442695, %v848_v59  ;;  %v749_v8 = vmul.f32 1.442695, %v747_v6 }
 0x545   : > { %4186 = vmatmul.msk.bf16.gmra.mxu0 %vm436_vm0, %v414_v53 }
 0x546   : > { %4521 = vpow2.f32 %v850_v60 }
 0x549   : > { %v847_v61 = vpop.xlane.xlu0 %846 }
 0x54a   : > { %v849_v62 = vsub.f32 %v839_v55, %v847_v61 }
 0x54c   : > { %v852_v63 = vmul.f32 1.442695, %v849_v62  ;;  %v4522_v0 = vpop.eup %4521 }
 0x54d   : > { %v854_v1 = vsel %vm538_vm2, %v4522_v0, 0.0 }
 0x54e   : > { %4523 = vpow2.f32 %v852_v63  ;;  %855 = vadd.xlane.f32.xlu2 %v854_v1 }
 0x54f   : > { %4525 = vpow2.f32 %v749_v8 }
 0x554   : > { %v4524_v2 = vpop.eup %4523 }
 0x555   : > { %v857_v3 = vsel %vm538_vm2, %v4524_v2, 0.0  ;;  %v4526_v9 = vpop.eup %4525 }
 0x556   : > { %858 = vadd.xlane.f32.xlu1 %v857_v3  ;;  %745 = vmax.xlane.f32.xlu2 %v744_v4  ;;  %v753_v10 = vsel %vm538_vm2, %v4526_v9, 0.0 }
 0x55c   : > { %v765_v5 = vpop.permute.xlu0 %764 }
 0x55d   : > { %777 = vmatpush.bf16.msra.mxu1 %v765_v5 }
 0x564   : > { %v887_v12 = vpop.permute.xlu0 %886 }
 0x56c   : > { %v956_v20 = vpop.permute.xlu0 %955 }
 0x56d   : > { %v961_v24 = vsel %vm517_vm1, %v956_v20, 0 }
 0x56e   : > { %865 = vrot.lane.b32.xlu2 %v5003_v19, %s4843_s28 }
 0x597   : > { %754 = vadd.xlane.f32.xlu2 %v753_v10 }
 0x5af   : > { %953 = vrot.lane.b32.xlu2 %v5011_v42, %s4848_s14 }
 0x5c1   : > { %v856_v11 = vpop.xlane.xlu2 %855 }
 0x5c2   : > { %4527 = vrcp.f32 %v856_v11 }
 0x5c8   : > { %v4528_v17 = vpop.eup %4527 }
 0x5c9   : > { %v859_v13 = vpop.xlane.xlu1 %858  ;;  %v746_v14 = vpop.xlane.xlu2 %745  ;;  %v862_v21 = vmul.f32 %v4528_v17, %v4522_v0 }
 0x5ca   : > { %4529 = vrcp.f32 %v859_v13  ;;  %v748_v15 = vsub.f32 %v738_v7, %v746_v14 }
 0x5cc   : > { %v751_v16 = vmul.f32 1.442695, %v748_v15 }
 0x5ce   : > { %4531 = vpow2.f32 %v751_v16 }
 0x5d0   : > { %v4530_v18 = vpop.eup %4529 }
 0x5d1   : > { %v863_v22 = vmul.f32 %v4530_v18, %v4524_v2  ;;  %v866_v23 = vpop.permute.xlu2 %865  ;;  %v480_v2 = vpop.f32.mrf.mxu0 }
 0x5d2   : > { %878 = vmatpush.bf16.msra.mxu2 %v866_v23  ;;  %v1117_v53 = vmul.f32 0.35355338, %v480_v2 }
 0x5d3   : > { %v864_v25 = vpack.c.bf16 %v863_v22, %v862_v21 }
 0x5d4   : > { %v4532_v26 = vpop.eup %4531 }
 0x5d5   : > { %4201 = vmatmul.msk.bf16.vlgmr.msra.gmra.mxu2 %vm538_vm2, %v864_v25  ;;  %v756_v27 = vsel %vm538_vm2, %v4532_v26, 0.0 }
 0x5d6   : > { %970 = vmatpush.bf16.xpose.msrb.mxu2 %v961_v24  ;;  %757 = vadd.xlane.f32.xlu1 %v756_v27 }
 0x5d9   : > { %v482_v6 = vpop.f32.mrf.mxu0 }
 0x5da   : > { %v5070_v8 = vpack.c.bf16 %v482_v6, %v480_v2 }
 0x5ef   : > { %888 = vrot.lane.b32.xlu1 %v5003_v19, %s4846_s12 }
 0x60a   : > { %v755_v28 = vpop.xlane.xlu2 %754 }
 0x60b   : > { %4533 = vrcp.f32 %v755_v28 }
 0x611   : > { %v4534_v31 = vpop.eup %4533 }
 0x612   : > { %v954_v29 = vpop.permute.xlu2 %953  ;;  %v761_v33 = vmul.f32 %v4534_v31, %v4526_v9 }
 0x613   : > { %4204 = vmatmul.msk.bf16.vlgmr.msrb.gmra.mxu2 %vm517_vm1, %v954_v29 }
 0x649   : > { %v758_v30 = vpop.xlane.xlu1 %757 }
 0x64a   : > { %4535 = vrcp.f32 %v758_v30 }
 0x650   : > { %v4536_v32 = vpop.eup %4535 }
 0x651   : > { %v762_v34 = vmul.f32 %v4536_v32, %v4532_v26 }
 0x653   : > { %v763_v35 = vpack.c.bf16 %v762_v34, %v761_v33 }
 0x655   : > { %4199 = vmatmul.msk.bf16.vlgmr.msra.gmra.mxu1 %vm538_vm2, %v763_v35 }
 0x658   : > { %v5050_v38 = vpop.f32.mrf.mxu2 }
 0x659   : > { %6853 = vst [vmem:[#allocation6_spill] sm:$0xff] %v5050_v38 }
 0x660   : > { %v5052_v39 = vpop.f32.mrf.mxu2 }
 0x661   : > { %v889_v36 = vpop.permute.xlu1 %888  ;;  %6854 = vst [vmem:[#allocation7_spill] sm:$0xff] %v5052_v39 }
 0x662   : > { %v894_v37 = vsel %vm517_vm1, %v889_v36, 0 }
 0x663   : > { %903 = vmatpush.bf16.xpose.msrb.mxu1 %v894_v37 }
 0x66a   : > { %4202 = vmatmul.msk.bf16.vlgmr.msrb.gmra.mxu1 %vm517_vm1, %v887_v12 }
 0x696   : > { %v972_v40 = vpop.f32.mrf.mxu2 }
 0x697   : > { %v977_v41 = vsel %vm538_vm2, %v972_v40, -inf }
 0x698   : > { %978 = vmax.xlane.f32.xlu2 %v977_v41 }
 0x69e   : > { %v974_v58 = vpop.f32.mrf.mxu2 }
 0x69f   : > { %v980_v61 = vsel %vm538_vm2, %v974_v58, -inf }
 0x6d2   : > { %v5058_v54 = vpop.f32.mrf.mxu1 }
 0x6d3   : > { %6855 = vst [vmem:[#allocation8_spill] sm:$0xff] %v5058_v54 }
 0x6da   : > { %v5060_v55 = vpop.f32.mrf.mxu1 }
 0x6db   : > { %6856 = vst [vmem:[#allocation9_spill] sm:$0xff] %v5060_v55 }
 0x6e7   : > { %v905_v56 = vpop.f32.mrf.mxu1 }
 0x6e8   : > { %v910_v57 = vsel %vm538_vm2, %v905_v56, -inf }
 0x6e9   : > { %911 = vmax.xlane.f32.xlu0 %v910_v57 }
 0x6ef   : > { %v907_v59 = vpop.f32.mrf.mxu1 }
 0x6f0   : > { %v913_v60 = vsel %vm538_vm2, %v907_v59, -inf }
 0x6f1   : > { %914 = vmax.xlane.f32.xlu1 %v913_v60  ;;  %981 = vmax.xlane.f32.xlu0 %v980_v61 }
 0x705   : > { %933 = vrot.lane.b32.xlu0 %v5003_v19, %s4849_s15 }
 0x70b   : > { %v979_v62 = vpop.xlane.xlu2 %978 }
 0x70c   : > { %v983_v63 = vsub.f32 %v972_v40, %v979_v62 }
 0x70d   : > { %1020 = vrot.lane.b32.xlu0 %v5011_v42, %s4850_s16 }
 0x70e   : > { %v985_v0 = vmul.f32 1.442695, %v983_v63 }
 0x710   : > { %4537 = vpow2.f32 %v985_v0 }
 0x715   : > { %1122 = vrot.lane.b32.xlu0 %v5070_v8, %s4844_s29 }
 0x716   : > { %v4538_v1 = vpop.eup %4537 }
 0x717   : > { %v989_v7 = vsel %vm538_vm2, %v4538_v1, 0.0 }
 0x718   : > { %990 = vadd.xlane.f32.xlu1 %v989_v7 }
 0x75c   : > { %v912_v3 = vpop.xlane.xlu0 %911 }
 0x75d   : > { %v916_v4 = vsub.f32 %v905_v56, %v912_v3  ;;  %v1118_v56 = vmul.f32 0.35355338, %v482_v6 }
 0x75f   : > { %v918_v5 = vmul.f32 1.442695, %v916_v4  ;;  %v5085_v57 = vpack.c.bf16 %v1118_v56, %v1117_v53 }
 0x761   : > { %4539 = vpow2.f32 %v918_v5 }
 0x764   : > { %v982_v9 = vpop.xlane.xlu0 %981  ;;  %v915_v10 = vpop.xlane.xlu1 %914 }
 0x765   : > { %v984_v11 = vsub.f32 %v974_v58, %v982_v9  ;;  %v917_v13 = vsub.f32 %v907_v59, %v915_v10 }
 0x767   : > { %v4540_v42 = vpop.eup %4539  ;;  %v987_v12 = vmul.f32 1.442695, %v984_v11  ;;  %v920_v15 = vmul.f32 1.442695, %v917_v13 }
 0x768   : > { %v922_v14 = vsel %vm538_vm2, %v4540_v42, 0.0 }
 0x769   : > { %923 = vadd.xlane.f32.xlu1 %v922_v14  ;;  %4541 = vpow2.f32 %v987_v12 }
 0x76a   : > { %4543 = vpow2.f32 %v920_v15 }
 0x76f   : > { %v4542_v16 = vpop.eup %4541 }
 0x770   : > { %v992_v17 = vsel %vm538_vm2, %v4542_v16, 0.0  ;;  %v4544_v18 = vpop.eup %4543 }
 0x771   : > { %993 = vadd.xlane.f32.xlu2 %v992_v17  ;;  %v925_v21 = vsel %vm538_vm2, %v4544_v18, 0.0 }
 0x777   : > { %v934_v20 = vpop.permute.xlu0 %933 }
 0x778   : > { %946 = vmatpush.bf16.msrb.mxu3 %v934_v20 }
 0x779   : > { %926 = vadd.xlane.f32.xlu2 %v925_v21 }
 0x77f   : > { %v1021_v24 = vpop.permute.xlu0 %1020 }
 0x782   : > { %1022 = vrot.lane.b32.xlu1 %v5003_v19, %s4852_s19 }
 0x787   : > { %v1123_v29 = vpop.permute.xlu0 %1122 }
 0x788   : > { %v1128_v34 = vsel %vm517_vm1, %v1123_v29, 0  ;;  %v402_v29 = vld [vmem:[%s4940_s27 + $0x30] sm:$0xff] }
 0x78b   : > { %v991_v22 = vpop.xlane.xlu1 %990 }
 0x791   : > { %1000 = vrot.lane.b32.xlu2 %v5003_v19, %s4851_s18 }
 0x7dc   : > { %v924_v25 = vpop.xlane.xlu1 %923 }
 0x7e4   : > { %v994_v23 = vpop.xlane.xlu2 %993 }
 0x7e5   : > { %4545 = vrcp.f32 %v994_v23 }
 0x7e6   : > { %4547 = vrcp.f32 %v991_v22 }
 0x7e7   : > { %4549 = vrcp.f32 %v924_v25 }
 0x7eb   : > { %v4546_v27 = vpop.eup %4545 }
 0x7ec   : > { %v927_v26 = vpop.xlane.xlu2 %926  ;;  %v4548_v28 = vpop.eup %4547  ;;  %v998_v31 = vmul.f32 %v4546_v27, %v4542_v16 }
 0x7ed   : > { %4551 = vrcp.f32 %v927_v26  ;;  %v4550_v30 = vpop.eup %4549  ;;  %v997_v35 = vmul.f32 %v4548_v28, %v4538_v1 }
 0x7ee   : > { %v930_v36 = vmul.f32 %v4550_v30, %v4540_v42  ;;  %v403_v30 = vld [vmem:[%s4940_s27 + $0x38] sm:$0xff] }
 0x7ef   : > { %v999_v50 = vpack.c.bf16 %v998_v31, %v997_v35  ;;  %v415_v31 = vpack.c.bf16 %v403_v30, %v402_v29 }
 0x7f1   : > { %4187 = vmatmul.msk.bf16.gmra.mxu0 %vm436_vm0, %v415_v31 }
 0x7f3   : > { %v4552_v32 = vpop.eup %4551 }
 0x7f4   : > { %v1023_v33 = vpop.permute.xlu1 %1022  ;;  %v931_v37 = vmul.f32 %v4552_v32, %v4544_v18  ;;  %v1001_v41 = vpop.permute.xlu2 %1000 }
 0x7f5   : > { %v1028_v40 = vsel %vm517_vm1, %v1023_v33, 0  ;;  %1013 = vmatpush.bf16.msra.mxu1 %v1001_v41 }
 0x7f6   : > { %1037 = vmatpush.bf16.xpose.msra.mxu3 %v1028_v40  ;;  %v932_v52 = vpack.c.bf16 %v931_v37, %v930_v36  ;;  %v404_v37 = vld [vmem:[%s4940_s27 + $0x40] sm:$0xff]  ;;  %v405_v40 = vld [vmem:[%s4940_s27 + $0x48] sm:$0xff] }
 0x7f7   : > { %v416_v53 = vpack.c.bf16 %v405_v40, %v404_v37 }
 0x7f8   : > { %4203 = vmatmul.msk.bf16.vlgmr.msrb.gmra.mxu3 %vm538_vm2, %v932_v52  ;;  %4205 = vmatmul.msk.bf16.vlgmr.msra.gmra.mxu1 %vm538_vm2, %v999_v50 }
 0x7f9   : > { %1137 = vmatpush.bf16.xpose.msrb.mxu1 %v1128_v34 }
 0x801   : > { %4188 = vmatmul.msk.bf16.gmra.mxu0 %vm436_vm0, %v416_v53 }
 0x808   : > { %4206 = vmatmul.msk.bf16.vlgmr.msra.gmra.mxu3 %vm517_vm1, %v1021_v24  ;;  %4208 = vmatmul.msk.bf16.vlgmr.msrb.gmra.mxu1 %vm517_vm1, %v5085_v57 }
 0x875   : > { %v5090_v58 = vpop.f32.mrf.mxu1 }
 0x87b   : > { %v5092_v59 = vpop.f32.mrf.mxu3 }
 0x87c   : > { %6857 = vst [vmem:[#allocation10_spill] sm:$0xff] %v5092_v59 }
 0x87d   : > { %v5094_v60 = vpop.f32.mrf.mxu1 }
 0x883   : > { %v5096_v61 = vpop.f32.mrf.mxu3 }
 0x884   : > { %6858 = vst [vmem:[#allocation11_spill] sm:$0xff] %v5096_v61 }
 0x885   : > { %v1139_v62 = vpop.f32.mrf.mxu1 }
 0x886   : > { %v1144_v63 = vsel %vm538_vm2, %v1139_v62, -inf }
 0x887   : > { %1145 = vmax.xlane.f32.xlu2 %v1144_v63 }
 0x88b   : > { %v1039_v0 = vpop.f32.mrf.mxu3 }
 0x88c   : > { %v1044_v1 = vsel %vm538_vm2, %v1039_v0, -inf }
 0x88d   : > { %1045 = vmax.xlane.f32.xlu0 %v1044_v1  ;;  %v1141_v7 = vpop.f32.mrf.mxu1 }
 0x88e   : > { %v1147_v4 = vsel %vm538_vm2, %v1141_v7, -inf }
 0x893   : > { %v1041_v2 = vpop.f32.mrf.mxu3 }
 0x894   : > { %v1047_v3 = vsel %vm538_vm2, %v1041_v2, -inf }
 0x895   : > { %1048 = vmax.xlane.f32.xlu1 %v1047_v3  ;;  %1148 = vmax.xlane.f32.xlu0 %v1147_v4  ;;  %v408_v4 = vld [vmem:[%s4940_s27 + $0x60] sm:$0xff] }
 0x8a9   : > { %1067 = vrot.lane.b32.xlu0 %v5003_v19, %s4853_s20 }
 0x8b1   : > { %1188 = vrot.lane.b32.xlu0 %v5085_v57, %s4845_s30 }
 0x8b9   : > { %1257 = vrot.lane.b32.xlu0 %v5070_v8, %s4847_s13 }
 0x8c1   : > { %1302 = vrot.lane.b32.xlu0 %v5070_v8, %s4851_s18 }
 0x8fa   : > { %v1146_v5 = vpop.xlane.xlu2 %1145 }
 0x8fb   : > { %v1150_v6 = vsub.f32 %v1139_v62, %v1146_v5  ;;  %v409_v5 = vld [vmem:[%s4940_s27 + $0x68] sm:$0xff] }
 0x8fd   : > { %v1152_v9 = vmul.f32 1.442695, %v1150_v6  ;;  %v418_v6 = vpack.c.bf16 %v409_v5, %v408_v4 }
 0x8ff   : > { %4553 = vpow2.f32 %v1152_v9 }
 0x900   : > { %v1046_v10 = vpop.xlane.xlu0 %1045 }
 0x901   : > { %v1050_v11 = vsub.f32 %v1039_v0, %v1046_v10 }
 0x903   : > { %v1052_v42 = vmul.f32 1.442695, %v1050_v11 }
 0x905   : > { %v4554_v12 = vpop.eup %4553  ;;  %4555 = vpow2.f32 %v1052_v42 }
 0x906   : > { %v1156_v19 = vsel %vm538_vm2, %v4554_v12, 0.0 }
 0x907   : > { %1157 = vadd.xlane.f32.xlu1 %v1156_v19 }
 0x908   : > { %v1149_v13 = vpop.xlane.xlu0 %1148  ;;  %v1049_v22 = vpop.xlane.xlu1 %1048 }
 0x909   : > { %v1151_v14 = vsub.f32 %v1141_v7, %v1149_v13  ;;  %v1051_v23 = vsub.f32 %v1041_v2, %v1049_v22  ;;  %v406_v7 = vld [vmem:[%s4940_s27 + $0x50] sm:$0xff]  ;;  %v407_v2 = vld [vmem:[%s4940_s27 + $0x58] sm:$0xff] }
 0x90a   : > { %v417_v3 = vpack.c.bf16 %v407_v2, %v406_v7 }
 0x90b   : > { %v5111_v15 = vpop.eup %4555  ;;  %v1154_v16 = vmul.f32 1.442695, %v1151_v14  ;;  %v1054_v24 = vmul.f32 1.442695, %v1051_v23  ;;  %v485_v14 = vpop.f32.mrf.mxu0 }
 0x90c   : > { %v1056_v17 = vsel %vm538_vm2, %v5111_v15, 0.0  ;;  %4189 = vmatmul.msk.bf16.gmra.mxu0 %vm436_vm0, %v417_v3 }
 0x90d   : > { %4557 = vpow2.f32 %v1154_v16 }
 0x90e   : > { %4559 = vpow2.f32 %v1054_v24 }
 0x90f   : > { %1057 = vadd.xlane.f32.xlu1 %v1056_v17 }
 0x913   : > { %v4558_v18 = vpop.eup %4557  ;;  %v487_v16 = vpop.f32.mrf.mxu0 }
 0x914   : > { %v1159_v20 = vsel %vm538_vm2, %v4558_v18, 0.0  ;;  %v4560_v25 = vpop.eup %4559  ;;  %v5142_v17 = vpack.c.bf16 %v487_v16, %v485_v14 }
 0x915   : > { %1160 = vadd.xlane.f32.xlu2 %v1159_v20  ;;  %v1059_v26 = vsel %vm538_vm2, %v4560_v25, 0.0  ;;  %v1420_v20 = vmul.f32 0.35355338, %v487_v16 }
 0x916   : > { %1424 = vrot.lane.b32.xlu0 %v5142_v17, %s4844_s29 }
 0x91b   : > { %v1068_v21 = vpop.permute.xlu0 %1067 }
 0x91c   : > { %1080 = vmatpush.bf16.msra.mxu2 %v1068_v21  ;;  %4190 = vmatmul.msk.bf16.gmra.mxu0 %vm436_vm0, %v418_v6  ;;  %v490_v21 = vpop.f32.mrf.mxu0 }
 0x91e   : > { %1559 = vrot.lane.b32.xlu0 %v5142_v17, %s4847_s13 }
 0x923   : > { %v1189_v32 = vpop.permute.xlu0 %1188 }
 0x924   : > { %v492_v24 = vpop.f32.mrf.mxu0 }
 0x928   : > { %1167 = vrot.lane.b32.xlu1 %v5070_v8, %s4843_s28 }
 0x92b   : > { %v1258_v50 = vpop.permute.xlu0 %1257 }
 0x92c   : > { %v1263_v63 = vsel %vm517_vm1, %v1258_v50, 0 }
 0x92d   : > { %1190 = vrot.lane.b32.xlu2 %v5070_v8, %s4846_s12 }
 0x933   : > { %v1303_v13 = vpop.permute.xlu0 %1302 }
 0x935   : > { %1255 = vrot.lane.b32.xlu2 %v5085_v57, %s4848_s14 }
 0x95e   : > { %1060 = vadd.xlane.f32.xlu2 %v1059_v26  ;;  %v1722_v26 = vmul.f32 0.35355338, %v492_v24 }
 0x97a   : > { %v1158_v27 = vpop.xlane.xlu1 %1157 }
 0x982   : > { %v1058_v34 = vpop.xlane.xlu1 %1057 }
 0x988   : > { %v1161_v28 = vpop.xlane.xlu2 %1160 }
 0x989   : > { %4561 = vrcp.f32 %v1161_v28  ;;  %v495_v30 = vpop.f32.mrf.mxu0 }
 0x98a   : > { %4563 = vrcp.f32 %v1158_v27 }
 0x98b   : > { %4565 = vrcp.f32 %v1058_v34 }
 0x98f   : > { %v4562_v36 = vpop.eup %4561 }
 0x990   : > { %v1191_v33 = vpop.permute.xlu2 %1190  ;;  %v4564_v41 = vpop.eup %4563  ;;  %v1165_v52 = vmul.f32 %v4562_v36, %v4558_v18  ;;  %v1419_v18 = vmul.f32 0.35355338, %v485_v14 }
 0x991   : > { %v1196_v35 = vsel %vm517_vm1, %v1191_v33, 0  ;;  %v1164_v56 = vmul.f32 %v4564_v41, %v4554_v12  ;;  %v4566_v10 = vpop.eup %4565  ;;  %v497_v33 = vpop.f32.mrf.mxu0 }
 0x992   : > { %1205 = vmatpush.bf16.xpose.msrb.mxu2 %v1196_v35  ;;  %v1064_v42 = vmul.f32 %v4566_v10, %v5111_v15  ;;  %v5150_v22 = vpack.c.bf16 %v1420_v20, %v1419_v18  ;;  %v5164_v34 = vpack.c.bf16 %v497_v33, %v495_v30  ;;  %v2024_v53 = vmul.f32 0.35355338, %v497_v33 }
 0x993   : > { %v1166_v0 = vpack.c.bf16 %v1165_v52, %v1164_v56  ;;  %v5190_v52 = vpack.c.bf16 %v492_v24, %v490_v21  ;;  %v5246_v24 = vpack.c.bf16 %v4978_v45, %v4976_v44 }
 0x994   : > { %1624 = vrot.lane.b32.xlu0 %v5150_v22, %s4850_s16 }
 0x998   : > { %v1256_v1 = vpop.permute.xlu2 %1255 }
 0x999   : > { %v500_v35 = vpop.f32.mrf.mxu0 }
 0x99a   : > { %v1168_v62 = vpop.permute.xlu1 %1167  ;;  %v2325_v40 = vmul.f32 0.35355338, %v500_v35 }
 0x99b   : > { %1180 = vmatpush.bf16.msrb.mxu3 %v1168_v62  ;;  %v1425_v62 = vpop.permute.xlu0 %1424 }
 0x99e   : > { %4209 = vmatmul.msk.bf16.vlgmr.msrb.gmra.mxu3 %vm538_vm2, %v1166_v0 }
 0x99f   : > { %1272 = vmatpush.bf16.xpose.msra.mxu3 %v1263_v63  ;;  %v1430_v63 = vsel %vm517_vm1, %v1425_v62, 0 }
 0x9a1   : > { %v502_v36 = vpop.f32.mrf.mxu0 }
 0x9a2   : > { %v5172_v37 = vpack.c.bf16 %v502_v36, %v500_v35  ;;  %v2326_v41 = vmul.f32 0.35355338, %v502_v36 }
 0x9a4   : > { %v5182_v50 = vpack.c.bf16 %v2326_v41, %v2325_v40 }
 0x9ae   : > { %4212 = vmatmul.msk.bf16.vlgmr.msra.gmra.mxu3 %vm517_vm1, %v1256_v1 }
 0x9d1   : > { %v1061_v9 = vpop.xlane.xlu2 %1060 }
 0x9d2   : > { %4567 = vrcp.f32 %v1061_v9 }
 0x9d8   : > { %v4568_v11 = vpop.eup %4567 }
 0x9d9   : > { %v1065_v12 = vmul.f32 %v4568_v11, %v4560_v25  ;;  %v1721_v25 = vmul.f32 0.35355338, %v490_v21 }
 0x9db   : > { %v1066_v19 = vpack.c.bf16 %v1065_v12, %v1064_v42  ;;  %v5156_v27 = vpack.c.bf16 %v1722_v26, %v1721_v25  ;;  %v2627_v12 = vmul.f32 0.35355338, %v4976_v44  ;;  %v1560_v25 = vpop.permute.xlu0 %1559 }
 0x9dd   : > { %4207 = vmatmul.msk.bf16.vlgmr.msra.gmra.mxu2 %vm538_vm2, %v1066_v19  ;;  %1792 = vrot.lane.b32.xlu0 %v5156_v27, %s4845_s30  ;;  %v2628_v19 = vmul.f32 0.35355338, %v4978_v45 }
 0x9de   : > { %1315 = vmatpush.bf16.msra.mxu2 %v1303_v13 }
 0x9df   : > { %v5235_v14 = vpack.c.bf16 %v2628_v19, %v2627_v12 }
 0x9e5   : > { %1859 = vrot.lane.b32.xlu0 %v5156_v27, %s4848_s14 }
 0x9ed   : > { %4210 = vmatmul.msk.bf16.vlgmr.msrb.gmra.mxu2 %vm517_vm1, %v1189_v32  ;;  %2096 = vrot.lane.b32.xlu0 %v5164_v34, %s4846_s12 }
 0x9ee   : > { %1439 = vmatpush.bf16.xpose.msrb.mxu2 %v1430_v63 }
 0x9f5   : > { %2230 = vrot.lane.b32.xlu0 %v5164_v34, %s4852_s19 }
 0x9fd   : > { %2330 = vrot.lane.b32.xlu0 %v5172_v37, %s4844_s29 }
 0xa05   : > { %2465 = vrot.lane.b32.xlu0 %v5172_v37, %s4847_s13 }
 0xa0d   : > { %2530 = vrot.lane.b32.xlu0 %v5182_v50, %s4850_s16 }
 0xa21   : > { %v5148_v15 = vpop.f32.mrf.mxu3 }
 0xa22   : > { %6859 = vst [vmem:[#allocation12_spill] sm:$0xff] %v5148_v15 }
 0xa29   : > { %v5154_v23 = vpop.f32.mrf.mxu3 }
 0xa2a   : > { %6860 = vst [vmem:[#allocation13_spill] sm:$0xff] %v5154_v23 }
 0xa31   : > { %v1274_v28 = vpop.f32.mrf.mxu3 }
 0xa32   : > { %v1279_v29 = vsel %vm538_vm2, %v1274_v28, -inf }
 0xa33   : > { %1280 = vmax.xlane.f32.xlu2 %v1279_v29 }
 0xa39   : > { %v1276_v31 = vpop.f32.mrf.mxu3 }
 0xa3a   : > { %v1282_v32 = vsel %vm538_vm2, %v1276_v31, -inf }
 0xa3b   : > { %1283 = vmax.xlane.f32.xlu1 %v1282_v32 }
 0xa4b   : > { %1324 = vrot.lane.b32.xlu2 %v5070_v8, %s4852_s19 }
 0xa53   : > { %1490 = vrot.lane.b32.xlu2 %v5150_v22, %s4845_s30 }
 0xa54   : > { %1235 = vrot.lane.b32.xlu1 %v5070_v8, %s4849_s15 }
 0xa5b   : > { %1557 = vrot.lane.b32.xlu2 %v5150_v22, %s4848_s14 }
 0xa5c   : > { %1322 = vrot.lane.b32.xlu1 %v5085_v57, %s4850_s16  ;;  %v2023_v57 = vmul.f32 0.35355338, %v495_v30 }
 0xa5e   : > { %v5208_v56 = vpack.c.bf16 %v2024_v53, %v2023_v57 }
 0xa60   : > { %v5228_v9 = vpop.f32.mrf.mxu2 }
 0xa61   : > { %6861 = vst [vmem:[#allocation14_spill] sm:$0xff] %v5228_v9 }
 0xa63   : > { %1794 = vrot.lane.b32.xlu2 %v5190_v52, %s4846_s12 }
 0xa64   : > { %1492 = vrot.lane.b32.xlu1 %v5142_v17, %s4846_s12 }
 0xa68   : > { %v5231_v42 = vpop.f32.mrf.mxu2 }
 0xa69   : > { %6862 = vst [vmem:[#allocation15_spill] sm:$0xff] %v5231_v42 }
 0xa6b   : > { %1928 = vrot.lane.b32.xlu2 %v5190_v52, %s4852_s19 }
 0xa6c   : > { %1626 = vrot.lane.b32.xlu1 %v5142_v17, %s4852_s19 }
 0xa70   : > { %v5240_v20 = vpop.f32.mrf.mxu2 }
 0xa71   : > { %v1212_v21 = vsel %vm538_vm2, %v5240_v20, -inf }
 0xa73   : > { %2028 = vrot.lane.b32.xlu2 %v5164_v34, %s4844_s29 }
 0xa74   : > { %1726 = vrot.lane.b32.xlu1 %v5190_v52, %s4844_s29 }
 0xa78   : > { %v5266_v45 = vpop.f32.mrf.mxu2 }
 0xa7b   : > { %2163 = vrot.lane.b32.xlu2 %v5164_v34, %s4847_s13 }
 0xa7c   : > { %1861 = vrot.lane.b32.xlu1 %v5190_v52, %s4847_s13 }
 0xa83   : > { %2228 = vrot.lane.b32.xlu2 %v5208_v56, %s4850_s16 }
 0xa84   : > { %1926 = vrot.lane.b32.xlu1 %v5156_v27, %s4850_s16 }
 0xa8b   : > { %2396 = vrot.lane.b32.xlu2 %v5182_v50, %s4845_s30 }
 0xa8c   : > { %2094 = vrot.lane.b32.xlu1 %v5208_v56, %s4845_s30 }
 0xa93   : > { %2463 = vrot.lane.b32.xlu2 %v5182_v50, %s4848_s14 }
 0xa94   : > { %2161 = vrot.lane.b32.xlu1 %v5208_v56, %s4848_s14 }
 0xa9c   : > { %2398 = vrot.lane.b32.xlu1 %v5172_v37, %s4846_s12 }
 0xaa4   : > { %2532 = vrot.lane.b32.xlu1 %v5172_v37, %s4852_s19 }
 0xaa6   : > { %v1281_v0 = vpop.xlane.xlu2 %1280 }
 0xaa7   : > { %v1285_v1 = vsub.f32 %v1274_v28, %v1281_v0  ;;  %v5254_v28 = vpop.permute.xlu0 %1624 }
 0xaa9   : > { %v1287_v7 = vmul.f32 1.442695, %v1285_v1 }
 0xaab   : > { %4569 = vpow2.f32 %v1287_v7 }
 0xaae   : > { %v1284_v2 = vpop.xlane.xlu1 %1283  ;;  %v1325_v13 = vpop.permute.xlu2 %1324 }
 0xaaf   : > { %v1286_v3 = vsub.f32 %v1276_v31, %v1284_v2  ;;  %v1330_v18 = vsel %vm517_vm1, %v1325_v13, 0  ;;  %v5258_v30 = vpop.permute.xlu0 %1792  ;;  %v1215_v31 = vsel %vm538_vm2, %v5266_v45, -inf }
 0xab1   : > { %v4570_v4 = vpop.eup %4569  ;;  %v1289_v5 = vmul.f32 1.442695, %v1286_v3 }
 0xab2   : > { %v1291_v6 = vsel %vm538_vm2, %v4570_v4, 0.0 }
 0xab3   : > { %4571 = vpow2.f32 %v1289_v5  ;;  %1292 = vadd.xlane.f32.xlu0 %v1291_v6 }
 0xab6   : > { %v5250_v26 = vpop.permute.xlu2 %1490 }
 0xab7   : > { %v1860_v32 = vpop.permute.xlu0 %1859 }
 0xab9   : > { %v4572_v10 = vpop.eup %4571 }
 0xaba   : > { %v1294_v11 = vsel %vm538_vm2, %v4572_v10, 0.0 }
 0xabc   : > { %1295 = vadd.xlane.f32.xlu2 %v1294_v11 }
 0xabe   : > { %v1558_v29 = vpop.permute.xlu2 %1557 }
 0xabf   : > { %v5278_v35 = vpop.permute.xlu0 %2096 }
 0xac6   : > { %v1236_v16 = vpop.permute.xlu1 %1235  ;;  %v5262_v44 = vpop.permute.xlu2 %1794 }
 0xac7   : > { %1248 = vmatpush.bf16.msra.mxu1 %v1236_v16  ;;  %2698 = vrot.lane.b32.xlu0 %v5235_v14, %s4845_s30  ;;  %v5282_v40 = vpop.permute.xlu0 %2230  ;;  %v1565_v16 = vsel %vm517_vm1, %v1560_v25, 0 }
 0xacb   : > { %1339 = vmatpush.bf16.xpose.msrb.mxu1 %v1330_v18 }
 0xace   : > { %1213 = vmax.xlane.f32.xlu1 %v1212_v21  ;;  %v5274_v33 = vpop.permute.xlu2 %1928  ;;  %v5290_v1 = vpop.permute.xlu1 %1322 }
 0xacf   : > { %v2331_v57 = vpop.permute.xlu0 %2330 }
 0xad4   : > { %2700 = vrot.lane.b32.xlu2 %v5246_v24, %s4846_s12 }
 0xad6   : > { %v2029_v36 = vpop.permute.xlu2 %2028  ;;  %v5292_v5 = vpop.permute.xlu1 %1492 }
 0xad7   : > { %v2466_v62 = vpop.permute.xlu0 %2465 }
 0xadc   : > { %2834 = vrot.lane.b32.xlu2 %v5246_v24, %s4852_s19 }
 0xade   : > { %v2164_v41 = vpop.permute.xlu2 %2163  ;;  %v5298_v18 = vpop.permute.xlu1 %1626 }
 0xae4   : > { %2765 = vrot.lane.b32.xlu2 %v5235_v14, %s4848_s14  ;;  %s6702_s14 = scalar_lea.vmem %s6848_s11, %s4322_s24 }
 0xae6   : > { %v5284_v53 = vpop.permute.xlu2 %2228 }
 0xae7   : > { %2632 = vrot.lane.b32.xlu1 %v5246_v24, %s4844_s29 }
 0xaec   : > { %2832 = vrot.lane.b32.xlu2 %v5235_v14, %s4850_s16 }
 0xaee   : > { %v5286_v63 = vpop.permute.xlu2 %2396 }
 0xaef   : > { %2767 = vrot.lane.b32.xlu1 %v5246_v24, %s4847_s13 }
 0xaf1   : > { %1216 = vmax.xlane.f32.xlu0 %v1215_v31 }
 0xaf4   : > { %1369 = vrot.lane.b32.xlu2 %v5070_v8, %s4853_s20  ;;  %v5288_v8 = vpop.permute.xlu0 %2530 }
 0xaf6   : > { %v2464_v0 = vpop.permute.xlu2 %2463 }
 0xaf7   : > { %1537 = vrot.lane.b32.xlu1 %v5142_v17, %s4849_s15 }
 0xafc   : > { %1469 = vrot.lane.b32.xlu2 %v5142_v17, %s4843_s28 }
 0xb26   : > { %v1293_v7 = vpop.xlane.xlu0 %1292 }
 0xb27   : > { %4573 = vrcp.f32 %v1293_v7  ;;  %v1727_v7 = vpop.permute.xlu1 %1726 }
 0xb2d   : > { %v4574_v3 = vpop.eup %4573 }
 0xb2e   : > { %v1299_v11 = vmul.f32 %v4574_v3, %v4570_v4 }
 0xb2f   : > { %v1296_v2 = vpop.xlane.xlu2 %1295  ;;  %v1862_v3 = vpop.permute.xlu1 %1861 }
 0xb30   : > { %4575 = vrcp.f32 %v1296_v2  ;;  %v1732_v2 = vsel %vm517_vm1, %v1727_v7, 0  ;;  %v1867_v25 = vsel %vm517_vm1, %v1862_v3, 0  ;;  %v2471_v7 = vsel %vm517_vm1, %v2466_v62, 0 }
 0xb36   : > { %v4576_v6 = vpop.eup %4575 }
 0xb37   : > { %v1300_v12 = vmul.f32 %v4576_v6, %v4572_v10  ;;  %v5294_v19 = vpop.permute.xlu2 %2700 }
 0xb39   : > { %v1301_v13 = vpack.c.bf16 %v1300_v12, %v1299_v11  ;;  %v2034_v11 = vsel %vm517_vm1, %v2029_v36, 0 }
 0xb3b   : > { %4213 = vmatmul.msk.bf16.vlgmr.msra.gmra.mxu2 %vm538_vm2, %v1301_v13  ;;  %v2169_v13 = vsel %vm517_vm1, %v2164_v41, 0 }
 0xb3c   : > { %1574 = vmatpush.bf16.xpose.msra.mxu2 %v1565_v16 }
 0xb3f   : > { %v5300_v21 = vpop.permute.xlu2 %2834 }
 0xb47   : > { %v2766_v31 = vpop.permute.xlu2 %2765 }
 0xb4b   : > { %4216 = vmatmul.msk.bf16.vlgmr.msrb.gmra.mxu2 %vm517_vm1, %v5150_v22  ;;  %v5312_v22 = vpop.permute.xlu1 %1926 }
 0xb4c   : > { %1741 = vmatpush.bf16.xpose.msrb.mxu2 %v1732_v2 }
 0xb4f   : > { %v5305_v4 = vpop.permute.xlu2 %2832 }
 0xb53   : > { %v5314_v12 = vpop.permute.xlu1 %2094 }
 0xb57   : > { %v1370_v10 = vpop.permute.xlu2 %1369 }
 0xb58   : > { %1382 = vmatpush.bf16.msrb.mxu3 %v1370_v10 }
 0xb5b   : > { %4220 = vmatmul.msk.bf16.vlgmr.msra.gmra.mxu2 %vm517_vm1, %v1558_v29  ;;  %v2162_v16 = vpop.permute.xlu1 %2161  ;;  %v2336_v29 = vsel %vm517_vm1, %v2331_v57, 0 }
 0xb5c   : > { %1876 = vmatpush.bf16.xpose.msra.mxu2 %v1867_v25 }
 0xb5f   : > { %v1470_v6 = vpop.permute.xlu2 %1469 }
 0xb60   : > { %1482 = vmatpush.bf16.msra.mxu3 %v1470_v6 }
 0xb63   : > { %v5321_v36 = vpop.permute.xlu1 %2398 }
 0xb6b   : > { %4224 = vmatmul.msk.bf16.vlgmr.msrb.gmra.mxu2 %vm517_vm1, %v5156_v27  ;;  %v5323_v27 = vpop.permute.xlu1 %2532 }
 0xb6c   : > { %2043 = vmatpush.bf16.xpose.msrb.mxu2 %v2034_v11 }
 0xb73   : > { %v1214_v41 = vpop.xlane.xlu1 %1213 }
 0xb7b   : > { %4228 = vmatmul.msk.bf16.vlgmr.msra.gmra.mxu2 %vm517_vm1, %v1860_v32  ;;  %v2633_v2 = vpop.permute.xlu1 %2632 }
 0xb7c   : > { %2178 = vmatpush.bf16.xpose.msra.mxu2 %v2169_v13  ;;  %v2638_v32 = vsel %vm517_vm1, %v2633_v2, 0  ;;  %v5360_v2 = vpop.permute.xlu0 %2698 }
 0xb83   : > { %v2768_v57 = vpop.permute.xlu1 %2767 }
 0xb8b   : > { %4232 = vmatmul.msk.bf16.vlgmr.msrb.gmra.mxu2 %vm517_vm1, %v5208_v56  ;;  %v2773_v56 = vsel %vm517_vm1, %v2768_v57, 0  ;;  %v5416_v49 = vpop.permute.xlu1 %1537 }
 0xb8c   : > { %2345 = vmatpush.bf16.xpose.msrb.mxu2 %v2336_v29 }
 0xb9b   : > { %4236 = vmatmul.msk.bf16.vlgmr.msra.gmra.mxu2 %vm517_vm1, %v2162_v16 }
 0xb9c   : > { %2480 = vmatpush.bf16.xpose.msra.mxu2 %v2471_v7 }
 0xbab   : > { %4240 = vmatmul.msk.bf16.vlgmr.msrb.gmra.mxu2 %vm517_vm1, %v5182_v50 }
 0xbac   : > { %2647 = vmatpush.bf16.xpose.msrb.mxu2 %v2638_v32 }
 0xbbb   : > { %4244 = vmatmul.msk.bf16.vlgmr.msra.gmra.mxu2 %vm517_vm1, %v2464_v0 }
 0xbbc   : > { %2782 = vmatpush.bf16.xpose.msra.mxu2 %v2773_v56  ;;  %v1217_v56 = vpop.xlane.xlu0 %1216 }
 0xbbe   : > { %v5332_v10 = vpop.f32.mrf.mxu2 }
 0xbbf   : > { %6863 = vst [vmem:[#allocation16_spill] sm:$0xff] %v5332_v10 }
 0xbc6   : > { %v5334_v62 = vpop.f32.mrf.mxu2 }
 0xbc7   : > { %6864 = vst [vmem:[#allocation17_spill] sm:$0xff] %v5334_v62 }
 0xbcb   : > { %4248 = vmatmul.msk.bf16.vlgmr.msrb.gmra.mxu2 %vm517_vm1, %v5235_v14 }
 0xbce   : > { %v5338_v3 = vpop.f32.mrf.mxu2 }
 0xbcf   : > { %v1446_v25 = vsel %vm538_vm2, %v5338_v3, -inf }
 0xbd0   : > { %1447 = vmax.xlane.f32.xlu2 %v1446_v25  ;;  %v1219_v25 = vsub.f32 %v5266_v45, %v1217_v56 }
 0xbd6   : > { %v1443_v50 = vpop.f32.mrf.mxu2 }
 0xbd7   : > { %v1449_v6 = vsel %vm538_vm2, %v1443_v50, -inf }
 0xbd8   : > { %1450 = vmax.xlane.f32.xlu0 %v1449_v6 }
 0xbdb   : > { %4252 = vmatmul.msk.bf16.vlgmr.msra.gmra.mxu2 %vm517_vm1, %v2766_v31 }
 0xbde   : > { %v5344_v0 = vpop.f32.mrf.mxu2 }
 0xbdf   : > { %v1581_v11 = vsel %vm538_vm2, %v5344_v0, -inf }
 0xbe0   : > { %1582 = vmax.xlane.f32.xlu0 %v1581_v11 }
 0xbe6   : > { %v5348_v13 = vpop.f32.mrf.mxu2 }
 0xbe7   : > { %v1584_v14 = vsel %vm538_vm2, %v5348_v13, -inf }
 0xbe8   : > { %1585 = vmax.xlane.f32.xlu1 %v1584_v14  ;;  %v1222_v14 = vmul.f32 1.442695, %v1219_v25 }
 0xbea   : > { %4577 = vpow2.f32 %v1222_v14 }
 0xbee   : > { %v5352_v16 = vpop.f32.mrf.mxu2 }
 0xbef   : > { %v1748_v29 = vsel %vm538_vm2, %v5352_v16, -inf }
 0xbf0   : > { %1749 = vmax.xlane.f32.xlu0 %v1748_v29  ;;  %v1218_v29 = vsub.f32 %v5240_v20, %v1214_v41  ;;  %v5376_v23 = vpop.eup %4577 }
 0xbf1   : > { %v1227_v56 = vsel %vm538_vm2, %v5376_v23, 0.0 }
 0xbf6   : > { %v5356_v7 = vpop.f32.mrf.mxu2 }
 0xbf7   : > { %v1751_v31 = vsel %vm538_vm2, %v5356_v7, -inf }
 0xbf8   : > { %1752 = vmax.xlane.f32.xlu1 %v1751_v31 }
 0xbfe   : > { %v5362_v32 = vpop.f32.mrf.mxu2 }
 0xbff   : > { %v1883_v57 = vsel %vm538_vm2, %v5362_v32, -inf }
 0xc00   : > { %1884 = vmax.xlane.f32.xlu1 %v1883_v57  ;;  %v1220_v57 = vmul.f32 1.442695, %v1218_v29 }
 0xc02   : > { %4579 = vpow2.f32 %v1220_v57 }
 0xc06   : > { %v5367_v6 = vpop.f32.mrf.mxu2 }
 0xc07   : > { %v1886_v11 = vsel %vm538_vm2, %v5367_v6, -inf }
 0xc08   : > { %1887 = vmax.xlane.f32.xlu0 %v1886_v11  ;;  %v5384_v20 = vpop.eup %4579 }
 0xc09   : > { %v1224_v11 = vsel %vm538_vm2, %v5384_v20, 0.0 }
 0xc0e   : > { %v5372_v31 = vpop.f32.mrf.mxu2 }
 0xc0f   : > { %v2050_v15 = vsel %vm538_vm2, %v5372_v31, -inf }
 0xc10   : > { %2051 = vmax.xlane.f32.xlu2 %v2050_v15 }
 0xc16   : > { %v5378_v45 = vpop.f32.mrf.mxu2 }
 0xc17   : > { %v2053_v25 = vsel %vm538_vm2, %v5378_v45, -inf }
 0xc18   : > { %1228 = vadd.xlane.f32.xlu2 %v1227_v56  ;;  %2054 = vmax.xlane.f32.xlu0 %v2053_v25 }
 0xc1e   : > { %v5386_v41 = vpop.f32.mrf.mxu2 }
 0xc1f   : > { %v2185_v15 = vsel %vm538_vm2, %v5386_v41, -inf }
 0xc20   : > { %2186 = vmax.xlane.f32.xlu1 %v2185_v15  ;;  %1225 = vadd.xlane.f32.xlu0 %v1224_v11 }
 0xc26   : > { %v5398_v14 = vpop.f32.mrf.mxu2 }
 0xc27   : > { %v2188_v15 = vsel %vm538_vm2, %v5398_v14, -inf }
 0xc2e   : > { %v5402_v29 = vpop.f32.mrf.mxu2 }
 0xc2f   : > { %v2352_v56 = vsel %vm538_vm2, %v5402_v29, -inf }
 0xc30   : > { %1671 = vrot.lane.b32.xlu2 %v5142_v17, %s4853_s20 }
 0xc34   : > { %1604 = vrot.lane.b32.xlu0 %v5142_v17, %s4851_s18 }
 0xc36   : > { %v5406_v57 = vpop.f32.mrf.mxu2 }
 0xc37   : > { %v2355_v47 = vsel %vm538_vm2, %v5406_v57, -inf }
 0xc39   : > { %1839 = vrot.lane.b32.xlu1 %v5190_v52, %s4849_s15 }
 0xc3e   : > { %v5410_v25 = vpop.f32.mrf.mxu2 }
 0xc41   : > { %1906 = vrot.lane.b32.xlu1 %v5190_v52, %s4851_s18 }
 0xc46   : > { %v5414_v38 = vpop.f32.mrf.mxu2 }
 0xc49   : > { %2208 = vrot.lane.b32.xlu1 %v5164_v34, %s4851_s18 }
 0xc4b   : > { %v1451_v17 = vpop.xlane.xlu0 %1450 }
 0xc4c   : > { %v1453_v11 = vsub.f32 %v1443_v50, %v1451_v17 }
 0xc4e   : > { %v1456_v39 = vmul.f32 1.442695, %v1453_v11  ;;  %v5418_v62 = vpop.f32.mrf.mxu2 }
 0xc50   : > { %4581 = vpow2.f32 %v1456_v39 }
 0xc53   : > { %v1583_v51 = vpop.xlane.xlu0 %1582 }
 0xc56   : > { %v5422_v59 = vpop.eup %4581 }
 0xc57   : > { %v1461_v50 = vsel %vm538_vm2, %v5422_v59, 0.0 }
 0xc59   : > { %2353 = vmax.xlane.f32.xlu2 %v2352_v56 }
 0xc5b   : > { %v5420_v10 = vpop.xlane.xlu1 %1585 }
 0xc5e   : > { %2189 = vmax.xlane.f32.xlu0 %v2188_v15  ;;  %v5431_v15 = vpop.f32.mrf.mxu2 }
 0xc63   : > { %v1750_v61 = vpop.xlane.xlu0 %1749 }
 0xc64   : > { %v1754_v56 = vsub.f32 %v5352_v16, %v1750_v61  ;;  %v2657_v61 = vsel %vm538_vm2, %v5431_v15, -inf }
 0xc66   : > { %v1756_v39 = vmul.f32 1.442695, %v1754_v56 }
 0xc68   : > { %4583 = vpow2.f32 %v1756_v39 }
 0xc6b   : > { %v1753_v17 = vpop.xlane.xlu1 %1752 }
 0xc6c   : > { %v1755_v11 = vsub.f32 %v5356_v7, %v1753_v17 }
 0xc6e   : > { %v1758_v16 = vmul.f32 1.442695, %v1755_v11 }
 0xc70   : > { %4585 = vpow2.f32 %v1758_v16 }
 0xc71   : > { %1973 = vrot.lane.b32.xlu2 %v5190_v52, %s4853_s20 }
 0xc72   : > { %1771 = vrot.lane.b32.xlu0 %v5190_v52, %s4843_s28  ;;  %v1448_v52 = vpop.xlane.xlu2 %1447 }
 0xc73   : > { %1462 = vadd.xlane.f32.xlu1 %v1461_v50  ;;  %v5440_v50 = vpop.eup %4583 }
 0xc74   : > { %v1760_v7 = vsel %vm538_vm2, %v5440_v50, 0.0 }
 0xc76   : > { %v5447_v9 = vpop.eup %4585 }
 0xc77   : > { %v1763_v11 = vsel %vm538_vm2, %v5447_v9, 0.0 }
 0xc79   : > { %2275 = vrot.lane.b32.xlu2 %v5164_v34, %s4853_s20 }
 0xc7a   : > { %2141 = vrot.lane.b32.xlu0 %v5164_v34, %s4849_s15 }
 0xc7b   : > { %2658 = vmax.xlane.f32.xlu1 %v2657_v61  ;;  %v1888_v56 = vpop.xlane.xlu0 %1887 }
 0xc82   : > { %2073 = vrot.lane.b32.xlu0 %v5164_v34, %s4843_s28 }
 0xc83   : > { %1761 = vadd.xlane.f32.xlu1 %v1760_v7  ;;  %v2052_v39 = vpop.xlane.xlu2 %2051 }
 0xc84   : > { %v2056_v17 = vsub.f32 %v5372_v31, %v2052_v39 }
 0xc86   : > { %v2058_v42 = vmul.f32 1.442695, %v2056_v17 }
 0xc88   : > { %4587 = vpow2.f32 %v2058_v42 }
 0xc8b   : > { %1764 = vadd.xlane.f32.xlu1 %v1763_v11  ;;  %v5451_v61 = vpop.xlane.xlu0 %2054  ;;  %v1229_v34 = vpop.xlane.xlu2 %1228  ;;  %v1498_v11 = vsel %vm517_vm1, %v5292_v5, 0  ;;  %v1452_v5 = vsub.f32 %v5338_v3, %v1448_v52  ;;  %v2490_v52 = vsel %vm538_vm2, %v5414_v38, -inf }
 0xc8c   : > { %4589 = vrcp.f32 %v1229_v34  ;;  %v1587_v34 = vsub.f32 %v5344_v0, %v1583_v51  ;;  %v2487_v51 = vsel %vm538_vm2, %v5410_v25, -inf }
 0xc8e   : > { %v5453_v16 = vpop.eup %4587 }
 0xc8f   : > { %v2062_v7 = vsel %vm538_vm2, %v5453_v16, 0.0 }
 0xc92   : > { %v4590_v31 = vpop.eup %4589 }
 0xc93   : > { %v1226_v55 = vpop.xlane.xlu0 %1225  ;;  %2063 = vadd.xlane.f32.xlu1 %v2062_v7  ;;  %v1233_v42 = vmul.f32 %v4590_v31, %v5376_v23  ;;  %v1885_v7 = vpop.xlane.xlu1 %1884  ;;  %v1890_v23 = vsub.f32 %v5367_v6, %v1888_v56  ;;  %v1454_v31 = vmul.f32 1.442695, %v1452_v5 }
 0xc94   : > { %4591 = vrcp.f32 %v1226_v55  ;;  %v1589_v55 = vmul.f32 1.442695, %v1587_v34  ;;  %v1800_v34 = vsel %vm517_vm1, %v5262_v44, 0  ;;  %v1889_v44 = vsub.f32 %v5362_v32, %v1885_v7 }
 0xc95   : > { %v2057_v32 = vsub.f32 %v5378_v45, %v5451_v61  ;;  %v2102_v61 = vsel %vm517_vm1, %v5278_v35, 0  ;;  %v2236_v35 = vsel %vm517_vm1, %v5282_v40, 0  ;;  %v2538_v40 = vsel %vm517_vm1, %v5323_v27, 0 }
 0xc96   : > { %4593 = vpow2.f32 %v1589_v55  ;;  %v5498_v55 = vpop.f32.mrf.mxu2  ;;  %v1891_v5 = vmul.f32 1.442695, %v1889_v44 }
 0xc9a   : > { %v4592_v39 = vpop.eup %4591 }
 0xc9b   : > { %v1232_v17 = vmul.f32 %v4592_v39, %v5384_v20  ;;  %v2654_v20 = vsel %vm538_vm2, %v5418_v62, -inf  ;;  %v2187_v0 = vpop.xlane.xlu1 %2186 }
 0xc9c   : > { %v2191_v6 = vsub.f32 %v5386_v41, %v2187_v0  ;;  %v1588_v41 = vsub.f32 %v5348_v13, %v5420_v10  ;;  %v2789_v13 = vsel %vm538_vm2, %v5498_v55, -inf }
 0xc9d   : > { %v1234_v54 = vpack.c.bf16 %v1233_v42, %v1232_v17 }
 0xc9e   : > { %v2193_v56 = vmul.f32 1.442695, %v2191_v6 }
 0xc9f   : > { %4211 = vmatmul.msk.bf16.vlgmr.msra.gmra.mxu1 %vm538_vm2, %v1234_v54  ;;  %v1893_v54 = vmul.f32 1.442695, %v1890_v23 }
 0xca0   : > { %1507 = vmatpush.bf16.xpose.msra.mxu1 %v1498_v11  ;;  %v1591_v11 = vmul.f32 1.442695, %v1588_v41 }
 0xca1   : > { %4595 = vpow2.f32 %v1893_v54  ;;  %v5515_v54 = vpop.f32.mrf.mxu2 }
 0xca2   : > { %2356 = vmax.xlane.f32.xlu2 %v2355_v47  ;;  %v5471_v47 = vpop.eup %4593  ;;  %4597 = vpow2.f32 %v1454_v31 }
 0xca3   : > { %v1593_v3 = vsel %vm538_vm2, %v5471_v47, 0.0  ;;  %4599 = vpow2.f32 %v2193_v56 }
 0xca4   : > { %4601 = vpow2.f32 %v1591_v11 }
 0xca5   : > { %4603 = vpow2.f32 %v1891_v5 }
 0xca6   : > { %v1605_v43 = vpop.permute.xlu0 %1604 }
 0xca7   : > { %1617 = vmatpush.bf16.msrb.mxu0 %v1605_v43  ;;  %v1632_v43 = vsel %vm517_vm1, %v5298_v18, 0  ;;  %v5482_v39 = vpop.eup %4595 }
 0xca8   : > { %v5484_v18 = vpop.eup %4597 }
 0xca9   : > { %v1458_v42 = vsel %vm538_vm2, %v5484_v18, 0.0  ;;  %v5492_v17 = vpop.eup %4599 }
 0xcaa   : > { %2655 = vmax.xlane.f32.xlu2 %v2654_v20  ;;  %v2197_v10 = vsel %vm538_vm2, %v5492_v17, 0.0  ;;  %v5504_v23 = vpop.eup %4601  ;;  %v5506_v20 = vpop.permute.xlu2 %1671 }
 0xcab   : > { %v5561_v44 = vpop.permute.xlu1 %1839 }
 0xcac   : > { %2488 = vmax.xlane.f32.xlu0 %v2487_v51  ;;  %v1934_v51 = vsel %vm517_vm1, %v5274_v33, 0 }
 0xcaf   : > { %4214 = vmatmul.msk.bf16.vlgmr.msrb.gmra.mxu1 %vm517_vm1, %v5290_v1  ;;  %v1898_v1 = vsel %vm538_vm2, %v5482_v39, 0.0 }
 0xcb0   : > { %1641 = vmatpush.bf16.xpose.msrb.mxu1 %v1632_v43  ;;  %v2792_v43 = vsel %vm538_vm2, %v5515_v54, -inf }
 0xcb2   : > { %1594 = vadd.xlane.f32.xlu2 %v1593_v3  ;;  %v2060_v3 = vmul.f32 1.442695, %v2057_v32 }
 0xcb3   : > { %v1907_v5 = vpop.permute.xlu1 %1906 }
 0xcb4   : > { %2491 = vmax.xlane.f32.xlu0 %v2490_v52 }
 0xcba   : > { %1899 = vadd.xlane.f32.xlu2 %v1898_v1 }
 0xcbc   : > { %1459 = vadd.xlane.f32.xlu0 %v1458_v42 }
 0xcbf   : > { %4218 = vmatmul.msk.bf16.vlgmr.msra.gmra.mxu1 %vm517_vm1, %v5250_v26  ;;  %v1596_v26 = vsel %vm538_vm2, %v5504_v23, 0.0 }
 0xcc0   : > { %1809 = vmatpush.bf16.xpose.msra.mxu1 %v1800_v34 }
 0xcc2   : > { %2198 = vadd.xlane.f32.xlu2 %v2197_v10 }
 0xcc4   : > { %2790 = vmax.xlane.f32.xlu0 %v2789_v13 }
 0xccc   : > { %1597 = vadd.xlane.f32.xlu0 %v1596_v26  ;;  %v2354_v0 = vpop.xlane.xlu2 %2353 }
 0xccd   : > { %v2358_v6 = vsub.f32 %v5402_v29, %v2354_v0  ;;  %v2706_v0 = vsel %vm517_vm1, %v5294_v19, 0 }
 0xccf   : > { %4222 = vmatmul.msk.bf16.vlgmr.msrb.gmra.mxu1 %vm517_vm1, %v5254_v28  ;;  %v5523_v28 = vpop.eup %4603  ;;  %v2360_v52 = vmul.f32 1.442695, %v2358_v6  ;;  %v2840_v6 = vsel %vm517_vm1, %v5300_v21, 0 }
 0xcd0   : > { %1943 = vmatpush.bf16.xpose.msrb.mxu1 %v1934_v51  ;;  %v1895_v45 = vsel %vm538_vm2, %v5523_v28, 0.0 }
 0xcd1   : > { %v2190_v31 = vpop.xlane.xlu0 %2189 }
 0xcd2   : > { %v2192_v7 = vsub.f32 %v5398_v14, %v2190_v31  ;;  %v5580_v31 = vpop.permute.xlu1 %2208 }
 0xcd4   : > { %v2195_v33 = vmul.f32 1.442695, %v2192_v7  ;;  %2793 = vmax.xlane.f32.xlu0 %v2792_v43  ;;  %v5553_v34 = vpop.permute.xlu2 %1973 }
 0xcd6   : > { %4605 = vpow2.f32 %v2195_v33 }
 0xcd7   : > { %4607 = vpow2.f32 %v2060_v3 }
 0xcd8   : > { %4609 = vpow2.f32 %v2360_v52 }
 0xcda   : > { %2375 = vrot.lane.b32.xlu2 %v5172_v37, %s4843_s28 }
 0xcdc   : > { %v5529_v14 = vpop.eup %4605  ;;  %1896 = vadd.xlane.f32.xlu0 %v1895_v45  ;;  %v5555_v10 = vpop.permute.xlu2 %2275 }
 0xcdd   : > { %v2200_v29 = vsel %vm538_vm2, %v5529_v14, 0.0  ;;  %v5537_v56 = vpop.eup %4607 }
 0xcde   : > { %2201 = vadd.xlane.f32.xlu1 %v2200_v29  ;;  %v5539_v1 = vpop.eup %4609  ;;  %v2065_v41 = vsel %vm538_vm2, %v5537_v56, 0.0 }
 0xcdf   : > { %4226 = vmatmul.msk.bf16.vlgmr.msra.gmra.mxu1 %vm517_vm1, %v5258_v30  ;;  %v2364_v11 = vsel %vm538_vm2, %v5539_v1, 0.0  ;;  %v2404_v30 = vsel %vm517_vm1, %v5321_v36, 0 }
 0xce0   : > { %2111 = vmatpush.bf16.xpose.msra.mxu1 %v2102_v61 }
 0xce4   : > { %v1772_v42 = vpop.permute.xlu0 %1771  ;;  %2066 = vadd.xlane.f32.xlu0 %v2065_v41 }
 0xce5   : > { %1784 = vmatpush.bf16.msra.mxu0 %v1772_v42 }
 0xce6   : > { %2365 = vadd.xlane.f32.xlu1 %v2364_v11  ;;  %v5586_v43 = vpop.xlane.xlu1 %1462 }
 0xcec   : > { %v5557_v13 = vpop.permute.xlu0 %2141 }
 0xcee   : > { %v5602_v45 = vpop.xlane.xlu1 %2658 }
 0xcef   : > { %4230 = vmatmul.msk.bf16.vlgmr.msrb.gmra.mxu1 %vm517_vm1, %v5312_v22 }
 0xcf0   : > { %2245 = vmatpush.bf16.xpose.msrb.mxu1 %v2236_v35 }
 0xcff   : > { %4234 = vmatmul.msk.bf16.vlgmr.msra.gmra.mxu1 %vm517_vm1, %v5314_v12  ;;  %v5566_v12 = vpop.permute.xlu0 %2073 }
 0xd00   : > { %2413 = vmatpush.bf16.xpose.msra.mxu1 %v2404_v30 }
 0xd0f   : > { %4238 = vmatmul.msk.bf16.vlgmr.msrb.gmra.mxu1 %vm517_vm1, %v5284_v53 }
 0xd10   : > { %2547 = vmatpush.bf16.xpose.msrb.mxu1 %v2538_v40 }
 0xd15   : > { %v2357_v22 = vpop.xlane.xlu2 %2356 }
 0xd16   : > { %v2359_v36 = vsub.f32 %v5406_v57, %v2357_v22 }
 0xd18   : > { %v2362_v26 = vmul.f32 1.442695, %v2359_v36 }
 0xd1a   : > { %4611 = vpow2.f32 %v2362_v26 }
 0xd1c   : > { %v5568_v51 = vpop.f32.mrf.mxu1 }
 0xd1d   : > { %v5598_v3 = vpop.xlane.xlu2 %2655 }
 0xd1f   : > { %v5572_v27 = vpop.xlane.xlu0 %2488  ;;  %4242 = vmatmul.msk.bf16.vlgmr.msra.gmra.mxu1 %vm517_vm1, %v5286_v63 }
 0xd20   : > { %v5576_v53 = vpop.eup %4611  ;;  %2715 = vmatpush.bf16.xpose.msra.mxu1 %v2706_v0 }
 0xd21   : > { %v2367_v57 = vsel %vm538_vm2, %v5576_v53, 0.0 }
 0xd22   : > { %2368 = vadd.xlane.f32.xlu0 %v2367_v57 }
 0xd24   : > { %v5582_v32 = vpop.f32.mrf.mxu1 }
 0xd25   : > { %v1595_v41 = vpop.xlane.xlu2 %1594 }
 0xd26   : > { %4613 = vrcp.f32 %v1595_v41 }
 0xd27   : > { %v5584_v7 = vpop.xlane.xlu0 %2491 }
 0xd2c   : > { %v5588_v19 = vpop.f32.mrf.mxu1  ;;  %v4614_v35 = vpop.eup %4613 }
 0xd2d   : > { %v1346_v63 = vsel %vm538_vm2, %v5588_v19, -inf  ;;  %v1601_v22 = vmul.f32 %v4614_v35, %v5471_v47 }
 0xd2e   : > { %1347 = vmax.xlane.f32.xlu0 %v1346_v63 }
 0xd2f   : > { %v5594_v33 = vpop.xlane.xlu0 %1459  ;;  %4246 = vmatmul.msk.bf16.vlgmr.msrb.gmra.mxu1 %vm517_vm1, %v5288_v8  ;;  %v1762_v8 = vpop.xlane.xlu1 %1761 }
 0xd30   : > { %2849 = vmatpush.bf16.xpose.msrb.mxu1 %v2840_v6 }
 0xd34   : > { %v5600_v52 = vpop.f32.mrf.mxu1 }
 0xd35   : > { %v1349_v29 = vsel %vm538_vm2, %v5600_v52, -inf }
 0xd36   : > { %1350 = vmax.xlane.f32.xlu1 %v1349_v29 }
 0xd37   : > { %v5606_v61 = vpop.xlane.xlu0 %2790  ;;  %v1765_v26 = vpop.xlane.xlu1 %1764 }
 0xd3c   : > { %v5608_v21 = vpop.f32.mrf.mxu1 }
 0xd3d   : > { %v1514_v42 = vsel %vm538_vm2, %v5608_v21, -inf }
 0xd3e   : > { %1515 = vmax.xlane.f32.xlu1 %v1514_v42 }
 0xd3f   : > { %v1598_v11 = vpop.xlane.xlu0 %1597  ;;  %4250 = vmatmul.msk.bf16.vlgmr.msra.gmra.mxu1 %vm517_vm1, %v5360_v2 }
 0xd40   : > { %4615 = vrcp.f32 %v1598_v11  ;;  %v1900_v11 = vpop.xlane.xlu2 %1899 }
 0xd41   : > { %4617 = vrcp.f32 %v1765_v26 }
 0xd42   : > { %2443 = vrot.lane.b32.xlu0 %v5172_v37, %s4849_s15  ;;  %4619 = vrcp.f32 %v1762_v8 }
 0xd44   : > { %v5616_v30 = vpop.f32.mrf.mxu1 }
 0xd46   : > { %v4616_v40 = vpop.eup %4615 }
 0xd47   : > { %v1602_v36 = vmul.f32 %v4616_v40, %v5504_v23  ;;  %v5625_v63 = vpop.xlane.xlu0 %2793  ;;  %v4618_v47 = vpop.eup %4617 }
 0xd48   : > { %v4620_v23 = vpop.eup %4619  ;;  %v1769_v29 = vmul.f32 %v4618_v47, %v5447_v9 }
 0xd49   : > { %v1603_v0 = vpack.c.bf16 %v1602_v36, %v1601_v22 }
 0xd4b   : > { %4221 = vmatmul.msk.bf16.vlgmr.msrb.gmra.mxu0 %vm538_vm2, %v1603_v0  ;;  %v2064_v0 = vpop.xlane.xlu1 %2063 }
 0xd4c   : > { %1919 = vmatpush.bf16.msrb.mxu0 %v1907_v5  ;;  %v5621_v57 = vpop.f32.mrf.mxu1  ;;  %v1768_v5 = vmul.f32 %v4620_v23, %v5440_v50 }
 0xd4d   : > { %v1648_v2 = vsel %vm538_vm2, %v5621_v57, -inf }
 0xd4e   : > { %1649 = vmax.xlane.f32.xlu1 %v1648_v2  ;;  %v1770_v41 = vpack.c.bf16 %v1769_v29, %v1768_v5 }
 0xd4f   : > { %4254 = vmatmul.msk.bf16.vlgmr.msrb.gmra.mxu1 %vm517_vm1, %v5305_v4  ;;  %v1897_v42 = vpop.xlane.xlu0 %1896 }
 0xd50   : > { %4621 = vrcp.f32 %v1897_v42 }
 0xd51   : > { %4623 = vrcp.f32 %v1900_v11 }
 0xd53   : > { %v2202_v42 = vpop.xlane.xlu1 %2201 }
 0xd54   : > { %v5629_v6 = vpop.f32.mrf.mxu1 }
 0xd56   : > { %v4622_v4 = vpop.eup %4621 }
 0xd57   : > { %v4624_v35 = vpop.eup %4623  ;;  %v1903_v22 = vmul.f32 %v4622_v4, %v5523_v28  ;;  %v2067_v26 = vpop.xlane.xlu0 %2066 }
 0xd58   : > { %v1904_v50 = vmul.f32 %v4624_v35, %v5482_v39  ;;  %4625 = vrcp.f32 %v2067_v26  ;;  %v2199_v28 = vpop.xlane.xlu2 %2198  ;;  %v1651_v39 = vsel %vm538_vm2, %v5629_v6, -inf }
 0xd59   : > { %4627 = vrcp.f32 %v2064_v0 }
 0xd5a   : > { %v1905_v36 = vpack.c.bf16 %v1904_v50, %v1903_v22  ;;  %4629 = vrcp.f32 %v2202_v42 }
 0xd5b   : > { %4225 = vmatmul.msk.bf16.vlgmr.msra.gmra.mxu0 %vm538_vm2, %v1770_v41  ;;  %4631 = vrcp.f32 %v2199_v28  ;;  %v2366_v28 = vpop.xlane.xlu1 %2365 }
 0xd5c   : > { %2086 = vmatpush.bf16.msra.mxu0 %v5566_v12  ;;  %v5635_v8 = vpop.f32.mrf.mxu1  ;;  %v1517_v12 = vsel %vm538_vm2, %v5616_v30, -inf  ;;  %4633 = vrcp.f32 %v2366_v28 }
 0xd5d   : > { %v1816_v35 = vsel %vm538_vm2, %v5635_v8, -inf }
 0xd5e   : > { %v4626_v47 = vpop.eup %4625 }
 0xd5f   : > { %v4628_v23 = vpop.eup %4627  ;;  %v2071_v5 = vmul.f32 %v4626_v47, %v5537_v56 }
 0xd60   : > { %v2376_v4 = vpop.permute.xlu2 %2375  ;;  %v4630_v56 = vpop.eup %4629 }
 0xd61   : > { %v4632_v50 = vpop.eup %4631 }
 0xd62   : > { %v2205_v26 = vmul.f32 %v4632_v50, %v5492_v17  ;;  %v4634_v17 = vpop.eup %4633 }
 0xd63   : > { %v2372_v42 = vmul.f32 %v4634_v17, %v5539_v1 }
 0xd64   : > { %v5637_v40 = vpop.f32.mrf.mxu1 }
 0xd65   : > { %v1819_v9 = vsel %vm538_vm2, %v5637_v40, -inf }
 0xd66   : > { %1820 = vmax.xlane.f32.xlu1 %v1819_v9 }
 0xd6b   : > { %4229 = vmatmul.msk.bf16.vlgmr.msrb.gmra.mxu0 %vm538_vm2, %v1905_v36  ;;  %v2206_v36 = vmul.f32 %v4630_v56, %v5529_v14 }
 0xd6c   : > { %2221 = vmatpush.bf16.msrb.mxu0 %v5580_v31  ;;  %v5647_v2 = vpop.f32.mrf.mxu1  ;;  %1518 = vmax.xlane.f32.xlu0 %v1517_v12  ;;  %v2070_v31 = vmul.f32 %v4628_v23, %v5453_v16 }
 0xd6d   : > { %v1950_v9 = vsel %vm538_vm2, %v5647_v2, -inf  ;;  %v2207_v0 = vpack.c.bf16 %v2206_v36, %v2205_v26 }
 0xd6e   : > { %v2072_v11 = vpack.c.bf16 %v2071_v5, %v2070_v31 }
 0xd74   : > { %v5651_v29 = vpop.f32.mrf.mxu1  ;;  %1652 = vmax.xlane.f32.xlu0 %v1651_v39 }
 0xd75   : > { %v1953_v41 = vsel %vm538_vm2, %v5651_v29, -inf }
 0xd76   : > { %1954 = vmax.xlane.f32.xlu1 %v1953_v41 }
 0xd7b   : > { %4233 = vmatmul.msk.bf16.vlgmr.msra.gmra.mxu0 %vm538_vm2, %v2072_v11 }
 0xd7c   : > { %2388 = vmatpush.bf16.msra.mxu0 %v2376_v4  ;;  %v5660_v22 = vpop.f32.mrf.mxu1  ;;  %1817 = vmax.xlane.f32.xlu0 %v1816_v35 }
 0xd7d   : > { %v2118_v12 = vsel %vm538_vm2, %v5660_v22, -inf }
 0xd84   : > { %v5664_v16 = vpop.f32.mrf.mxu1  ;;  %1951 = vmax.xlane.f32.xlu0 %v1950_v9 }
 0xd85   : > { %v2121_v39 = vsel %vm538_vm2, %v5664_v16, -inf }
 0xd8b   : > { %4237 = vmatmul.msk.bf16.vlgmr.msrb.gmra.mxu0 %vm538_vm2, %v2207_v0 }
 0xd8c   : > { %v5671_v47 = vpop.f32.mrf.mxu1  ;;  %2119 = vmax.xlane.f32.xlu0 %v2118_v12  ;;  %v2493_v12 = vsub.f32 %v5410_v25, %v5572_v27 }
 0xd8d   : > { %v2252_v5 = vsel %vm538_vm2, %v5671_v47, -inf }
 0xd94   : > { %v5675_v23 = vpop.f32.mrf.mxu1  ;;  %2122 = vmax.xlane.f32.xlu0 %v2121_v39 }
 0xd95   : > { %v2369_v14 = vpop.xlane.xlu0 %2368  ;;  %v2255_v50 = vsel %vm538_vm2, %v5675_v23, -inf }
 0xd96   : > { %4635 = vrcp.f32 %v2369_v14 }
 0xd9c   : > { %v4636_v41 = vpop.eup %4635  ;;  %v5679_v31 = vpop.f32.mrf.mxu1  ;;  %2253 = vmax.xlane.f32.xlu0 %v2252_v5  ;;  %v2495_v5 = vmul.f32 1.442695, %v2493_v12 }
 0xd9d   : > { %v2373_v11 = vmul.f32 %v4636_v41, %v5576_v53  ;;  %v2420_v4 = vsel %vm538_vm2, %v5679_v31, -inf }
 0xd9e   : > { %2421 = vmax.xlane.f32.xlu2 %v2420_v4 }
 0xd9f   : > { %v2374_v35 = vpack.c.bf16 %v2373_v11, %v2372_v42 }
 0xda1   : > { %v1348_v56 = vpop.xlane.xlu0 %1347  ;;  %4241 = vmatmul.msk.bf16.vlgmr.msra.gmra.mxu0 %vm538_vm2, %v2374_v35 }
 0xda2   : > { %v1352_v9 = vsub.f32 %v5588_v19, %v1348_v56  ;;  %v2494_v19 = vsub.f32 %v5414_v38, %v5584_v7 }
 0xda4   : > { %v1354_v36 = vmul.f32 1.442695, %v1352_v9  ;;  %v5689_v26 = vpop.f32.mrf.mxu1  ;;  %2256 = vmax.xlane.f32.xlu0 %v2255_v50  ;;  %v2497_v41 = vmul.f32 1.442695, %v2494_v19 }
 0xda5   : > { %v2423_v1 = vsel %vm538_vm2, %v5689_v26, -inf }
 0xda6   : > { %4637 = vpow2.f32 %v1354_v36  ;;  %2424 = vmax.xlane.f32.xlu2 %v2423_v1 }
 0xda9   : > { %v1351_v53 = vpop.xlane.xlu1 %1350 }
 0xdaa   : > { %v1353_v0 = vsub.f32 %v5600_v52, %v1351_v53 }
 0xdac   : > { %v5696_v28 = vpop.eup %4637  ;;  %v1356_v39 = vmul.f32 1.442695, %v1353_v0  ;;  %v5700_v14 = vpop.f32.mrf.mxu1 }
 0xdad   : > { %v1358_v17 = vsel %vm538_vm2, %v5696_v28, 0.0  ;;  %v2554_v7 = vsel %vm538_vm2, %v5700_v14, -inf }
 0xdae   : > { %4639 = vpow2.f32 %v1356_v39  ;;  %1359 = vadd.xlane.f32.xlu1 %v1358_v17 }
 0xdaf   : > { %4641 = vpow2.f32 %v2495_v5 }
 0xdb0   : > { %4643 = vpow2.f32 %v2497_v41 }
 0xdb1   : > { %v1516_v42 = vpop.xlane.xlu1 %1515 }
 0xdb2   : > { %v1520_v25 = vsub.f32 %v5608_v21, %v1516_v42 }
 0xdb4   : > { %v5704_v52 = vpop.eup %4639  ;;  %v5707_v27 = vpop.f32.mrf.mxu1  ;;  %v1522_v11 = vmul.f32 1.442695, %v1520_v25  ;;  %v2660_v25 = vsub.f32 %v5418_v62, %v5598_v3 }
 0xdb5   : > { %v1361_v38 = vsel %vm538_vm2, %v5704_v52, 0.0  ;;  %v5713_v4 = vpop.eup %4641  ;;  %v2557_v53 = vsel %vm538_vm2, %v5707_v27, -inf  ;;  %v5739_v5 = vpop.permute.xlu0 %2443 }
 0xdb6   : > { %1362 = vadd.xlane.f32.xlu2 %v1361_v38  ;;  %2555 = vmax.xlane.f32.xlu1 %v2554_v7  ;;  %v5715_v35 = vpop.eup %4643  ;;  %4645 = vpow2.f32 %v1522_v11  ;;  %v2499_v21 = vsel %vm538_vm2, %v5713_v4, 0.0  ;;  %v2662_v7 = vmul.f32 1.442695, %v2660_v25 }
 0xdb7   : > { %v2502_v9 = vsel %vm538_vm2, %v5715_v35, 0.0 }
 0xdbc   : > { %v5717_v56 = vpop.f32.mrf.mxu1  ;;  %v5723_v50 = vpop.eup %4645 }
 0xdbd   : > { %v1526_v1 = vsel %vm538_vm2, %v5723_v50, 0.0  ;;  %v2722_v12 = vsel %vm538_vm2, %v5717_v56, -inf }
 0xdbe   : > { %2500 = vadd.xlane.f32.xlu2 %v2499_v21  ;;  %2503 = vadd.xlane.f32.xlu1 %v2502_v9 }
 0xdc1   : > { %v1650_v39 = vpop.xlane.xlu1 %1649 }
 0xdc2   : > { %v1654_v9 = vsub.f32 %v5621_v57, %v1650_v39 }
 0xdc4   : > { %v5725_v36 = vpop.f32.mrf.mxu1 }
 0xdc5   : > { %v2725_v17 = vsel %vm538_vm2, %v5725_v36, -inf }
 0xdc6   : > { %1527 = vadd.xlane.f32.xlu2 %v1526_v1  ;;  %2558 = vmax.xlane.f32.xlu1 %v2557_v53 }
 0xdcc   : > { %v5731_v0 = vpop.f32.mrf.mxu1 }
 0xdcd   : > { %v2856_v19 = vsel %vm538_vm2, %v5731_v0, -inf }
 0xdce   : > { %2723 = vmax.xlane.f32.xlu2 %v2722_v12  ;;  %2857 = vmax.xlane.f32.xlu1 %v2856_v19 }
 0xdd6   : > { %2726 = vmax.xlane.f32.xlu2 %v2725_v17 }
 0xdd9   : > { %v1821_v41 = vpop.xlane.xlu1 %1820 }
 0xdda   : > { %v1823_v42 = vsub.f32 %v5637_v40, %v1821_v41  ;;  %v1656_v40 = vmul.f32 1.442695, %v1654_v9 }
 0xddc   : > { %v1826_v38 = vmul.f32 1.442695, %v1823_v42 }
 0xdde   : > { %4647 = vpow2.f32 %v1826_v38 }
 0xddf   : > { %v1519_v11 = vpop.xlane.xlu0 %1518  ;;  %4649 = vpow2.f32 %v2662_v7 }
 0xde0   : > { %v1521_v21 = vsub.f32 %v5616_v30, %v1519_v11 }
 0xde2   : > { %v1524_v1 = vmul.f32 1.442695, %v1521_v21 }
 0xde4   : > { %v5746_v53 = vpop.eup %4647  ;;  %4651 = vpow2.f32 %v1524_v1 }
 0xde5   : > { %v1831_v12 = vsel %vm538_vm2, %v5746_v53, 0.0  ;;  %v5751_v3 = vpop.eup %4649  ;;  %4653 = vpow2.f32 %v1656_v40 }
 0xde6   : > { %1832 = vadd.xlane.f32.xlu2 %v1831_v12  ;;  %v2666_v25 = vsel %vm538_vm2, %v5751_v3, 0.0 }
 0xde7   : > { %v1653_v19 = vpop.xlane.xlu0 %1652 }
 0xde8   : > { %v1655_v62 = vsub.f32 %v5629_v6, %v1653_v19  ;;  %v5773_v19 = vpop.f32.mrf.mxu1 }
 0xde9   : > { %v1955_v17 = vpop.xlane.xlu1 %1954 }
 0xdea   : > { %v5753_v41 = vpop.eup %4651  ;;  %v1658_v30 = vmul.f32 1.442695, %v1655_v62  ;;  %v1957_v57 = vsub.f32 %v5651_v29, %v1955_v17  ;;  %v2859_v62 = vsel %vm538_vm2, %v5773_v19, -inf }
 0xdeb   : > { %v1529_v39 = vsel %vm538_vm2, %v5753_v41, 0.0  ;;  %v5760_v38 = vpop.eup %4653 }
 0xdec   : > { %4655 = vpow2.f32 %v1658_v30  ;;  %v1960_v42 = vmul.f32 1.442695, %v1957_v57  ;;  %1530 = vadd.xlane.f32.xlu0 %v1529_v39  ;;  %v1660_v29 = vsel %vm538_vm2, %v5760_v38, 0.0 }
 0xdee   : > { %4657 = vpow2.f32 %v1960_v42  ;;  %2667 = vadd.xlane.f32.xlu2 %v2666_v25 }
 0xdef   : > { %v1818_v6 = vpop.xlane.xlu0 %1817 }
 0xdf0   : > { %v1822_v11 = vsub.f32 %v5635_v8, %v1818_v6 }
 0xdf2   : > { %v5762_v7 = vpop.eup %4655  ;;  %v1824_v12 = vmul.f32 1.442695, %v1822_v11 }
 0xdf3   : > { %v1663_v21 = vsel %vm538_vm2, %v5762_v7, 0.0 }
 0xdf4   : > { %v5769_v9 = vpop.eup %4657  ;;  %1661 = vadd.xlane.f32.xlu0 %v1660_v29  ;;  %1664 = vadd.xlane.f32.xlu1 %v1663_v21  ;;  %4659 = vpow2.f32 %v1824_v12 }
 0xdf5   : > { %v1965_v1 = vsel %vm538_vm2, %v5769_v9, 0.0 }
 0xdf6   : > { %1966 = vadd.xlane.f32.xlu2 %v1965_v1 }
 0xdf7   : > { %v1952_v40 = vpop.xlane.xlu0 %1951 }
 0xdf8   : > { %v1956_v8 = vsub.f32 %v5647_v2, %v1952_v40 }
 0xdfa   : > { %v1958_v17 = vmul.f32 1.442695, %v1956_v8  ;;  %v5778_v57 = vpop.eup %4659 }
 0xdfb   : > { %v1828_v25 = vsel %vm538_vm2, %v5778_v57, 0.0 }
 0xdfc   : > { %2860 = vmax.xlane.f32.xlu1 %v2859_v62  ;;  %4661 = vpow2.f32 %v1958_v17 }
 0xdff   : > { %v2120_v30 = vpop.xlane.xlu0 %2119 }
 0xe00   : > { %v2124_v39 = vsub.f32 %v5660_v22, %v2120_v30 }
 0xe02   : > { %v2126_v42 = vmul.f32 1.442695, %v2124_v39  ;;  %v5783_v11 = vpop.eup %4661 }
 0xe03   : > { %v1962_v29 = vsel %vm538_vm2, %v5783_v11, 0.0 }
 0xe04   : > { %4663 = vpow2.f32 %v2126_v42  ;;  %1829 = vadd.xlane.f32.xlu1 %v1828_v25 }
 0xe07   : > { %v2123_v6 = vpop.xlane.xlu0 %2122 }
 0xe08   : > { %2510 = vrot.lane.b32.xlu0 %v5172_v37, %s4851_s18  ;;  %v2125_v39 = vsub.f32 %v5664_v16, %v2123_v6 }
 0xe0a   : > { %v5787_v2 = vpop.eup %4663 }
 0xe0b   : > { %v2130_v22 = vsel %vm538_vm2, %v5787_v2, 0.0 }
 0xe0c   : > { %1963 = vadd.xlane.f32.xlu1 %v1962_v29  ;;  %2131 = vadd.xlane.f32.xlu2 %v2130_v22 }
 0xe0f   : > { %v2254_v21 = vpop.xlane.xlu0 %2253 }
 0xe10   : > { %v2258_v1 = vsub.f32 %v5671_v47, %v2254_v21  ;;  %v2128_v47 = vmul.f32 1.442695, %v2125_v39 }
 0xe11   : > { %v2422_v12 = vpop.xlane.xlu2 %2421 }
 0xe12   : > { %v2260_v40 = vmul.f32 1.442695, %v2258_v1  ;;  %v2426_v8 = vsub.f32 %v5679_v31, %v2422_v12  ;;  %v2661_v31 = vsub.f32 %v5431_v15, %v5602_v45 }
 0xe14   : > { %4665 = vpow2.f32 %v2260_v40  ;;  %v2428_v62 = vmul.f32 1.442695, %v2426_v8  ;;  %v2664_v16 = vmul.f32 1.442695, %v2661_v31 }
 0xe16   : > { %4667 = vpow2.f32 %v2428_v62 }
 0xe17   : > { %4669 = vpow2.f32 %v2128_v47  ;;  %v2257_v12 = vpop.xlane.xlu0 %2256 }
 0xe18   : > { %v2259_v62 = vsub.f32 %v5675_v23, %v2257_v12 }
 0xe19   : > { %v2425_v25 = vpop.xlane.xlu2 %2424 }
 0xe1a   : > { %v5795_v17 = vpop.eup %4665  ;;  %v2262_v47 = vmul.f32 1.442695, %v2259_v62  ;;  %v2427_v23 = vsub.f32 %v5689_v26, %v2425_v25 }
 0xe1b   : > { %v2264_v30 = vsel %vm538_vm2, %v5795_v17, 0.0 }
 0xe1c   : > { %2265 = vadd.xlane.f32.xlu2 %v2264_v30  ;;  %v5800_v42 = vpop.eup %4667 }
 0xe1d   : > { %v2432_v22 = vsel %vm538_vm2, %v5800_v42, 0.0  ;;  %v5808_v6 = vpop.eup %4669 }
 0xe1e   : > { %v2133_v45 = vsel %vm538_vm2, %v5808_v6, 0.0 }
 0xe21   : > { %v1360_v29 = vpop.xlane.xlu1 %1359 }
 0xe22   : > { %4671 = vrcp.f32 %v1360_v29 }
 0xe24   : > { %2433 = vadd.xlane.f32.xlu2 %v2432_v22 }
 0xe25   : > { %2577 = vrot.lane.b32.xlu1 %v5172_v37, %s4853_s20 }
 0xe28   : > { %v4672_v40 = vpop.eup %4671 }
 0xe29   : > { %v2556_v21 = vpop.xlane.xlu1 %2555  ;;  %v1363_v1 = vpop.xlane.xlu2 %1362  ;;  %v1366_v30 = vmul.f32 %v4672_v40, %v5696_v28 }
 0xe2a   : > { %4673 = vrcp.f32 %v1363_v1  ;;  %v2560_v26 = vsub.f32 %v5700_v14, %v2556_v21 }
 0xe2b   : > { %4675 = vpow2.f32 %v2664_v16  ;;  %v2430_v16 = vmul.f32 1.442695, %v2427_v23 }
 0xe2c   : > { %4677 = vrcp.f32 %v5594_v33 }
 0xe2d   : > { %4679 = vrcp.f32 %v5586_v43 }
 0xe2e   : > { %4681 = vpow2.f32 %v2262_v47 }
 0xe2f   : > { %4683 = vpow2.f32 %v2430_v16 }
 0xe30   : > { %v4674_v8 = vpop.eup %4673 }
 0xe31   : > { %v1367_v37 = vmul.f32 %v4674_v8, %v5704_v52  ;;  %v5813_v39 = vpop.xlane.xlu1 %2503  ;;  %v5815_v15 = vpop.xlane.xlu2 %2500 }
 0xe32   : > { %2134 = vadd.xlane.f32.xlu0 %v2133_v45  ;;  %v5820_v22 = vpop.eup %4675 }
 0xe33   : > { %v1368_v29 = vpack.c.bf16 %v1367_v37, %v1366_v30  ;;  %v2669_v52 = vsel %vm538_vm2, %v5820_v22, 0.0  ;;  %v4678_v1 = vpop.eup %4677  ;;  %v2562_v37 = vmul.f32 1.442695, %v2560_v26 }
 0xe34   : > { %v4680_v12 = vpop.eup %4679  ;;  %v1466_v43 = vmul.f32 %v4678_v1, %v5484_v18 }
 0xe35   : > { %4215 = vmatmul.msk.bf16.vlgmr.msrb.gmra.mxu3 %vm538_vm2, %v1368_v29  ;;  %v1467_v25 = vmul.f32 %v4680_v12, %v5422_v59  ;;  %v2795_v59 = vsub.f32 %v5498_v55, %v5606_v61 }
 0xe36   : > { %1550 = vmatpush.bf16.msrb.mxu3 %v5416_v49  ;;  %v5831_v49 = vpop.eup %4681 }
 0xe37   : > { %v2267_v8 = vsel %vm538_vm2, %v5831_v49, 0.0  ;;  %v1468_v30 = vpack.c.bf16 %v1467_v25, %v1466_v43  ;;  %v5840_v45 = vpop.eup %4683  ;;  %v2797_v29 = vmul.f32 1.442695, %v2795_v59 }
 0xe38   : > { %v2435_v14 = vsel %vm538_vm2, %v5840_v45, 0.0 }
 0xe39   : > { %v1528_v28 = vpop.xlane.xlu2 %1527  ;;  %v2559_v31 = vpop.xlane.xlu1 %2558 }
 0xe3a   : > { %2670 = vadd.xlane.f32.xlu0 %v2669_v52  ;;  %v2561_v33 = vsub.f32 %v5707_v27, %v2559_v31 }
 0xe3c   : > { %2745 = vrot.lane.b32.xlu2 %v5246_v24, %s4849_s15  ;;  %v2564_v40 = vmul.f32 1.442695, %v2561_v33 }
 0xe3e   : > { %4685 = vpow2.f32 %v2564_v40 }
 0xe3f   : > { %4687 = vpow2.f32 %v2562_v37 }
 0xe41   : > { %v2724_v62 = vpop.xlane.xlu2 %2723  ;;  %v2858_v16 = vpop.xlane.xlu1 %2857 }
 0xe42   : > { %2268 = vadd.xlane.f32.xlu0 %v2267_v8  ;;  %v2728_v27 = vsub.f32 %v5717_v56, %v2724_v62  ;;  %v2862_v33 = vsub.f32 %v5731_v0, %v2858_v16 }
 0xe44   : > { %v2730_v18 = vmul.f32 1.442695, %v2728_v27  ;;  %v5847_v21 = vpop.eup %4685  ;;  %v2864_v43 = vmul.f32 1.442695, %v2862_v33  ;;  %v5891_v33 = vpop.f32.mrf.mxu0 }
 0xe45   : > { %4217 = vmatmul.msk.bf16.vlgmr.msra.gmra.mxu3 %vm538_vm2, %v1468_v30  ;;  %v5849_v56 = vpop.eup %4687  ;;  %v2569_v47 = vsel %vm538_vm2, %v5847_v21, 0.0 }
 0xe46   : > { %1684 = vmatpush.bf16.msra.mxu3 %v5506_v20  ;;  %4689 = vpow2.f32 %v2730_v18  ;;  %v2566_v55 = vsel %vm538_vm2, %v5849_v56, 0.0 }
 0xe47   : > { %4691 = vpow2.f32 %v2797_v29 }
 0xe49   : > { %v2727_v20 = vpop.xlane.xlu2 %2726 }
 0xe4a   : > { %2436 = vadd.xlane.f32.xlu0 %v2435_v14  ;;  %v2729_v23 = vsub.f32 %v5725_v36, %v2727_v20 }
 0xe4c   : > { %v5855_v61 = vpop.eup %4689  ;;  %v2732_v1 = vmul.f32 1.442695, %v2729_v23 }
 0xe4d   : > { %v5858_v52 = vpop.eup %4691  ;;  %v2734_v31 = vsel %vm538_vm2, %v5855_v61, 0.0 }
 0xe4e   : > { %v2801_v12 = vsel %vm538_vm2, %v5858_v52, 0.0  ;;  %4693 = vpow2.f32 %v2732_v1 }
 0xe4f   : > { %2570 = vadd.xlane.f32.xlu1 %v2569_v47  ;;  %4695 = vrcp.f32 %v1528_v28 }
 0xe52   : > { %2567 = vadd.xlane.f32.xlu0 %v2566_v55 }
 0xe54   : > { %v5865_v36 = vpop.eup %4693 }
 0xe55   : > { %v4696_v25 = vpop.eup %4695  ;;  %v2737_v40 = vsel %vm538_vm2, %v5865_v36, 0.0 }
 0xe56   : > { %v1534_v62 = vmul.f32 %v4696_v25, %v5723_v50 }
 0xe57   : > { %2735 = vadd.xlane.f32.xlu1 %v2734_v31 }
 0xe59   : > { %v1833_v23 = vpop.xlane.xlu2 %1832 }
 0xe5a   : > { %2802 = vadd.xlane.f32.xlu0 %v2801_v12 }
 0xe5f   : > { %v1531_v26 = vpop.xlane.xlu0 %1530 }
 0xe60   : > { %4697 = vrcp.f32 %v1531_v26  ;;  %v5900_v26 = vpop.f32.mrf.mxu0 }
 0xe61   : > { %4699 = vpow2.f32 %v2864_v43 }
 0xe65   : > { %2738 = vadd.xlane.f32.xlu2 %v2737_v40 }
 0xe66   : > { %v4698_v8 = vpop.eup %4697 }
 0xe67   : > { %v1535_v30 = vmul.f32 %v4698_v8, %v5753_v41  ;;  %v1665_v37 = vpop.xlane.xlu1 %1664  ;;  %v5871_v0 = vpop.eup %4699 }
 0xe68   : > { %v1662_v27 = vpop.xlane.xlu0 %1661  ;;  %4701 = vrcp.f32 %v1665_v37  ;;  %v2868_v59 = vsel %vm538_vm2, %v5871_v0, 0.0 }
 0xe69   : > { %v1536_v28 = vpack.c.bf16 %v1535_v30, %v1534_v62  ;;  %4703 = vrcp.f32 %v1662_v27  ;;  %v4391_v62 = vpack.i.bf16 %v5094_v60, %v5090_v58  ;;  %v4401_v58 = vpack.i.bf16 %v5582_v32, %v5568_v51  ;;  %v6865_v32 = vld [vmem:[#allocation4_spill] sm:$0xff] }
 0xe6a   : > { %4705 = vrcp.f32 %v5813_v39 }
 0xe6b   : > { %4219 = vmatmul.msk.bf16.vlgmr.msrb.gmra.mxu3 %vm538_vm2, %v1536_v28  ;;  %4707 = vrcp.f32 %v5815_v15 }
 0xe6c   : > { %1852 = vmatpush.bf16.msrb.mxu3 %v5561_v44 }
 0xe6d   : > { %2869 = vadd.xlane.f32.xlu2 %v2868_v59 }
 0xe6e   : > { %v4702_v18 = vpop.eup %4701 }
 0xe6f   : > { %v2861_v50 = vpop.xlane.xlu1 %2860  ;;  %v4704_v14 = vpop.eup %4703  ;;  %v1669_v20 = vmul.f32 %v4702_v18, %v5762_v7 }
 0xe70   : > { %v2863_v41 = vsub.f32 %v5773_v19, %v2861_v50  ;;  %2677 = vrot.lane.b32.xlu1 %v5246_v24, %s4843_s28  ;;  %v4706_v47 = vpop.eup %4705  ;;  %v1668_v55 = vmul.f32 %v4704_v14, %v5760_v38  ;;  %v6867_v50 = vld [vmem:[#allocation8_spill] sm:$0xff] }
 0xe71   : > { %v4708_v44 = vpop.eup %4707  ;;  %v2508_v39 = vmul.f32 %v4706_v47, %v5715_v35 }
 0xe72   : > { %v2866_v29 = vmul.f32 1.442695, %v2863_v41  ;;  %v2507_v15 = vmul.f32 %v4708_v44, %v5713_v4  ;;  %v1670_v31 = vpack.c.bf16 %v1669_v20, %v1668_v55  ;;  %v5895_v4 = vpop.xlane.xlu2 %2667  ;;  %v6868_v41 = vld [vmem:[#allocation9_spill] sm:$0xff]  ;;  %v6869_v20 = vld [vmem:[#allocation14_spill] sm:$0xff]  ;;  %v6870_v55 = vld [vmem:[#allocation15_spill] sm:$0xff] }
 0xe73   : > { %v4381_v18 = vpack.i.bf16 %v6868_v41, %v6867_v50 }
 0xe74   : > { %4709 = vpow2.f32 %v2866_v29  ;;  %v2509_v7 = vpack.c.bf16 %v2508_v39, %v2507_v15 }
 0xe77   : > { %v1830_v19 = vpop.xlane.xlu1 %1829 }
 0xe78   : > { %4711 = vrcp.f32 %v1830_v19  ;;  %v6872_v19 = vld [vmem:[#allocation11_spill] sm:$0xff] }
 0xe79   : > { %4713 = vrcp.f32 %v1833_v23  ;;  %v4396_v23 = vpack.i.bf16 %v6870_v55, %v6869_v20 }
 0xe7a   : > { %v5886_v1 = vpop.eup %4709  ;;  %v2511_v16 = vpop.permute.xlu0 %2510 }
 0xe7b   : > { %4223 = vmatmul.msk.bf16.vlgmr.msra.gmra.mxu3 %vm538_vm2, %v1670_v31  ;;  %2523 = vmatpush.bf16.msrb.mxu0 %v2511_v16  ;;  %v2871_v12 = vsel %vm538_vm2, %v5886_v1, 0.0  ;;  %v1967_v30 = vpop.xlane.xlu2 %1966  ;;  %v6871_v31 = vld [vmem:[#allocation10_spill] sm:$0xff] }
 0xe7c   : > { %1986 = vmatpush.bf16.msra.mxu3 %v5553_v34  ;;  %2872 = vadd.xlane.f32.xlu0 %v2871_v12  ;;  %v2796_v34 = vsub.f32 %v5515_v54, %v5625_v63  ;;  %v4386_v16 = vpack.i.bf16 %v6872_v19, %v6871_v31 }
 0xe7e   : > { %4245 = vmatmul.msk.bf16.vlgmr.msrb.gmra.mxu0 %vm538_vm2, %v2509_v7  ;;  %v4712_v35 = vpop.eup %4711  ;;  %v2799_v37 = vmul.f32 1.442695, %v2796_v34  ;;  %v6874_v7 = vld [vmem:[#allocation17_spill] sm:$0xff] }
 0xe7f   : > { %v4714_v38 = vpop.eup %4713  ;;  %v1836_v43 = vmul.f32 %v4712_v35, %v5778_v57  ;;  %v1964_v8 = vpop.xlane.xlu1 %1963  ;;  %v4371_v57 = vpack.i.bf16 %v5022_v48, %v5018_v46 }
 0xe80   : > { %v1837_v25 = vmul.f32 %v4714_v38, %v5746_v53  ;;  %4715 = vrcp.f32 %v1964_v8  ;;  %v5910_v53 = vpop.f32.mrf.mxu0 }
 0xe81   : > { %4717 = vrcp.f32 %v1967_v30 }
 0xe82   : > { %v1838_v40 = vpack.c.bf16 %v1837_v25, %v1836_v43  ;;  %4719 = vpow2.f32 %v2799_v37 }
 0xe83   : > { %v2132_v46 = vpop.xlane.xlu2 %2131 }
 0xe84   : > { %4721 = vrcp.f32 %v2132_v46 }
 0xe85   : > { %2812 = vrot.lane.b32.xlu2 %v5246_v24, %s4851_s18 }
 0xe86   : > { %v4716_v54 = vpop.eup %4715 }
 0xe87   : > { %v4718_v60 = vpop.eup %4717  ;;  %v1970_v63 = vmul.f32 %v4716_v54, %v5783_v11  ;;  %v6866_v11 = vld [vmem:[#allocation5_spill] sm:$0xff] }
 0xe88   : > { %v1971_v28 = vmul.f32 %v4718_v60, %v5769_v9  ;;  %v5926_v51 = vpop.f32.mrf.mxu0  ;;  %v4376_v59 = vpack.i.bf16 %v6866_v11, %v6865_v32 }
 0xe8b   : > { %4227 = vmatmul.msk.bf16.vlgmr.msrb.gmra.mxu3 %vm538_vm2, %v1838_v40 }
 0xe8c   : > { %2154 = vmatpush.bf16.msrb.mxu3 %v5557_v13  ;;  %v5918_v13 = vpop.eup %4719 }
 0xe8d   : > { %4392 = vrot.lane.b32.xlu2 %v4391_v62, %s4854_s22  ;;  %v2804_v27 = vsel %vm538_vm2, %v5918_v13, 0.0  ;;  %v4722_v14 = vpop.eup %4721 }
 0xe8f   : > { %v2266_v12 = vpop.xlane.xlu2 %2265 }
 0xe90   : > { %2879 = vrot.lane.b32.xlu0 %v5246_v24, %s4853_s20  ;;  %v1972_v24 = vpack.c.bf16 %v1971_v28, %v1970_v63  ;;  %v1921_v48 = vpop.f32.mrf.mxu0 }
 0xe95   : > { %4402 = vrot.lane.b32.xlu2 %v4401_v58, %s4855_s23 }
 0xe97   : > { %v2578_v37 = vpop.permute.xlu1 %2577  ;;  %v2434_v54 = vpop.xlane.xlu2 %2433 }
 0xe98   : > { %4372 = vrot.lane.b32.xlu0 %v4371_v57, %s4855_s23  ;;  %v1923_v39 = vpop.f32.mrf.mxu0 }
 0xe99   : > { %v4436_v46 = vpack.i.bf16 %v1923_v39, %v1921_v48 }
 0xe9a   : > { %2805 = vadd.xlane.f32.xlu1 %v2804_v27 }
 0xe9b   : > { %4231 = vmatmul.msk.bf16.vlgmr.msra.gmra.mxu3 %vm538_vm2, %v1972_v24 }
 0xe9c   : > { %2288 = vmatpush.bf16.msra.mxu3 %v5555_v10  ;;  %v2138_v10 = vmul.f32 %v4722_v14, %v5787_v2 }
 0xe9f   : > { %v2746_v11 = vpop.permute.xlu2 %2745 }
 0xea0   : > { %4377 = vrot.lane.b32.xlu0 %v4376_v59, %s4854_s22  ;;  %v5948_v38 = vpop.f32.mrf.mxu0 }
 0xea5   : > { %v2135_v9 = vpop.xlane.xlu0 %2134 }
 0xea6   : > { %4723 = vrcp.f32 %v2135_v9 }
 0xea7   : > { %4725 = vrcp.f32 %v2266_v12 }
 0xea8   : > { %4382 = vrot.lane.b32.xlu0 %v4381_v18, %s4856_s25  ;;  %v5954_v60 = vpop.f32.mrf.mxu0 }
 0xeac   : > { %v4724_v29 = vpop.eup %4723 }
 0xead   : > { %v2139_v47 = vmul.f32 %v4724_v29, %v5808_v6  ;;  %v2671_v44 = vpop.xlane.xlu0 %2670  ;;  %v6873_v6 = vld [vmem:[#allocation16_spill] sm:$0xff]  ;;  %v4726_v25 = vpop.eup %4725 }
 0xeae   : > { %v4406_v35 = vpack.i.bf16 %v6874_v7, %v6873_v6  ;;  %v2272_v40 = vmul.f32 %v4726_v25, %v5795_v17  ;;  %v4421_v17 = vpack.i.bf16 %v5900_v26, %v5891_v33 }
 0xeaf   : > { %v2140_v15 = vpack.c.bf16 %v2139_v47, %v2138_v10 }
 0xeb0   : > { %4397 = vrot.lane.b32.xlu0 %v4396_v23, %s4856_s25  ;;  %v2223_v28 = vpop.f32.mrf.mxu0 }
 0xeb1   : > { %4235 = vmatmul.msk.bf16.vlgmr.msrb.gmra.mxu3 %vm538_vm2, %v2140_v15 }
 0xeb2   : > { %2456 = vmatpush.bf16.msrb.mxu3 %v5739_v5 }
 0xeb3   : > { %4387 = vrot.lane.b32.xlu1 %v4386_v16, %s4855_s23 }
 0xeb5   : > { %v2269_v2 = vpop.xlane.xlu0 %2268 }
 0xeb6   : > { %4727 = vrcp.f32 %v2269_v2 }
 0xeb8   : > { %4407 = vrot.lane.b32.xlu0 %v4406_v35, %s4854_s22  ;;  %v1384_v43 = vpop.f32.mrf.mxu3  ;;  %v2225_v33 = vpop.f32.mrf.mxu0  ;;  %v4327_v35 = vld [vmem:[%s6839_s2 + $0x8] sm:$0xff] }
 0xeb9   : > { %v4451_v9 = vpack.i.bf16 %v2225_v33, %v2223_v28  ;;  %2983 = vmatpush.bf16.msrb.mxu2 %v4327_v35 }
 0xebc   : > { %v4728_v34 = vpop.eup %4727 }
 0xebd   : > { %v2273_v8 = vmul.f32 %v4728_v34, %v5831_v49  ;;  %v2437_v62 = vpop.xlane.xlu0 %2436 }
 0xebe   : > { %4729 = vrcp.f32 %v2437_v62 }
 0xebf   : > { %v2274_v5 = vpack.c.bf16 %v2273_v8, %v2272_v40  ;;  %4731 = vrcp.f32 %v2434_v54 }
 0xec0   : > { %v1386_v30 = vpop.f32.mrf.mxu3  ;;  %v5976_v39 = vpop.f32.mrf.mxu0 }
 0xec1   : > { %v4411_v58 = vpack.i.bf16 %v1386_v30, %v1384_v43  ;;  %4239 = vmatmul.msk.bf16.vlgmr.msra.gmra.mxu3 %vm538_vm2, %v2274_v5  ;;  %v4326_v43 = vld [vmem:[%s6839_s2] sm:$0xff] }
 0xec2   : > { %2590 = vmatpush.bf16.msra.mxu3 %v2578_v37  ;;  %v2571_v59 = vpop.xlane.xlu1 %2570  ;;  %2984 = vmatpush.bf16.msrb.mxu2 %v4326_v43 }
 0xec3   : > { %4412 = vrot.lane.b32.xlu2 %v4411_v58, %s4856_s25 }
 0xec4   : > { %v4730_v63 = vpop.eup %4729 }
 0xec5   : > { %v4732_v49 = vpop.eup %4731  ;;  %v2441_v57 = vmul.f32 %v4730_v63, %v5840_v45  ;;  %v2568_v32 = vpop.xlane.xlu0 %2567 }
 0xec6   : > { %v2440_v24 = vmul.f32 %v4732_v49, %v5800_v42  ;;  %4733 = vrcp.f32 %v2568_v32 }
 0xec7   : > { %4735 = vrcp.f32 %v2571_v59 }
 0xec8   : > { %v2442_v27 = vpack.c.bf16 %v2441_v57, %v2440_v24  ;;  %4737 = vrcp.f32 %v2671_v44  ;;  %v5967_v48 = vpop.f32.mrf.mxu3  ;;  %v5981_v12 = vpop.f32.mrf.mxu0 }
 0xec9   : > { %4739 = vrcp.f32 %v5895_v4 }
 0xeca   : > { %v2736_v50 = vpop.xlane.xlu1 %2735 }
 0xecb   : > { %4422 = vrot.lane.b32.xlu2 %v4421_v17, %s4854_s22 }
 0xecc   : > { %v4734_v45 = vpop.eup %4733 }
 0xecd   : > { %v4736_v42 = vpop.eup %4735  ;;  %v2574_v41 = vmul.f32 %v4734_v45, %v5849_v56  ;;  %v2803_v31 = vpop.xlane.xlu0 %2802 }
 0xece   : > { %v4738_v18 = vpop.eup %4737  ;;  %v2575_v14 = vmul.f32 %v4736_v42, %v5847_v21 }
 0xecf   : > { %v4740_v29 = vpop.eup %4739  ;;  %v2675_v47 = vmul.f32 %v4738_v18, %v5820_v22 }
 0xed0   : > { %v2576_v10 = vpack.c.bf16 %v2575_v14, %v2574_v41  ;;  %v2674_v4 = vmul.f32 %v4740_v29, %v5751_v3  ;;  %v5973_v55 = vpop.f32.mrf.mxu3 }
 0xed1   : > { %4243 = vmatmul.msk.bf16.vlgmr.msrb.gmra.mxu3 %vm538_vm2, %v2442_v27 }
 0xed2   : > { %2758 = vmatpush.bf16.msrb.mxu3 %v2746_v11  ;;  %v2676_v56 = vpack.c.bf16 %v2675_v47, %v2674_v4 }
 0xed3   : > { %4437 = vrot.lane.b32.xlu2 %v4436_v46, %s4854_s22 }
 0xed8   : > { %v2739_v26 = vpop.xlane.xlu2 %2738 }
 0xed9   : > { %4741 = vrcp.f32 %v2739_v26 }
 0xeda   : > { %4743 = vrcp.f32 %v2736_v50  ;;  %v6876_v50 = vld [vmem:[#allocation2_spill] sm:$0xff] }
 0xedb   : > { %4452 = vrot.lane.b32.xlu2 %v4451_v9, %s4854_s22  ;;  %v6875_v9 = vld [vmem:[#allocation3_spill] sm:$0xff] }
 0xedf   : > { %v4742_v23 = vpop.eup %4741 }
 0xee0   : > { %v2870_v44 = vpop.xlane.xlu2 %2869  ;;  %v4744_v22 = vpop.eup %4743  ;;  %v2743_v15 = vmul.f32 %v4742_v23, %v5865_v36 }
 0xee1   : > { %4247 = vmatmul.msk.bf16.vlgmr.msra.gmra.mxu3 %vm538_vm2, %v2576_v10  ;;  %v2742_v3 = vmul.f32 %v4744_v22, %v5855_v61 }
 0xee2   : > { %v2678_v20 = vpop.permute.xlu1 %2677 }
 0xee3   : > { %2690 = vmatpush.bf16.msra.mxu0 %v2678_v20  ;;  %v2744_v16 = vpack.c.bf16 %v2743_v15, %v2742_v3 }
 0xee6   : > { %4249 = vmatmul.msk.bf16.vlgmr.msra.gmra.mxu0 %vm538_vm2, %v2676_v56 }
 0xee8   : > { %v2813_v21 = vpop.permute.xlu2 %2812 }
 0xee9   : > { %2825 = vmatpush.bf16.msrb.mxu0 %v2813_v21 }
 0xeee   : > { %v1552_v19 = vpop.f32.mrf.mxu3 }
 0xeef   : > { %v2873_v2 = vpop.xlane.xlu0 %2872 }
 0xef0   : > { %4745 = vrcp.f32 %v2873_v2  ;;  %v4393_v4 = vpop.permute.xlu2 %4392  ;;  %v6878_v2 = vld [vmem:[#allocation6_spill] sm:$0xff] }
 0xef1   : > { %4251 = vmatmul.msk.bf16.vlgmr.msrb.gmra.mxu3 %vm538_vm2, %v2744_v16  ;;  %4747 = vrcp.f32 %v2870_v44  ;;  %v4395_v15 = vunpack.i.h.bf16 %v4393_v4 }
 0xef2   : > { %4749 = vrcp.f32 %v2803_v31  ;;  %v4394_v31 = vunpack.i.l.bf16 %v4393_v4 }
 0xef6   : > { %v1554_v6 = vpop.f32.mrf.mxu3  ;;  %v4746_v61 = vpop.eup %4745 }
 0xef7   : > { %v4416_v7 = vpack.i.bf16 %v1554_v6, %v1552_v19  ;;  %v4748_v34 = vpop.eup %4747  ;;  %v2877_v40 = vmul.f32 %v4746_v61, %v5886_v1  ;;  %v6877_v19 = vld [vmem:[#allocation7_spill] sm:$0xff] }
 0xef8   : > { %v2876_v8 = vmul.f32 %v4748_v34, %v5871_v0  ;;  %v4750_v49 = vpop.eup %4749  ;;  %v4403_v34 = vpop.permute.xlu2 %4402 }
 0xef9   : > { %4417 = vrot.lane.b32.xlu0 %v4416_v7, %s4855_s23  ;;  %v2809_v28 = vmul.f32 %v4750_v49, %v5858_v52 }
 0xefa   : > { %v2878_v30 = vpack.c.bf16 %v2877_v40, %v2876_v8 }
 0xefb   : > { %v2525_v36 = vpop.f32.mrf.mxu0 }
 0xefe   : > { %v1686_v25 = vpop.f32.mrf.mxu3 }
 0xf02   : > { %v2880_v5 = vpop.permute.xlu0 %2879 }
 0xf03   : > { %v2527_v62 = vpop.f32.mrf.mxu0  ;;  %2892 = vmatpush.bf16.msra.mxu3 %v2880_v5  ;;  %v4405_v5 = vunpack.i.h.bf16 %v4403_v34 }
 0xf04   : > { %v4466_v37 = vpack.i.bf16 %v2527_v62, %v2525_v36  ;;  %v4404_v62 = vunpack.i.l.bf16 %v4403_v34 }
 0xf06   : > { %v1688_v54 = vpop.f32.mrf.mxu3  ;;  %4467 = vrot.lane.b32.xlu2 %v4466_v37, %s4854_s22  ;;  %4255 = vmatmul.msk.bf16.vlgmr.msra.gmra.mxu3 %vm538_vm2, %v2878_v30 }
 0xf07   : > { %v4426_v58 = vpack.i.bf16 %v1688_v54, %v1686_v25 }
 0xf09   : > { %4427 = vrot.lane.b32.xlu1 %v4426_v58, %s4856_s25 }
 0xf0a   : > { %v4373_v63 = vpop.permute.xlu0 %4372 }
 0xf0b   : > { %v4375_v32 = vunpack.i.h.bf16 %v4373_v63  ;;  %v4374_v11 = vunpack.i.l.bf16 %v4373_v63  ;;  %v6879_v63 = vld [vmem:[#allocation13_spill] sm:$0xff] }
 0xf0d   : > { %v2806_v17 = vpop.xlane.xlu1 %2805  ;;  %v809_v42 = vsel %vm517_vm1, %v6875_v9, %v4375_v32  ;;  %v808_v52 = vsel %vm517_vm1, %v6876_v50, %v4374_v11 }
 0xf0e   : > { %4751 = vrcp.f32 %v2806_v17  ;;  %v1854_v1 = vpop.f32.mrf.mxu3  ;;  %v1414_v17 = vsel %vm517_vm1, %v6879_v63, %v4405_v5 }
 0xf12   : > { %v4378_v0 = vpop.permute.xlu0 %4377 }
 0xf13   : > { %v4380_v33 = vunpack.i.h.bf16 %v4378_v0  ;;  %v4379_v45 = vunpack.i.l.bf16 %v4378_v0 }
 0xf14   : > { %v4752_v57 = vpop.eup %4751 }
 0xf15   : > { %v2810_v24 = vmul.f32 %v4752_v57, %v5918_v13  ;;  %v810_v18 = vsel %vm538_vm2, %v808_v52, %v4379_v45  ;;  %v811_v14 = vsel %vm538_vm2, %v809_v42, %v4380_v33 }
 0xf16   : > { %v1856_v27 = vpop.f32.mrf.mxu3 }
 0xf17   : > { %v2811_v59 = vpack.c.bf16 %v2810_v24, %v2809_v28  ;;  %v4431_v46 = vpack.i.bf16 %v1856_v27, %v1854_v1  ;;  %v6880_v1 = vld [vmem:[#allocation12_spill] sm:$0xff] }
 0xf18   : > { %v1413_v49 = vsel %vm517_vm1, %v6880_v1, %v4404_v62 }
 0xf19   : > { %4432 = vrot.lane.b32.xlu0 %v4431_v46, %s4855_s23  ;;  %4253 = vmatmul.msk.bf16.vlgmr.msrb.gmra.mxu0 %vm538_vm2, %v2811_v59 }
 0xf1a   : > { %v4383_v26 = vpop.permute.xlu0 %4382 }
 0xf1b   : > { %v4385_v13 = vunpack.i.h.bf16 %v4383_v26  ;;  %v4384_v41 = vunpack.i.l.bf16 %v4383_v26 }
 0xf1d   : > { %v813_v29 = vsel %vm812_vm3, %v810_v18, %v4384_v41  ;;  %v814_v10 = vsel %vm812_vm3, %v811_v14, %v4385_v13  ;;  %v4413_v58 = vpop.permute.xlu2 %4412 }
 0xf1e   : > { %v2929_v47 = vpack.c.bf16 %v814_v10, %v813_v29  ;;  %v1988_v44 = vpop.f32.mrf.mxu3  ;;  %v4415_v28 = vunpack.i.h.bf16 %v4413_v58  ;;  %v4414_v24 = vunpack.i.l.bf16 %v4413_v58 }
 0xf20   : > { %4264 = vmatmul.msk.bf16.vlgmr.msrb.gmra.mxu2 %vm436_vm0, %v2929_v47 }
 0xf22   : > { %v4398_v56 = vpop.permute.xlu0 %4397 }
 0xf23   : > { %v4400_v7 = vunpack.i.h.bf16 %v4398_v56  ;;  %v4399_v35 = vunpack.i.l.bf16 %v4398_v56 }
 0xf25   : > { %v4388_v20 = vpop.permute.xlu1 %4387  ;;  %v4423_v47 = vpop.permute.xlu2 %4422 }
 0xf26   : > { %v4390_v23 = vunpack.i.h.bf16 %v4388_v20  ;;  %v4389_v21 = vunpack.i.l.bf16 %v4388_v20  ;;  %v1990_v22 = vpop.f32.mrf.mxu3  ;;  %v4425_v20 = vunpack.i.h.bf16 %v4423_v47  ;;  %v4424_v56 = vunpack.i.l.bf16 %v4423_v47 }
 0xf27   : > { %v4441_v3 = vpack.i.bf16 %v1990_v22, %v1988_v44 }
 0xf28   : > { %v1112_v16 = vsel %vm517_vm1, %v6877_v19, %v4390_v23  ;;  %v1111_v6 = vsel %vm517_vm1, %v6878_v2, %v4389_v21 }
 0xf29   : > { %v1113_v36 = vsel %vm538_vm2, %v1111_v6, %v4394_v31  ;;  %v1114_v61 = vsel %vm538_vm2, %v1112_v16, %v4395_v15  ;;  %4442 = vrot.lane.b32.xlu1 %v4441_v3, %s4856_s25 }
 0xf2a   : > { %v1115_v43 = vsel %vm812_vm3, %v1113_v36, %v4399_v35  ;;  %v1116_v25 = vsel %vm812_vm3, %v1114_v61, %v4400_v7  ;;  %v4408_v8 = vpop.permute.xlu0 %4407 }
 0xf2b   : > { %v2930_v40 = vpack.c.bf16 %v1116_v25, %v1115_v43  ;;  %v4410_v30 = vunpack.i.h.bf16 %v4408_v8  ;;  %v4409_v37 = vunpack.i.l.bf16 %v4408_v8 }
 0xf2d   : > { %v1415_v0 = vsel %vm538_vm2, %v1413_v49, %v4409_v37  ;;  %v1416_v57 = vsel %vm538_vm2, %v1414_v17, %v4410_v30 }
 0xf2e   : > { %v1417_v27 = vsel %vm812_vm3, %v1415_v0, %v4414_v24  ;;  %v1418_v32 = vsel %vm812_vm3, %v1416_v57, %v4415_v28  ;;  %v4819_v28 = vld [vmem:[%s4940_s27] sm:$0xff] }
 0xf2f   : > { %v2931_v46 = vpack.c.bf16 %v1418_v32, %v1417_v27 }
 0xf30   : > { %4265 = vmatmul.msk.bf16.gmra.mxu2 %vm436_vm0, %v2930_v40  ;;  %v4438_v40 = vpop.permute.xlu2 %4437 }
 0xf31   : > { %v4440_v62 = vunpack.i.h.bf16 %v4438_v40  ;;  %v4439_v30 = vunpack.i.l.bf16 %v4438_v40 }
 0xf34   : > { %v2156_v54 = vpop.f32.mrf.mxu3 }
 0xf3c   : > { %v2158_v11 = vpop.f32.mrf.mxu3 }
 0xf3d   : > { %v4446_v59 = vpack.i.bf16 %v2158_v11, %v2156_v54 }
 0xf3f   : > { %4447 = vrot.lane.b32.xlu0 %v4446_v59, %s4855_s23 }
 0xf40   : > { %4266 = vmatmul.msk.bf16.gmra.mxu2 %vm436_vm0, %v2931_v46  ;;  %v4820_v46 = vld [vmem:[%s4940_s27 + $0x10] sm:$0xff] }
 0xf44   : > { %v2290_v33 = vpop.f32.mrf.mxu3 }
 0xf4c   : > { %v2292_v45 = vpop.f32.mrf.mxu3 }
 0xf4d   : > { %v4456_v26 = vpack.i.bf16 %v2292_v45, %v2290_v33 }
 0xf4f   : > { %4457 = vrot.lane.b32.xlu1 %v4456_v26, %s4856_s25 }
 0xf54   : > { %v2458_v9 = vpop.f32.mrf.mxu3 }
 0xf5c   : > { %v2460_v42 = vpop.f32.mrf.mxu3 }
 0xf5d   : > { %v4461_v50 = vpack.i.bf16 %v2460_v42, %v2458_v9  ;;  %v4821_v42 = vld [vmem:[%s4940_s27 + $0x18] sm:$0xff] }
 0xf5f   : > { %4462 = vrot.lane.b32.xlu0 %v4461_v50, %s4855_s23 }
 0xf64   : > { %v2592_v52 = vpop.f32.mrf.mxu3 }
 0xf6b   : > { %v4418_v18 = vpop.permute.xlu0 %4417 }
 0xf6c   : > { %v2594_v13 = vpop.f32.mrf.mxu3  ;;  %v4420_v29 = vunpack.i.h.bf16 %v4418_v18  ;;  %v4419_v10 = vunpack.i.l.bf16 %v4418_v18 }
 0xf6d   : > { %v4471_v41 = vpack.i.bf16 %v2594_v13, %v2592_v52  ;;  %v4453_v13 = vpop.permute.xlu2 %4452 }
 0xf6e   : > { %v1716_v44 = vsel %vm517_vm1, %v5973_v55, %v4420_v29  ;;  %v1715_v4 = vsel %vm517_vm1, %v5967_v48, %v4419_v10  ;;  %v6041_v48 = vpop.f32.mrf.mxu0  ;;  %v4455_v29 = vunpack.i.h.bf16 %v4453_v13  ;;  %v4454_v10 = vunpack.i.l.bf16 %v4453_v13 }
 0xf6f   : > { %4472 = vrot.lane.b32.xlu1 %v4471_v41, %s4856_s25  ;;  %v1717_v31 = vsel %vm538_vm2, %v1715_v4, %v4424_v56  ;;  %v1718_v3 = vsel %vm538_vm2, %v1716_v44, %v4425_v20 }
 0xf74   : > { %v2760_v14 = vpop.f32.mrf.mxu3 }
 0xf76   : > { %v6043_v7 = vpop.f32.mrf.mxu0 }
 0xf7b   : > { %v4428_v23 = vpop.permute.xlu1 %4427 }
 0xf7c   : > { %v4430_v21 = vunpack.i.h.bf16 %v4428_v23  ;;  %v4429_v22 = vunpack.i.l.bf16 %v4428_v23  ;;  %v2762_v15 = vpop.f32.mrf.mxu3 }
 0xf7d   : > { %v4476_v19 = vpack.i.bf16 %v2762_v15, %v2760_v14 }
 0xf7e   : > { %v1719_v16 = vsel %vm812_vm3, %v1717_v31, %v4429_v22  ;;  %v1720_v2 = vsel %vm812_vm3, %v1718_v3, %v4430_v21 }
 0xf7f   : > { %v2932_v6 = vpack.c.bf16 %v1720_v2, %v1719_v16  ;;  %4477 = vrot.lane.b32.xlu0 %v4476_v19, %s4855_s23  ;;  %v4823_v19 = vld [vmem:[%s4940_s27 + $0x28] sm:$0xff]  ;;  %v4824_v2 = vld [vmem:[%s4940_s27 + $0x20] sm:$0xff] }
 0xf81   : > { %4267 = vmatmul.msk.bf16.gmra.mxu2 %vm436_vm0, %v2932_v6 }
 0xf89   : > { %v2894_v55 = vpop.f32.mrf.mxu3 }
 0xf8b   : > { %v4433_v61 = vpop.permute.xlu0 %4432 }
 0xf8c   : > { %v4435_v43 = vunpack.i.h.bf16 %v4433_v61  ;;  %v4434_v25 = vunpack.i.l.bf16 %v4433_v61 }
 0xf8e   : > { %v2018_v8 = vsel %vm517_vm1, %v5926_v51, %v4435_v43  ;;  %v2017_v5 = vsel %vm517_vm1, %v5910_v53, %v4434_v25  ;;  %v4468_v25 = vpop.permute.xlu2 %4467 }
 0xf8f   : > { %v2019_v63 = vsel %vm538_vm2, %v2017_v5, %v4439_v30  ;;  %v2020_v17 = vsel %vm538_vm2, %v2018_v8, %v4440_v62  ;;  %v4470_v8 = vunpack.i.h.bf16 %v4468_v25  ;;  %v4469_v5 = vunpack.i.l.bf16 %v4468_v25 }
 0xf91   : > { %v2896_v35 = vpop.f32.mrf.mxu3 }
 0xf92   : > { %v4486_v36 = vpack.i.bf16 %v2896_v35, %v2894_v55 }
 0xf94   : > { %4487 = vrot.lane.b32.xlu1 %v4486_v36, %s4856_s25 }
 0xf96   : > { %v2827_v34 = vpop.f32.mrf.mxu0 }
 0xf9b   : > { %v4443_v37 = vpop.permute.xlu1 %4442 }
 0xf9c   : > { %v4445_v54 = vunpack.i.h.bf16 %v4443_v37  ;;  %v4444_v58 = vunpack.i.l.bf16 %v4443_v37 }
 0xf9e   : > { %v2021_v1 = vsel %vm812_vm3, %v2019_v63, %v4444_v58  ;;  %v2022_v49 = vsel %vm812_vm3, %v2020_v17, %v4445_v54  ;;  %v2829_v0 = vpop.f32.mrf.mxu0 }
 0xf9f   : > { %v2933_v51 = vpack.c.bf16 %v2022_v49, %v2021_v1  ;;  %v4481_v57 = vpack.i.bf16 %v2829_v0, %v2827_v34 }
 0xfa1   : > { %4482 = vrot.lane.b32.xlu2 %v4481_v57, %s4854_s22  ;;  %4268 = vmatmul.msk.bf16.gmra.mxu2 %vm436_vm0, %v2933_v51 }
 0xfa3   : > { %v2986_v53 = vpop.f32.mrf.mxu2 }
 0xfa4   : > { %v6057_v24 = vadd.f32 %v4819_v28, %v2986_v53 }
 0xfa6   : > { %v3044_v27 = vsel %vm436_vm0, %v6057_v24, 0.0 }
 0xfa9   : > { %3045 = vadd.xlane.f32.xlu0 %v3044_v27  ;;  %v4825_v27 = vld [vmem:[%s4940_s27 + $0x30] sm:$0xff] }
 0xfab   : > { %v2988_v32 = vpop.f32.mrf.mxu2 }
 0xfb1   : > { %v4448_v59 = vpop.permute.xlu0 %4447 }
 0xfb2   : > { %v4450_v26 = vunpack.i.h.bf16 %v4448_v59  ;;  %v4449_v9 = vunpack.i.l.bf16 %v4448_v59 }
 0xfb3   : > { %v2991_v11 = vpop.f32.mrf.mxu2 }
 0xfb4   : > { %v6062_v33 = vadd.f32 %v4820_v46, %v2991_v11  ;;  %v2320_v18 = vsel %vm517_vm1, %v5954_v60, %v4450_v26  ;;  %v2319_v14 = vsel %vm517_vm1, %v5948_v38, %v4449_v9  ;;  %v4822_v60 = vld [vmem:[%s4940_s27 + $0x8] sm:$0xff] }
 0xfb5   : > { %v2321_v20 = vsel %vm538_vm2, %v2319_v14, %v4454_v10  ;;  %v2322_v56 = vsel %vm538_vm2, %v2320_v18, %v4455_v29  ;;  %v6080_v15 = vadd.f32 %v4822_v60, %v2988_v32 }
 0xfb6   : > { %v3050_v52 = vsel %vm436_vm0, %v6062_v33, 0.0 }
 0xfb7   : > { %v3047_v31 = vsel %vm436_vm0, %v6080_v15, 0.0 }
 0xfbb   : > { %v2993_v45 = vpop.f32.mrf.mxu2 }
 0xfbc   : > { %v6065_v50 = vadd.f32 %v4821_v42, %v2993_v45 }
 0xfbe   : > { %3051 = vadd.xlane.f32.xlu1 %v3050_v52  ;;  %v3053_v41 = vsel %vm436_vm0, %v6065_v50, 0.0 }
 0xfbf   : > { %3054 = vadd.xlane.f32.xlu0 %v3053_v41 }
 0xfc1   : > { %v4458_v47 = vpop.permute.xlu1 %4457 }
 0xfc2   : > { %v4460_v44 = vunpack.i.h.bf16 %v4458_v47  ;;  %v4459_v4 = vunpack.i.l.bf16 %v4458_v47 }
 0xfc3   : > { %v2996_v23 = vpop.f32.mrf.mxu2 }
 0xfc4   : > { %v2323_v21 = vsel %vm812_vm3, %v2321_v20, %v4459_v4  ;;  %v2324_v22 = vsel %vm812_vm3, %v2322_v56, %v4460_v44  ;;  %v6089_v6 = vadd.f32 %v4824_v2, %v2996_v23 }
 0xfc5   : > { %v2934_v38 = vpack.c.bf16 %v2324_v22, %v2323_v21  ;;  %v4826_v22 = vld [vmem:[%s4940_s27 + $0x38] sm:$0xff] }
 0xfc6   : > { %v3056_v35 = vsel %vm436_vm0, %v6089_v6, 0.0 }
 0xfc7   : > { %4269 = vmatmul.msk.bf16.gmra.mxu2 %vm436_vm0, %v2934_v38 }
 0xfca   : > { %3048 = vadd.xlane.f32.xlu2 %v3047_v31 }
 0xfcb   : > { %v2998_v3 = vpop.f32.mrf.mxu2 }
 0xfcc   : > { %v6086_v16 = vadd.f32 %v4823_v19, %v2998_v3  ;;  %v4827_v3 = vld [vmem:[%s4940_s27 + $0x40] sm:$0xff] }
 0xfce   : > { %v3059_v55 = vsel %vm436_vm0, %v6086_v16, 0.0 }
 0xfcf   : > { %3060 = vadd.xlane.f32.xlu1 %v3059_v55 }
 0xfd1   : > { %v4463_v36 = vpop.permute.xlu0 %4462 }
 0xfd2   : > { %3057 = vadd.xlane.f32.xlu2 %v3056_v35  ;;  %v4465_v61 = vunpack.i.h.bf16 %v4463_v36  ;;  %v4464_v43 = vunpack.i.l.bf16 %v4463_v36 }
 0xfd4   : > { %v2622_v34 = vsel %vm517_vm1, %v5981_v12, %v4465_v61  ;;  %v2621_v40 = vsel %vm517_vm1, %v5976_v39, %v4464_v43  ;;  %v4857_v39 = vmov 32.0  }
 0xfd5   : > { %v2623_v54 = vsel %vm538_vm2, %v2621_v40, %v4469_v5  ;;  %v2624_v58 = vsel %vm538_vm2, %v2622_v34, %v4470_v8  ;;  %4753 = vrcp.f32 %v4857_v39 }
 0xfdb   : > { %v4754_v46 = vpop.eup %4753 }
 0xfdc   : > { %v3093_v14 = vmul.f32 32.0, %v4754_v46  ;;  %vm3097_vm4 = vweird.f32 %v4754_v46 }
 0xfe1   : > { %v4473_v62 = vpop.permute.xlu1 %4472 }
 0xfe2   : > { %v4475_v30 = vunpack.i.h.bf16 %v4473_v62  ;;  %v4474_v37 = vunpack.i.l.bf16 %v4473_v62 }
 0xfe4   : > { %v2625_v63 = vsel %vm812_vm3, %v2623_v54, %v4474_v37  ;;  %v2626_v17 = vsel %vm812_vm3, %v2624_v58, %v4475_v30 }
 0xfe5   : > { %v2935_v1 = vpack.c.bf16 %v2626_v17, %v2625_v63 }
 0xfe7   : > { %4270 = vmatmul.msk.bf16.gmra.mxu2 %vm436_vm0, %v2935_v1 }
 0xff1   : > { %v4478_v12 = vpop.permute.xlu0 %4477 }
 0xff2   : > { %v4480_v0 = vunpack.i.h.bf16 %v4478_v12  ;;  %v4479_v51 = vunpack.i.l.bf16 %v4478_v12 }
 0xff4   : > { %v2924_v11 = vsel %vm517_vm1, %v6043_v7, %v4480_v0  ;;  %v2923_v45 = vsel %vm517_vm1, %v6041_v48, %v4479_v51  ;;  %v3094_v48 = vsub.f32 1.0, %v3093_v14 }
 0xff6   : > { %v3095_v29 = vmul.f32 %v4754_v46, %v3094_v48 }
 0xff8   : > { %v3096_v10 = vadd.f32 %v4754_v46, %v3095_v29  ;;  %v4832_v29 = vld [vmem:[%s4940_s27 + $0x68] sm:$0xff] }
 0xffa   : > { %v6118_v47 = vsel %vm3097_vm4, %v4754_v46, %v3096_v10 }
 0xffb   : > { %v4483_v49 = vpop.permute.xlu2 %4482 }
 0xffc   : > { %v4485_v57 = vunpack.i.h.bf16 %v4483_v49  ;;  %v4484_v53 = vunpack.i.l.bf16 %v4483_v49 }
 0xffe   : > { %v2926_v52 = vsel %vm538_vm2, %v2924_v11, %v4485_v57  ;;  %v2925_v13 = vsel %vm538_vm2, %v2923_v45, %v4484_v53  ;;  %v4829_v53 = vld [vmem:[%s4940_s27 + $0x58] sm:$0xff] }
0x1004   : > { %v3001_v28 = vpop.f32.mrf.mxu2 }
0x1005   : > { %v6105_v32 = vadd.f32 %v4825_v27, %v3001_v28 }
0x1006   : > { %v4488_v59 = vpop.permute.xlu1 %4487 }
0x1007   : > { %v4490_v26 = vunpack.i.h.bf16 %v4488_v59  ;;  %v4489_v9 = vunpack.i.l.bf16 %v4488_v59  ;;  %v3062_v42 = vsel %vm436_vm0, %v6105_v32, 0.0  ;;  %v4830_v59 = vld [vmem:[%s4940_s27 + $0x50] sm:$0xff] }
0x1008   : > { %3063 = vadd.xlane.f32.xlu1 %v3062_v42 }
0x1009   : > { %v2927_v41 = vsel %vm812_vm3, %v2925_v13, %v4489_v9  ;;  %v2928_v18 = vsel %vm812_vm3, %v2926_v52, %v4490_v26  ;;  %v4831_v9 = vld [vmem:[%s4940_s27 + $0x60] sm:$0xff] }
0x100a   : > { %v2936_v7 = vpack.c.bf16 %v2928_v18, %v2927_v41 }
0x100c   : > { %4271 = vmatmul.msk.bf16.gmra.mxu2 %vm436_vm0, %v2936_v7  ;;  %v3003_v21 = vpop.f32.mrf.mxu2 }
0x100d   : > { %v6128_v60 = vadd.f32 %v4826_v22, %v3003_v21 }
0x100f   : > { %v3065_v38 = vsel %vm436_vm0, %v6128_v60, 0.0 }
0x101c   : > { %v3046_v44 = vpop.xlane.xlu0 %3045 }
0x101d   : > { %v3099_v4 = vmul.f32 %v6118_v47, %v3046_v44 }
0x101f   : > { %v6122_v20 = vsub.f32 %v6057_v24, %v3099_v4 }
0x1021   : > { %v3131_v56 = vmul.f32 %v6122_v20, %v6122_v20 }
0x1023   : > { %v3147_v23 = vsel %vm436_vm0, %v3131_v56, 0.0  ;;  %v4833_v56 = vld [vmem:[%s4940_s27 + $0x70] sm:$0xff] }
0x1024   : > { %3148 = vadd.xlane.f32.xlu0 %v3147_v23  ;;  %v3006_v31 = vpop.f32.mrf.mxu2 }
0x1025   : > { %v6133_v19 = vadd.f32 %v4827_v3, %v3006_v31 }
0x1027   : > { %v3068_v55 = vsel %vm436_vm0, %v6133_v19, 0.0 }
0x102c   : > { %3066 = vadd.xlane.f32.xlu0 %v3065_v38  ;;  %v3008_v5 = vpop.f32.mrf.mxu2 }
0x1031   : > { %v3052_v43 = vpop.xlane.xlu1 %3051 }
0x1032   : > { %v3055_v24 = vpop.xlane.xlu0 %3054  ;;  %v3101_v40 = vmul.f32 %v6118_v47, %v3052_v43 }
0x1033   : > { %v3102_v2 = vmul.f32 %v6118_v47, %v3055_v24 }
0x1034   : > { %3069 = vadd.xlane.f32.xlu0 %v3068_v55  ;;  %v6153_v37 = vsub.f32 %v6062_v33, %v3101_v40 }
0x1035   : > { %v6139_v35 = vsub.f32 %v6065_v50, %v3102_v2 }
0x1036   : > { %v3133_v33 = vmul.f32 %v6153_v37, %v6153_v37 }
0x1037   : > { %v3134_v36 = vmul.f32 %v6139_v35, %v6139_v35 }
0x1038   : > { %v3153_v39 = vsel %vm436_vm0, %v3133_v33, 0.0 }
0x1039   : > { %v3156_v61 = vsel %vm436_vm0, %v3134_v36, 0.0 }
0x103a   : > { %3157 = vadd.xlane.f32.xlu1 %v3156_v61 }
0x103d   : > { %v3049_v25 = vpop.xlane.xlu2 %3048 }
0x103e   : > { %v3100_v34 = vmul.f32 %v6118_v47, %v3049_v25 }
0x1040   : > { %v6147_v8 = vsub.f32 %v6080_v15, %v3100_v34 }
0x1042   : > { %v3061_v62 = vpop.xlane.xlu1 %3060  ;;  %v3132_v50 = vmul.f32 %v6147_v8, %v6147_v8 }
0x1043   : > { %v3104_v30 = vmul.f32 %v6118_v47, %v3061_v62 }
0x1044   : > { %v3150_v54 = vsel %vm436_vm0, %v3132_v50, 0.0  ;;  %v4834_v50 = vld [vmem:[%s4940_s27 + $0x78] sm:$0xff] }
0x1045   : > { %v6157_v58 = vsub.f32 %v6086_v16, %v3104_v30  ;;  %3151 = vadd.xlane.f32.xlu2 %v3150_v54  ;;  %v3058_v63 = vpop.xlane.xlu2 %3057 }
0x1046   : > { %v3103_v15 = vmul.f32 %v6118_v47, %v3058_v63  ;;  %v4328_v63 = vld [vmem:[%s6842_s5] sm:$0xff] }
0x1047   : > { %v3136_v17 = vmul.f32 %v6157_v58, %v6157_v58 }
0x1048   : > { %v6163_v1 = vsub.f32 %v6089_v6, %v3103_v15  ;;  %v4828_v6 = vld [vmem:[%s4940_s27 + $0x48] sm:$0xff] }
0x1049   : > { %v3162_v12 = vsel %vm436_vm0, %v3136_v17, 0.0  ;;  %v6173_v51 = vadd.f32 %v4828_v6, %v3008_v5  ;;  %v4329_v5 = vld [vmem:[%s6842_s5 + $0x8] sm:$0xff] }
0x104a   : > { %3163 = vadd.xlane.f32.xlu0 %v3162_v12  ;;  %v3011_v16 = vpop.f32.mrf.mxu2  ;;  %v3135_v49 = vmul.f32 %v6163_v1, %v6163_v1  ;;  %3499 = vmatpush.bf16.msra.mxu0 %v4329_v5 }
0x104b   : > { %v3071_v27 = vsel %vm436_vm0, %v6173_v51, 0.0  ;;  %v6183_v46 = vadd.f32 %v4830_v59, %v3011_v16 }
0x104c   : > { %v3159_v0 = vsel %vm436_vm0, %v3135_v49, 0.0 }
0x104d   : > { %3154 = vadd.xlane.f32.xlu2 %v3153_v39  ;;  %3160 = vadd.xlane.f32.xlu1 %v3159_v0  ;;  %v3074_v45 = vsel %vm436_vm0, %v6183_v46, 0.0 }
0x104e   : > { %3500 = vmatpush.bf16.msra.mxu0 %v4328_v63 }
0x1052   : > { %v3013_v57 = vpop.f32.mrf.mxu2 }
0x1053   : > { %v6176_v28 = vadd.f32 %v4829_v53, %v3013_v57 }
0x1055   : > { %3072 = vadd.xlane.f32.xlu2 %v3071_v27  ;;  %v3077_v11 = vsel %vm436_vm0, %v6176_v28, 0.0 }
0x1056   : > { %3078 = vadd.xlane.f32.xlu1 %v3077_v11 }
0x105d   : > { %3075 = vadd.xlane.f32.xlu2 %v3074_v45 }
0x106a   : > { %v3016_v26 = vpop.f32.mrf.mxu2 }
0x106b   : > { %v6188_v42 = vadd.f32 %v4831_v9, %v3016_v26 }
0x106d   : > { %v3080_v52 = vsel %vm436_vm0, %v6188_v42, 0.0 }
0x106e   : > { %3081 = vadd.xlane.f32.xlu1 %v3080_v52 }
0x1072   : > { %v3018_v48 = vpop.f32.mrf.mxu2 }
0x1073   : > { %v6200_v10 = vadd.f32 %v4832_v29, %v3018_v48 }
0x1075   : > { %v3083_v44 = vsel %vm436_vm0, %v6200_v10, 0.0 }
0x107b   : > { %v3064_v13 = vpop.xlane.xlu1 %3063 }
0x107c   : > { %v3105_v41 = vmul.f32 %v6118_v47, %v3064_v13 }
0x107e   : > { %v6194_v18 = vsub.f32 %v6105_v32, %v3105_v41 }
0x1080   : > { %v3137_v7 = vmul.f32 %v6194_v18, %v6194_v18 }
0x1082   : > { %v3165_v14 = vsel %vm436_vm0, %v3137_v7, 0.0 }
0x1083   : > { %3166 = vadd.xlane.f32.xlu0 %v3165_v14 }
0x108b   : > { %3084 = vadd.xlane.f32.xlu0 %v3083_v44 }
0x108f   : > { %v3021_v4 = vpop.f32.mrf.mxu2 }
0x1090   : > { %v6205_v23 = vadd.f32 %v4833_v56, %v3021_v4 }
0x1092   : > { %v3086_v32 = vsel %vm436_vm0, %v6205_v23, 0.0 }
0x1093   : > { %3087 = vadd.xlane.f32.xlu0 %v3086_v32 }
0x1097   : > { %v3149_v21 = vpop.xlane.xlu0 %3148  ;;  %v3023_v34 = vpop.f32.mrf.mxu2 }
0x1098   : > { %v3195_v3 = vmul.f32 %v3149_v21, %v6118_v47  ;;  %v6228_v30 = vadd.f32 %v4834_v50, %v3023_v34 }
0x109a   : > { %v3211_v55 = vadd.f32 1e-06, %v3195_v3  ;;  %v3089_v17 = vsel %vm436_vm0, %v6228_v30, 0.0 }
0x109c   : > { %4755 = vrsqrt.f32 %v3211_v55  ;;  %vm3233_vm6 = vweird.f32 %v3211_v55 }
0x109f   : > { %v3067_v22 = vpop.xlane.xlu0 %3066 }
0x10a0   : > { %v3106_v38 = vmul.f32 %v6118_v47, %v3067_v22 }
0x10a2   : > { %v6211_v31 = vsub.f32 %v6128_v60, %v3106_v38  ;;  %v4756_v62 = vpop.eup %4755 }
0x10a3   : > { %v3228_v54 = vmul.f32 %v4756_v62, %v3211_v55  ;;  %vm3234_vm5 = vweird.f32 %v4756_v62 }
0x10a4   : > { %v3138_v24 = vmul.f32 %v6211_v31, %v6211_v31  ;;  %vm3235_vm7 = vmor %vm3233_vm6, %vm3234_vm5 }
0x10a5   : > { %v3229_v33 = vmul.f32 %v4756_v62, %v3228_v54 }
0x10a6   : > { %v3168_v2 = vsel %vm436_vm0, %v3138_v24, 0.0  ;;  %v6258_v24 = vld [vmem:[%s6840_s3] ss:$0 sm:$0xff] }
0x10a7   : > { %v3070_v36 = vpop.xlane.xlu0 %3069  ;;  %3169 = vadd.xlane.f32.xlu2 %v3168_v2  ;;  %v3230_v39 = vmul.f32 0.5, %v3229_v33 }
0x10a8   : > { %v3107_v61 = vmul.f32 %v6118_v47, %v3070_v36 }
0x10a9   : > { %v3231_v57 = vsub.f32 1.5, %v3230_v39 }
0x10aa   : > { %v6219_v43 = vsub.f32 %v6133_v19, %v3107_v61 }
0x10ab   : > { %v3232_v13 = vmul.f32 %v4756_v62, %v3231_v57 }
0x10ac   : > { %v3139_v60 = vmul.f32 %v6219_v43, %v6219_v43 }
0x10ad   : > { %v3158_v40 = vpop.xlane.xlu1 %3157  ;;  %v3236_v44 = vsel %vm3235_vm7, %v4756_v62, %v3232_v13 }
0x10ae   : > { %v3171_v25 = vsel %vm436_vm0, %v3139_v60, 0.0  ;;  %v3198_v19 = vmul.f32 %v3158_v40, %v6118_v47  ;;  %v3387_v2 = vmul.f32 %v3236_v44, %v6122_v20 }
0x10af   : > { %3172 = vadd.xlane.f32.xlu2 %v3171_v25 }
0x10b0   : > { %v6234_v15 = vadd.f32 1e-06, %v3198_v19  ;;  %v3406_v50 = vmul.f32 %v6258_v24, %v3387_v2 }
0x10b2   : > { %4757 = vrsqrt.f32 %v6234_v15  ;;  %vm3263_vm15 = vweird.f32 %v6234_v15 }
0x10b7   : > { %3090 = vadd.xlane.f32.xlu2 %v3089_v17 }
0x10b8   : > { %v3152_v12 = vpop.xlane.xlu2 %3151  ;;  %v6240_v6 = vpop.eup %4757 }
0x10b9   : > { %v3196_v16 = vmul.f32 %v3152_v12, %v6118_v47  ;;  %v3258_v26 = vmul.f32 %v6240_v6, %v6234_v15  ;;  %vm3264_vm12 = vweird.f32 %v6240_v6 }
0x10ba   : > { %vm3265_vm1 = vmor %vm3263_vm15, %vm3264_vm12 }
0x10bb   : > { %v3212_v49 = vadd.f32 1e-06, %v3196_v16  ;;  %v3259_v48 = vmul.f32 %v6240_v6, %v3258_v26 }
0x10bd   : > { %4759 = vrsqrt.f32 %v3212_v49  ;;  %v3164_v0 = vpop.xlane.xlu0 %3163  ;;  %v3260_v55 = vmul.f32 0.5, %v3259_v48  ;;  %vm3243_vm9 = vweird.f32 %v3212_v49 }
0x10be   : > { %v3200_v9 = vmul.f32 %v3164_v0, %v6118_v47 }
0x10bf   : > { %v3261_v54 = vsub.f32 1.5, %v3260_v55 }
0x10c0   : > { %v3155_v53 = vpop.xlane.xlu2 %3154  ;;  %v3161_v27 = vpop.xlane.xlu1 %3160  ;;  %v6250_v29 = vadd.f32 1e-06, %v3200_v9 }
0x10c1   : > { %v3197_v11 = vmul.f32 %v3155_v53, %v6118_v47  ;;  %v3199_v59 = vmul.f32 %v3161_v27, %v6118_v47  ;;  %v3262_v27 = vmul.f32 %v6240_v6, %v3261_v54 }
0x10c2   : > { %vm3283_vm6 = vweird.f32 %v6250_v29 }
0x10c3   : > { %v4760_v45 = vpop.eup %4759  ;;  %v3213_v52 = vadd.f32 1e-06, %v3197_v11  ;;  %v6247_v7 = vadd.f32 1e-06, %v3199_v59 }
0x10c4   : > { %v3238_v41 = vmul.f32 %v4760_v45, %v3212_v49  ;;  %vm3244_vm8 = vweird.f32 %v4760_v45 }
0x10c5   : > { %4761 = vrsqrt.f32 %v3213_v52  ;;  %vm3245_vm10 = vmor %vm3243_vm9, %vm3244_vm8  ;;  %vm3253_vm13 = vweird.f32 %v3213_v52  ;;  %vm3273_vm4 = vweird.f32 %v6247_v7 }
0x10c6   : > { %v3239_v14 = vmul.f32 %v4760_v45, %v3238_v41  ;;  %4763 = vrsqrt.f32 %v6247_v7  ;;  %v3266_v41 = vsel %vm3265_vm1, %v6240_v6, %v3262_v27 }
0x10c7   : > { %4765 = vrsqrt.f32 %v6250_v29  ;;  %v3390_v44 = vmul.f32 %v3266_v41, %v6139_v35 }
0x10c8   : > { %v3240_v4 = vmul.f32 0.5, %v3239_v14  ;;  %v3073_v56 = vpop.xlane.xlu2 %3072 }
0x10c9   : > { %v3108_v32 = vmul.f32 %v6118_v47, %v3073_v56  ;;  %v3079_v21 = vpop.xlane.xlu1 %3078 }
0x10ca   : > { %v3241_v22 = vsub.f32 1.5, %v3240_v4  ;;  %v3110_v38 = vmul.f32 %v6118_v47, %v3079_v21 }
0x10cb   : > { %v4762_v3 = vpop.eup %4761  ;;  %v6263_v36 = vsub.f32 %v6173_v51, %v3108_v32  ;;  %v6277_v51 = vld [vmem:[%s6841_s4] ss:$0 sm:$0xff]  ;;  %v3409_v32 = vmul.f32 %v6258_v24, %v3390_v44  ;;  %v4336_v44 = vld [vmem:[%s6844_s7 + $0x30] sm:$0xff] }
0x10cc   : > { %v3242_v61 = vmul.f32 %v4760_v45, %v3241_v22  ;;  %v3248_v60 = vmul.f32 %v4762_v3, %v3213_v52  ;;  %v6266_v25 = vsub.f32 %v6176_v28, %v3110_v38  ;;  %v6272_v62 = vpop.eup %4763  ;;  %vm3254_vm11 = vweird.f32 %v4762_v3 }
0x10cd   : > { %v3140_v34 = vmul.f32 %v6263_v36, %v6263_v36  ;;  %v4766_v12 = vpop.eup %4765  ;;  %v3268_v0 = vmul.f32 %v6272_v62, %v6247_v7  ;;  %vm3255_vm14 = vmor %vm3253_vm13, %vm3254_vm11  ;;  %vm3274_vm2 = vweird.f32 %v6272_v62 }
0x10ce   : > { %v3246_v40 = vsel %vm3245_vm10, %v4760_v45, %v3242_v61  ;;  %v3249_v5 = vmul.f32 %v4762_v3, %v3248_v60  ;;  %v3142_v20 = vmul.f32 %v6266_v25, %v6266_v25  ;;  %v3278_v11 = vmul.f32 %v4766_v12, %v6250_v29  ;;  %vm3275_vm5 = vmor %vm3273_vm4, %vm3274_vm2 }
0x10cf   : > { %v3388_v28 = vmul.f32 %v3246_v40, %v6147_v8  ;;  %v3174_v19 = vsel %vm436_vm0, %v3140_v34, 0.0  ;;  %v6288_v8 = vadd.f32 %v6277_v51, %v3406_v50  ;;  %v3269_v13 = vmul.f32 %v6272_v62, %v3268_v0 }
0x10d0   : > { %v3250_v63 = vmul.f32 0.5, %v3249_v5  ;;  %v3076_v17 = vpop.xlane.xlu2 %3075  ;;  %3175 = vadd.xlane.f32.xlu1 %v3174_v19  ;;  %v3180_v33 = vsel %vm436_vm0, %v3142_v20, 0.0  ;;  %v3279_v52 = vmul.f32 %v4766_v12, %v3278_v11  ;;  %vm3284_vm3 = vweird.f32 %v4766_v12 }
0x10d1   : > { %v3407_v16 = vmul.f32 %v6258_v24, %v3388_v28  ;;  %v3109_v49 = vmul.f32 %v6118_v47, %v3076_v17  ;;  %3181 = vadd.xlane.f32.xlu0 %v3180_v33  ;;  %v3270_v48 = vmul.f32 0.5, %v3269_v13  ;;  %vm3285_vm7 = vmor %vm3283_vm6, %vm3284_vm3 }
0x10d2   : > { %v3251_v39 = vsub.f32 1.5, %v3250_v63  ;;  %v3280_v4 = vmul.f32 0.5, %v3279_v52 }
0x10d3   : > { %v6292_v57 = vadd.f32 %v6277_v51, %v3407_v16  ;;  %v6295_v53 = vsub.f32 %v6183_v46, %v3109_v49  ;;  %v3271_v56 = vsub.f32 1.5, %v3270_v48 }
0x10d4   : > { %v3252_v59 = vmul.f32 %v4762_v3, %v3251_v39  ;;  %v3281_v21 = vsub.f32 1.5, %v3280_v4 }
0x10d5   : > { %v3441_v45 = vpack.c.bf16 %v6292_v57, %v6288_v8  ;;  %v3141_v26 = vmul.f32 %v6295_v53, %v6295_v53  ;;  %v3272_v6 = vmul.f32 %v6272_v62, %v3271_v56 }
0x10d6   : > { %v3256_v9 = vsel %vm3255_vm14, %v4762_v3, %v3252_v59  ;;  %v6319_v3 = vadd.f32 %v6277_v51, %v3409_v32  ;;  %v3282_v35 = vmul.f32 %v4766_v12, %v3281_v21 }
0x10d7   : > { %4280 = vmatmul.msk.bf16.vlgmr.msra.gmra.mxu0 %vm436_vm0, %v3441_v45  ;;  %v3177_v46 = vsel %vm436_vm0, %v3141_v26, 0.0  ;;  %v3389_v14 = vmul.f32 %v3256_v9, %v6153_v37  ;;  %v3276_v61 = vsel %vm3275_vm5, %v6272_v62, %v3272_v6 }
0x10d8   : > { %3178 = vadd.xlane.f32.xlu1 %v3177_v46  ;;  %v3286_v34 = vsel %vm3285_vm7, %v4766_v12, %v3282_v35 }
0x10d9   : > { %v3408_v15 = vmul.f32 %v6258_v24, %v3389_v14  ;;  %v3392_v40 = vmul.f32 %v3286_v34, %v6157_v58  ;;  %v4334_v34 = vld [vmem:[%s6844_s7 + $0x20] sm:$0xff] }
0x10db   : > { %v6313_v38 = vadd.f32 %v6277_v51, %v3408_v15  ;;  %v3411_v29 = vmul.f32 %v6258_v24, %v3392_v40 }
0x10dd   : > { %v3442_v55 = vpack.c.bf16 %v6319_v3, %v6313_v38  ;;  %v6341_v62 = vadd.f32 %v6277_v51, %v3411_v29 }
0x10e1   : > { %v3082_v22 = vpop.xlane.xlu1 %3081 }
0x10e2   : > { %v3111_v37 = vmul.f32 %v6118_v47, %v3082_v22  ;;  %v4335_v22 = vld [vmem:[%s6844_s7 + $0x28] sm:$0xff] }
0x10e4   : > { %v6323_v2 = vsub.f32 %v6188_v42, %v3111_v37  ;;  %v3391_v42 = vmul.f32 %v3276_v61, %v6163_v1 }
0x10e6   : > { %v3143_v60 = vmul.f32 %v6323_v2, %v6323_v2  ;;  %v3410_v5 = vmul.f32 %v6258_v24, %v3391_v42 }
0x10e7   : > { %4281 = vmatmul.msk.bf16.gmra.mxu0 %vm436_vm0, %v3442_v55 }
0x10e8   : > { %v3183_v7 = vsel %vm436_vm0, %v3143_v60, 0.0  ;;  %v6338_v20 = vadd.f32 %v6277_v51, %v3410_v5  ;;  %v4333_v5 = vld [vmem:[%s6844_s7 + $0x18] sm:$0xff] }
0x10e9   : > { %3184 = vadd.xlane.f32.xlu2 %v3183_v7 }
0x10ea   : > { %v3443_v50 = vpack.c.bf16 %v6341_v62, %v6338_v20 }
0x10f6   : > { %v3167_v28 = vpop.xlane.xlu0 %3166 }
0x10f7   : > { %4282 = vmatmul.msk.bf16.gmra.mxu0 %vm436_vm0, %v3443_v50  ;;  %v3201_v63 = vmul.f32 %v3167_v28, %v6118_v47  ;;  %v4332_v28 = vld [vmem:[%s6844_s7 + $0x10] sm:$0xff] }
0x10f9   : > { %v3217_v16 = vadd.f32 1e-06, %v3201_v63  ;;  %v4330_v63 = vld [vmem:[%s6844_s7] sm:$0xff] }
0x10fb   : > { %4767 = vrsqrt.f32 %v3217_v16  ;;  %vm3293_vm9 = vweird.f32 %v3217_v16 }
0x10fe   : > { %v3085_v1 = vpop.xlane.xlu0 %3084 }
0x10ff   : > { %v3112_v19 = vmul.f32 %v6118_v47, %v3085_v1 }
0x1101   : > { %v6348_v58 = vsub.f32 %v6200_v10, %v3112_v19  ;;  %v4768_v0 = vpop.eup %4767  ;;  %v4331_v19 = vld [vmem:[%s6844_s7 + $0x8] sm:$0xff] }
0x1102   : > { %v3288_v27 = vmul.f32 %v4768_v0, %v3217_v16  ;;  %vm3294_vm8 = vweird.f32 %v4768_v0 }
0x1103   : > { %v3144_v54 = vmul.f32 %v6348_v58, %v6348_v58  ;;  %vm3295_vm10 = vmor %vm3293_vm9, %vm3294_vm8 }
0x1104   : > { %v3289_v11 = vmul.f32 %v4768_v0, %v3288_v27 }
0x1105   : > { %v3186_v17 = vsel %vm436_vm0, %v3144_v54, 0.0 }
0x1106   : > { %3187 = vadd.xlane.f32.xlu1 %v3186_v17  ;;  %v3088_v33 = vpop.xlane.xlu0 %3087  ;;  %v3290_v9 = vmul.f32 0.5, %v3289_v11 }
0x1107   : > { %v3113_v12 = vmul.f32 %v6118_v47, %v3088_v33 }
0x1108   : > { %v3291_v13 = vsub.f32 1.5, %v3290_v9 }
0x1109   : > { %v6356_v49 = vsub.f32 %v6205_v23, %v3113_v12  ;;  %v4337_v23 = vld [vmem:[%s6844_s7 + $0x38] sm:$0xff] }
0x110a   : > { %v3292_v52 = vmul.f32 %v4768_v0, %v3291_v13  ;;  %3634 = vmatpush.bf16.msra.mxu1 %v4337_v23  ;;  %4340 = vmatpush.bf16.msrb.mxu3 %v4337_v23 }
0x110b   : > { %v3145_v39 = vmul.f32 %v6356_v49, %v6356_v49 }
0x110c   : > { %v3296_v4 = vsel %vm3295_vm10, %v4768_v0, %v3292_v52 }
0x110d   : > { %v3189_v10 = vsel %vm436_vm0, %v3145_v39, 0.0  ;;  %v3393_v6 = vmul.f32 %v3296_v4, %v6194_v18 }
0x110e   : > { %3190 = vadd.xlane.f32.xlu0 %v3189_v10  ;;  %3635 = vmatpush.bf16.msra.mxu1 %v4336_v44 }
0x110f   : > { %4341 = vmatpush.bf16.msrb.mxu3 %v4336_v44  ;;  %v3412_v7 = vmul.f32 %v6258_v24, %v3393_v6 }
0x1111   : > { %v6390_v29 = vadd.f32 %v6277_v51, %v3412_v7 }
0x1112   : > { %3636 = vmatpush.bf16.msra.mxu1 %v4335_v22 }
0x1113   : > { %4342 = vmatpush.bf16.msrb.mxu3 %v4335_v22 }
0x1116   : > { %3637 = vmatpush.bf16.msra.mxu1 %v4334_v34 }
0x1117   : > { %4343 = vmatpush.bf16.msrb.mxu3 %v4334_v34 }
0x111a   : > { %v3170_v59 = vpop.xlane.xlu2 %3169  ;;  %3638 = vmatpush.bf16.msra.mxu1 %v4333_v5 }
0x111b   : > { %v3202_v45 = vmul.f32 %v3170_v59, %v6118_v47  ;;  %4344 = vmatpush.bf16.msrb.mxu3 %v4333_v5 }
0x111d   : > { %v3218_v26 = vadd.f32 1e-06, %v3202_v45 }
0x111e   : > { %3639 = vmatpush.bf16.msra.mxu1 %v4332_v28 }
0x111f   : > { %4769 = vrsqrt.f32 %v3218_v26  ;;  %vm3303_vm12 = vweird.f32 %v3218_v26  ;;  %4345 = vmatpush.bf16.msrb.mxu3 %v4332_v28 }
0x1122   : > { %v3173_v46 = vpop.xlane.xlu2 %3172  ;;  %3640 = vmatpush.bf16.msra.mxu1 %v4331_v19 }
0x1123   : > { %v3203_v55 = vmul.f32 %v3173_v46, %v6118_v47  ;;  %4346 = vmatpush.bf16.msrb.mxu3 %v4331_v19 }
0x1125   : > { %v4770_v41 = vpop.eup %4769  ;;  %v3219_v42 = vadd.f32 1e-06, %v3203_v55 }
0x1126   : > { %v3298_v14 = vmul.f32 %v4770_v41, %v3218_v26  ;;  %vm3304_vm11 = vweird.f32 %v4770_v41  ;;  %3641 = vmatpush.bf16.msra.mxu1 %v4330_v63 }
0x1127   : > { %vm3305_vm13 = vmor %vm3303_vm12, %vm3304_vm11  ;;  %4771 = vrsqrt.f32 %v3219_v42  ;;  %4347 = vmatpush.bf16.msrb.mxu3 %v4330_v63  ;;  %vm3313_vm15 = vweird.f32 %v3219_v42 }
0x1128   : > { %v3299_v48 = vmul.f32 %v4770_v41, %v3298_v14 }
0x112a   : > { %v3300_v15 = vmul.f32 0.5, %v3299_v48  ;;  %v3091_v56 = vpop.xlane.xlu2 %3090 }
0x112b   : > { %v3114_v32 = vmul.f32 %v6118_v47, %v3091_v56 }
0x112c   : > { %v3301_v21 = vsub.f32 1.5, %v3300_v15 }
0x112d   : > { %v6374_v37 = vsub.f32 %v6228_v30, %v3114_v32  ;;  %v4772_v1 = vpop.eup %4771 }
0x112e   : > { %v3302_v35 = vmul.f32 %v4770_v41, %v3301_v21  ;;  %v3308_v54 = vmul.f32 %v4772_v1, %v3219_v42  ;;  %vm3314_vm14 = vweird.f32 %v4772_v1 }
0x112f   : > { %v3146_v61 = vmul.f32 %v6374_v37, %v6374_v37  ;;  %vm3315_vm1 = vmor %vm3313_vm15, %vm3314_vm14 }
0x1130   : > { %v3306_v60 = vsel %vm3305_vm13, %v4770_v41, %v3302_v35  ;;  %v3309_v17 = vmul.f32 %v4772_v1, %v3308_v54  ;;  %v6414_v35 = vld [vmem:[%s6843_s6] ss:$0 sm:$0xff] }
0x1131   : > { %v3394_v18 = vmul.f32 %v3306_v60, %v6211_v31  ;;  %v3192_v30 = vsel %vm436_vm0, %v3146_v61, 0.0 }
0x1132   : > { %3193 = vadd.xlane.f32.xlu2 %v3192_v30  ;;  %v3310_v0 = vmul.f32 0.5, %v3309_v17 }
0x1133   : > { %v3413_v40 = vmul.f32 %v6258_v24, %v3394_v18 }
0x1134   : > { %v3311_v11 = vsub.f32 1.5, %v3310_v0 }
0x1135   : > { %v6393_v50 = vadd.f32 %v6277_v51, %v3413_v40 }
0x1136   : > { %v3312_v46 = vmul.f32 %v4772_v1, %v3311_v11 }
0x1137   : > { %v3444_v31 = vpack.c.bf16 %v6393_v50, %v6390_v29 }
0x1138   : > { %v3316_v14 = vsel %vm3315_vm1, %v4772_v1, %v3312_v46 }
0x1139   : > { %4283 = vmatmul.msk.bf16.gmra.mxu0 %vm436_vm0, %v3444_v31  ;;  %v3395_v32 = vmul.f32 %v3316_v14, %v6219_v43 }
0x113b   : > { %v3414_v34 = vmul.f32 %v6258_v24, %v3395_v32 }
0x113d   : > { %v6422_v31 = vadd.f32 %v6277_v51, %v3414_v34 }
0x1143   : > { %v3176_v33 = vpop.xlane.xlu1 %3175 }
0x1144   : > { %v3204_v12 = vmul.f32 %v3176_v33, %v6118_v47  ;;  %v3182_v16 = vpop.xlane.xlu0 %3181 }
0x1145   : > { %v3206_v39 = vmul.f32 %v3182_v16, %v6118_v47 }
0x1146   : > { %v3220_v10 = vadd.f32 1e-06, %v3204_v12 }
0x1147   : > { %v3222_v27 = vadd.f32 1e-06, %v3206_v39 }
0x1148   : > { %4773 = vrsqrt.f32 %v3220_v10  ;;  %vm3323_vm3 = vweird.f32 %v3220_v10 }
0x1149   : > { %4775 = vrsqrt.f32 %v3222_v27  ;;  %vm3343_vm9 = vweird.f32 %v3222_v27 }
0x114b   : > { %v3179_v59 = vpop.xlane.xlu1 %3178 }
0x114c   : > { %v3205_v45 = vmul.f32 %v3179_v59, %v6118_v47 }
0x114e   : > { %v4774_v26 = vpop.eup %4773  ;;  %v3221_v9 = vadd.f32 1e-06, %v3205_v45 }
0x114f   : > { %v4776_v13 = vpop.eup %4775  ;;  %v3318_v23 = vmul.f32 %v4774_v26, %v3220_v10  ;;  %vm3324_vm2 = vweird.f32 %v4774_v26 }
0x1150   : > { %v3338_v41 = vmul.f32 %v4776_v13, %v3222_v27  ;;  %4777 = vrsqrt.f32 %v3221_v9  ;;  %vm3325_vm4 = vmor %vm3323_vm3, %vm3324_vm2  ;;  %vm3344_vm6 = vweird.f32 %v4776_v13  ;;  %vm3333_vm7 = vweird.f32 %v3221_v9 }
0x1151   : > { %v3319_v52 = vmul.f32 %v4774_v26, %v3318_v23  ;;  %vm3345_vm10 = vmor %vm3343_vm9, %vm3344_vm6 }
0x1152   : > { %v3339_v44 = vmul.f32 %v4776_v13, %v3338_v41 }
0x1153   : > { %v3320_v48 = vmul.f32 0.5, %v3319_v52 }
0x1154   : > { %v3502_v4 = vpop.f32.mrf.mxu0  ;;  %v3340_v22 = vmul.f32 0.5, %v3339_v44 }
0x1155   : > { %v3321_v15 = vsub.f32 1.5, %v3320_v48  ;;  %v3503_v43 = vadd.f32 %v6414_v35, %v3502_v4 }
0x1156   : > { %v4778_v56 = vpop.eup %4777  ;;  %v3341_v18 = vsub.f32 1.5, %v3340_v22 }
0x1157   : > { %v3322_v21 = vmul.f32 %v4774_v26, %v3321_v15  ;;  %v3328_v6 = vmul.f32 %v4778_v56, %v3221_v9  ;;  %vm3334_vm5 = vweird.f32 %v4778_v56  ;;  %v3542_v19 = vmax.f32 %v3503_v43, 0.0 }
0x1158   : > { %v3342_v28 = vmul.f32 %v4776_v13, %v3341_v18  ;;  %vm3335_vm8 = vmor %vm3333_vm7, %vm3334_vm5 }
0x1159   : > { %v3326_v55 = vsel %vm3325_vm4, %v4774_v26, %v3322_v21  ;;  %v3329_v61 = vmul.f32 %v4778_v56, %v3328_v6 }
0x115a   : > { %v3396_v60 = vmul.f32 %v3326_v55, %v6263_v36  ;;  %v3346_v16 = vsel %vm3345_vm10, %v4776_v13, %v3342_v28 }
0x115b   : > { %v3330_v30 = vmul.f32 0.5, %v3329_v61  ;;  %v3398_v11 = vmul.f32 %v3346_v16, %v6266_v25 }
0x115c   : > { %v3504_v7 = vpop.f32.mrf.mxu0  ;;  %v3415_v42 = vmul.f32 %v6258_v24, %v3396_v60  ;;  %v3185_v12 = vpop.xlane.xlu2 %3184 }
0x115d   : > { %v3331_v40 = vsub.f32 1.5, %v3330_v30  ;;  %v3505_v5 = vadd.f32 %v6414_v35, %v3504_v7  ;;  %v3207_v10 = vmul.f32 %v3185_v12, %v6118_v47  ;;  %v3417_v27 = vmul.f32 %v6258_v24, %v3398_v11 }
0x115e   : > { %v6425_v36 = vadd.f32 %v6277_v51, %v3415_v42 }
0x115f   : > { %v3332_v1 = vmul.f32 %v4778_v56, %v3331_v40  ;;  %v3543_v54 = vmax.f32 %v3505_v5, 0.0  ;;  %v3223_v59 = vadd.f32 1e-06, %v3207_v10 }
0x1160   : > { %v3445_v63 = vpack.c.bf16 %v6425_v36, %v6422_v31 }
0x1161   : > { %v3336_v17 = vsel %vm3335_vm8, %v4778_v56, %v3332_v1  ;;  %v3558_v33 = vpack.c.bf16 %v3543_v54, %v3542_v19  ;;  %4779 = vrsqrt.f32 %v3223_v59  ;;  %vm3353_vm12 = vweird.f32 %v3223_v59 }
0x1162   : > { %4284 = vmatmul.msk.bf16.gmra.mxu0 %vm436_vm0, %v3445_v63  ;;  %v3397_v39 = vmul.f32 %v3336_v17, %v6295_v53  ;;  %v6441_v53 = vadd.f32 %v6277_v51, %v3417_v27 }
0x1163   : > { %3642 = vmatmul.bf16.vlgmr.msra.gmra.mxu1 %v3558_v33 }
0x1164   : > { %v3507_v0 = vpop.f32.mrf.mxu0  ;;  %v3416_v45 = vmul.f32 %v6258_v24, %v3397_v39 }
0x1165   : > { %v3508_v26 = vadd.f32 %v6414_v35, %v3507_v0 }
0x1166   : > { %v6437_v46 = vadd.f32 %v6277_v51, %v3416_v45 }
0x1167   : > { %v3544_v23 = vmax.f32 %v3508_v26, 0.0  ;;  %v4780_v14 = vpop.eup %4779 }
0x1168   : > { %v3446_v25 = vpack.c.bf16 %v6441_v53, %v6437_v46  ;;  %v3348_v44 = vmul.f32 %v4780_v14, %v3223_v59  ;;  %vm3354_vm11 = vweird.f32 %v4780_v14 }
0x1169   : > { %vm3355_vm13 = vmor %vm3353_vm12, %vm3354_vm11 }
0x116a   : > { %v3349_v4 = vmul.f32 %v4780_v14, %v3348_v44 }
0x116c   : > { %v3509_v9 = vpop.f32.mrf.mxu0  ;;  %v3350_v6 = vmul.f32 0.5, %v3349_v4 }
0x116d   : > { %v3510_v13 = vadd.f32 %v6414_v35, %v3509_v9 }
0x116e   : > { %v3351_v34 = vsub.f32 1.5, %v3350_v6 }
0x116f   : > { %v3545_v41 = vmax.f32 %v3510_v13, 0.0 }
0x1170   : > { %v3352_v43 = vmul.f32 %v4780_v14, %v3351_v34 }
0x1171   : > { %v3559_v52 = vpack.c.bf16 %v3545_v41, %v3544_v23 }
0x1172   : > { %4285 = vmatmul.msk.bf16.gmra.mxu0 %vm436_vm0, %v3446_v25  ;;  %v3356_v40 = vsel %vm3355_vm13, %v4780_v14, %v3352_v43 }
0x1173   : > { %3647 = vmatmul.bf16.gmra.mxu1 %v3559_v52  ;;  %v3399_v1 = vmul.f32 %v3356_v40, %v6323_v2 }
0x1174   : > { %v3512_v48 = vpop.f32.mrf.mxu0 }
0x1175   : > { %v3513_v32 = vadd.f32 %v6414_v35, %v3512_v48  ;;  %v3418_v12 = vmul.f32 %v6258_v24, %v3399_v1 }
0x1177   : > { %v3546_v61 = vmax.f32 %v3513_v32, 0.0  ;;  %v6455_v10 = vadd.f32 %v6277_v51, %v3418_v12 }
0x1179   : > { %v3188_v15 = vpop.xlane.xlu1 %3187 }
0x117a   : > { %v3208_v56 = vmul.f32 %v3188_v15, %v6118_v47 }
0x117c   : > { %v3224_v21 = vadd.f32 1e-06, %v3208_v56  ;;  %v3514_v22 = vpop.f32.mrf.mxu0 }
0x117d   : > { %v3515_v55 = vadd.f32 %v6414_v35, %v3514_v22 }
0x117e   : > { %4781 = vrsqrt.f32 %v3224_v21  ;;  %vm3363_vm15 = vweird.f32 %v3224_v21 }
0x117f   : > { %v3547_v60 = vmax.f32 %v3515_v55, 0.0 }
0x1181   : > { %v3560_v18 = vpack.c.bf16 %v3547_v60, %v3546_v61  ;;  %v3191_v54 = vpop.xlane.xlu0 %3190 }
0x1182   : > { %v3209_v33 = vmul.f32 %v3191_v54, %v6118_v47 }
0x1183   : > { %3652 = vmatmul.bf16.gmra.mxu1 %v3560_v18 }
0x1184   : > { %v4782_v30 = vpop.eup %4781  ;;  %v3225_v39 = vadd.f32 1e-06, %v3209_v33 }
0x1185   : > { %v3358_v7 = vmul.f32 %v4782_v30, %v3224_v21  ;;  %vm3364_vm14 = vweird.f32 %v4782_v30 }
0x1186   : > { %vm3365_vm1 = vmor %vm3363_vm15, %vm3364_vm14  ;;  %4783 = vrsqrt.f32 %v3225_v39  ;;  %vm3373_vm3 = vweird.f32 %v3225_v39 }
0x1187   : > { %v3359_v42 = vmul.f32 %v4782_v30, %v3358_v7 }
0x1189   : > { %v3360_v5 = vmul.f32 0.5, %v3359_v42 }
0x118b   : > { %v3361_v28 = vsub.f32 1.5, %v3360_v5 }
0x118d   : > { %v3362_v19 = vmul.f32 %v4782_v30, %v3361_v28 }
0x118f   : > { %v3366_v63 = vsel %vm3365_vm1, %v4782_v30, %v3362_v19 }
0x1190   : > { %v3400_v17 = vmul.f32 %v3366_v63, %v6348_v58  ;;  %v4784_v58 = vpop.eup %4783 }
0x1191   : > { %v3368_v11 = vmul.f32 %v4784_v58, %v3225_v39  ;;  %vm3374_vm2 = vweird.f32 %v4784_v58 }
0x1192   : > { %v3419_v16 = vmul.f32 %v6258_v24, %v3400_v17  ;;  %vm3375_vm4 = vmor %vm3373_vm3, %vm3374_vm2 }
0x1193   : > { %v3369_v59 = vmul.f32 %v4784_v58, %v3368_v11 }
0x1194   : > { %v6458_v0 = vadd.f32 %v6277_v51, %v3419_v16 }
0x1195   : > { %v3370_v9 = vmul.f32 0.5, %v3369_v59 }
0x1196   : > { %v3447_v2 = vpack.c.bf16 %v6458_v0, %v6455_v10 }
0x1197   : > { %v3371_v13 = vsub.f32 1.5, %v3370_v9 }
0x1198   : > { %4286 = vmatmul.msk.bf16.gmra.mxu0 %vm436_vm0, %v3447_v2 }
0x1199   : > { %v3372_v41 = vmul.f32 %v4784_v58, %v3371_v13 }
0x119b   : > { %v3376_v14 = vsel %vm3375_vm4, %v4784_v58, %v3372_v41 }
0x119c   : > { %v3401_v15 = vmul.f32 %v3376_v14, %v6356_v49 }
0x119e   : > { %v3420_v22 = vmul.f32 %v6258_v24, %v3401_v15 }
0x11a0   : > { %v6471_v34 = vadd.f32 %v6277_v51, %v3420_v22 }
0x11a5   : > { %v3194_v45 = vpop.xlane.xlu2 %3193 }
0x11a6   : > { %v3210_v27 = vmul.f32 %v3194_v45, %v6118_v47 }
0x11a8   : > { %v3226_v26 = vadd.f32 1e-06, %v3210_v27 }
0x11aa   : > { %4785 = vrsqrt.f32 %v3226_v26  ;;  %vm3383_vm6 = vweird.f32 %v3226_v26 }
0x11b0   : > { %v4786_v23 = vpop.eup %4785 }
0x11b1   : > { %v3378_v25 = vmul.f32 %v4786_v23, %v3226_v26  ;;  %vm3384_vm5 = vweird.f32 %v4786_v23 }
0x11b2   : > { %vm3385_vm7 = vmor %vm3383_vm6, %vm3384_vm5 }
0x11b3   : > { %v3379_v52 = vmul.f32 %v4786_v23, %v3378_v25 }
0x11b5   : > { %v3380_v48 = vmul.f32 0.5, %v3379_v52 }
0x11b6   : > { %v3517_v44 = vpop.f32.mrf.mxu0 }
0x11b7   : > { %v3381_v4 = vsub.f32 1.5, %v3380_v48  ;;  %v3518_v6 = vadd.f32 %v6414_v35, %v3517_v44 }
0x11b9   : > { %v3382_v56 = vmul.f32 %v4786_v23, %v3381_v4  ;;  %v3548_v18 = vmax.f32 %v3518_v6, 0.0 }
0x11bb   : > { %v3386_v32 = vsel %vm3385_vm7, %v4786_v23, %v3382_v56 }
0x11bc   : > { %v3402_v21 = vmul.f32 %v3386_v32, %v6374_v37 }
0x11be   : > { %v3519_v55 = vpop.f32.mrf.mxu0  ;;  %v3421_v61 = vmul.f32 %v6258_v24, %v3402_v21  ;;  %v6482_v24 = vld [vmem:[%s6845_s8] ss:$0 sm:$0xff] }
0x11bf   : > { %v3520_v60 = vadd.f32 %v6414_v35, %v3519_v55 }
0x11c0   : > { %v6474_v49 = vadd.f32 %v6277_v51, %v3421_v61 }
0x11c1   : > { %v3549_v30 = vmax.f32 %v3520_v60, 0.0 }
0x11c2   : > { %v3448_v37 = vpack.c.bf16 %v6474_v49, %v6471_v34 }
0x11c3   : > { %v3561_v43 = vpack.c.bf16 %v3549_v30, %v3548_v18 }
0x11c4   : > { %4287 = vmatmul.msk.bf16.gmra.mxu0 %vm436_vm0, %v3448_v37 }
0x11c5   : > { %3657 = vmatmul.bf16.gmra.mxu1 %v3561_v43 }
0x11df   : > { %v3522_v7 = vpop.f32.mrf.mxu0 }
0x11e0   : > { %v3643_v42 = vpop.f32.mrf.mxu1  ;;  %v3523_v28 = vadd.f32 %v6414_v35, %v3522_v7 }
0x11e1   : > { %v3644_v40 = vadd.f32 %v6482_v24, %v3643_v42 }
0x11e2   : > { %v3550_v17 = vmax.f32 %v3523_v28, 0.0 }
0x11e3   : > { %v6486_v51 = vadd.f32 %v3644_v40, %v6288_v8 }
0x11e5   : > { %v3701_v5 = vsel %vm436_vm0, %v6486_v51, 0.0 }
0x11e6   : > { %3702 = vadd.xlane.f32.xlu1 %v3701_v5 }
0x11e7   : > { %v3524_v1 = vpop.f32.mrf.mxu0 }
0x11e8   : > { %v3525_v19 = vadd.f32 %v6414_v35, %v3524_v1  ;;  %v3645_v54 = vpop.f32.mrf.mxu1 }
0x11e9   : > { %v3646_v63 = vadd.f32 %v6482_v24, %v3645_v54 }
0x11ea   : > { %v3551_v33 = vmax.f32 %v3525_v19, 0.0 }
0x11eb   : > { %v6494_v12 = vadd.f32 %v3646_v63, %v6292_v57 }
0x11ec   : > { %v3562_v16 = vpack.c.bf16 %v3551_v33, %v3550_v17 }
0x11ed   : > { %v3704_v8 = vsel %vm436_vm0, %v6494_v12, 0.0 }
0x11ee   : > { %3662 = vmatmul.bf16.gmra.mxu1 %v3562_v16  ;;  %3705 = vadd.xlane.f32.xlu0 %v3704_v8 }
0x11ef   : > { %v3527_v39 = vpop.f32.mrf.mxu0 }
0x11f0   : > { %v3648_v2 = vpop.f32.mrf.mxu1  ;;  %v3528_v45 = vadd.f32 %v6414_v35, %v3527_v39 }
0x11f1   : > { %v3649_v58 = vadd.f32 %v6482_v24, %v3648_v2 }
0x11f2   : > { %v3552_v13 = vmax.f32 %v3528_v45, 0.0 }
0x11f3   : > { %v6500_v11 = vadd.f32 %v3649_v58, %v6313_v38 }
0x11f5   : > { %v3707_v59 = vsel %vm436_vm0, %v6500_v11, 0.0 }
0x11f6   : > { %3708 = vadd.xlane.f32.xlu2 %v3707_v59 }
0x11f7   : > { %v3529_v57 = vpop.f32.mrf.mxu0 }
0x11f8   : > { %v3530_v27 = vadd.f32 %v6414_v35, %v3529_v57  ;;  %v3650_v26 = vpop.f32.mrf.mxu1 }
0x11f9   : > { %v3651_v9 = vadd.f32 %v6482_v24, %v3650_v26 }
0x11fa   : > { %v3553_v23 = vmax.f32 %v3530_v27, 0.0 }
0x11fb   : > { %v6508_v41 = vadd.f32 %v3651_v9, %v6319_v3 }
0x11fc   : > { %v3563_v25 = vpack.c.bf16 %v3553_v23, %v3552_v13 }
0x11fd   : > { %v3710_v38 = vsel %vm436_vm0, %v6508_v41, 0.0 }
0x11fe   : > { %3711 = vadd.xlane.f32.xlu1 %v3710_v38  ;;  %3667 = vmatmul.bf16.gmra.mxu1 %v3563_v25 }
0x1200   : > { %v3653_v52 = vpop.f32.mrf.mxu1 }
0x1201   : > { %v3654_v14 = vadd.f32 %v6482_v24, %v3653_v52 }
0x1203   : > { %v6514_v48 = vadd.f32 %v3654_v14, %v6338_v20 }
0x1205   : > { %v3713_v44 = vsel %vm436_vm0, %v6514_v48, 0.0 }
0x1206   : > { %3714 = vadd.xlane.f32.xlu0 %v3713_v44 }
0x1208   : > { %v3655_v4 = vpop.f32.mrf.mxu1 }
0x1209   : > { %v3656_v3 = vadd.f32 %v6482_v24, %v3655_v4 }
0x120b   : > { %v6520_v15 = vadd.f32 %v3656_v3, %v6341_v62 }
0x120d   : > { %v3716_v56 = vsel %vm436_vm0, %v6520_v15, 0.0 }
0x120e   : > { %3717 = vadd.xlane.f32.xlu2 %v3716_v56 }
0x1215   : > { %v3532_v32 = vpop.f32.mrf.mxu0 }
0x1216   : > { %v3533_v21 = vadd.f32 %v6414_v35, %v3532_v32 }
0x1218   : > { %v3554_v6 = vmax.f32 %v3533_v21, 0.0 }
0x121d   : > { %v3534_v22 = vpop.f32.mrf.mxu0 }
0x121e   : > { %v3535_v20 = vadd.f32 %v6414_v35, %v3534_v22 }
0x1220   : > { %v3555_v55 = vmax.f32 %v3535_v20, 0.0 }
0x1222   : > { %v3564_v61 = vpack.c.bf16 %v3555_v55, %v3554_v6 }
0x1224   : > { %3672 = vmatmul.bf16.vlgmr.msrb.gmra.mxu3 %v3564_v61 }
0x1241   : > { %v3537_v60 = vpop.f32.mrf.mxu0 }
0x1242   : > { %v3658_v18 = vpop.f32.mrf.mxu1  ;;  %v3538_v43 = vadd.f32 %v6414_v35, %v3537_v60 }
0x1243   : > { %v3659_v30 = vadd.f32 %v6482_v24, %v3658_v18 }
0x1244   : > { %v3556_v28 = vmax.f32 %v3538_v43, 0.0 }
0x1245   : > { %v3689_v62 = vadd.f32 %v3659_v30, %v6390_v29 }
0x1247   : > { %v3719_v37 = vsel %vm436_vm0, %v3689_v62, 0.0 }
0x1248   : > { %3720 = vadd.xlane.f32.xlu1 %v3719_v37 }
0x1249   : > { %v3539_v7 = vpop.f32.mrf.mxu0 }
0x124a   : > { %v3540_v42 = vadd.f32 %v6414_v35, %v3539_v7  ;;  %v3660_v40 = vpop.f32.mrf.mxu1 }
0x124b   : > { %v3661_v5 = vadd.f32 %v6482_v24, %v3660_v40 }
0x124c   : > { %v3557_v1 = vmax.f32 %v3540_v42, 0.0 }
0x124d   : > { %v6533_v19 = vadd.f32 %v3661_v5, %v6393_v50 }
0x124e   : > { %v3565_v54 = vpack.c.bf16 %v3557_v1, %v3556_v28 }
0x124f   : > { %v3722_v29 = vsel %vm436_vm0, %v6533_v19, 0.0 }
0x1250   : > { %3723 = vadd.xlane.f32.xlu0 %v3722_v29  ;;  %3677 = vmatmul.bf16.gmra.mxu3 %v3565_v54 }
0x1259   : > { %v3703_v23 = vpop.xlane.xlu1 %3702 }
0x125a   : > { %v3749_v38 = vmul.f32 %v3703_v23, %v6118_v47 }
0x125c   : > { %v6573_v14 = vsub.f32 %v6486_v51, %v3749_v38 }
0x125e   : > { %v3781_v3 = vmul.f32 %v6573_v14, %v6573_v14 }
0x1260   : > { %v3797_v32 = vsel %vm436_vm0, %v3781_v3, 0.0 }
0x1261   : > { %v3706_v55 = vpop.xlane.xlu0 %3705 }
0x1262   : > { %v3750_v60 = vmul.f32 %v3706_v55, %v6118_v47 }
0x1269   : > { %v3709_v43 = vpop.xlane.xlu2 %3708 }
0x126a   : > { %v3751_v40 = vmul.f32 %v3709_v43, %v6118_v47 }
0x126b   : > { %v3663_v63 = vpop.f32.mrf.mxu1 }
0x126c   : > { %v3664_v17 = vadd.f32 %v6482_v24, %v3663_v63 }
0x126e   : > { %v6539_v33 = vadd.f32 %v3664_v17, %v6422_v31 }
0x1270   : > { %v3725_v35 = vsel %vm436_vm0, %v6539_v33, 0.0 }
0x1271   : > { %3726 = vadd.xlane.f32.xlu2 %v3725_v35  ;;  %v3712_v44 = vpop.xlane.xlu1 %3711 }
0x1272   : > { %v3752_v4 = vmul.f32 %v3712_v44, %v6118_v47 }
0x1273   : > { %v3665_v16 = vpop.f32.mrf.mxu1 }
0x1274   : > { %v3666_v50 = vadd.f32 %v6482_v24, %v3665_v16  ;;  %v6581_v56 = vsub.f32 %v6508_v41, %v3752_v4 }
0x1276   : > { %v6545_v8 = vadd.f32 %v3666_v50, %v6425_v36  ;;  %v3784_v21 = vmul.f32 %v6581_v56, %v6581_v56 }
0x1278   : > { %v3728_v39 = vsel %vm436_vm0, %v6545_v8, 0.0  ;;  %v3806_v20 = vsel %vm436_vm0, %v3784_v21, 0.0 }
0x1279   : > { %3729 = vadd.xlane.f32.xlu1 %v3728_v39  ;;  %v3715_v7 = vpop.xlane.xlu0 %3714 }
0x127a   : > { %v3753_v5 = vmul.f32 %v3715_v7, %v6118_v47 }
0x127b   : > { %v3668_v2 = vpop.f32.mrf.mxu1 }
0x127c   : > { %v3669_v58 = vadd.f32 %v6482_v24, %v3668_v2  ;;  %v6615_v54 = vsub.f32 %v6514_v48, %v3753_v5 }
0x127e   : > { %v6551_v31 = vadd.f32 %v3669_v58, %v6437_v46 }
0x1280   : > { %v3731_v59 = vsel %vm436_vm0, %v6551_v31, 0.0 }
0x1281   : > { %3732 = vadd.xlane.f32.xlu0 %v3731_v59  ;;  %v3718_v17 = vpop.xlane.xlu2 %3717 }
0x1283   : > { %v3670_v45 = vpop.f32.mrf.mxu1 }
0x1284   : > { %v3671_v57 = vadd.f32 %v6482_v24, %v3670_v45 }
0x1286   : > { %v6557_v36 = vadd.f32 %v3671_v57, %v6441_v53 }
0x1288   : > { %v3734_v27 = vsel %vm436_vm0, %v6557_v36, 0.0 }
0x1289   : > { %3735 = vadd.xlane.f32.xlu2 %v3734_v27 }
0x12a7   : > { %v3673_v26 = vpop.f32.mrf.mxu3 }
0x12a8   : > { %v3674_v9 = vadd.f32 %v6482_v24, %v3673_v26 }
0x12aa   : > { %v6563_v46 = vadd.f32 %v3674_v9, %v6455_v10 }
0x12ac   : > { %v3737_v13 = vsel %vm436_vm0, %v6563_v46, 0.0 }
0x12ad   : > { %3738 = vadd.xlane.f32.xlu1 %v3737_v13 }
0x12af   : > { %v3675_v25 = vpop.f32.mrf.mxu3 }
0x12b0   : > { %v3676_v53 = vadd.f32 %v6482_v24, %v3675_v25 }
0x12b2   : > { %v6570_v52 = vadd.f32 %v3676_v53, %v6458_v0 }
0x12b4   : > { %v3740_v10 = vsel %vm436_vm0, %v6570_v52, 0.0 }
0x12b5   : > { %3741 = vadd.xlane.f32.xlu0 %v3740_v10 }
0x12bb   : > { %v3721_v0 = vpop.xlane.xlu1 %3720 }
0x12bc   : > { %v3755_v51 = vmul.f32 %v3721_v0, %v6118_v47 }
0x12bd   : > { %3798 = vadd.xlane.f32.xlu0 %v3797_v32 }
0x12be   : > { %v6587_v22 = vsub.f32 %v3689_v62, %v3755_v51  ;;  %v6599_v62 = vsub.f32 %v6494_v12, %v3750_v60  ;;  %v6612_v12 = vsub.f32 %v6500_v11, %v3751_v40  ;;  %v3785_v11 = vmul.f32 %v6615_v54, %v6615_v54 }
0x12c0   : > { %v3787_v6 = vmul.f32 %v6587_v22, %v6587_v22  ;;  %v3783_v48 = vmul.f32 %v6612_v12, %v6612_v12  ;;  %v3809_v39 = vsel %vm436_vm0, %v3785_v11, 0.0 }
0x12c2   : > { %v3815_v41 = vsel %vm436_vm0, %v3787_v6, 0.0  ;;  %v3803_v2 = vsel %vm436_vm0, %v3783_v48, 0.0 }
0x12c3   : > { %v3724_v35 = vpop.xlane.xlu0 %3723 }
0x12c5   : > { %3807 = vadd.xlane.f32.xlu0 %v3806_v20 }
0x12cd   : > { %3816 = vadd.xlane.f32.xlu0 %v3815_v41 }
0x12d3   : > { %v3678_v61 = vpop.f32.mrf.mxu3 }
0x12d4   : > { %v3679_v18 = vadd.f32 %v6482_v24, %v3678_v61 }
0x12d6   : > { %v6596_v30 = vadd.f32 %v3679_v18, %v6471_v34  ;;  %v3782_v34 = vmul.f32 %v6599_v62, %v6599_v62 }
0x12d8   : > { %v3743_v37 = vsel %vm436_vm0, %v6596_v30, 0.0  ;;  %v3800_v63 = vsel %vm436_vm0, %v3782_v34, 0.0 }
0x12d9   : > { %3744 = vadd.xlane.f32.xlu2 %v3743_v37 }
0x12db   : > { %v3680_v42 = vpop.f32.mrf.mxu3 }
0x12dc   : > { %v3681_v28 = vadd.f32 %v6482_v24, %v3680_v42  ;;  %v3754_v24 = vmul.f32 %v3718_v17, %v6118_v47 }
0x12de   : > { %v6609_v1 = vadd.f32 %v3681_v28, %v6474_v49  ;;  %v3756_v49 = vmul.f32 %v3724_v35, %v6118_v47  ;;  %v6627_v16 = vsub.f32 %v6520_v15, %v3754_v24 }
0x12e0   : > { %v3746_v29 = vsel %vm436_vm0, %v6609_v1, 0.0  ;;  %v6630_v50 = vsub.f32 %v6533_v19, %v3756_v49  ;;  %v3786_v15 = vmul.f32 %v6627_v16, %v6627_v16 }
0x12e1   : > { %3747 = vadd.xlane.f32.xlu1 %v3746_v29  ;;  %3801 = vadd.xlane.f32.xlu2 %v3800_v63 }
0x12e2   : > { %v3788_v57 = vmul.f32 %v6630_v50, %v6630_v50  ;;  %v3812_v13 = vsel %vm436_vm0, %v3786_v15, 0.0 }
0x12e4   : > { %v3727_v58 = vpop.xlane.xlu2 %3726  ;;  %v3818_v9 = vsel %vm436_vm0, %v3788_v57, 0.0 }
0x12e5   : > { %v3757_v59 = vmul.f32 %v3727_v58, %v6118_v47 }
0x12e7   : > { %v6644_v26 = vsub.f32 %v6539_v33, %v3757_v59  ;;  %v6693_v59 = vld [vmem:[%s6847_s10] ss:$0 sm:$0xff] }
0x12e9   : > { %3810 = vadd.xlane.f32.xlu2 %v3809_v39  ;;  %3804 = vadd.xlane.f32.xlu1 %v3803_v2  ;;  %v6688_v39 = vld [vmem:[%s6846_s9] ss:$0 sm:$0xff] }
0x12ec   : > { %v3730_v45 = vpop.xlane.xlu1 %3729 }
0x12ed   : > { %v3758_v27 = vmul.f32 %v3730_v45, %v6118_v47 }
0x12ef   : > { %v6641_v19 = vsub.f32 %v6545_v8, %v3758_v27  ;;  %v3789_v8 = vmul.f32 %v6644_v26, %v6644_v26 }
0x12f1   : > { %3819 = vadd.xlane.f32.xlu2 %v3818_v9  ;;  %3813 = vadd.xlane.f32.xlu1 %v3812_v13  ;;  %v3790_v23 = vmul.f32 %v6641_v19, %v6641_v19  ;;  %v3821_v10 = vsel %vm436_vm0, %v3789_v8, 0.0 }
0x12f3   : > { %v3824_v25 = vsel %vm436_vm0, %v3790_v23, 0.0 }
0x12f4   : > { %v3733_v38 = vpop.xlane.xlu0 %3732  ;;  %3825 = vadd.xlane.f32.xlu0 %v3824_v25 }
0x12f5   : > { %v3759_v53 = vmul.f32 %v3733_v38, %v6118_v47 }
0x12f7   : > { %v6655_v33 = vsub.f32 %v6551_v31, %v3759_v53 }
0x12f9   : > { %3822 = vadd.xlane.f32.xlu1 %v3821_v10  ;;  %v3791_v44 = vmul.f32 %v6655_v33, %v6655_v33 }
0x12fb   : > { %v3827_v4 = vsel %vm436_vm0, %v3791_v44, 0.0 }
0x12fc   : > { %3828 = vadd.xlane.f32.xlu2 %v3827_v4  ;;  %v3736_v3 = vpop.xlane.xlu2 %3735 }
0x12fd   : > { %v3760_v32 = vmul.f32 %v3736_v3, %v6118_v47 }
0x12ff   : > { %v6663_v0 = vsub.f32 %v6557_v36, %v3760_v32 }
0x1301   : > { %v3792_v51 = vmul.f32 %v6663_v0, %v6663_v0 }
0x1303   : > { %v3830_v31 = vsel %vm436_vm0, %v3792_v51, 0.0 }
0x1304   : > { %3831 = vadd.xlane.f32.xlu1 %v3830_v31 }
0x1320   : > { %v3739_v21 = vpop.xlane.xlu1 %3738 }
0x1321   : > { %v3761_v20 = vmul.f32 %v3739_v21, %v6118_v47 }
0x1323   : > { %v6670_v6 = vsub.f32 %v6563_v46, %v3761_v20 }
0x1325   : > { %v3793_v41 = vmul.f32 %v6670_v6, %v6670_v6 }
0x1327   : > { %v3833_v55 = vsel %vm436_vm0, %v3793_v41, 0.0 }
0x1328   : > { %v3742_v61 = vpop.xlane.xlu0 %3741  ;;  %3834 = vadd.xlane.f32.xlu0 %v3833_v55 }
0x1329   : > { %v3762_v36 = vmul.f32 %v3742_v61, %v6118_v47 }
0x132b   : > { %v6677_v60 = vsub.f32 %v6570_v52, %v3762_v36 }
0x132d   : > { %v3794_v18 = vmul.f32 %v6677_v60, %v6677_v60 }
0x132f   : > { %v3836_v37 = vsel %vm436_vm0, %v3794_v18, 0.0 }
0x1330   : > { %v3799_v43 = vpop.xlane.xlu0 %3798  ;;  %3837 = vadd.xlane.f32.xlu2 %v3836_v37 }
0x1331   : > { %v3845_v46 = vmul.f32 %v3799_v43, %v6118_v47 }
0x1333   : > { %v3861_v7 = vadd.f32 1e-06, %v3845_v46 }
0x1335   : > { %4787 = vrsqrt.f32 %v3861_v7  ;;  %vm3883_vm9 = vweird.f32 %v3861_v7 }
0x1338   : > { %v3808_v42 = vpop.xlane.xlu0 %3807 }
0x1339   : > { %v3848_v40 = vmul.f32 %v3808_v42, %v6118_v47 }
0x133b   : > { %v4788_v5 = vpop.eup %4787  ;;  %v3864_v28 = vadd.f32 1e-06, %v3848_v40 }
0x133c   : > { %v3878_v34 = vmul.f32 %v4788_v5, %v3861_v7  ;;  %vm3884_vm8 = vweird.f32 %v4788_v5 }
0x133d   : > { %4789 = vrsqrt.f32 %v3864_v28  ;;  %vm3885_vm10 = vmor %vm3883_vm9, %vm3884_vm8  ;;  %vm3913_vm12 = vweird.f32 %v3864_v28 }
0x133e   : > { %v3879_v52 = vmul.f32 %v4788_v5, %v3878_v34 }
0x1340   : > { %v3880_v29 = vmul.f32 0.5, %v3879_v52  ;;  %v3817_v63 = vpop.xlane.xlu0 %3816 }
0x1341   : > { %v3851_v17 = vmul.f32 %v3817_v63, %v6118_v47 }
0x1342   : > { %v3881_v35 = vsub.f32 1.5, %v3880_v29 }
0x1343   : > { %v4790_v24 = vpop.eup %4789  ;;  %v3867_v49 = vadd.f32 1e-06, %v3851_v17 }
0x1344   : > { %v3882_v11 = vmul.f32 %v4788_v5, %v3881_v35  ;;  %v3908_v48 = vmul.f32 %v4790_v24, %v3864_v28  ;;  %vm3914_vm11 = vweird.f32 %v4790_v24 }
0x1345   : > { %4791 = vrsqrt.f32 %v3867_v49  ;;  %vm3915_vm13 = vmor %vm3913_vm12, %vm3914_vm11  ;;  %vm3943_vm15 = vweird.f32 %v3867_v49 }
0x1346   : > { %v3886_v2 = vsel %vm3885_vm10, %v4788_v5, %v3882_v11  ;;  %v3909_v58 = vmul.f32 %v4790_v24, %v3908_v48 }
0x1347   : > { %v4037_v45 = vmul.f32 %v3886_v2, %v6573_v14 }
0x1348   : > { %v3910_v57 = vmul.f32 0.5, %v3909_v58 }
0x1349   : > { %v4056_v15 = vmul.f32 %v6688_v39, %v4037_v45 }
0x134a   : > { %v3911_v27 = vsub.f32 1.5, %v3910_v57 }
0x134b   : > { %v4792_v9 = vpop.eup %4791  ;;  %v4075_v13 = vadd.f32 %v6693_v59, %v4056_v15 }
0x134c   : > { %v3912_v23 = vmul.f32 %v4790_v24, %v3911_v27  ;;  %v3938_v25 = vmul.f32 %v4792_v9, %v3867_v49  ;;  %v3745_v38 = vpop.xlane.xlu2 %3744  ;;  %vm3944_vm14 = vweird.f32 %v4792_v9 }
0x134d   : > { %4091 = vst.msk [vmem:[%s6702_s14] sm:$0xff] %vm436_vm0, %v4075_v13  ;;  %v3763_v14 = vmul.f32 %v3745_v38, %v6118_v47  ;;  %vm3945_vm1 = vmor %vm3943_vm15, %vm3944_vm14 }
0x134e   : > { %v3916_v8 = vsel %vm3915_vm13, %v4790_v24, %v3912_v23  ;;  %v3939_v53 = vmul.f32 %v4792_v9, %v3938_v25 }
0x134f   : > { %v4040_v10 = vmul.f32 %v3916_v8, %v6581_v56  ;;  %v6710_v44 = vsub.f32 %v6596_v30, %v3763_v14 }
0x1350   : > { %v3940_v4 = vmul.f32 0.5, %v3939_v53 }
0x1351   : > { %v4059_v3 = vmul.f32 %v6688_v39, %v4040_v10  ;;  %v3795_v32 = vmul.f32 %v6710_v44, %v6710_v44 }
0x1352   : > { %v3941_v51 = vsub.f32 1.5, %v3940_v4 }
0x1353   : > { %v4078_v31 = vadd.f32 %v6693_v59, %v4059_v3  ;;  %v3839_v21 = vsel %vm436_vm0, %v3795_v32, 0.0 }
0x1354   : > { %v3942_v20 = vmul.f32 %v4792_v9, %v3941_v51  ;;  %v3748_v41 = vpop.xlane.xlu1 %3747  ;;  %3840 = vadd.xlane.f32.xlu1 %v3839_v21  ;;  %v3802_v56 = vpop.xlane.xlu2 %3801 }
0x1355   : > { %4094 = vst.msk [vmem:[%s6702_s14 + $0x18] sm:$0xff] %vm436_vm0, %v4078_v31  ;;  %v3764_v30 = vmul.f32 %v3748_v41, %v6118_v47  ;;  %v3846_v55 = vmul.f32 %v3802_v56, %v6118_v47 }
0x1356   : > { %v3946_v61 = vsel %vm3945_vm1, %v4792_v9, %v3942_v20 }
0x1357   : > { %v4043_v36 = vmul.f32 %v3946_v61, %v6587_v22  ;;  %v6723_v18 = vsub.f32 %v6609_v1, %v3764_v30  ;;  %v3862_v37 = vadd.f32 1e-06, %v3846_v55 }
0x1359   : > { %v4062_v43 = vmul.f32 %v6688_v39, %v4043_v36  ;;  %4793 = vrsqrt.f32 %v3862_v37  ;;  %v3796_v46 = vmul.f32 %v6723_v18, %v6723_v18  ;;  %vm3893_vm3 = vweird.f32 %v3862_v37 }
0x135b   : > { %v4081_v7 = vadd.f32 %v6693_v59, %v4062_v43  ;;  %v3842_v42 = vsel %vm436_vm0, %v3796_v46, 0.0 }
0x135c   : > { %3843 = vadd.xlane.f32.xlu0 %v3842_v42  ;;  %v3805_v40 = vpop.xlane.xlu1 %3804  ;;  %v3811_v5 = vpop.xlane.xlu2 %3810 }
0x135d   : > { %4097 = vst.msk [vmem:[%s6702_s14 + $0x30] sm:$0xff] %vm436_vm0, %v4081_v7  ;;  %v3847_v22 = vmul.f32 %v3805_v40, %v6118_v47  ;;  %v3849_v1 = vmul.f32 %v3811_v5, %v6118_v47 }
0x135f   : > { %v4794_v28 = vpop.eup %4793  ;;  %v3863_v34 = vadd.f32 1e-06, %v3847_v22  ;;  %v3865_v52 = vadd.f32 1e-06, %v3849_v1 }
0x1360   : > { %v3888_v29 = vmul.f32 %v4794_v28, %v3862_v37  ;;  %vm3894_vm2 = vweird.f32 %v4794_v28 }
0x1361   : > { %4795 = vrsqrt.f32 %v3863_v34  ;;  %vm3895_vm4 = vmor %vm3893_vm3, %vm3894_vm2  ;;  %vm3903_vm7 = vweird.f32 %v3863_v34  ;;  %vm3923_vm9 = vweird.f32 %v3865_v52 }
0x1362   : > { %v3889_v63 = vmul.f32 %v4794_v28, %v3888_v29  ;;  %4797 = vrsqrt.f32 %v3865_v52 }
0x1364   : > { %v3890_v17 = vmul.f32 0.5, %v3889_v63  ;;  %v3814_v35 = vpop.xlane.xlu1 %3813  ;;  %v3820_v24 = vpop.xlane.xlu2 %3819 }
0x1365   : > { %v3850_v49 = vmul.f32 %v3814_v35, %v6118_v47  ;;  %v3852_v11 = vmul.f32 %v3820_v24, %v6118_v47 }
0x1366   : > { %v3891_v48 = vsub.f32 1.5, %v3890_v17 }
0x1367   : > { %v4796_v2 = vpop.eup %4795  ;;  %v6736_v58 = vadd.f32 1e-06, %v3850_v49  ;;  %v6738_v45 = vadd.f32 1e-06, %v3852_v11  ;;  %v3826_v57 = vpop.xlane.xlu0 %3825 }
0x1368   : > { %v4798_v15 = vpop.eup %4797  ;;  %v3892_v27 = vmul.f32 %v4794_v28, %v3891_v48  ;;  %v3898_v9 = vmul.f32 %v4796_v2, %v3863_v34  ;;  %v3854_v13 = vmul.f32 %v3826_v57, %v6118_v47  ;;  %vm3904_vm5 = vweird.f32 %v4796_v2 }
0x1369   : > { %v3918_v23 = vmul.f32 %v4798_v15, %v3865_v52  ;;  %4799 = vrsqrt.f32 %v6736_v58  ;;  %vm3924_vm6 = vweird.f32 %v4798_v15  ;;  %vm3905_vm8 = vmor %vm3903_vm7, %vm3904_vm5  ;;  %vm3933_vm12 = vweird.f32 %v6736_v58 }
0x136a   : > { %v3896_v25 = vsel %vm3895_vm4, %v4794_v28, %v3892_v27  ;;  %v3899_v38 = vmul.f32 %v4796_v2, %v3898_v9  ;;  %4801 = vrsqrt.f32 %v6738_v45  ;;  %v6744_v53 = vadd.f32 1e-06, %v3854_v13  ;;  %vm3925_vm10 = vmor %vm3923_vm9, %vm3924_vm6 }
0x136b   : > { %v4038_v14 = vmul.f32 %v3896_v25, %v6599_v62  ;;  %v3919_v8 = vmul.f32 %v4798_v15, %v3918_v23  ;;  %vm3953_vm15 = vweird.f32 %v6738_v45 }
0x136c   : > { %v3900_v10 = vmul.f32 0.5, %v3899_v38  ;;  %v3823_v4 = vpop.xlane.xlu1 %3822  ;;  %4803 = vrsqrt.f32 %v6744_v53  ;;  %vm3973_vm3 = vweird.f32 %v6744_v53 }
0x136d   : > { %v4057_v3 = vmul.f32 %v6688_v39, %v4038_v14  ;;  %v3920_v32 = vmul.f32 0.5, %v3919_v8  ;;  %v3853_v31 = vmul.f32 %v3823_v4, %v6118_v47 }
0x136e   : > { %v3901_v51 = vsub.f32 1.5, %v3900_v10 }
0x136f   : > { %v4800_v21 = vpop.eup %4799  ;;  %v4076_v20 = vadd.f32 %v6693_v59, %v4057_v3  ;;  %v3921_v41 = vsub.f32 1.5, %v3920_v32  ;;  %v3829_v62 = vpop.xlane.xlu2 %3828  ;;  %v6751_v61 = vadd.f32 1e-06, %v3853_v31 }
0x1370   : > { %v4802_v56 = vpop.eup %4801  ;;  %v3902_v30 = vmul.f32 %v4796_v2, %v3901_v51  ;;  %v3928_v55 = vmul.f32 %v4800_v21, %v6736_v58  ;;  %v3855_v43 = vmul.f32 %v3829_v62, %v6118_v47  ;;  %vm3934_vm11 = vweird.f32 %v4800_v21 }
0x1371   : > { %4092 = vst.msk [vmem:[%s6702_s14 + $0x8] sm:$0xff] %vm436_vm0, %v4076_v20  ;;  %v3922_v36 = vmul.f32 %v4798_v15, %v3921_v41  ;;  %v3948_v37 = vmul.f32 %v4802_v56, %v6738_v45  ;;  %4805 = vrsqrt.f32 %v6751_v61  ;;  %vm3954_vm13 = vweird.f32 %v4802_v56  ;;  %vm3935_vm14 = vmor %vm3933_vm12, %vm3934_vm11 }
0x1372   : > { %v3906_v46 = vsel %vm3905_vm8, %v4796_v2, %v3902_v30  ;;  %v3929_v7 = vmul.f32 %v4800_v21, %v3928_v55  ;;  %v4804_v42 = vpop.eup %4803  ;;  %v6759_v1 = vadd.f32 1e-06, %v3855_v43  ;;  %vm3955_vm1 = vmor %vm3953_vm15, %vm3954_vm13  ;;  %vm3963_vm6 = vweird.f32 %v6751_v61 }
0x1373   : > { %v4039_v40 = vmul.f32 %v3906_v46, %v6612_v12  ;;  %v3926_v5 = vsel %vm3925_vm10, %v4798_v15, %v3922_v36  ;;  %v3949_v22 = vmul.f32 %v4802_v56, %v3948_v37  ;;  %v3968_v52 = vmul.f32 %v4804_v42, %v6744_v53 }
0x1374   : > { %v4041_v28 = vmul.f32 %v3926_v5, %v6615_v54  ;;  %v3930_v34 = vmul.f32 0.5, %v3929_v7  ;;  %4807 = vrsqrt.f32 %v6759_v1  ;;  %vm3974_vm2 = vweird.f32 %v4804_v42 }
0x1375   : > { %v4058_v29 = vmul.f32 %v6688_v39, %v4039_v40  ;;  %v3950_v63 = vmul.f32 0.5, %v3949_v22  ;;  %v3969_v12 = vmul.f32 %v4804_v42, %v3968_v52  ;;  %vm3975_vm4 = vmor %vm3973_vm3, %vm3974_vm2  ;;  %vm3983_vm9 = vweird.f32 %v6759_v1 }
0x1376   : > { %v4060_v17 = vmul.f32 %v6688_v39, %v4041_v28  ;;  %v3931_v35 = vsub.f32 1.5, %v3930_v34 }
0x1377   : > { %v4077_v24 = vadd.f32 %v6693_v59, %v4058_v29  ;;  %v3951_v54 = vsub.f32 1.5, %v3950_v63  ;;  %v3832_v49 = vpop.xlane.xlu1 %3831  ;;  %v4806_v11 = vpop.eup %4805  ;;  %v3970_v57 = vmul.f32 0.5, %v3969_v12 }
0x1378   : > { %v4079_v48 = vadd.f32 %v6693_v59, %v4060_v17  ;;  %v3932_v2 = vmul.f32 %v4800_v21, %v3931_v35  ;;  %v3856_v15 = vmul.f32 %v3832_v49, %v6118_v47  ;;  %v3958_v9 = vmul.f32 %v4806_v11, %v6751_v61 }
0x1379   : > { %4093 = vst.msk [vmem:[%s6702_s14 + $0x10] sm:$0xff] %vm436_vm0, %v4077_v24  ;;  %v3952_v27 = vmul.f32 %v4802_v56, %v3951_v54  ;;  %v3971_v13 = vsub.f32 1.5, %v3970_v57  ;;  %vm3964_vm5 = vweird.f32 %v4806_v11 }
0x137a   : > { %4095 = vst.msk [vmem:[%s6702_s14 + $0x20] sm:$0xff] %vm436_vm0, %v4079_v48  ;;  %v3936_v58 = vsel %vm3935_vm14, %v4800_v21, %v3932_v2  ;;  %v3872_v23 = vadd.f32 1e-06, %v3856_v15  ;;  %v4808_v25 = vpop.eup %4807  ;;  %v3959_v8 = vmul.f32 %v4806_v11, %v3958_v9  ;;  %vm3965_vm7 = vmor %vm3963_vm6, %vm3964_vm5 }
0x137b   : > { %v4042_v38 = vmul.f32 %v3936_v58, %v6627_v16  ;;  %v3956_v14 = vsel %vm3955_vm1, %v4802_v56, %v3952_v27  ;;  %v3972_v4 = vmul.f32 %v4804_v42, %v3971_v13  ;;  %v3978_v45 = vmul.f32 %v4808_v25, %v6759_v1 }
0x137c   : > { %v4044_v10 = vmul.f32 %v3956_v14, %v6630_v50  ;;  %v3960_v32 = vmul.f32 0.5, %v3959_v8  ;;  %4809 = vrsqrt.f32 %v3872_v23  ;;  %vm3984_vm8 = vweird.f32 %v4808_v25 }
0x137d   : > { %v4061_v3 = vmul.f32 %v6688_v39, %v4042_v38  ;;  %v3976_v31 = vsel %vm3975_vm4, %v4804_v42, %v3972_v4  ;;  %v3979_v16 = vmul.f32 %v4808_v25, %v3978_v45  ;;  %vm3985_vm10 = vmor %vm3983_vm9, %vm3984_vm8  ;;  %vm3993_vm12 = vweird.f32 %v3872_v23 }
0x137e   : > { %v4063_v51 = vmul.f32 %v6688_v39, %v4044_v10  ;;  %v4046_v50 = vmul.f32 %v3976_v31, %v6641_v19  ;;  %v3961_v20 = vsub.f32 1.5, %v3960_v32 }
0x137f   : > { %v4080_v21 = vadd.f32 %v6693_v59, %v4061_v3  ;;  %v3980_v41 = vmul.f32 0.5, %v3979_v16 }
0x1380   : > { %v4082_v53 = vadd.f32 %v6693_v59, %v4063_v51  ;;  %v4065_v62 = vmul.f32 %v6688_v39, %v4046_v50  ;;  %v3962_v56 = vmul.f32 %v4806_v11, %v3961_v20 }
0x1381   : > { %4096 = vst.msk [vmem:[%s6702_s14 + $0x28] sm:$0xff] %vm436_vm0, %v4080_v21  ;;  %v3981_v30 = vsub.f32 1.5, %v3980_v41 }
0x1382   : > { %4098 = vst.msk [vmem:[%s6702_s14 + $0x38] sm:$0xff] %vm436_vm0, %v4082_v53  ;;  %v4810_v55 = vpop.eup %4809  ;;  %v4084_v19 = vadd.f32 %v6693_v59, %v4065_v62  ;;  %v3966_v36 = vsel %vm3965_vm7, %v4806_v11, %v3962_v56 }
0x1383   : > { %v4045_v37 = vmul.f32 %v3966_v36, %v6644_v26  ;;  %v3982_v43 = vmul.f32 %v4808_v25, %v3981_v30  ;;  %v3988_v46 = vmul.f32 %v4810_v55, %v3872_v23  ;;  %vm3994_vm11 = vweird.f32 %v4810_v55 }
0x1384   : > { %4100 = vst.msk [vmem:[%s6702_s14 + $0x48] sm:$0xff] %vm436_vm0, %v4084_v19  ;;  %vm3995_vm13 = vmor %vm3993_vm12, %vm3994_vm11 }
0x1385   : > { %v4064_v61 = vmul.f32 %v6688_v39, %v4045_v37  ;;  %v3986_v7 = vsel %vm3985_vm10, %v4808_v25, %v3982_v43  ;;  %v3989_v42 = vmul.f32 %v4810_v55, %v3988_v46 }
0x1386   : > { %v4047_v40 = vmul.f32 %v3986_v7, %v6655_v33 }
0x1387   : > { %v4083_v5 = vadd.f32 %v6693_v59, %v4064_v61  ;;  %v3990_v22 = vmul.f32 0.5, %v3989_v42 }
0x1388   : > { %v4066_v26 = vmul.f32 %v6688_v39, %v4047_v40 }
0x1389   : > { %4099 = vst.msk [vmem:[%s6702_s14 + $0x40] sm:$0xff] %vm436_vm0, %v4083_v5  ;;  %v3991_v1 = vsub.f32 1.5, %v3990_v22 }
0x138a   : > { %v4085_v28 = vadd.f32 %v6693_v59, %v4066_v26 }
0x138b   : > { %v3992_v34 = vmul.f32 %v4810_v55, %v3991_v1 }
0x138c   : > { %4101 = vst.msk [vmem:[%s6702_s14 + $0x50] sm:$0xff] %vm436_vm0, %v4085_v28 }
0x138d   : > { %v3996_v52 = vsel %vm3995_vm13, %v4810_v55, %v3992_v34 }
0x138e   : > { %v4048_v33 = vmul.f32 %v3996_v52, %v6663_v0 }
0x1390   : > { %v4067_v29 = vmul.f32 %v6688_v39, %v4048_v33 }
0x1392   : > { %v4086_v63 = vadd.f32 %v6693_v59, %v4067_v29 }
0x1394   : > { %4102 = vst.msk [vmem:[%s6702_s14 + $0x58] sm:$0xff] %vm436_vm0, %v4086_v63 }
0x139b   : > { %v3835_v17 = vpop.xlane.xlu0 %3834 }
0x139c   : > { %v3857_v35 = vmul.f32 %v3835_v17, %v6118_v47 }
0x139e   : > { %v3873_v12 = vadd.f32 1e-06, %v3857_v35 }
0x13a0   : > { %4811 = vrsqrt.f32 %v3873_v12  ;;  %vm4003_vm15 = vweird.f32 %v3873_v12 }
0x13a3   : > { %v3838_v24 = vpop.xlane.xlu2 %3837 }
0x13a4   : > { %v3858_v54 = vmul.f32 %v3838_v24, %v6118_v47 }
0x13a6   : > { %v4812_v49 = vpop.eup %4811  ;;  %v3874_v11 = vadd.f32 1e-06, %v3858_v54 }
0x13a7   : > { %v3998_v48 = vmul.f32 %v4812_v49, %v3873_v12  ;;  %vm4004_vm14 = vweird.f32 %v4812_v49 }
0x13a8   : > { %4813 = vrsqrt.f32 %v3874_v11  ;;  %vm4005_vm1 = vmor %vm4003_vm15, %vm4004_vm14  ;;  %vm4013_vm3 = vweird.f32 %v3874_v11 }
0x13a9   : > { %v3999_v2 = vmul.f32 %v4812_v49, %v3998_v48 }
0x13ab   : > { %v4000_v0 = vmul.f32 0.5, %v3999_v2 }
0x13ad   : > { %v4001_v57 = vsub.f32 1.5, %v4000_v0 }
0x13ae   : > { %v4814_v15 = vpop.eup %4813 }
0x13af   : > { %v4002_v27 = vmul.f32 %v4812_v49, %v4001_v57  ;;  %v4008_v9 = vmul.f32 %v4814_v15, %v3874_v11  ;;  %vm4014_vm2 = vweird.f32 %v4814_v15 }
0x13b0   : > { %vm4015_vm4 = vmor %vm4013_vm3, %vm4014_vm2 }
0x13b1   : > { %v4006_v58 = vsel %vm4005_vm1, %v4812_v49, %v4002_v27  ;;  %v4009_v13 = vmul.f32 %v4814_v15, %v4008_v9 }
0x13b2   : > { %v4049_v23 = vmul.f32 %v4006_v58, %v6670_v6 }
0x13b3   : > { %v4010_v25 = vmul.f32 0.5, %v4009_v13 }
0x13b4   : > { %v4068_v38 = vmul.f32 %v6688_v39, %v4049_v23 }
0x13b5   : > { %v4011_v14 = vsub.f32 1.5, %v4010_v25 }
0x13b6   : > { %v4087_v8 = vadd.f32 %v6693_v59, %v4068_v38 }
0x13b7   : > { %v4012_v10 = vmul.f32 %v4814_v15, %v4011_v14 }
0x13b8   : > { %4103 = vst.msk [vmem:[%s6702_s14 + $0x60] sm:$0xff] %vm436_vm0, %v4087_v8 }
0x13b9   : > { %v4016_v4 = vsel %vm4015_vm4, %v4814_v15, %v4012_v10 }
0x13ba   : > { %v4050_v45 = vmul.f32 %v4016_v4, %v6677_v60 }
0x13bc   : > { %v4069_v3 = vmul.f32 %v6688_v39, %v4050_v45 }
0x13be   : > { %v4088_v32 = vadd.f32 %v6693_v59, %v4069_v3 }
0x13c0   : > { %4104 = vst.msk [vmem:[%s6702_s14 + $0x68] sm:$0xff] %vm436_vm0, %v4088_v32 }
0x13c7   : > { %v3841_v6 = vpop.xlane.xlu1 %3840 }
0x13c8   : > { %v3859_v51 = vmul.f32 %v3841_v6, %v6118_v47 }
0x13ca   : > { %v3875_v31 = vadd.f32 1e-06, %v3859_v51 }
0x13cc   : > { %4815 = vrsqrt.f32 %v3875_v31  ;;  %vm4023_vm6 = vweird.f32 %v3875_v31 }
0x13cf   : > { %v3844_v16 = vpop.xlane.xlu0 %3843 }
0x13d0   : > { %v3860_v21 = vmul.f32 %v3844_v16, %v6118_v47 }
0x13d2   : > { %v4816_v50 = vpop.eup %4815  ;;  %v3876_v20 = vadd.f32 1e-06, %v3860_v21 }
0x13d3   : > { %v4018_v53 = vmul.f32 %v4816_v50, %v3875_v31  ;;  %vm4024_vm5 = vweird.f32 %v4816_v50 }
0x13d4   : > { %4817 = vrsqrt.f32 %v3876_v20  ;;  %vm4025_vm7 = vmor %vm4023_vm6, %vm4024_vm5  ;;  %vm4033_vm9 = vweird.f32 %v3876_v20 }
0x13d5   : > { %v4019_v41 = vmul.f32 %v4816_v50, %v4018_v53 }
0x13d7   : > { %v4020_v60 = vmul.f32 0.5, %v4019_v41 }
0x13d9   : > { %v4021_v62 = vsub.f32 1.5, %v4020_v60 }
0x13da   : > { %v4818_v56 = vpop.eup %4817 }
0x13db   : > { %v4022_v30 = vmul.f32 %v4816_v50, %v4021_v62  ;;  %v4028_v55 = vmul.f32 %v4818_v56, %v3876_v20  ;;  %vm4034_vm8 = vweird.f32 %v4818_v56 }
0x13dc   : > { %vm4035_vm10 = vmor %vm4033_vm9, %vm4034_vm8 }
0x13dd   : > { %v4026_v19 = vsel %vm4025_vm7, %v4816_v50, %v4022_v30  ;;  %v4029_v36 = vmul.f32 %v4818_v56, %v4028_v55 }
0x13de   : > { %v4051_v37 = vmul.f32 %v4026_v19, %v6710_v44 }
0x13df   : > { %v4030_v47 = vmul.f32 0.5, %v4029_v36 }
0x13e0   : > { %v4070_v43 = vmul.f32 %v6688_v39, %v4051_v37 }
0x13e1   : > { %v4031_v46 = vsub.f32 1.5, %v4030_v47 }
0x13e2   : > { %v4089_v61 = vadd.f32 %v6693_v59, %v4070_v43 }
0x13e3   : > { %v4032_v7 = vmul.f32 %v4818_v56, %v4031_v46 }
0x13e4   : > { %4105 = vst.msk [vmem:[%s6702_s14 + $0x70] sm:$0xff] %vm436_vm0, %v4089_v61 }
0x13e5   : > { %v4036_v42 = vsel %vm4035_vm10, %v4818_v56, %v4032_v7 }
0x13e6   : > { %v4052_v40 = vmul.f32 %v4036_v42, %v6723_v18 }
0x13e8   : > { %v4071_v5 = vmul.f32 %v6688_v39, %v4052_v40 }
0x13ea   : > { %v4090_v22 = vadd.f32 %v6693_v59, %v4071_v5 }
0x13ec   : > { %4106 = vst.msk [vmem:[%s6702_s14 + $0x78] sm:$0xff] %vm436_vm0, %v4090_v22 }
0x13ed PF: > { %s21_s17 = sadd.s32 1, %s4841_s17  }
0x13ee   : > { %p18_p4 = scmp.ge.s32.totalorder %s21_s17, 4  }
0x13f0   :  { %20 = sbr.rel (!%p18_p4) target bundleno = 1 (0x1), region = 94 }

</bundles_post_ra>
